<compile_context>
chip_gen: v6e
topology: v6e:2x2x1
jax: 0.10.0
libtpu: 0.0.40
codegen_flags: <defaults>
</compile_context>

<pallas_src>
import math

import jax
import jax.numpy as jnp
import numpy as np
from jax import lax
from jax.experimental import pallas as pl
from jax.experimental.pallas import tpu as pltpu

TILE_N = 8          # images per grid step (multiple of 8); raise for big batches
CM = 64             # M-chunk for the conv matmuls (bounds live vreg pressure)

H_IN, W_IN = 28, 28
H1_PAD = 32         # conv1 output rows computed per image (26 valid, padded to 32)
H_IN_PAD = H1_PAD + 2  # 34 zero-padded input rows per image
W1O, C1 = 26, 8
H2, C2 = 24, 16
L1 = W1O * C1       # 208 packed conv1 lanes: lane = out_col*8 + ch
L2 = 512            # packed conv2 lanes: lane = parity*256 + pair*16 + ch (pair<12 used)
NPOOL = 12


# -----------------------------------------------------------------------------
# Fused kernel: conv1 -> conv2 -> 2x2 maxpool -> fc1 -> fc2 for one batch tile
# -----------------------------------------------------------------------------
def net_kernel(x_ref, w1t_ref, b1_ref, w2t_ref, b2_ref,
               wf1_ref, bf1_ref, wf2_ref, bf2_ref,
               out_ref, h1_ref, h2_ref):
    tn = out_ref.shape[0]
    m1 = h1_ref.shape[0]          # 32 * tn, rows ordered (y, image)
    m2 = h2_ref.shape[0]          # 24 * tn

    # ---- conv1 + ReLU: 3 Toeplitz matmuls over the W axis ----
    for m in range(0, m1, CM):
        acc = jnp.zeros((CM, L1), jnp.float32)
        for kh in range(3):
            lhs = x_ref[0, kh * tn + m: kh * tn + m + CM, :]          # (CM, 28)
            acc = acc + jnp.dot(lhs, w1t_ref[kh],
                                preferred_element_type=jnp.float32)
        h1_ref[m:m + CM, :] = jnp.maximum(acc + b1_ref[...], 0.0)

    # ---- conv2 + ReLU ----
    for m in range(0, m2, CM):
        acc = jnp.zeros((CM, L2), jnp.float32)
        for kh in range(3):
            lhs = h1_ref[kh * tn + m: kh * tn + m + CM, :]            # (CM, 208)
            acc = acc + jnp.dot(lhs, w2t_ref[kh],
                                preferred_element_type=jnp.float32)
        h2_ref[m:m + CM, :] = jnp.maximum(acc + b2_ref[...], 0.0)

    # ---- 2x2 max-pool fused with fc1 (accumulated over the 12 pooled rows) ----
    acc = jnp.zeros((tn, 64), jnp.float32)
    for h in range(NPOOL):
        r0 = (2 * h) * tn
        r1 = (2 * h + 1) * tn
        pa = jnp.maximum(h2_ref[r0:r0 + tn, 0:256], h2_ref[r1:r1 + tn, 0:256])
        pb = jnp.maximum(h2_ref[r0:r0 + tn, 256:512], h2_ref[r1:r1 + tn, 256:512])
        pooled = jnp.maximum(pa, pb)                                   # (tn, 256)
        acc = acc + jnp.dot(pooled, wf1_ref[h],
                            preferred_element_type=jnp.float32)
    hfc = jnp.maximum(acc + bf1_ref[...], 0.0)                         # (tn, 64)

    # ---- fc2 ----
    out_ref[...] = (jnp.dot(hfc, wf2_ref[...],
                            preferred_element_type=jnp.float32) + bf2_ref[...])


# -----------------------------------------------------------------------------
# Wrapper: batch-tile grid, resident weights, y-major input layout
# -----------------------------------------------------------------------------
@jax.jit
def net_forward(x_nchw, packed):
    n = x_nchw.shape[0]
    nt = pl.cdiv(n, TILE_N)
    n_pad = nt * TILE_N

    x = x_nchw.reshape(n, H_IN, W_IN)
    x = jnp.pad(x, ((0, n_pad - n), (0, H_IN_PAD - H_IN), (0, 0)))
    # y-major layout inside each batch tile: row index = y * TILE_N + image
    x = x.reshape(nt, TILE_N, H_IN_PAD, W_IN).transpose(0, 2, 1, 3)
    x = x.reshape(nt, H_IN_PAD * TILE_N, W_IN)

    out = pl.pallas_call(
        net_kernel,
        out_shape=jax.ShapeDtypeStruct((n_pad, 10), jnp.float32),
        grid_spec=pltpu.PrefetchScalarGridSpec(
            num_scalar_prefetch=0,
            grid=(nt,),
            in_specs=[
                pl.BlockSpec((1, H_IN_PAD * TILE_N, W_IN), lambda i: (i, 0, 0)),
                pl.BlockSpec((3, W_IN, L1), lambda i: (0, 0, 0)),
                pl.BlockSpec((1, L1), lambda i: (0, 0)),
                pl.BlockSpec((3, L1, L2), lambda i: (0, 0, 0)),
                pl.BlockSpec((1, L2), lambda i: (0, 0)),
                pl.BlockSpec((NPOOL, 256, 64), lambda i: (0, 0, 0)),
                pl.BlockSpec((1, 64), lambda i: (0, 0)),
                pl.BlockSpec((64, 10), lambda i: (0, 0)),
                pl.BlockSpec((1, 10), lambda i: (0, 0)),
            ],
            out_specs=pl.BlockSpec((TILE_N, 10), lambda i: (i, 0)),
            scratch_shapes=[
                pltpu.VMEM((H1_PAD * TILE_N, L1), jnp.float32),   # conv1 activations
                pltpu.VMEM((H2 * TILE_N, L2), jnp.float32),       # conv2 activations
            ],
        ),
        compiler_params=pltpu.CompilerParams(
            dimension_semantics=("parallel",)),
    )(x, packed["w1t"], packed["b1p"], packed["w2t"], packed["b2p"],
      packed["wf1"], packed["bf1"], packed["wf2"], packed["bf2"])
    return out[:n]


# -----------------------------------------------------------------------------
# Parameters: torch-layout init + host-side packing into Toeplitz/lane layouts
# -----------------------------------------------------------------------------
def init_raw_params(key):
    ks = jax.random.split(key, 8)

    def u(k, shape, fan_in):
        b = 1.0 / math.sqrt(fan_in)
        return jax.random.uniform(k, shape, jnp.float32, -b, b)

    return dict(
        conv1_w=u(ks[0], (8, 1, 3, 3), 9),   conv1_b=u(ks[1], (8,), 9),
        conv2_w=u(ks[2], (16, 8, 3, 3), 72), conv2_b=u(ks[3], (16,), 72),
        fc1_w=u(ks[4], (64, 2304), 2304),    fc1_b=u(ks[5], (64,), 2304),
        fc2_w=u(ks[6], (10, 64), 64),        fc2_b=u(ks[7], (10,), 64),
    )


def pack_params(raw):
    W1 = np.asarray(raw["conv1_w"], np.float32)
    b1 = np.asarray(raw["conv1_b"], np.float32)
    W2 = np.asarray(raw["conv2_w"], np.float32)
    b2 = np.asarray(raw["conv2_b"], np.float32)
    F1 = np.asarray(raw["fc1_w"], np.float32)
    F1b = np.asarray(raw["fc1_b"], np.float32)
    F2 = np.asarray(raw["fc2_w"], np.float32)
    F2b = np.asarray(raw["fc2_b"], np.float32)

    # conv1 Toeplitz: rows = input column (28), cols = out_col*8 + out_ch
    w1t = np.zeros((3, W_IN, L1), np.float32)
    for kh in range(3):
        for x in range(W1O):
            for kw in range(3):
                w1t[kh, x + kw, x * C1:(x + 1) * C1] = W1[:, 0, kh, kw]
    b1p = np.tile(b1, W1O).reshape(1, L1)

    # conv2 Toeplitz: rows = packed conv1 lane (208),
    # cols = parity*256 + pair*16 + out_ch  (pairs >= 12 stay zero)
    w2t = np.zeros((3, L1, L2), np.float32)
    b2p = np.zeros((1, L2), np.float32)
    for j in range(NPOOL):
        for parity in range(2):
            x2 = 2 * j + parity
            off = parity * 256 + j * C2
            b2p[0, off:off + C2] = b2
            for kh in range(3):
                for kw in range(3):
                    xin = x2 + kw
                    w2t[kh, xin * C1:(xin + 1) * C1, off:off + C2] = W2[:, :, kh, kw].T

    # fc1, permuted to match the packed pooled activation layout (pair*16 + ch)
    F1r = F1.reshape(64, C2, NPOOL, NPOOL)      # [out, ch, pool_h, pool_w]
    wf1 = np.zeros((NPOOL, 256, 64), np.float32)
    for h in range(NPOOL):
        for j in range(NPOOL):
            wf1[h, j * C2:(j + 1) * C2, :] = F1r[:, :, h, j].T
    bf1 = F1b.reshape(1, 64)

    wf2 = np.ascontiguousarray(F2.T)            # (64, 10)
    bf2 = F2b.reshape(1, 10)

    return {k: jnp.asarray(v) for k, v in dict(
        w1t=w1t, b1p=b1p, w2t=w2t, b2p=b2p,
        wf1=wf1, bf1=bf1, wf2=wf2, bf2=bf2).items()}


# -----------------------------------------------------------------------------
# Pure-JAX reference (torch-layout weights) for validation
# -----------------------------------------------------------------------------
def reference_forward(x_nchw, raw):
    dn = ("NCHW", "OIHW", "NCHW")
    h = lax.conv_general_dilated(x_nchw, raw["conv1_w"], (1, 1), "VALID",
                                 dimension_numbers=dn,
                                 precision=lax.Precision.HIGHEST)
    h = jnp.maximum(h + raw["conv1_b"].reshape(1, 8, 1, 1), 0.0)
    h = lax.conv_general_dilated(h, raw["conv2_w"], (1, 1), "VALID",
                                 dimension_numbers=dn,
                                 precision=lax.Precision.HIGHEST)
    h = jnp.maximum(h + raw["conv2_b"].reshape(1, 16, 1, 1), 0.0)
    h = lax.reduce_window(h, -jnp.inf, lax.max, (1, 1, 2, 2), (1, 1, 2, 2), "VALID")
    flat = h.reshape(h.shape[0], -1)
    h = jnp.maximum(flat @ raw["fc1_w"].T + raw["fc1_b"], 0.0)
    return h @ raw["fc2_w"].T + raw["fc2_b"]


if __name__ == "__main__":
    key = jax.random.PRNGKey(0)
    k_x, k_p = jax.random.split(key)

    N = 2
    # PyTorch-style NCHW input; 28x28 is implied by fc1's 2304 = 16*12*12.
    x = jax.random.normal(k_x, (N, 1, H_IN, W_IN), jnp.float32)

    raw = init_raw_params(k_p)
    packed = pack_params(raw)

    out = net_forward(x, packed)
    jax.block_until_ready(out)

    ref = reference_forward(x, raw)
    assert out.shape == (N, 10), out.shape
    max_err = float(np.max(np.abs(np.asarray(out) - np.asarray(ref))))
    assert np.allclose(np.asarray(out), np.asarray(ref), atol=2e-2, rtol=2e-2), max_err

    print("KERNEL_OK")
</pallas_src>

<mosaic_0001>
module attributes {stable_mosaic.version = 11 : i64} {
  func.func @net_kernel(%arg0: i32, %arg1: memref<1x272x28xf32, #tpu.memory_space<vmem>>, %arg2: memref<3x28x208xf32, #tpu.memory_space<vmem>>, %arg3: memref<1x208xf32, #tpu.memory_space<vmem>>, %arg4: memref<3x208x512xf32, #tpu.memory_space<vmem>>, %arg5: memref<1x512xf32, #tpu.memory_space<vmem>>, %arg6: memref<12x256x64xf32, #tpu.memory_space<vmem>>, %arg7: memref<1x64xf32, #tpu.memory_space<vmem>>, %arg8: memref<64x10xf32, #tpu.memory_space<vmem>>, %arg9: memref<1x10xf32, #tpu.memory_space<vmem>>, %arg10: memref<8x10xf32, #tpu.memory_space<vmem>>, %arg11: memref<256x208xf32, #tpu.memory_space<vmem>>, %arg12: memref<192x512xf32, #tpu.memory_space<vmem>>) attributes {dimension_semantics = [#tpu.dimension_semantics<parallel>], iteration_bounds = array<i64: 1>, scalar_prefetch = 0 : i64, scratch_operands = 2 : i64, tpu.core_type = #tpu.core_type<tc>, window_params = [{transform_indices = @transform_0, window_bounds = array<i64: 1, 272, 28>}, {pipeline_mode = #tpu.pipeline_mode<synchronous>, transform_indices = @transform_1, window_bounds = array<i64: 3, 28, 208>}, {pipeline_mode = #tpu.pipeline_mode<synchronous>, transform_indices = @transform_2, window_bounds = array<i64: 1, 208>}, {pipeline_mode = #tpu.pipeline_mode<synchronous>, transform_indices = @transform_3, window_bounds = array<i64: 3, 208, 512>}, {pipeline_mode = #tpu.pipeline_mode<synchronous>, transform_indices = @transform_4, window_bounds = array<i64: 1, 512>}, {pipeline_mode = #tpu.pipeline_mode<synchronous>, transform_indices = @transform_5, window_bounds = array<i64: 12, 256, 64>}, {pipeline_mode = #tpu.pipeline_mode<synchronous>, transform_indices = @transform_6, window_bounds = array<i64: 1, 64>}, {pipeline_mode = #tpu.pipeline_mode<synchronous>, transform_indices = @transform_7, window_bounds = array<i64: 64, 10>}, {pipeline_mode = #tpu.pipeline_mode<synchronous>, transform_indices = @transform_8, window_bounds = array<i64: 1, 10>}, {transform_indices = @transform_9, window_bounds = array<i64: 8, 10>}]} {
    %cst = arith.constant 0.000000e+00 : f32
    %0 = vector.broadcast %cst : f32 to vector<64x208xf32>
    %c0 = arith.constant 0 : index
    %c0_0 = arith.constant 0 : index
    %c0_1 = arith.constant 0 : index
    %1 = vector.load %arg1[%c0, %c0_0, %c0_1] : memref<1x272x28xf32, #tpu.memory_space<vmem>>, vector<1x64x28xf32>
    %2 = vector.shape_cast %1 : vector<1x64x28xf32> to vector<64x28xf32>
    %c0_2 = arith.constant 0 : index
    %c0_3 = arith.constant 0 : index
    %c0_4 = arith.constant 0 : index
    %3 = vector.load %arg2[%c0_2, %c0_3, %c0_4] : memref<3x28x208xf32, #tpu.memory_space<vmem>>, vector<1x28x208xf32>
    %4 = vector.shape_cast %3 : vector<1x28x208xf32> to vector<28x208xf32>
    %cst_5 = arith.constant dense<0.000000e+00> : vector<64x208xf32>
    %5 = tpu.matmul %2, %4, %cst_5 {dimension_numbers = #tpu.dot_dimension_numbers<[1], [0], [0], [1], [0, 0, 1, 1], [], []>} : vector<64x28xf32>, vector<28x208xf32>, vector<64x208xf32> -> vector<64x208xf32>
    %6 = arith.addf %0, %5 : vector<64x208xf32>
    %c0_6 = arith.constant 0 : index
    %c8 = arith.constant 8 : index
    %c0_7 = arith.constant 0 : index
    %7 = vector.load %arg1[%c0_6, %c8, %c0_7] : memref<1x272x28xf32, #tpu.memory_space<vmem>>, vector<1x64x28xf32>
    %8 = vector.shape_cast %7 : vector<1x64x28xf32> to vector<64x28xf32>
    %c1 = arith.constant 1 : index
    %c0_8 = arith.constant 0 : index
    %c0_9 = arith.constant 0 : index
    %9 = vector.load %arg2[%c1, %c0_8, %c0_9] : memref<3x28x208xf32, #tpu.memory_space<vmem>>, vector<1x28x208xf32>
    %10 = vector.shape_cast %9 : vector<1x28x208xf32> to vector<28x208xf32>
    %cst_10 = arith.constant dense<0.000000e+00> : vector<64x208xf32>
    %11 = tpu.matmul %8, %10, %cst_10 {dimension_numbers = #tpu.dot_dimension_numbers<[1], [0], [0], [1], [0, 0, 1, 1], [], []>} : vector<64x28xf32>, vector<28x208xf32>, vector<64x208xf32> -> vector<64x208xf32>
    %12 = arith.addf %6, %11 : vector<64x208xf32>
    %c0_11 = arith.constant 0 : index
    %c16 = arith.constant 16 : index
    %c0_12 = arith.constant 0 : index
    %13 = vector.load %arg1[%c0_11, %c16, %c0_12] : memref<1x272x28xf32, #tpu.memory_space<vmem>>, vector<1x64x28xf32>
    %14 = vector.shape_cast %13 : vector<1x64x28xf32> to vector<64x28xf32>
    %c2 = arith.constant 2 : index
    %c0_13 = arith.constant 0 : index
    %c0_14 = arith.constant 0 : index
    %15 = vector.load %arg2[%c2, %c0_13, %c0_14] : memref<3x28x208xf32, #tpu.memory_space<vmem>>, vector<1x28x208xf32>
    %16 = vector.shape_cast %15 : vector<1x28x208xf32> to vector<28x208xf32>
    %cst_15 = arith.constant dense<0.000000e+00> : vector<64x208xf32>
    %17 = tpu.matmul %14, %16, %cst_15 {dimension_numbers = #tpu.dot_dimension_numbers<[1], [0], [0], [1], [0, 0, 1, 1], [], []>} : vector<64x28xf32>, vector<28x208xf32>, vector<64x208xf32> -> vector<64x208xf32>
    %18 = arith.addf %12, %17 : vector<64x208xf32>
    %c0_16 = arith.constant 0 : index
    %c0_17 = arith.constant 0 : index
    %19 = vector.load %arg3[%c0_16, %c0_17] : memref<1x208xf32, #tpu.memory_space<vmem>>, vector<1x208xf32>
    %20 = vector.broadcast %19 : vector<1x208xf32> to vector<64x208xf32>
    %21 = arith.addf %18, %20 : vector<64x208xf32>
    %cst_18 = arith.constant 0.000000e+00 : f32
    %22 = vector.broadcast %cst_18 : f32 to vector<64x208xf32>
    %23 = arith.maximumf %21, %22 : vector<64x208xf32>
    %c0_19 = arith.constant 0 : index
    %c0_20 = arith.constant 0 : index
    %24 = vector.load %arg11[%c0_19, %c0_20] : memref<256x208xf32, #tpu.memory_space<vmem>>, vector<64x208xf32>
    tpu.vector_store %arg11[%c0_19, %c0_20], %23 {strides = array<i32>} : memref<256x208xf32, #tpu.memory_space<vmem>>, vector<64x208xf32>,
    %cst_21 = arith.constant 0.000000e+00 : f32
    %25 = vector.broadcast %cst_21 : f32 to vector<64x208xf32>
    %c0_22 = arith.constant 0 : index
    %c64 = arith.constant 64 : index
    %c0_23 = arith.constant 0 : index
    %26 = vector.load %arg1[%c0_22, %c64, %c0_23] : memref<1x272x28xf32, #tpu.memory_space<vmem>>, vector<1x64x28xf32>
    %27 = vector.shape_cast %26 : vector<1x64x28xf32> to vector<64x28xf32>
    %c0_24 = arith.constant 0 : index
    %c0_25 = arith.constant 0 : index
    %c0_26 = arith.constant 0 : index
    %28 = vector.load %arg2[%c0_24, %c0_25, %c0_26] : memref<3x28x208xf32, #tpu.memory_space<vmem>>, vector<1x28x208xf32>
    %29 = vector.shape_cast %28 : vector<1x28x208xf32> to vector<28x208xf32>
    %cst_27 = arith.constant dense<0.000000e+00> : vector<64x208xf32>
    %30 = tpu.matmul %27, %29, %cst_27 {dimension_numbers = #tpu.dot_dimension_numbers<[1], [0], [0], [1], [0, 0, 1, 1], [], []>} : vector<64x28xf32>, vector<28x208xf32>, vector<64x208xf32> -> vector<64x208xf32>
    %31 = arith.addf %25, %30 : vector<64x208xf32>
    %c0_28 = arith.constant 0 : index
    %c72 = arith.constant 72 : index
    %c0_29 = arith.constant 0 : index
    %32 = vector.load %arg1[%c0_28, %c72, %c0_29] : memref<1x272x28xf32, #tpu.memory_space<vmem>>, vector<1x64x28xf32>
    %33 = vector.shape_cast %32 : vector<1x64x28xf32> to vector<64x28xf32>
    %c1_30 = arith.constant 1 : index
    %c0_31 = arith.constant 0 : index
    %c0_32 = arith.constant 0 : index
    %34 = vector.load %arg2[%c1_30, %c0_31, %c0_32] : memref<3x28x208xf32, #tpu.memory_space<vmem>>, vector<1x28x208xf32>
    %35 = vector.shape_cast %34 : vector<1x28x208xf32> to vector<28x208xf32>
    %cst_33 = arith.constant dense<0.000000e+00> : vector<64x208xf32>
    %36 = tpu.matmul %33, %35, %cst_33 {dimension_numbers = #tpu.dot_dimension_numbers<[1], [0], [0], [1], [0, 0, 1, 1], [], []>} : vector<64x28xf32>, vector<28x208xf32>, vector<64x208xf32> -> vector<64x208xf32>
    %37 = arith.addf %31, %36 : vector<64x208xf32>
    %c0_34 = arith.constant 0 : index
    %c80 = arith.constant 80 : index
    %c0_35 = arith.constant 0 : index
    %38 = vector.load %arg1[%c0_34, %c80, %c0_35] : memref<1x272x28xf32, #tpu.memory_space<vmem>>, vector<1x64x28xf32>
    %39 = vector.shape_cast %38 : vector<1x64x28xf32> to vector<64x28xf32>
    %c2_36 = arith.constant 2 : index
    %c0_37 = arith.constant 0 : index
    %c0_38 = arith.constant 0 : index
    %40 = vector.load %arg2[%c2_36, %c0_37, %c0_38] : memref<3x28x208xf32, #tpu.memory_space<vmem>>, vector<1x28x208xf32>
    %41 = vector.shape_cast %40 : vector<1x28x208xf32> to vector<28x208xf32>
    %cst_39 = arith.constant dense<0.000000e+00> : vector<64x208xf32>
    %42 = tpu.matmul %39, %41, %cst_39 {dimension_numbers = #tpu.dot_dimension_numbers<[1], [0], [0], [1], [0, 0, 1, 1], [], []>} : vector<64x28xf32>, vector<28x208xf32>, vector<64x208xf32> -> vector<64x208xf32>
    %43 = arith.addf %37, %42 : vector<64x208xf32>
    %c0_40 = arith.constant 0 : index
    %c0_41 = arith.constant 0 : index
    %44 = vector.load %arg3[%c0_40, %c0_41] : memref<1x208xf32, #tpu.memory_space<vmem>>, vector<1x208xf32>
    %45 = vector.broadcast %44 : vector<1x208xf32> to vector<64x208xf32>
    %46 = arith.addf %43, %45 : vector<64x208xf32>
    %cst_42 = arith.constant 0.000000e+00 : f32
    %47 = vector.broadcast %cst_42 : f32 to vector<64x208xf32>
    %48 = arith.maximumf %46, %47 : vector<64x208xf32>
    %c64_43 = arith.constant 64 : index
    %c0_44 = arith.constant 0 : index
    %49 = vector.load %arg11[%c64_43, %c0_44] : memref<256x208xf32, #tpu.memory_space<vmem>>, vector<64x208xf32>
    tpu.vector_store %arg11[%c64_43, %c0_44], %48 {strides = array<i32>} : memref<256x208xf32, #tpu.memory_space<vmem>>, vector<64x208xf32>,
    %cst_45 = arith.constant 0.000000e+00 : f32
    %50 = vector.broadcast %cst_45 : f32 to vector<64x208xf32>
    %c0_46 = arith.constant 0 : index
    %c128 = arith.constant 128 : index
    %c0_47 = arith.constant 0 : index
    %51 = vector.load %arg1[%c0_46, %c128, %c0_47] : memref<1x272x28xf32, #tpu.memory_space<vmem>>, vector<1x64x28xf32>
    %52 = vector.shape_cast %51 : vector<1x64x28xf32> to vector<64x28xf32>
    %c0_48 = arith.constant 0 : index
    %c0_49 = arith.constant 0 : index
    %c0_50 = arith.constant 0 : index
    %53 = vector.load %arg2[%c0_48, %c0_49, %c0_50] : memref<3x28x208xf32, #tpu.memory_space<vmem>>, vector<1x28x208xf32>
    %54 = vector.shape_cast %53 : vector<1x28x208xf32> to vector<28x208xf32>
    %cst_51 = arith.constant dense<0.000000e+00> : vector<64x208xf32>
    %55 = tpu.matmul %52, %54, %cst_51 {dimension_numbers = #tpu.dot_dimension_numbers<[1], [0], [0], [1], [0, 0, 1, 1], [], []>} : vector<64x28xf32>, vector<28x208xf32>, vector<64x208xf32> -> vector<64x208xf32>
    %56 = arith.addf %50, %55 : vector<64x208xf32>
    %c0_52 = arith.constant 0 : index
    %c136 = arith.constant 136 : index
    %c0_53 = arith.constant 0 : index
    %57 = vector.load %arg1[%c0_52, %c136, %c0_53] : memref<1x272x28xf32, #tpu.memory_space<vmem>>, vector<1x64x28xf32>
    %58 = vector.shape_cast %57 : vector<1x64x28xf32> to vector<64x28xf32>
    %c1_54 = arith.constant 1 : index
    %c0_55 = arith.constant 0 : index
    %c0_56 = arith.constant 0 : index
    %59 = vector.load %arg2[%c1_54, %c0_55, %c0_56] : memref<3x28x208xf32, #tpu.memory_space<vmem>>, vector<1x28x208xf32>
    %60 = vector.shape_cast %59 : vector<1x28x208xf32> to vector<28x208xf32>
    %cst_57 = arith.constant dense<0.000000e+00> : vector<64x208xf32>
    %61 = tpu.matmul %58, %60, %cst_57 {dimension_numbers = #tpu.dot_dimension_numbers<[1], [0], [0], [1], [0, 0, 1, 1], [], []>} : vector<64x28xf32>, vector<28x208xf32>, vector<64x208xf32> -> vector<64x208xf32>
    %62 = arith.addf %56, %61 : vector<64x208xf32>
    %c0_58 = arith.constant 0 : index
    %c144 = arith.constant 144 : index
    %c0_59 = arith.constant 0 : index
    %63 = vector.load %arg1[%c0_58, %c144, %c0_59] : memref<1x272x28xf32, #tpu.memory_space<vmem>>, vector<1x64x28xf32>
    %64 = vector.shape_cast %63 : vector<1x64x28xf32> to vector<64x28xf32>
    %c2_60 = arith.constant 2 : index
    %c0_61 = arith.constant 0 : index
    %c0_62 = arith.constant 0 : index
    %65 = vector.load %arg2[%c2_60, %c0_61, %c0_62] : memref<3x28x208xf32, #tpu.memory_space<vmem>>, vector<1x28x208xf32>
    %66 = vector.shape_cast %65 : vector<1x28x208xf32> to vector<28x208xf32>
    %cst_63 = arith.constant dense<0.000000e+00> : vector<64x208xf32>
    %67 = tpu.matmul %64, %66, %cst_63 {dimension_numbers = #tpu.dot_dimension_numbers<[1], [0], [0], [1], [0, 0, 1, 1], [], []>} : vector<64x28xf32>, vector<28x208xf32>, vector<64x208xf32> -> vector<64x208xf32>
    %68 = arith.addf %62, %67 : vector<64x208xf32>
    %c0_64 = arith.constant 0 : index
    %c0_65 = arith.constant 0 : index
    %69 = vector.load %arg3[%c0_64, %c0_65] : memref<1x208xf32, #tpu.memory_space<vmem>>, vector<1x208xf32>
    %70 = vector.broadcast %69 : vector<1x208xf32> to vector<64x208xf32>
    %71 = arith.addf %68, %70 : vector<64x208xf32>
    %cst_66 = arith.constant 0.000000e+00 : f32
    %72 = vector.broadcast %cst_66 : f32 to vector<64x208xf32>
    %73 = arith.maximumf %71, %72 : vector<64x208xf32>
    %c128_67 = arith.constant 128 : index
    %c0_68 = arith.constant 0 : index
    %74 = vector.load %arg11[%c128_67, %c0_68] : memref<256x208xf32, #tpu.memory_space<vmem>>, vector<64x208xf32>
    tpu.vector_store %arg11[%c128_67, %c0_68], %73 {strides = array<i32>} : memref<256x208xf32, #tpu.memory_space<vmem>>, vector<64x208xf32>,
    %cst_69 = arith.constant 0.000000e+00 : f32
    %75 = vector.broadcast %cst_69 : f32 to vector<64x208xf32>
    %c0_70 = arith.constant 0 : index
    %c192 = arith.constant 192 : index
    %c0_71 = arith.constant 0 : index
    %76 = vector.load %arg1[%c0_70, %c192, %c0_71] : memref<1x272x28xf32, #tpu.memory_space<vmem>>, vector<1x64x28xf32>
    %77 = vector.shape_cast %76 : vector<1x64x28xf32> to vector<64x28xf32>
    %c0_72 = arith.constant 0 : index
    %c0_73 = arith.constant 0 : index
    %c0_74 = arith.constant 0 : index
    %78 = vector.load %arg2[%c0_72, %c0_73, %c0_74] : memref<3x28x208xf32, #tpu.memory_space<vmem>>, vector<1x28x208xf32>
    %79 = vector.shape_cast %78 : vector<1x28x208xf32> to vector<28x208xf32>
    %cst_75 = arith.constant dense<0.000000e+00> : vector<64x208xf32>
    %80 = tpu.matmul %77, %79, %cst_75 {dimension_numbers = #tpu.dot_dimension_numbers<[1], [0], [0], [1], [0, 0, 1, 1], [], []>} : vector<64x28xf32>, vector<28x208xf32>, vector<64x208xf32> -> vector<64x208xf32>
    %81 = arith.addf %75, %80 : vector<64x208xf32>
    %c0_76 = arith.constant 0 : index
    %c200 = arith.constant 200 : index
    %c0_77 = arith.constant 0 : index
    %82 = vector.load %arg1[%c0_76, %c200, %c0_77] : memref<1x272x28xf32, #tpu.memory_space<vmem>>, vector<1x64x28xf32>
    %83 = vector.shape_cast %82 : vector<1x64x28xf32> to vector<64x28xf32>
    %c1_78 = arith.constant 1 : index
    %c0_79 = arith.constant 0 : index
    %c0_80 = arith.constant 0 : index
    %84 = vector.load %arg2[%c1_78, %c0_79, %c0_80] : memref<3x28x208xf32, #tpu.memory_space<vmem>>, vector<1x28x208xf32>
    %85 = vector.shape_cast %84 : vector<1x28x208xf32> to vector<28x208xf32>
    %cst_81 = arith.constant dense<0.000000e+00> : vector<64x208xf32>
    %86 = tpu.matmul %83, %85, %cst_81 {dimension_numbers = #tpu.dot_dimension_numbers<[1], [0], [0], [1], [0, 0, 1, 1], [], []>} : vector<64x28xf32>, vector<28x208xf32>, vector<64x208xf32> -> vector<64x208xf32>
    %87 = arith.addf %81, %86 : vector<64x208xf32>
    %c0_82 = arith.constant 0 : index
    %c208 = arith.constant 208 : index
    %c0_83 = arith.constant 0 : index
    %88 = vector.load %arg1[%c0_82, %c208, %c0_83] : memref<1x272x28xf32, #tpu.memory_space<vmem>>, vector<1x64x28xf32>
    %89 = vector.shape_cast %88 : vector<1x64x28xf32> to vector<64x28xf32>
    %c2_84 = arith.constant 2 : index
    %c0_85 = arith.constant 0 : index
    %c0_86 = arith.constant 0 : index
    %90 = vector.load %arg2[%c2_84, %c0_85, %c0_86] : memref<3x28x208xf32, #tpu.memory_space<vmem>>, vector<1x28x208xf32>
    %91 = vector.shape_cast %90 : vector<1x28x208xf32> to vector<28x208xf32>
    %cst_87 = arith.constant dense<0.000000e+00> : vector<64x208xf32>
    %92 = tpu.matmul %89, %91, %cst_87 {dimension_numbers = #tpu.dot_dimension_numbers<[1], [0], [0], [1], [0, 0, 1, 1], [], []>} : vector<64x28xf32>, vector<28x208xf32>, vector<64x208xf32> -> vector<64x208xf32>
    %93 = arith.addf %87, %92 : vector<64x208xf32>
    %c0_88 = arith.constant 0 : index
    %c0_89 = arith.constant 0 : index
    %94 = vector.load %arg3[%c0_88, %c0_89] : memref<1x208xf32, #tpu.memory_space<vmem>>, vector<1x208xf32>
    %95 = vector.broadcast %94 : vector<1x208xf32> to vector<64x208xf32>
    %96 = arith.addf %93, %95 : vector<64x208xf32>
    %cst_90 = arith.constant 0.000000e+00 : f32
    %97 = vector.broadcast %cst_90 : f32 to vector<64x208xf32>
    %98 = arith.maximumf %96, %97 : vector<64x208xf32>
    %c192_91 = arith.constant 192 : index
    %c0_92 = arith.constant 0 : index
    %99 = vector.load %arg11[%c192_91, %c0_92] : memref<256x208xf32, #tpu.memory_space<vmem>>, vector<64x208xf32>
    tpu.vector_store %arg11[%c192_91, %c0_92], %98 {strides = array<i32>} : memref<256x208xf32, #tpu.memory_space<vmem>>, vector<64x208xf32>,
    %cst_93 = arith.constant 0.000000e+00 : f32
    %100 = vector.broadcast %cst_93 : f32 to vector<64x512xf32>
    %c0_94 = arith.constant 0 : index
    %c0_95 = arith.constant 0 : index
    %101 = vector.load %arg11[%c0_94, %c0_95] : memref<256x208xf32, #tpu.memory_space<vmem>>, vector<64x208xf32>
    %c0_96 = arith.constant 0 : index
    %c0_97 = arith.constant 0 : index
    %c0_98 = arith.constant 0 : index
    %102 = vector.load %arg4[%c0_96, %c0_97, %c0_98] : memref<3x208x512xf32, #tpu.memory_space<vmem>>, vector<1x208x512xf32>
    %103 = vector.shape_cast %102 : vector<1x208x512xf32> to vector<208x512xf32>
    %cst_99 = arith.constant dense<0.000000e+00> : vector<64x512xf32>
    %104 = tpu.matmul %101, %103, %cst_99 {dimension_numbers = #tpu.dot_dimension_numbers<[1], [0], [0], [1], [0, 0, 1, 1], [], []>} : vector<64x208xf32>, vector<208x512xf32>, vector<64x512xf32> -> vector<64x512xf32>
    %105 = arith.addf %100, %104 : vector<64x512xf32>
    %c8_100 = arith.constant 8 : index
    %c0_101 = arith.constant 0 : index
    %106 = vector.load %arg11[%c8_100, %c0_101] : memref<256x208xf32, #tpu.memory_space<vmem>>, vector<64x208xf32>
    %c1_102 = arith.constant 1 : index
    %c0_103 = arith.constant 0 : index
    %c0_104 = arith.constant 0 : index
    %107 = vector.load %arg4[%c1_102, %c0_103, %c0_104] : memref<3x208x512xf32, #tpu.memory_space<vmem>>, vector<1x208x512xf32>
    %108 = vector.shape_cast %107 : vector<1x208x512xf32> to vector<208x512xf32>
    %cst_105 = arith.constant dense<0.000000e+00> : vector<64x512xf32>
    %109 = tpu.matmul %106, %108, %cst_105 {dimension_numbers = #tpu.dot_dimension_numbers<[1], [0], [0], [1], [0, 0, 1, 1], [], []>} : vector<64x208xf32>, vector<208x512xf32>, vector<64x512xf32> -> vector<64x512xf32>
    %110 = arith.addf %105, %109 : vector<64x512xf32>
    %c16_106 = arith.constant 16 : index
    %c0_107 = arith.constant 0 : index
    %111 = vector.load %arg11[%c16_106, %c0_107] : memref<256x208xf32, #tpu.memory_space<vmem>>, vector<64x208xf32>
    %c2_108 = arith.constant 2 : index
    %c0_109 = arith.constant 0 : index
    %c0_110 = arith.constant 0 : index
    %112 = vector.load %arg4[%c2_108, %c0_109, %c0_110] : memref<3x208x512xf32, #tpu.memory_space<vmem>>, vector<1x208x512xf32>
    %113 = vector.shape_cast %112 : vector<1x208x512xf32> to vector<208x512xf32>
    %cst_111 = arith.constant dense<0.000000e+00> : vector<64x512xf32>
    %114 = tpu.matmul %111, %113, %cst_111 {dimension_numbers = #tpu.dot_dimension_numbers<[1], [0], [0], [1], [0, 0, 1, 1], [], []>} : vector<64x208xf32>, vector<208x512xf32>, vector<64x512xf32> -> vector<64x512xf32>
    %115 = arith.addf %110, %114 : vector<64x512xf32>
    %c0_112 = arith.constant 0 : index
    %c0_113 = arith.constant 0 : index
    %116 = vector.load %arg5[%c0_112, %c0_113] : memref<1x512xf32, #tpu.memory_space<vmem>>, vector<1x512xf32>
    %117 = vector.broadcast %116 : vector<1x512xf32> to vector<64x512xf32>
    %118 = arith.addf %115, %117 : vector<64x512xf32>
    %cst_114 = arith.constant 0.000000e+00 : f32
    %119 = vector.broadcast %cst_114 : f32 to vector<64x512xf32>
    %120 = arith.maximumf %118, %119 : vector<64x512xf32>
    %c0_115 = arith.constant 0 : index
    %c0_116 = arith.constant 0 : index
    %121 = vector.load %arg12[%c0_115, %c0_116] : memref<192x512xf32, #tpu.memory_space<vmem>>, vector<64x512xf32>
    tpu.vector_store %arg12[%c0_115, %c0_116], %120 {strides = array<i32>} : memref<192x512xf32, #tpu.memory_space<vmem>>, vector<64x512xf32>,
    %cst_117 = arith.constant 0.000000e+00 : f32
    %122 = vector.broadcast %cst_117 : f32 to vector<64x512xf32>
    %c64_118 = arith.constant 64 : index
    %c0_119 = arith.constant 0 : index
    %123 = vector.load %arg11[%c64_118, %c0_119] : memref<256x208xf32, #tpu.memory_space<vmem>>, vector<64x208xf32>
    %c0_120 = arith.constant 0 : index
    %c0_121 = arith.constant 0 : index
    %c0_122 = arith.constant 0 : index
    %124 = vector.load %arg4[%c0_120, %c0_121, %c0_122] : memref<3x208x512xf32, #tpu.memory_space<vmem>>, vector<1x208x512xf32>
    %125 = vector.shape_cast %124 : vector<1x208x512xf32> to vector<208x512xf32>
    %cst_123 = arith.constant dense<0.000000e+00> : vector<64x512xf32>
    %126 = tpu.matmul %123, %125, %cst_123 {dimension_numbers = #tpu.dot_dimension_numbers<[1], [0], [0], [1], [0, 0, 1, 1], [], []>} : vector<64x208xf32>, vector<208x512xf32>, vector<64x512xf32> -> vector<64x512xf32>
    %127 = arith.addf %122, %126 : vector<64x512xf32>
    %c72_124 = arith.constant 72 : index
    %c0_125 = arith.constant 0 : index
    %128 = vector.load %arg11[%c72_124, %c0_125] : memref<256x208xf32, #tpu.memory_space<vmem>>, vector<64x208xf32>
    %c1_126 = arith.constant 1 : index
    %c0_127 = arith.constant 0 : index
    %c0_128 = arith.constant 0 : index
    %129 = vector.load %arg4[%c1_126, %c0_127, %c0_128] : memref<3x208x512xf32, #tpu.memory_space<vmem>>, vector<1x208x512xf32>
    %130 = vector.shape_cast %129 : vector<1x208x512xf32> to vector<208x512xf32>
    %cst_129 = arith.constant dense<0.000000e+00> : vector<64x512xf32>
    %131 = tpu.matmul %128, %130, %cst_129 {dimension_numbers = #tpu.dot_dimension_numbers<[1], [0], [0], [1], [0, 0, 1, 1], [], []>} : vector<64x208xf32>, vector<208x512xf32>, vector<64x512xf32> -> vector<64x512xf32>
    %132 = arith.addf %127, %131 : vector<64x512xf32>
    %c80_130 = arith.constant 80 : index
    %c0_131 = arith.constant 0 : index
    %133 = vector.load %arg11[%c80_130, %c0_131] : memref<256x208xf32, #tpu.memory_space<vmem>>, vector<64x208xf32>
    %c2_132 = arith.constant 2 : index
    %c0_133 = arith.constant 0 : index
    %c0_134 = arith.constant 0 : index
    %134 = vector.load %arg4[%c2_132, %c0_133, %c0_134] : memref<3x208x512xf32, #tpu.memory_space<vmem>>, vector<1x208x512xf32>
    %135 = vector.shape_cast %134 : vector<1x208x512xf32> to vector<208x512xf32>
    %cst_135 = arith.constant dense<0.000000e+00> : vector<64x512xf32>
    %136 = tpu.matmul %133, %135, %cst_135 {dimension_numbers = #tpu.dot_dimension_numbers<[1], [0], [0], [1], [0, 0, 1, 1], [], []>} : vector<64x208xf32>, vector<208x512xf32>, vector<64x512xf32> -> vector<64x512xf32>
    %137 = arith.addf %132, %136 : vector<64x512xf32>
    %c0_136 = arith.constant 0 : index
    %c0_137 = arith.constant 0 : index
    %138 = vector.load %arg5[%c0_136, %c0_137] : memref<1x512xf32, #tpu.memory_space<vmem>>, vector<1x512xf32>
    %139 = vector.broadcast %138 : vector<1x512xf32> to vector<64x512xf32>
    %140 = arith.addf %137, %139 : vector<64x512xf32>
    %cst_138 = arith.constant 0.000000e+00 : f32
    %141 = vector.broadcast %cst_138 : f32 to vector<64x512xf32>
    %142 = arith.maximumf %140, %141 : vector<64x512xf32>
    %c64_139 = arith.constant 64 : index
    %c0_140 = arith.constant 0 : index
    %143 = vector.load %arg12[%c64_139, %c0_140] : memref<192x512xf32, #tpu.memory_space<vmem>>, vector<64x512xf32>
    tpu.vector_store %arg12[%c64_139, %c0_140], %142 {strides = array<i32>} : memref<192x512xf32, #tpu.memory_space<vmem>>, vector<64x512xf32>,
    %cst_141 = arith.constant 0.000000e+00 : f32
    %144 = vector.broadcast %cst_141 : f32 to vector<64x512xf32>
    %c128_142 = arith.constant 128 : index
    %c0_143 = arith.constant 0 : index
    %145 = vector.load %arg11[%c128_142, %c0_143] : memref<256x208xf32, #tpu.memory_space<vmem>>, vector<64x208xf32>
    %c0_144 = arith.constant 0 : index
    %c0_145 = arith.constant 0 : index
    %c0_146 = arith.constant 0 : index
    %146 = vector.load %arg4[%c0_144, %c0_145, %c0_146] : memref<3x208x512xf32, #tpu.memory_space<vmem>>, vector<1x208x512xf32>
    %147 = vector.shape_cast %146 : vector<1x208x512xf32> to vector<208x512xf32>
    %cst_147 = arith.constant dense<0.000000e+00> : vector<64x512xf32>
    %148 = tpu.matmul %145, %147, %cst_147 {dimension_numbers = #tpu.dot_dimension_numbers<[1], [0], [0], [1], [0, 0, 1, 1], [], []>} : vector<64x208xf32>, vector<208x512xf32>, vector<64x512xf32> -> vector<64x512xf32>
    %149 = arith.addf %144, %148 : vector<64x512xf32>
    %c136_148 = arith.constant 136 : index
    %c0_149 = arith.constant 0 : index
    %150 = vector.load %arg11[%c136_148, %c0_149] : memref<256x208xf32, #tpu.memory_space<vmem>>, vector<64x208xf32>
    %c1_150 = arith.constant 1 : index
    %c0_151 = arith.constant 0 : index
    %c0_152 = arith.constant 0 : index
    %151 = vector.load %arg4[%c1_150, %c0_151, %c0_152] : memref<3x208x512xf32, #tpu.memory_space<vmem>>, vector<1x208x512xf32>
    %152 = vector.shape_cast %151 : vector<1x208x512xf32> to vector<208x512xf32>
    %cst_153 = arith.constant dense<0.000000e+00> : vector<64x512xf32>
    %153 = tpu.matmul %150, %152, %cst_153 {dimension_numbers = #tpu.dot_dimension_numbers<[1], [0], [0], [1], [0, 0, 1, 1], [], []>} : vector<64x208xf32>, vector<208x512xf32>, vector<64x512xf32> -> vector<64x512xf32>
    %154 = arith.addf %149, %153 : vector<64x512xf32>
    %c144_154 = arith.constant 144 : index
    %c0_155 = arith.constant 0 : index
    %155 = vector.load %arg11[%c144_154, %c0_155] : memref<256x208xf32, #tpu.memory_space<vmem>>, vector<64x208xf32>
    %c2_156 = arith.constant 2 : index
    %c0_157 = arith.constant 0 : index
    %c0_158 = arith.constant 0 : index
    %156 = vector.load %arg4[%c2_156, %c0_157, %c0_158] : memref<3x208x512xf32, #tpu.memory_space<vmem>>, vector<1x208x512xf32>
    %157 = vector.shape_cast %156 : vector<1x208x512xf32> to vector<208x512xf32>
    %cst_159 = arith.constant dense<0.000000e+00> : vector<64x512xf32>
    %158 = tpu.matmul %155, %157, %cst_159 {dimension_numbers = #tpu.dot_dimension_numbers<[1], [0], [0], [1], [0, 0, 1, 1], [], []>} : vector<64x208xf32>, vector<208x512xf32>, vector<64x512xf32> -> vector<64x512xf32>
    %159 = arith.addf %154, %158 : vector<64x512xf32>
    %c0_160 = arith.constant 0 : index
    %c0_161 = arith.constant 0 : index
    %160 = vector.load %arg5[%c0_160, %c0_161] : memref<1x512xf32, #tpu.memory_space<vmem>>, vector<1x512xf32>
    %161 = vector.broadcast %160 : vector<1x512xf32> to vector<64x512xf32>
    %162 = arith.addf %159, %161 : vector<64x512xf32>
    %cst_162 = arith.constant 0.000000e+00 : f32
    %163 = vector.broadcast %cst_162 : f32 to vector<64x512xf32>
    %164 = arith.maximumf %162, %163 : vector<64x512xf32>
    %c128_163 = arith.constant 128 : index
    %c0_164 = arith.constant 0 : index
    %165 = vector.load %arg12[%c128_163, %c0_164] : memref<192x512xf32, #tpu.memory_space<vmem>>, vector<64x512xf32>
    tpu.vector_store %arg12[%c128_163, %c0_164], %164 {strides = array<i32>} : memref<192x512xf32, #tpu.memory_space<vmem>>, vector<64x512xf32>,
    %cst_165 = arith.constant 0.000000e+00 : f32
    %166 = vector.broadcast %cst_165 : f32 to vector<8x64xf32>
    %c0_166 = arith.constant 0 : index
    %c0_167 = arith.constant 0 : index
    %167 = vector.load %arg12[%c0_166, %c0_167] : memref<192x512xf32, #tpu.memory_space<vmem>>, vector<8x256xf32>
    %c8_168 = arith.constant 8 : index
    %c0_169 = arith.constant 0 : index
    %168 = vector.load %arg12[%c8_168, %c0_169] : memref<192x512xf32, #tpu.memory_space<vmem>>, vector<8x256xf32>
    %169 = arith.maximumf %167, %168 : vector<8x256xf32>
    %c0_170 = arith.constant 0 : index
    %c256 = arith.constant 256 : index
    %170 = vector.load %arg12[%c0_170, %c256] : memref<192x512xf32, #tpu.memory_space<vmem>>, vector<8x256xf32>
    %c8_171 = arith.constant 8 : index
    %c256_172 = arith.constant 256 : index
    %171 = vector.load %arg12[%c8_171, %c256_172] : memref<192x512xf32, #tpu.memory_space<vmem>>, vector<8x256xf32>
    %172 = arith.maximumf %170, %171 : vector<8x256xf32>
    %173 = arith.maximumf %169, %172 : vector<8x256xf32>
    %c0_173 = arith.constant 0 : index
    %c0_174 = arith.constant 0 : index
    %c0_175 = arith.constant 0 : index
    %174 = vector.load %arg6[%c0_173, %c0_174, %c0_175] : memref<12x256x64xf32, #tpu.memory_space<vmem>>, vector<1x256x64xf32>
    %175 = vector.shape_cast %174 : vector<1x256x64xf32> to vector<256x64xf32>
    %cst_176 = arith.constant dense<0.000000e+00> : vector<8x64xf32>
    %176 = tpu.matmul %173, %175, %cst_176 {dimension_numbers = #tpu.dot_dimension_numbers<[1], [0], [0], [1], [0, 0, 1, 1], [], []>} : vector<8x256xf32>, vector<256x64xf32>, vector<8x64xf32> -> vector<8x64xf32>
    %177 = arith.addf %166, %176 : vector<8x64xf32>
    %c16_177 = arith.constant 16 : index
    %c0_178 = arith.constant 0 : index
    %178 = vector.load %arg12[%c16_177, %c0_178] : memref<192x512xf32, #tpu.memory_space<vmem>>, vector<8x256xf32>
    %c24 = arith.constant 24 : index
    %c0_179 = arith.constant 0 : index
    %179 = vector.load %arg12[%c24, %c0_179] : memref<192x512xf32, #tpu.memory_space<vmem>>, vector<8x256xf32>
    %180 = arith.maximumf %178, %179 : vector<8x256xf32>
    %c16_180 = arith.constant 16 : index
    %c256_181 = arith.constant 256 : index
    %181 = vector.load %arg12[%c16_180, %c256_181] : memref<192x512xf32, #tpu.memory_space<vmem>>, vector<8x256xf32>
    %c24_182 = arith.constant 24 : index
    %c256_183 = arith.constant 256 : index
    %182 = vector.load %arg12[%c24_182, %c256_183] : memref<192x512xf32, #tpu.memory_space<vmem>>, vector<8x256xf32>
    %183 = arith.maximumf %181, %182 : vector<8x256xf32>
    %184 = arith.maximumf %180, %183 : vector<8x256xf32>
    %c1_184 = arith.constant 1 : index
    %c0_185 = arith.constant 0 : index
    %c0_186 = arith.constant 0 : index
    %185 = vector.load %arg6[%c1_184, %c0_185, %c0_186] : memref<12x256x64xf32, #tpu.memory_space<vmem>>, vector<1x256x64xf32>
    %186 = vector.shape_cast %185 : vector<1x256x64xf32> to vector<256x64xf32>
    %cst_187 = arith.constant dense<0.000000e+00> : vector<8x64xf32>
    %187 = tpu.matmul %184, %186, %cst_187 {dimension_numbers = #tpu.dot_dimension_numbers<[1], [0], [0], [1], [0, 0, 1, 1], [], []>} : vector<8x256xf32>, vector<256x64xf32>, vector<8x64xf32> -> vector<8x64xf32>
    %188 = arith.addf %177, %187 : vector<8x64xf32>
    %c32 = arith.constant 32 : index
    %c0_188 = arith.constant 0 : index
    %189 = vector.load %arg12[%c32, %c0_188] : memref<192x512xf32, #tpu.memory_space<vmem>>, vector<8x256xf32>
    %c40 = arith.constant 40 : index
    %c0_189 = arith.constant 0 : index
    %190 = vector.load %arg12[%c40, %c0_189] : memref<192x512xf32, #tpu.memory_space<vmem>>, vector<8x256xf32>
    %191 = arith.maximumf %189, %190 : vector<8x256xf32>
    %c32_190 = arith.constant 32 : index
    %c256_191 = arith.constant 256 : index
    %192 = vector.load %arg12[%c32_190, %c256_191] : memref<192x512xf32, #tpu.memory_space<vmem>>, vector<8x256xf32>
    %c40_192 = arith.constant 40 : index
    %c256_193 = arith.constant 256 : index
    %193 = vector.load %arg12[%c40_192, %c256_193] : memref<192x512xf32, #tpu.memory_space<vmem>>, vector<8x256xf32>
    %194 = arith.maximumf %192, %193 : vector<8x256xf32>
    %195 = arith.maximumf %191, %194 : vector<8x256xf32>
    %c2_194 = arith.constant 2 : index
    %c0_195 = arith.constant 0 : index
    %c0_196 = arith.constant 0 : index
    %196 = vector.load %arg6[%c2_194, %c0_195, %c0_196] : memref<12x256x64xf32, #tpu.memory_space<vmem>>, vector<1x256x64xf32>
    %197 = vector.shape_cast %196 : vector<1x256x64xf32> to vector<256x64xf32>
    %cst_197 = arith.constant dense<0.000000e+00> : vector<8x64xf32>
    %198 = tpu.matmul %195, %197, %cst_197 {dimension_numbers = #tpu.dot_dimension_numbers<[1], [0], [0], [1], [0, 0, 1, 1], [], []>} : vector<8x256xf32>, vector<256x64xf32>, vector<8x64xf32> -> vector<8x64xf32>
    %199 = arith.addf %188, %198 : vector<8x64xf32>
    %c48 = arith.constant 48 : index
    %c0_198 = arith.constant 0 : index
    %200 = vector.load %arg12[%c48, %c0_198] : memref<192x512xf32, #tpu.memory_space<vmem>>, vector<8x256xf32>
    %c56 = arith.constant 56 : index
    %c0_199 = arith.constant 0 : index
    %201 = vector.load %arg12[%c56, %c0_199] : memref<192x512xf32, #tpu.memory_space<vmem>>, vector<8x256xf32>
    %202 = arith.maximumf %200, %201 : vector<8x256xf32>
    %c48_200 = arith.constant 48 : index
    %c256_201 = arith.constant 256 : index
    %203 = vector.load %arg12[%c48_200, %c256_201] : memref<192x512xf32, #tpu.memory_space<vmem>>, vector<8x256xf32>
    %c56_202 = arith.constant 56 : index
    %c256_203 = arith.constant 256 : index
    %204 = vector.load %arg12[%c56_202, %c256_203] : memref<192x512xf32, #tpu.memory_space<vmem>>, vector<8x256xf32>
    %205 = arith.maximumf %203, %204 : vector<8x256xf32>
    %206 = arith.maximumf %202, %205 : vector<8x256xf32>
    %c3 = arith.constant 3 : index
    %c0_204 = arith.constant 0 : index
    %c0_205 = arith.constant 0 : index
    %207 = vector.load %arg6[%c3, %c0_204, %c0_205] : memref<12x256x64xf32, #tpu.memory_space<vmem>>, vector<1x256x64xf32>
    %208 = vector.shape_cast %207 : vector<1x256x64xf32> to vector<256x64xf32>
    %cst_206 = arith.constant dense<0.000000e+00> : vector<8x64xf32>
    %209 = tpu.matmul %206, %208, %cst_206 {dimension_numbers = #tpu.dot_dimension_numbers<[1], [0], [0], [1], [0, 0, 1, 1], [], []>} : vector<8x256xf32>, vector<256x64xf32>, vector<8x64xf32> -> vector<8x64xf32>
    %210 = arith.addf %199, %209 : vector<8x64xf32>
    %c64_207 = arith.constant 64 : index
    %c0_208 = arith.constant 0 : index
    %211 = vector.load %arg12[%c64_207, %c0_208] : memref<192x512xf32, #tpu.memory_space<vmem>>, vector<8x256xf32>
    %c72_209 = arith.constant 72 : index
    %c0_210 = arith.constant 0 : index
    %212 = vector.load %arg12[%c72_209, %c0_210] : memref<192x512xf32, #tpu.memory_space<vmem>>, vector<8x256xf32>
    %213 = arith.maximumf %211, %212 : vector<8x256xf32>
    %c64_211 = arith.constant 64 : index
    %c256_212 = arith.constant 256 : index
    %214 = vector.load %arg12[%c64_211, %c256_212] : memref<192x512xf32, #tpu.memory_space<vmem>>, vector<8x256xf32>
    %c72_213 = arith.constant 72 : index
    %c256_214 = arith.constant 256 : index
    %215 = vector.load %arg12[%c72_213, %c256_214] : memref<192x512xf32, #tpu.memory_space<vmem>>, vector<8x256xf32>
    %216 = arith.maximumf %214, %215 : vector<8x256xf32>
    %217 = arith.maximumf %213, %216 : vector<8x256xf32>
    %c4 = arith.constant 4 : index
    %c0_215 = arith.constant 0 : index
    %c0_216 = arith.constant 0 : index
    %218 = vector.load %arg6[%c4, %c0_215, %c0_216] : memref<12x256x64xf32, #tpu.memory_space<vmem>>, vector<1x256x64xf32>
    %219 = vector.shape_cast %218 : vector<1x256x64xf32> to vector<256x64xf32>
    %cst_217 = arith.constant dense<0.000000e+00> : vector<8x64xf32>
    %220 = tpu.matmul %217, %219, %cst_217 {dimension_numbers = #tpu.dot_dimension_numbers<[1], [0], [0], [1], [0, 0, 1, 1], [], []>} : vector<8x256xf32>, vector<256x64xf32>, vector<8x64xf32> -> vector<8x64xf32>
    %221 = arith.addf %210, %220 : vector<8x64xf32>
    %c80_218 = arith.constant 80 : index
    %c0_219 = arith.constant 0 : index
    %222 = vector.load %arg12[%c80_218, %c0_219] : memref<192x512xf32, #tpu.memory_space<vmem>>, vector<8x256xf32>
    %c88 = arith.constant 88 : index
    %c0_220 = arith.constant 0 : index
    %223 = vector.load %arg12[%c88, %c0_220] : memref<192x512xf32, #tpu.memory_space<vmem>>, vector<8x256xf32>
    %224 = arith.maximumf %222, %223 : vector<8x256xf32>
    %c80_221 = arith.constant 80 : index
    %c256_222 = arith.constant 256 : index
    %225 = vector.load %arg12[%c80_221, %c256_222] : memref<192x512xf32, #tpu.memory_space<vmem>>, vector<8x256xf32>
    %c88_223 = arith.constant 88 : index
    %c256_224 = arith.constant 256 : index
    %226 = vector.load %arg12[%c88_223, %c256_224] : memref<192x512xf32, #tpu.memory_space<vmem>>, vector<8x256xf32>
    %227 = arith.maximumf %225, %226 : vector<8x256xf32>
    %228 = arith.maximumf %224, %227 : vector<8x256xf32>
    %c5 = arith.constant 5 : index
    %c0_225 = arith.constant 0 : index
    %c0_226 = arith.constant 0 : index
    %229 = vector.load %arg6[%c5, %c0_225, %c0_226] : memref<12x256x64xf32, #tpu.memory_space<vmem>>, vector<1x256x64xf32>
    %230 = vector.shape_cast %229 : vector<1x256x64xf32> to vector<256x64xf32>
    %cst_227 = arith.constant dense<0.000000e+00> : vector<8x64xf32>
    %231 = tpu.matmul %228, %230, %cst_227 {dimension_numbers = #tpu.dot_dimension_numbers<[1], [0], [0], [1], [0, 0, 1, 1], [], []>} : vector<8x256xf32>, vector<256x64xf32>, vector<8x64xf32> -> vector<8x64xf32>
    %232 = arith.addf %221, %231 : vector<8x64xf32>
    %c96 = arith.constant 96 : index
    %c0_228 = arith.constant 0 : index
    %233 = vector.load %arg12[%c96, %c0_228] : memref<192x512xf32, #tpu.memory_space<vmem>>, vector<8x256xf32>
    %c104 = arith.constant 104 : index
    %c0_229 = arith.constant 0 : index
    %234 = vector.load %arg12[%c104, %c0_229] : memref<192x512xf32, #tpu.memory_space<vmem>>, vector<8x256xf32>
    %235 = arith.maximumf %233, %234 : vector<8x256xf32>
    %c96_230 = arith.constant 96 : index
    %c256_231 = arith.constant 256 : index
    %236 = vector.load %arg12[%c96_230, %c256_231] : memref<192x512xf32, #tpu.memory_space<vmem>>, vector<8x256xf32>
    %c104_232 = arith.constant 104 : index
    %c256_233 = arith.constant 256 : index
    %237 = vector.load %arg12[%c104_232, %c256_233] : memref<192x512xf32, #tpu.memory_space<vmem>>, vector<8x256xf32>
    %238 = arith.maximumf %236, %237 : vector<8x256xf32>
    %239 = arith.maximumf %235, %238 : vector<8x256xf32>
    %c6 = arith.constant 6 : index
    %c0_234 = arith.constant 0 : index
    %c0_235 = arith.constant 0 : index
    %240 = vector.load %arg6[%c6, %c0_234, %c0_235] : memref<12x256x64xf32, #tpu.memory_space<vmem>>, vector<1x256x64xf32>
    %241 = vector.shape_cast %240 : vector<1x256x64xf32> to vector<256x64xf32>
    %cst_236 = arith.constant dense<0.000000e+00> : vector<8x64xf32>
    %242 = tpu.matmul %239, %241, %cst_236 {dimension_numbers = #tpu.dot_dimension_numbers<[1], [0], [0], [1], [0, 0, 1, 1], [], []>} : vector<8x256xf32>, vector<256x64xf32>, vector<8x64xf32> -> vector<8x64xf32>
    %243 = arith.addf %232, %242 : vector<8x64xf32>
    %c112 = arith.constant 112 : index
    %c0_237 = arith.constant 0 : index
    %244 = vector.load %arg12[%c112, %c0_237] : memref<192x512xf32, #tpu.memory_space<vmem>>, vector<8x256xf32>
    %c120 = arith.constant 120 : index
    %c0_238 = arith.constant 0 : index
    %245 = vector.load %arg12[%c120, %c0_238] : memref<192x512xf32, #tpu.memory_space<vmem>>, vector<8x256xf32>
    %246 = arith.maximumf %244, %245 : vector<8x256xf32>
    %c112_239 = arith.constant 112 : index
    %c256_240 = arith.constant 256 : index
    %247 = vector.load %arg12[%c112_239, %c256_240] : memref<192x512xf32, #tpu.memory_space<vmem>>, vector<8x256xf32>
    %c120_241 = arith.constant 120 : index
    %c256_242 = arith.constant 256 : index
    %248 = vector.load %arg12[%c120_241, %c256_242] : memref<192x512xf32, #tpu.memory_space<vmem>>, vector<8x256xf32>
    %249 = arith.maximumf %247, %248 : vector<8x256xf32>
    %250 = arith.maximumf %246, %249 : vector<8x256xf32>
    %c7 = arith.constant 7 : index
    %c0_243 = arith.constant 0 : index
    %c0_244 = arith.constant 0 : index
    %251 = vector.load %arg6[%c7, %c0_243, %c0_244] : memref<12x256x64xf32, #tpu.memory_space<vmem>>, vector<1x256x64xf32>
    %252 = vector.shape_cast %251 : vector<1x256x64xf32> to vector<256x64xf32>
    %cst_245 = arith.constant dense<0.000000e+00> : vector<8x64xf32>
    %253 = tpu.matmul %250, %252, %cst_245 {dimension_numbers = #tpu.dot_dimension_numbers<[1], [0], [0], [1], [0, 0, 1, 1], [], []>} : vector<8x256xf32>, vector<256x64xf32>, vector<8x64xf32> -> vector<8x64xf32>
    %254 = arith.addf %243, %253 : vector<8x64xf32>
    %c128_246 = arith.constant 128 : index
    %c0_247 = arith.constant 0 : index
    %255 = vector.load %arg12[%c128_246, %c0_247] : memref<192x512xf32, #tpu.memory_space<vmem>>, vector<8x256xf32>
    %c136_248 = arith.constant 136 : index
    %c0_249 = arith.constant 0 : index
    %256 = vector.load %arg12[%c136_248, %c0_249] : memref<192x512xf32, #tpu.memory_space<vmem>>, vector<8x256xf32>
    %257 = arith.maximumf %255, %256 : vector<8x256xf32>
    %c128_250 = arith.constant 128 : index
    %c256_251 = arith.constant 256 : index
    %258 = vector.load %arg12[%c128_250, %c256_251] : memref<192x512xf32, #tpu.memory_space<vmem>>, vector<8x256xf32>
    %c136_252 = arith.constant 136 : index
    %c256_253 = arith.constant 256 : index
    %259 = vector.load %arg12[%c136_252, %c256_253] : memref<192x512xf32, #tpu.memory_space<vmem>>, vector<8x256xf32>
    %260 = arith.maximumf %258, %259 : vector<8x256xf32>
    %261 = arith.maximumf %257, %260 : vector<8x256xf32>
    %c8_254 = arith.constant 8 : index
    %c0_255 = arith.constant 0 : index
    %c0_256 = arith.constant 0 : index
    %262 = vector.load %arg6[%c8_254, %c0_255, %c0_256] : memref<12x256x64xf32, #tpu.memory_space<vmem>>, vector<1x256x64xf32>
    %263 = vector.shape_cast %262 : vector<1x256x64xf32> to vector<256x64xf32>
    %cst_257 = arith.constant dense<0.000000e+00> : vector<8x64xf32>
    %264 = tpu.matmul %261, %263, %cst_257 {dimension_numbers = #tpu.dot_dimension_numbers<[1], [0], [0], [1], [0, 0, 1, 1], [], []>} : vector<8x256xf32>, vector<256x64xf32>, vector<8x64xf32> -> vector<8x64xf32>
    %265 = arith.addf %254, %264 : vector<8x64xf32>
    %c144_258 = arith.constant 144 : index
    %c0_259 = arith.constant 0 : index
    %266 = vector.load %arg12[%c144_258, %c0_259] : memref<192x512xf32, #tpu.memory_space<vmem>>, vector<8x256xf32>
    %c152 = arith.constant 152 : index
    %c0_260 = arith.constant 0 : index
    %267 = vector.load %arg12[%c152, %c0_260] : memref<192x512xf32, #tpu.memory_space<vmem>>, vector<8x256xf32>
    %268 = arith.maximumf %266, %267 : vector<8x256xf32>
    %c144_261 = arith.constant 144 : index
    %c256_262 = arith.constant 256 : index
    %269 = vector.load %arg12[%c144_261, %c256_262] : memref<192x512xf32, #tpu.memory_space<vmem>>, vector<8x256xf32>
    %c152_263 = arith.constant 152 : index
    %c256_264 = arith.constant 256 : index
    %270 = vector.load %arg12[%c152_263, %c256_264] : memref<192x512xf32, #tpu.memory_space<vmem>>, vector<8x256xf32>
    %271 = arith.maximumf %269, %270 : vector<8x256xf32>
    %272 = arith.maximumf %268, %271 : vector<8x256xf32>
    %c9 = arith.constant 9 : index
    %c0_265 = arith.constant 0 : index
    %c0_266 = arith.constant 0 : index
    %273 = vector.load %arg6[%c9, %c0_265, %c0_266] : memref<12x256x64xf32, #tpu.memory_space<vmem>>, vector<1x256x64xf32>
    %274 = vector.shape_cast %273 : vector<1x256x64xf32> to vector<256x64xf32>
    %cst_267 = arith.constant dense<0.000000e+00> : vector<8x64xf32>
    %275 = tpu.matmul %272, %274, %cst_267 {dimension_numbers = #tpu.dot_dimension_numbers<[1], [0], [0], [1], [0, 0, 1, 1], [], []>} : vector<8x256xf32>, vector<256x64xf32>, vector<8x64xf32> -> vector<8x64xf32>
    %276 = arith.addf %265, %275 : vector<8x64xf32>
    %c160 = arith.constant 160 : index
    %c0_268 = arith.constant 0 : index
    %277 = vector.load %arg12[%c160, %c0_268] : memref<192x512xf32, #tpu.memory_space<vmem>>, vector<8x256xf32>
    %c168 = arith.constant 168 : index
    %c0_269 = arith.constant 0 : index
    %278 = vector.load %arg12[%c168, %c0_269] : memref<192x512xf32, #tpu.memory_space<vmem>>, vector<8x256xf32>
    %279 = arith.maximumf %277, %278 : vector<8x256xf32>
    %c160_270 = arith.constant 160 : index
    %c256_271 = arith.constant 256 : index
    %280 = vector.load %arg12[%c160_270, %c256_271] : memref<192x512xf32, #tpu.memory_space<vmem>>, vector<8x256xf32>
    %c168_272 = arith.constant 168 : index
    %c256_273 = arith.constant 256 : index
    %281 = vector.load %arg12[%c168_272, %c256_273] : memref<192x512xf32, #tpu.memory_space<vmem>>, vector<8x256xf32>
    %282 = arith.maximumf %280, %281 : vector<8x256xf32>
    %283 = arith.maximumf %279, %282 : vector<8x256xf32>
    %c10 = arith.constant 10 : index
    %c0_274 = arith.constant 0 : index
    %c0_275 = arith.constant 0 : index
    %284 = vector.load %arg6[%c10, %c0_274, %c0_275] : memref<12x256x64xf32, #tpu.memory_space<vmem>>, vector<1x256x64xf32>
    %285 = vector.shape_cast %284 : vector<1x256x64xf32> to vector<256x64xf32>
    %cst_276 = arith.constant dense<0.000000e+00> : vector<8x64xf32>
    %286 = tpu.matmul %283, %285, %cst_276 {dimension_numbers = #tpu.dot_dimension_numbers<[1], [0], [0], [1], [0, 0, 1, 1], [], []>} : vector<8x256xf32>, vector<256x64xf32>, vector<8x64xf32> -> vector<8x64xf32>
    %287 = arith.addf %276, %286 : vector<8x64xf32>
    %c176 = arith.constant 176 : index
    %c0_277 = arith.constant 0 : index
    %288 = vector.load %arg12[%c176, %c0_277] : memref<192x512xf32, #tpu.memory_space<vmem>>, vector<8x256xf32>
    %c184 = arith.constant 184 : index
    %c0_278 = arith.constant 0 : index
    %289 = vector.load %arg12[%c184, %c0_278] : memref<192x512xf32, #tpu.memory_space<vmem>>, vector<8x256xf32>
    %290 = arith.maximumf %288, %289 : vector<8x256xf32>
    %c176_279 = arith.constant 176 : index
    %c256_280 = arith.constant 256 : index
    %291 = vector.load %arg12[%c176_279, %c256_280] : memref<192x512xf32, #tpu.memory_space<vmem>>, vector<8x256xf32>
    %c184_281 = arith.constant 184 : index
    %c256_282 = arith.constant 256 : index
    %292 = vector.load %arg12[%c184_281, %c256_282] : memref<192x512xf32, #tpu.memory_space<vmem>>, vector<8x256xf32>
    %293 = arith.maximumf %291, %292 : vector<8x256xf32>
    %294 = arith.maximumf %290, %293 : vector<8x256xf32>
    %c11 = arith.constant 11 : index
    %c0_283 = arith.constant 0 : index
    %c0_284 = arith.constant 0 : index
    %295 = vector.load %arg6[%c11, %c0_283, %c0_284] : memref<12x256x64xf32, #tpu.memory_space<vmem>>, vector<1x256x64xf32>
    %296 = vector.shape_cast %295 : vector<1x256x64xf32> to vector<256x64xf32>
    %cst_285 = arith.constant dense<0.000000e+00> : vector<8x64xf32>
    %297 = tpu.matmul %294, %296, %cst_285 {dimension_numbers = #tpu.dot_dimension_numbers<[1], [0], [0], [1], [0, 0, 1, 1], [], []>} : vector<8x256xf32>, vector<256x64xf32>, vector<8x64xf32> -> vector<8x64xf32>
    %298 = arith.addf %287, %297 : vector<8x64xf32>
    %c0_286 = arith.constant 0 : index
    %c0_287 = arith.constant 0 : index
    %299 = vector.load %arg7[%c0_286, %c0_287] : memref<1x64xf32, #tpu.memory_space<vmem>>, vector<1x64xf32>
    %300 = vector.broadcast %299 : vector<1x64xf32> to vector<8x64xf32>
    %301 = arith.addf %298, %300 : vector<8x64xf32>
    %cst_288 = arith.constant 0.000000e+00 : f32
    %302 = vector.broadcast %cst_288 : f32 to vector<8x64xf32>
    %303 = arith.maximumf %301, %302 : vector<8x64xf32>
    %c0_289 = arith.constant 0 : index
    %c0_290 = arith.constant 0 : index
    %304 = vector.load %arg8[%c0_289, %c0_290] : memref<64x10xf32, #tpu.memory_space<vmem>>, vector<64x10xf32>
    %cst_291 = arith.constant dense<0.000000e+00> : vector<8x10xf32>
    %305 = tpu.matmul %303, %304, %cst_291 {dimension_numbers = #tpu.dot_dimension_numbers<[1], [0], [0], [1], [0, 0, 1, 1], [], []>} : vector<8x64xf32>, vector<64x10xf32>, vector<8x10xf32> -> vector<8x10xf32>
    %c0_292 = arith.constant 0 : index
    %c0_293 = arith.constant 0 : index
    %306 = vector.load %arg9[%c0_292, %c0_293] : memref<1x10xf32, #tpu.memory_space<vmem>>, vector<1x10xf32>
    %307 = vector.broadcast %306 : vector<1x10xf32> to vector<8x10xf32>
    %308 = arith.addf %305, %307 : vector<8x10xf32>
    %c0_294 = arith.constant 0 : index
    %c0_295 = arith.constant 0 : index
    %309 = vector.load %arg10[%c0_294, %c0_295] : memref<8x10xf32, #tpu.memory_space<vmem>>, vector<8x10xf32>
    tpu.vector_store %arg10[%c0_294, %c0_295], %308 {strides = array<i32>} : memref<8x10xf32, #tpu.memory_space<vmem>>, vector<8x10xf32>,
    return
  }
  func.func @transform_0(%arg0: i32) -> (i32, i32, i32) {
    %c0_i32 = arith.constant 0 : i32
    %c0_i32_0 = arith.constant 0 : i32
    %c0_i32_1 = arith.constant 0 : i32
    return %arg0, %c0_i32, %c0_i32_0 : i32, i32, i32
  }
  func.func @transform_1(%arg0: i32) -> (i32, i32, i32) {
    %c0_i32 = arith.constant 0 : i32
    %c0_i32_0 = arith.constant 0 : i32
    %c0_i32_1 = arith.constant 0 : i32
    %c0_i32_2 = arith.constant 0 : i32
    return %c0_i32, %c0_i32_0, %c0_i32_1 : i32, i32, i32
  }
  func.func @transform_2(%arg0: i32) -> (i32, i32) {
    %c0_i32 = arith.constant 0 : i32
    %c0_i32_0 = arith.constant 0 : i32
    %c0_i32_1 = arith.constant 0 : i32
    return %c0_i32, %c0_i32_0 : i32, i32
  }
  func.func @transform_3(%arg0: i32) -> (i32, i32, i32) {
    %c0_i32 = arith.constant 0 : i32
    %c0_i32_0 = arith.constant 0 : i32
    %c0_i32_1 = arith.constant 0 : i32
    %c0_i32_2 = arith.constant 0 : i32
    return %c0_i32, %c0_i32_0, %c0_i32_1 : i32, i32, i32
  }
  func.func @transform_4(%arg0: i32) -> (i32, i32) {
    %c0_i32 = arith.constant 0 : i32
    %c0_i32_0 = arith.constant 0 : i32
    %c0_i32_1 = arith.constant 0 : i32
    return %c0_i32, %c0_i32_0 : i32, i32
  }
  func.func @transform_5(%arg0: i32) -> (i32, i32, i32) {
    %c0_i32 = arith.constant 0 : i32
    %c0_i32_0 = arith.constant 0 : i32
    %c0_i32_1 = arith.constant 0 : i32
    %c0_i32_2 = arith.constant 0 : i32
    return %c0_i32, %c0_i32_0, %c0_i32_1 : i32, i32, i32
  }
  func.func @transform_6(%arg0: i32) -> (i32, i32) {
    %c0_i32 = arith.constant 0 : i32
    %c0_i32_0 = arith.constant 0 : i32
    %c0_i32_1 = arith.constant 0 : i32
    return %c0_i32, %c0_i32_0 : i32, i32
  }
  func.func @transform_7(%arg0: i32) -> (i32, i32) {
    %c0_i32 = arith.constant 0 : i32
    %c0_i32_0 = arith.constant 0 : i32
    %c0_i32_1 = arith.constant 0 : i32
    return %c0_i32, %c0_i32_0 : i32, i32
  }
  func.func @transform_8(%arg0: i32) -> (i32, i32) {
    %c0_i32 = arith.constant 0 : i32
    %c0_i32_0 = arith.constant 0 : i32
    %c0_i32_1 = arith.constant 0 : i32
    return %c0_i32, %c0_i32_0 : i32, i32
  }
  func.func @transform_9(%arg0: i32) -> (i32, i32) {
    %c0_i32 = arith.constant 0 : i32
    %c0_i32_0 = arith.constant 0 : i32
    return %arg0, %c0_i32 : i32, i32
  }
}

</mosaic_0001>

<bundles_post_ra>
// kernel: net_forward.1
= control target key start
LH: loop header
LB: loop body
LE: loop exit
PB: predicated region body
PF: predicated region fallthrough
CT: control target
= control target key end

     0   :  { %vm83_vm0 = vcmask 1043456   ;;  %v15634_v3 = vmov 0.0   ;;  %vm58_vm1 = vcmask 228352   ;;  %vm546_vm2 = vcmask 654336   ;;  %s15624_s1 = inlined_call_operand.vmem [shape: f32[3,28,208], index: 1, kind: input, shape index: {}]   ;;  %s15625_s0 = inlined_call_operand.vmem [shape: f32[1,272,28], index: 0, kind: input, shape index: {}]   ;;  %s15626_s3 = inlined_call_operand.vmem [shape: f32[3,208,512], index: 3, kind: input, shape index: {}]   ;;  %s15627_s2 = inlined_call_operand.vmem [shape: f32[1,208], index: 2, kind: input, shape index: {}]   ;;  %s15628_s4 = inlined_call_operand.vmem [shape: f32[1,512], index: 4, kind: input, shape index: {}]   ;;  %s15629_s5 = inlined_call_operand.vmem [shape: f32[12,256,64], index: 5, kind: input, shape index: {}]   ;;  %s15630_s7 = inlined_call_operand.vmem [shape: f32[64,10], index: 7, kind: input, shape index: {}]   ;;  %s15631_s6 = inlined_call_operand.vmem [shape: f32[1,64], index: 6, kind: input, shape index: {}]   ;;  %s15632_s8 = inlined_call_operand.vmem [shape: f32[1,10], index: 8, kind: input, shape index: {}]   ;;  %s15633_s9 = inlined_call_operand.vmem [shape: f32[8,10], index: 9, kind: output, shape index: {}]  }
   0x1   :  { %v7338_v0 = vld [vmem:[%s15624_s1 + $0x78] sm:$0xf]  ;;  %v7337_v1 = vld [vmem:[%s15624_s1 + $0x70] sm:$0xf]  ;;  %v9164_v2 = vld [vmem:[%s15624_s1 + $0x68] sm:$0xff]  ;;  %154 = vmatprep.mubr.f32.mxu0 %v15634_v3  ;;  %190 = vmatprep.mubr.f32.mxu1 %v15634_v3  ;;  %vm9104_vm3 = vmmov 0  }
   0x2   :  { %7339 = vmatprep.subr.msk.mxu0 %vm83_vm0, %v7338_v0  ;;  %9086 = vmatprep.subr.msk.mxu1 %vm83_vm0, %v7338_v0  ;;  %v9173_v4 = vld [vmem:[%s15624_s1 + $0x60] sm:$0xff]  ;;  %v9180_v5 = vld [vmem:[%s15624_s1 + $0x58] sm:$0xff]  ;;  %v9187_v6 = vld [vmem:[%s15624_s1 + $0x50] sm:$0xff]  ;;  %vm7251_vm4 = vcmask 523264   ;;  %vm7325_vm5 = vcmask 80896  }
   0x3   :  { %7340 = vmatpush1.msk.msra.mxu0 %vm83_vm0, %v7337_v1  ;;  %9090 = vmatpush1.msk.msra.mxu1 %vm83_vm0, %v7337_v1  ;;  %v9194_v7 = vld [vmem:[%s15624_s1 + $0x48] sm:$0xff]  ;;  %v9201_v8 = vld [vmem:[%s15624_s1 + $0x40] sm:$0xff]  ;;  %v9211_v10 = vld [vmem:[%s15625_s0 + $0x38] sm:$0xff] }
   0x4   :  { %116 = vmatprep.subr.mxu0 %v9164_v2  ;;  %9087 = vmatprep.subr.mxu1 %v9164_v2  ;;  %v33_v9 = vld [vmem:[%s15625_s0 + $0x8] sm:$0xff]  ;;  %v47_v11 = vld [vmem:[%s15624_s1 + $0x38] sm:$0xf]  ;;  %v46_v13 = vld [vmem:[%s15624_s1 + $0x30] sm:$0xf] }
   0x5   :  { %117 = vmatpush1.msra.mxu0 %v9173_v4  ;;  %9091 = vmatpush1.msra.mxu1 %v9173_v4  ;;  %v7366_v12 = vld [vmem:[%s15624_s1 + $0xb8] sm:$0xf]  ;;  %v7365_v14 = vld [vmem:[%s15624_s1 + $0xb0] sm:$0xf]  ;;  %v9235_v15 = vld [vmem:[%s15624_s1 + $0x28] sm:$0xff] }
   0x6   :  { %118 = vmatprep.subr.mxu0 %v9180_v5  ;;  %9088 = vmatprep.subr.mxu1 %v9180_v5  ;;  %v9242_v16 = vld [vmem:[%s15624_s1 + $0x20] sm:$0xff]  ;;  %v9249_v17 = vld [vmem:[%s15625_s0 + $0x10] sm:$0xff]  ;;  %v9261_v19 = vld [vmem:[%s15624_s1 + $0x18] sm:$0xff] }
   0x7   :  { %119 = vmatpush1.msra.mxu0 %v9187_v6  ;;  %9092 = vmatpush1.msra.mxu1 %v9187_v6  ;;  %v9254_v18 = vld [vmem:[%s15625_s0 + $0x40] sm:$0xff]  ;;  %v9266_v20 = vld [vmem:[%s15624_s1 + $0xa8] sm:$0xff]  ;;  %v9273_v21 = vld [vmem:[%s15624_s1 + $0x10] sm:$0xff] }
   0x8   :  { %120 = vmatprep.subr.mxu0 %v9194_v7  ;;  %9089 = vmatprep.subr.mxu1 %v9194_v7  ;;  %v9282_v22 = vld [vmem:[%s15624_s1 + $0x8] sm:$0xff]  ;;  %v9289_v23 = vld [vmem:[%s15624_s1] sm:$0xff]  ;;  %v35_v25 = vld [vmem:[%s15625_s0 + $0x18] sm:$0xff] }
   0x9   :  { %121 = vmatpush1.msra.mxu0 %v9201_v8  ;;  %9093 = vmatpush1.msra.mxu1 %v9201_v8  ;;  %v9294_v24 = vld [vmem:[%s15624_s1 + $0xa0] sm:$0xff]  ;;  %v9311_v27 = vld [vmem:[%s15624_s1 + $0x98] sm:$0xff]  ;;  %v9321_v29 = vld [vmem:[%s15624_s1 + $0x90] sm:$0xff] }
   0xa   :  { %7341 = vmatmul.mubr.msk.f32.vlgmr.msra.gmra.mxu0 %vm58_vm1, %v33_v9  ;;  %7347 = vmatmul.mubr.msk.f32.vlgmr.msra.gmra.mxu1 %vm58_vm1, %v9211_v10  ;;  %v32_v26 = vld [vmem:[%s15625_s0] sm:$0xff]  ;;  %v7384_v28 = vld [vmem:[%s15624_s1 + $0x78] sm:$0xf]  ;;  %v7383_v30 = vld [vmem:[%s15624_s1 + $0x70] sm:$0xf] }
   0xb   :  { %7349 = vmatprep.subr.msk.mxu1 %vm83_vm0, %v47_v11  ;;  %7367 = vmatprep.subr.msk.mxu0 %vm83_vm0, %v7366_v12  ;;  %v36_v31 = vld [vmem:[%s15625_s0 + $0x20] sm:$0xff]  ;;  %v9338_v32 = vld [vmem:[%s15624_s1 + $0x88] sm:$0xff]  ;;  %v577_v35 = vld [vmem:[%s15624_s1 + $0x38] sm:$0xf] }
   0xc   :  { %7350 = vmatpush1.msk.msra.mxu1 %vm83_vm0, %v46_v13  ;;  %7368 = vmatpush1.msk.msra.mxu0 %vm83_vm0, %v7365_v14  ;;  %v9345_v33 = vld [vmem:[%s15624_s1 + $0x80] sm:$0xff]  ;;  %v37_v34 = vld [vmem:[%s15625_s0 + $0x28] sm:$0xff]  ;;  %v38_v36 = vld [vmem:[%s15625_s0 + $0x30] sm:$0xff] }
   0xd   :  { %238 = vmatprep.subr.mxu1 %v9235_v15  ;;  %160 = vmatprep.mubr.f32.mxu0 %v15634_v3  ;;  %v576_v37 = vld [vmem:[%s15624_s1 + $0x30] sm:$0xf]  ;;  %v7412_v38 = vld [vmem:[%s15624_s1 + $0xb8] sm:$0xf]  ;;  %v563_v40 = vld [vmem:[%s15625_s0 + $0x48] sm:$0xff] }
   0xe   :  { %196 = vmatprep.mubr.f32.mxu1 %v15634_v3  ;;  %239 = vmatpush1.msra.mxu1 %v9242_v16  ;;  %v7430_v39 = vld [vmem:[%s15624_s1 + $0x78] sm:$0xf]  ;;  %v7411_v41 = vld [vmem:[%s15624_s1 + $0xb0] sm:$0xf]  ;;  %v566_v44 = vld [vmem:[%s15625_s0 + $0x60] sm:$0xff] }
   0xf   :  { %7342 = vmatmul.mubr.msk.f32.gmra.mxu0 %vm58_vm1, %v9249_v17  ;;  %7348 = vmatmul.mubr.msk.f32.gmra.mxu1 %vm58_vm1, %v9254_v18  ;;  %v564_v42 = vld [vmem:[%s15625_s0 + $0x50] sm:$0xff]  ;;  %v565_v43 = vld [vmem:[%s15625_s0 + $0x58] sm:$0xff]  ;;  %v567_v46 = vld [vmem:[%s15625_s0 + $0x68] sm:$0xff] }
  0x10   :  { %240 = vmatprep.subr.mxu1 %v9261_v19  ;;  %398 = vmatprep.subr.mxu0 %v9266_v20  ;;  %v1102_v45 = vld [vmem:[%s15624_s1 + $0x38] sm:$0xf]  ;;  %v7429_v47 = vld [vmem:[%s15624_s1 + $0x70] sm:$0xf]  ;;  %v9488_v50 = vld [vmem:[%s15625_s0 + $0x80] sm:$0xff] }
  0x11   :  { %241 = vmatpush1.msra.mxu1 %v9273_v21  ;;  %166 = vmatprep.mubr.f32.mxu0 %v15634_v3  ;;  %v568_v48 = vld [vmem:[%s15625_s0 + $0x70] sm:$0xff]  ;;  %v569_v49 = vld [vmem:[%s15625_s0 + $0x78] sm:$0xff]  ;;  %v1088_v54 = vld [vmem:[%s15625_s0 + $0x88] sm:$0xff] }
  0x12   :  { %242 = vmatprep.subr.mxu1 %v9282_v22  ;;  %276 = vmatprep.mubr.f32.mxu1 %v15634_v3  ;;  %v7458_v51 = vld [vmem:[%s15624_s1 + $0xb8] sm:$0xf]  ;;  %v1101_v52 = vld [vmem:[%s15624_s1 + $0x30] sm:$0xf]  ;;  %v1091_v58 = vld [vmem:[%s15625_s0 + $0xa0] sm:$0xff] }
  0x13   :  { %243 = vmatpush1.msra.mxu1 %v9289_v23  ;;  %399 = vmatpush1.msra.mxu0 %v9294_v24  ;;  %v7476_v53 = vld [vmem:[%s15624_s1 + $0x78] sm:$0xf]  ;;  %v7457_v55 = vld [vmem:[%s15624_s1 + $0xb0] sm:$0xf]  ;;  %v1092_v60 = vld [vmem:[%s15625_s0 + $0xa8] sm:$0xff] }
  0x14   :  { %7343 = vmatmul.mubr.msk.f32.gmra.mxu0 %vm58_vm1, %v35_v25  ;;  %7351 = vmatmul.mubr.msk.f32.vlgmr.msra.gmra.mxu1 %vm58_vm1, %v32_v26  ;;  %v1089_v56 = vld [vmem:[%s15625_s0 + $0x90] sm:$0xff]  ;;  %v1090_v57 = vld [vmem:[%s15625_s0 + $0x98] sm:$0xff]  ;;  %v9607_v0 = vld [vmem:[%s15625_s0 + $0xc0] sm:$0xff] }
  0x15   :  { %172 = vmatprep.mubr.f32.mxu0 %v15634_v3  ;;  %282 = vmatprep.mubr.f32.mxu1 %v15634_v3  ;;  %v1627_v59 = vld [vmem:[%s15624_s1 + $0x38] sm:$0xf]  ;;  %v7475_v61 = vld [vmem:[%s15624_s1 + $0x70] sm:$0xf]  ;;  %v9699_v11 = vld [vmem:[%s15625_s0 + $0xe8] sm:$0xff] }
  0x16   :  { %400 = vmatprep.subr.mxu0 %v9311_v27  ;;  %7385 = vmatprep.subr.msk.mxu1 %vm83_vm0, %v7384_v28  ;;  %v1093_v62 = vld [vmem:[%s15625_s0 + $0xb0] sm:$0xff]  ;;  %v1094_v63 = vld [vmem:[%s15625_s0 + $0xb8] sm:$0xff]  ;;  %v7575_v12 = vld [vmem:[%s15626_s3 + $0x520] sm:$0xff] }
  0x17   :  { %401 = vmatpush1.msra.mxu0 %v9321_v29  ;;  %7386 = vmatpush1.msk.msra.mxu1 %vm83_vm0, %v7383_v30  ;;  %v7504_v1 = vld [vmem:[%s15624_s1 + $0xb8] sm:$0xf]  ;;  %v7572_v13 = vld [vmem:[%s15626_s3 + $0x508] sm:$0xff]  ;;  %v9717_v14 = vld [vmem:[%s15625_s0 + $0xf0] sm:$0xff] }
  0x18   :  { %7344 = vmatmul.mubr.msk.f32.gmra.mxu0 %vm58_vm1, %v36_v31  ;;  %7352 = vmatmul.mubr.msk.f32.gmra.mxu1 %vm58_vm1, %v33_v9  ;;  %v9685_v9 = vld [vmem:[%s15625_s0 + $0xe0] sm:$0xff]  ;;  %v7556_v26 = vld [vmem:[%s15626_s3 + $0x488] sm:$0xff] }
  0x19   :  { %178 = vmatprep.mubr.f32.mxu0 %v15634_v3  ;;  %288 = vmatprep.mubr.f32.mxu1 %v15634_v3  ;;  %v7555_v28 = vld [vmem:[%s15626_s3 + $0x480] sm:$0xff]  ;;  %v7552_v30 = vld [vmem:[%s15626_s3 + $0x468] sm:$0xff] }
  0x1a   :  { %402 = vmatprep.subr.mxu0 %v9338_v32  ;;  %643 = vmatprep.subr.mxu1 %v9164_v2 }
  0x1b   :  { %403 = vmatpush1.msra.mxu0 %v9345_v33  ;;  %644 = vmatpush1.msra.mxu1 %v9173_v4 }
  0x1c   :  { %7345 = vmatmul.mubr.msk.f32.gmra.mxu0 %vm58_vm1, %v37_v34  ;;  %7353 = vmatmul.mubr.msk.f32.gmra.mxu1 %vm58_vm1, %v9249_v17 }
  0x1d   :  { %184 = vmatprep.mubr.f32.mxu0 %v15634_v3  ;;  %294 = vmatprep.mubr.f32.mxu1 %v15634_v3 }
  0x1e   :  { %645 = vmatprep.subr.mxu1 %v9180_v5  ;;  %7395 = vmatprep.subr.msk.mxu0 %vm83_vm0, %v577_v35  ;;  %v7565_v35 = vld [vmem:[%s15626_s3 + $0x4d0] sm:$0xff] }
  0x1f   :  { %646 = vmatpush1.msra.mxu1 %v9187_v6 }
  0x20   :  { %7346 = vmatmul.mubr.msk.f32.gmra.mxu0 %vm58_vm1, %v38_v36  ;;  %7354 = vmatmul.mubr.msk.f32.gmra.mxu1 %vm58_vm1, %v35_v25 }
  0x21   :  { %300 = vmatprep.mubr.f32.mxu1 %v15634_v3  ;;  %436 = vmatprep.mubr.f32.mxu0 %v15634_v3 }
  0x22   :  { %647 = vmatprep.subr.mxu1 %v9194_v7 }
  0x23   :  { %648 = vmatpush1.msra.mxu1 %v9201_v8 }
  0x24   :  { %7355 = vmatmul.mubr.msk.f32.gmra.mxu1 %vm58_vm1, %v36_v31  ;;  %7369 = vmatmul.mubr.msk.f32.vlgmr.msra.gmra.mxu0 %vm58_vm1, %v9249_v17  ;;  %v9733_v17 = vld [vmem:[%s15625_s0 + $0xf8] sm:$0xff] }
  0x25   :  { %306 = vmatprep.mubr.f32.mxu1 %v15634_v3  ;;  %442 = vmatprep.mubr.f32.mxu0 %v15634_v3 }
  0x26   :  { %7396 = vmatpush1.msk.msra.mxu0 %vm83_vm0, %v576_v37  ;;  %7413 = vmatprep.subr.msk.mxu1 %vm83_vm0, %v7412_v38  ;;  %v7547_v37 = vld [vmem:[%s15626_s3 + $0x440] sm:$0xff]  ;;  %v7561_v38 = vld [vmem:[%s15626_s3 + $0x4b0] sm:$0xff] }
  0x27   :  { %765 = vmatprep.subr.mxu0 %v9235_v15 }
  0x28   :  { %7356 = vmatmul.mubr.msk.f32.gmra.mxu1 %vm58_vm1, %v37_v34  ;;  %7370 = vmatmul.mubr.msk.f32.gmra.mxu0 %vm58_vm1, %v35_v25  ;;  %v7574_v25 = vld [vmem:[%s15626_s3 + $0x518] sm:$0xff] }
  0x29   :  { %312 = vmatprep.mubr.f32.mxu1 %v15634_v3  ;;  %448 = vmatprep.mubr.f32.mxu0 %v15634_v3 }
  0x2a   :  { %766 = vmatpush1.msra.mxu0 %v9242_v16 }
  0x2b   :  { %767 = vmatprep.subr.mxu0 %v9261_v19 }
  0x2c   :  { %7357 = vmatmul.mubr.msk.f32.gmra.mxu1 %vm58_vm1, %v38_v36  ;;  %7371 = vmatmul.mubr.msk.f32.gmra.mxu0 %vm58_vm1, %v36_v31  ;;  %v7569_v31 = vld [vmem:[%s15626_s3 + $0x4f0] sm:$0xff] }
  0x2d   :  { %318 = vmatprep.mubr.f32.mxu1 %v15634_v3  ;;  %454 = vmatprep.mubr.f32.mxu0 %v15634_v3 }
  0x2e   :  { %768 = vmatpush1.msra.mxu0 %v9273_v21 }
  0x2f   :  { %769 = vmatprep.subr.mxu0 %v9282_v22 }
  0x30   :  { %7358 = vmatmul.mubr.msk.f32.gmra.mxu1 %vm58_vm1, %v9211_v10  ;;  %7372 = vmatmul.mubr.msk.f32.gmra.mxu0 %vm58_vm1, %v37_v34  ;;  %v7548_v34 = vld [vmem:[%s15626_s3 + $0x448] sm:$0xff] }
  0x31   :  { %460 = vmatprep.mubr.f32.mxu0 %v15634_v3  ;;  %681 = vmatprep.mubr.f32.mxu1 %v15634_v3 }
  0x32   :  { %770 = vmatpush1.msra.mxu0 %v9289_v23 }
  0x33   :  { %7431 = vmatprep.subr.msk.mxu0 %vm83_vm0, %v7430_v39  ;;  %v7544_v39 = vld [vmem:[%s15626_s3 + $0x428] sm:$0xff] }
  0x34   :  { %7373 = vmatmul.mubr.msk.f32.gmra.mxu0 %vm58_vm1, %v38_v36  ;;  %7387 = vmatmul.mubr.msk.f32.vlgmr.msra.gmra.mxu1 %vm58_vm1, %v563_v40  ;;  %v7562_v36 = vld [vmem:[%s15626_s3 + $0x4b8] sm:$0xff] }
  0x35   :  { %466 = vmatprep.mubr.f32.mxu0 %v15634_v3  ;;  %687 = vmatprep.mubr.f32.mxu1 %v15634_v3 }
  0x36   :  { %7414 = vmatpush1.msk.msra.mxu1 %vm83_vm0, %v7411_v41  ;;  %v7557_v41 = vld [vmem:[%s15626_s3 + $0x490] sm:$0xff] }
  0x37   :  { %924 = vmatprep.subr.mxu1 %v9266_v20 }
  0x38   :  { %7374 = vmatmul.mubr.msk.f32.gmra.mxu0 %vm58_vm1, %v9211_v10  ;;  %7388 = vmatmul.mubr.msk.f32.gmra.mxu1 %vm58_vm1, %v564_v42  ;;  %v7578_v10 = vld [vmem:[%s15626_s3 + $0x538] sm:$0xff] }
  0x39   :  { %472 = vmatprep.mubr.f32.mxu0 %v15634_v3  ;;  %693 = vmatprep.mubr.f32.mxu1 %v15634_v3 }
  0x3a   :  { %925 = vmatpush1.msra.mxu1 %v9294_v24 }
  0x3b   :  { %926 = vmatprep.subr.mxu1 %v9311_v27 }
  0x3c   :  { %7375 = vmatmul.mubr.msk.f32.gmra.mxu0 %vm58_vm1, %v9254_v18  ;;  %7389 = vmatmul.mubr.msk.f32.gmra.mxu1 %vm58_vm1, %v565_v43 }
  0x3d   :  { %478 = vmatprep.mubr.f32.mxu0 %v15634_v3  ;;  %699 = vmatprep.mubr.f32.mxu1 %v15634_v3 }
  0x3e   :  { %927 = vmatpush1.msra.mxu1 %v9321_v29 }
  0x3f   :  { %928 = vmatprep.subr.mxu1 %v9338_v32 }
  0x40   :  { %7376 = vmatmul.mubr.msk.f32.gmra.mxu0 %vm58_vm1, %v563_v40  ;;  %7390 = vmatmul.mubr.msk.f32.gmra.mxu1 %vm58_vm1, %v566_v44 }
  0x41   :  { %705 = vmatprep.mubr.f32.mxu1 %v15634_v3  ;;  %803 = vmatprep.mubr.f32.mxu0 %v15634_v3 }
  0x42   :  { %929 = vmatpush1.msra.mxu1 %v9345_v33 }
  0x43   :  { %7441 = vmatprep.subr.msk.mxu1 %vm83_vm0, %v1102_v45  ;;  %v7540_v45 = vld [vmem:[%s15626_s3 + $0x408] sm:$0xff] }
  0x44   :  { %7391 = vmatmul.mubr.msk.f32.gmra.mxu1 %vm58_vm1, %v567_v46  ;;  %7397 = vmatmul.mubr.msk.f32.vlgmr.msra.gmra.mxu0 %vm58_vm1, %v9254_v18  ;;  %v7567_v18 = vld [vmem:[%s15626_s3 + $0x4e0] sm:$0xff] }
  0x45   :  { %711 = vmatprep.mubr.f32.mxu1 %v15634_v3  ;;  %809 = vmatprep.mubr.f32.mxu0 %v15634_v3 }
  0x46   :  { %7432 = vmatpush1.msk.msra.mxu0 %vm83_vm0, %v7429_v47  ;;  %v7549_v47 = vld [vmem:[%s15626_s3 + $0x450] sm:$0xff] }
  0x47   :  { %1168 = vmatprep.subr.mxu0 %v9164_v2 }
  0x48   :  { %7392 = vmatmul.mubr.msk.f32.gmra.mxu1 %vm58_vm1, %v568_v48  ;;  %7398 = vmatmul.mubr.msk.f32.gmra.mxu0 %vm58_vm1, %v563_v40  ;;  %v7558_v40 = vld [vmem:[%s15626_s3 + $0x498] sm:$0xff] }
  0x49   :  { %717 = vmatprep.mubr.f32.mxu1 %v15634_v3  ;;  %815 = vmatprep.mubr.f32.mxu0 %v15634_v3 }
  0x4a   :  { %1169 = vmatpush1.msra.mxu0 %v9173_v4 }
  0x4b   :  { %1170 = vmatprep.subr.mxu0 %v9180_v5 }
  0x4c   :  { %7393 = vmatmul.mubr.msk.f32.gmra.mxu1 %vm58_vm1, %v569_v49  ;;  %7399 = vmatmul.mubr.msk.f32.gmra.mxu0 %vm58_vm1, %v564_v42 }
  0x4d   :  { %723 = vmatprep.mubr.f32.mxu1 %v15634_v3  ;;  %821 = vmatprep.mubr.f32.mxu0 %v15634_v3 }
  0x4e   :  { %1171 = vmatpush1.msra.mxu0 %v9187_v6 }
  0x4f   :  { %1172 = vmatprep.subr.mxu0 %v9194_v7 }
  0x50   :  { %7394 = vmatmul.mubr.msk.f32.gmra.mxu1 %vm58_vm1, %v9488_v50  ;;  %7400 = vmatmul.mubr.msk.f32.gmra.mxu0 %vm58_vm1, %v565_v43 }
  0x51   :  { %827 = vmatprep.mubr.f32.mxu0 %v15634_v3  ;;  %962 = vmatprep.mubr.f32.mxu1 %v15634_v3 }
  0x52   :  { %1173 = vmatpush1.msra.mxu0 %v9201_v8 }
  0x53   :  { %7459 = vmatprep.subr.msk.mxu0 %vm83_vm0, %v7458_v51  ;;  %v7536_v51 = vld [vmem:[%s15626_s3 + $0x3e8] sm:$0xff] }
  0x54   :  { %7401 = vmatmul.mubr.msk.f32.gmra.mxu0 %vm58_vm1, %v566_v44  ;;  %7415 = vmatmul.mubr.msk.f32.vlgmr.msra.gmra.mxu1 %vm58_vm1, %v564_v42  ;;  %v7554_v42 = vld [vmem:[%s15626_s3 + $0x478] sm:$0xff] }
  0x55   :  { %833 = vmatprep.mubr.f32.mxu0 %v15634_v3  ;;  %968 = vmatprep.mubr.f32.mxu1 %v15634_v3 }
  0x56   :  { %7442 = vmatpush1.msk.msra.mxu1 %vm83_vm0, %v1101_v52  ;;  %v7542_v52 = vld [vmem:[%s15626_s3 + $0x418] sm:$0xff] }
  0x57   :  { %1290 = vmatprep.subr.mxu1 %v9235_v15 }
  0x58   :  { %7402 = vmatmul.mubr.msk.f32.gmra.mxu0 %vm58_vm1, %v567_v46  ;;  %7416 = vmatmul.mubr.msk.f32.gmra.mxu1 %vm58_vm1, %v565_v43  ;;  %v7543_v43 = vld [vmem:[%s15626_s3 + $0x420] sm:$0xff] }
  0x59   :  { %839 = vmatprep.mubr.f32.mxu0 %v15634_v3  ;;  %974 = vmatprep.mubr.f32.mxu1 %v15634_v3 }
  0x5a   :  { %1291 = vmatpush1.msra.mxu1 %v9242_v16 }
  0x5b   :  { %1292 = vmatprep.subr.mxu1 %v9261_v19 }
  0x5c   :  { %7403 = vmatmul.mubr.msk.f32.gmra.mxu0 %vm58_vm1, %v568_v48  ;;  %7417 = vmatmul.mubr.msk.f32.gmra.mxu1 %vm58_vm1, %v566_v44  ;;  %v7553_v44 = vld [vmem:[%s15626_s3 + $0x470] sm:$0xff] }
  0x5d   :  { %845 = vmatprep.mubr.f32.mxu0 %v15634_v3  ;;  %980 = vmatprep.mubr.f32.mxu1 %v15634_v3 }
  0x5e   :  { %1293 = vmatpush1.msra.mxu1 %v9273_v21 }
  0x5f   :  { %1294 = vmatprep.subr.mxu1 %v9282_v22 }
  0x60   :  { %7404 = vmatmul.mubr.msk.f32.gmra.mxu0 %vm58_vm1, %v569_v49  ;;  %7418 = vmatmul.mubr.msk.f32.gmra.mxu1 %vm58_vm1, %v567_v46  ;;  %v7550_v46 = vld [vmem:[%s15626_s3 + $0x458] sm:$0xff] }
  0x61   :  { %986 = vmatprep.mubr.f32.mxu1 %v15634_v3  ;;  %1206 = vmatprep.mubr.f32.mxu0 %v15634_v3 }
  0x62   :  { %1295 = vmatpush1.msra.mxu1 %v9289_v23 }
  0x63   :  { %7477 = vmatprep.subr.msk.mxu1 %vm83_vm0, %v7476_v53 }
  0x64   :  { %7419 = vmatmul.mubr.msk.f32.gmra.mxu1 %vm58_vm1, %v568_v48  ;;  %7433 = vmatmul.mubr.msk.f32.vlgmr.msra.gmra.mxu0 %vm58_vm1, %v1088_v54  ;;  %v7546_v48 = vld [vmem:[%s15626_s3 + $0x438] sm:$0xff] }
  0x65   :  { %992 = vmatprep.mubr.f32.mxu1 %v15634_v3  ;;  %1212 = vmatprep.mubr.f32.mxu0 %v15634_v3 }
  0x66   :  { %7460 = vmatpush1.msk.msra.mxu0 %vm83_vm0, %v7457_v55  ;;  %v7541_v55 = vld [vmem:[%s15626_s3 + $0x410] sm:$0xff] }
  0x67   :  { %1449 = vmatprep.subr.mxu0 %v9266_v20 }
  0x68   :  { %7420 = vmatmul.mubr.msk.f32.gmra.mxu1 %vm58_vm1, %v569_v49  ;;  %7434 = vmatmul.mubr.msk.f32.gmra.mxu0 %vm58_vm1, %v1089_v56  ;;  %v7539_v49 = vld [vmem:[%s15626_s3 + $0x400] sm:$0xff] }
  0x69   :  { %998 = vmatprep.mubr.f32.mxu1 %v15634_v3  ;;  %1218 = vmatprep.mubr.f32.mxu0 %v15634_v3 }
  0x6a   :  { %1450 = vmatpush1.msra.mxu0 %v9294_v24 }
  0x6b   :  { %1451 = vmatprep.subr.mxu0 %v9311_v27 }
  0x6c   :  { %7421 = vmatmul.mubr.msk.f32.gmra.mxu1 %vm58_vm1, %v9488_v50  ;;  %7435 = vmatmul.mubr.msk.f32.gmra.mxu0 %vm58_vm1, %v1090_v57 }
  0x6d   :  { %1004 = vmatprep.mubr.f32.mxu1 %v15634_v3  ;;  %1224 = vmatprep.mubr.f32.mxu0 %v15634_v3 }
  0x6e   :  { %1452 = vmatpush1.msra.mxu0 %v9321_v29 }
  0x6f   :  { %1453 = vmatprep.subr.mxu0 %v9338_v32 }
  0x70   :  { %7422 = vmatmul.mubr.msk.f32.gmra.mxu1 %vm58_vm1, %v1088_v54  ;;  %7436 = vmatmul.mubr.msk.f32.gmra.mxu0 %vm58_vm1, %v1091_v58 }
  0x71   :  { %1328 = vmatprep.mubr.f32.mxu1 %v15634_v3  ;;  %1230 = vmatprep.mubr.f32.mxu0 %v15634_v3 }
  0x72   :  { %1454 = vmatpush1.msra.mxu0 %v9345_v33 }
  0x73   :  { %7487 = vmatprep.subr.msk.mxu0 %vm83_vm0, %v1627_v59 }
  0x74   :  { %7443 = vmatmul.mubr.msk.f32.vlgmr.msra.gmra.mxu1 %vm58_vm1, %v9488_v50  ;;  %7437 = vmatmul.mubr.msk.f32.gmra.mxu0 %vm58_vm1, %v1092_v60  ;;  %v7545_v50 = vld [vmem:[%s15626_s3 + $0x430] sm:$0xff] }
  0x75   :  { %1334 = vmatprep.mubr.f32.mxu1 %v15634_v3  ;;  %1236 = vmatprep.mubr.f32.mxu0 %v15634_v3 }
  0x76   :  { %7478 = vmatpush1.msk.msra.mxu1 %vm83_vm0, %v7475_v61  ;;  %v7532_v61 = vld [vmem:[%s15626_s3 + $0x3c8] sm:$0xff] }
  0x77   :  { %1693 = vmatprep.subr.mxu1 %v9164_v2  ;;  %v1626_v2 = vld [vmem:[%s15624_s1 + $0x30] sm:$0xf] }
  0x78   :  { %7444 = vmatmul.mubr.msk.f32.gmra.mxu1 %vm58_vm1, %v1088_v54  ;;  %7438 = vmatmul.mubr.msk.f32.gmra.mxu0 %vm58_vm1, %v1093_v62 }
  0x79   :  { %1340 = vmatprep.mubr.f32.mxu1 %v15634_v3  ;;  %1242 = vmatprep.mubr.f32.mxu0 %v15634_v3 }
  0x7a   :  { %1694 = vmatpush1.msra.mxu1 %v9173_v4  ;;  %v7576_v4 = vld [vmem:[%s15626_s3 + $0x528] sm:$0xff] }
  0x7b   :  { %1695 = vmatprep.subr.mxu1 %v9180_v5  ;;  %v1613_v5 = vld [vmem:[%s15625_s0 + $0xc8] sm:$0xff] }
  0x7c   :  { %7445 = vmatmul.mubr.msk.f32.gmra.mxu1 %vm58_vm1, %v1089_v56  ;;  %7439 = vmatmul.mubr.msk.f32.gmra.mxu0 %vm58_vm1, %v1094_v63 }
  0x7d   :  { %1346 = vmatprep.mubr.f32.mxu1 %v15634_v3  ;;  %1248 = vmatprep.mubr.f32.mxu0 %v15634_v3 }
  0x7e   :  { %1696 = vmatpush1.msra.mxu1 %v9187_v6  ;;  %v7503_v6 = vld [vmem:[%s15624_s1 + $0xb0] sm:$0xf] }
  0x7f   :  { %1697 = vmatprep.subr.mxu1 %v9194_v7  ;;  %v1614_v7 = vld [vmem:[%s15625_s0 + $0xd0] sm:$0xff] }
  0x80   :  { %7446 = vmatmul.mubr.msk.f32.gmra.mxu1 %vm58_vm1, %v1090_v57  ;;  %7440 = vmatmul.mubr.msk.f32.gmra.mxu0 %vm58_vm1, %v9607_v0 }
  0x81   :  { %1352 = vmatprep.mubr.f32.mxu1 %v15634_v3  ;;  %1487 = vmatprep.mubr.f32.mxu0 %v15634_v3 }
  0x82   :  { %1698 = vmatpush1.msra.mxu1 %v9201_v8  ;;  %v9672_v8 = vld [vmem:[%s15625_s0 + $0xd8] sm:$0xff] }
  0x83   :  { %7505 = vmatprep.subr.msk.mxu1 %vm83_vm0, %v7504_v1  ;;  %v7533_v1 = vld [vmem:[%s15626_s3 + $0x3d0] sm:$0xff] }
  0x84   :  { %7447 = vmatmul.mubr.msk.f32.gmra.mxu1 %vm58_vm1, %v1091_v58  ;;  %7461 = vmatmul.mubr.msk.f32.vlgmr.msra.gmra.mxu0 %vm58_vm1, %v1089_v56  ;;  %v7538_v56 = vld [vmem:[%s15626_s3 + $0x3f8] sm:$0xff] }
  0x85   :  { %1358 = vmatprep.mubr.f32.mxu1 %v15634_v3  ;;  %1493 = vmatprep.mubr.f32.mxu0 %v15634_v3 }
  0x86   :  { %7488 = vmatpush1.msk.msra.mxu0 %vm83_vm0, %v1626_v2 }
  0x87   :  { %1815 = vmatprep.subr.mxu0 %v9235_v15  ;;  %v7571_v15 = vld [vmem:[%s15626_s3 + $0x500] sm:$0xff] }
  0x88   :  { %7448 = vmatmul.mubr.msk.f32.gmra.mxu1 %vm58_vm1, %v1092_v60  ;;  %7462 = vmatmul.mubr.msk.f32.gmra.mxu0 %vm58_vm1, %v1090_v57  ;;  %v7535_v57 = vld [vmem:[%s15626_s3 + $0x3e0] sm:$0xff] }
  0x89   :  { %1364 = vmatprep.mubr.f32.mxu1 %v15634_v3  ;;  %1499 = vmatprep.mubr.f32.mxu0 %v15634_v3 }
  0x8a   :  { %1816 = vmatpush1.msra.mxu0 %v9242_v16  ;;  %v7568_v16 = vld [vmem:[%s15626_s3 + $0x4e8] sm:$0xff] }
  0x8b   :  { %1817 = vmatprep.subr.mxu0 %v9261_v19  ;;  %v7564_v19 = vld [vmem:[%s15626_s3 + $0x4c8] sm:$0xff] }
  0x8c   :  { %7449 = vmatmul.mubr.msk.f32.gmra.mxu1 %vm58_vm1, %v1093_v62  ;;  %7463 = vmatmul.mubr.msk.f32.gmra.mxu0 %vm58_vm1, %v1091_v58 }
  0x8d   :  { %1370 = vmatprep.mubr.f32.mxu1 %v15634_v3  ;;  %1505 = vmatprep.mubr.f32.mxu0 %v15634_v3 }
  0x8e   :  { %1818 = vmatpush1.msra.mxu0 %v9273_v21  ;;  %v7563_v21 = vld [vmem:[%s15626_s3 + $0x4c0] sm:$0xff] }
  0x8f   :  { %1819 = vmatprep.subr.mxu0 %v9282_v22  ;;  %v7560_v22 = vld [vmem:[%s15626_s3 + $0x4a8] sm:$0xff] }
  0x90   :  { %7450 = vmatmul.mubr.msk.f32.gmra.mxu1 %vm58_vm1, %v1094_v63  ;;  %7464 = vmatmul.mubr.msk.f32.gmra.mxu0 %vm58_vm1, %v1092_v60  ;;  %v7537_v60 = vld [vmem:[%s15626_s3 + $0x3f0] sm:$0xff] }
  0x91   :  { %1731 = vmatprep.mubr.f32.mxu1 %v15634_v3  ;;  %1511 = vmatprep.mubr.f32.mxu0 %v15634_v3 }
  0x92   :  { %1820 = vmatpush1.msra.mxu0 %v9289_v23  ;;  %v7577_v23 = vld [vmem:[%s15626_s3 + $0x530] sm:$0xff] }
  0x93   :  { %2388 = vmatprep.subr.mxu0 %v7576_v4 }
  0x94   :  { %7479 = vmatmul.mubr.msk.f32.vlgmr.msra.gmra.mxu1 %vm58_vm1, %v1613_v5  ;;  %7465 = vmatmul.mubr.msk.f32.gmra.mxu0 %vm58_vm1, %v1093_v62  ;;  %v1909_v62 = vld [vmem:[%s15625_s0 + $0x108] sm:$0xff] }
  0x95   :  { %1737 = vmatprep.mubr.f32.mxu1 %v15634_v3  ;;  %1517 = vmatprep.mubr.f32.mxu0 %v15634_v3 }
  0x96   :  { %7506 = vmatpush1.msk.msra.mxu1 %vm83_vm0, %v7503_v6  ;;  %v7530_v6 = vld [vmem:[%s15626_s3 + $0x3b8] sm:$0xff] }
  0x97   :  { %1974 = vmatprep.subr.mxu1 %v9266_v20  ;;  %v9749_v20 = vld [vmem:[%s15625_s0 + $0x100] sm:$0xff] }
  0x98   :  { %7480 = vmatmul.mubr.msk.f32.gmra.mxu1 %vm58_vm1, %v1614_v7  ;;  %7466 = vmatmul.mubr.msk.f32.gmra.mxu0 %vm58_vm1, %v1094_v63  ;;  %v7534_v63 = vld [vmem:[%s15626_s3 + $0x3d8] sm:$0xff] }
  0x99   :  { %1743 = vmatprep.mubr.f32.mxu1 %v15634_v3  ;;  %1523 = vmatprep.mubr.f32.mxu0 %v15634_v3 }
  0x9a   :  { %1975 = vmatpush1.msra.mxu1 %v9294_v24  ;;  %v7559_v24 = vld [vmem:[%s15626_s3 + $0x4a0] sm:$0xff] }
  0x9b   :  { %1976 = vmatprep.subr.mxu1 %v9311_v27  ;;  %v7573_v27 = vld [vmem:[%s15626_s3 + $0x510] sm:$0xff] }
  0x9c   :  { %7481 = vmatmul.mubr.msk.f32.gmra.mxu1 %vm58_vm1, %v9672_v8  ;;  %7467 = vmatmul.mubr.msk.f32.gmra.mxu0 %vm58_vm1, %v9607_v0 }
  0x9d   :  { %1749 = vmatprep.mubr.f32.mxu1 %v15634_v3  ;;  %1529 = vmatprep.mubr.f32.mxu0 %v15634_v3 }
  0x9e   :  { %1977 = vmatpush1.msra.mxu1 %v9321_v29  ;;  %v7570_v29 = vld [vmem:[%s15626_s3 + $0x4f8] sm:$0xff] }
  0x9f   :  { %1978 = vmatprep.subr.mxu1 %v9338_v32  ;;  %v7551_v32 = vld [vmem:[%s15626_s3 + $0x460] sm:$0xff] }
  0xa0   :  { %7482 = vmatmul.mubr.msk.f32.gmra.mxu1 %vm58_vm1, %v9685_v9  ;;  %7468 = vmatmul.mubr.msk.f32.gmra.mxu0 %vm58_vm1, %v1613_v5 }
  0xa1   :  { %1755 = vmatprep.mubr.f32.mxu1 %v15634_v3  ;;  %1853 = vmatprep.mubr.f32.mxu0 %v15634_v3 }
  0xa2   :  { %1979 = vmatpush1.msra.mxu1 %v9345_v33  ;;  %v7566_v33 = vld [vmem:[%s15626_s3 + $0x4d8] sm:$0xff] }
  0xa3   :  { %2501 = vmatprep.subr.mxu1 %v7578_v10 }
  0xa4   :  { %7483 = vmatmul.mubr.msk.f32.gmra.mxu1 %vm58_vm1, %v9699_v11  ;;  %7489 = vmatmul.mubr.msk.f32.vlgmr.msra.gmra.mxu0 %vm58_vm1, %v9607_v0  ;;  %v7531_v0 = vld [vmem:[%s15626_s3 + $0x3c0] sm:$0xff] }
  0xa5   :  { %1761 = vmatprep.mubr.f32.mxu1 %v15634_v3  ;;  %1859 = vmatprep.mubr.f32.mxu0 %v15634_v3 }
  0xa6   :  { %2389 = vmatpush1.msra.mxu0 %v7575_v12  ;;  %v7526_v12 = vld [vmem:[%s15626_s3 + $0x398] sm:$0xff] }
  0xa7   :  { %2390 = vmatprep.subr.mxu0 %v7572_v13  ;;  %v7523_v13 = vld [vmem:[%s15626_s3 + $0x380] sm:$0xff] }
  0xa8   :  { %7484 = vmatmul.mubr.msk.f32.gmra.mxu1 %vm58_vm1, %v9717_v14  ;;  %7490 = vmatmul.mubr.msk.f32.gmra.mxu0 %vm58_vm1, %v1613_v5  ;;  %v7528_v5 = vld [vmem:[%s15626_s3 + $0x3a8] sm:$0xff] }
  0xa9   :  { %1767 = vmatprep.mubr.f32.mxu1 %v15634_v3  ;;  %1865 = vmatprep.mubr.f32.mxu0 %v15634_v3 }
  0xaa   :  { %2391 = vmatpush1.msra.mxu0 %v7571_v15  ;;  %v7520_v15 = vld [vmem:[%s15626_s3 + $0x368] sm:$0xff] }
  0xab   :  { %2392 = vmatprep.subr.mxu0 %v7568_v16  ;;  %v7522_v16 = vld [vmem:[%s15626_s3 + $0x378] sm:$0xff] }
  0xac   :  { %7485 = vmatmul.mubr.msk.f32.gmra.mxu1 %vm58_vm1, %v9733_v17  ;;  %7491 = vmatmul.mubr.msk.f32.gmra.mxu0 %vm58_vm1, %v1614_v7 }
  0xad   :  { %1773 = vmatprep.mubr.f32.mxu1 %v15634_v3  ;;  %1871 = vmatprep.mubr.f32.mxu0 %v15634_v3 }
  0xae   :  { %2393 = vmatpush1.msra.mxu0 %v7567_v18 }
  0xaf   :  { %2394 = vmatprep.subr.mxu0 %v7564_v19  ;;  %v7519_v19 = vld [vmem:[%s15626_s3 + $0x360] sm:$0xff] }
  0xb0   :  { %7486 = vmatmul.mubr.msk.f32.gmra.mxu1 %vm58_vm1, %v9749_v20  ;;  %7492 = vmatmul.mubr.msk.f32.gmra.mxu0 %vm58_vm1, %v9672_v8 }
  0xb1   :  { %2012 = vmatprep.mubr.f32.mxu1 %v15634_v3  ;;  %1877 = vmatprep.mubr.f32.mxu0 %v15634_v3 }
  0xb2   :  { %2395 = vmatpush1.msra.mxu0 %v7563_v21  ;;  %v7516_v21 = vld [vmem:[%s15626_s3 + $0x348] sm:$0xff] }
  0xb3   :  { %2396 = vmatprep.subr.mxu0 %v7560_v22  ;;  %v7518_v22 = vld [vmem:[%s15626_s3 + $0x358] sm:$0xff] }
  0xb4   :  { %7507 = vmatmul.mubr.msk.f32.vlgmr.msra.gmra.mxu1 %vm58_vm1, %v1614_v7  ;;  %7493 = vmatmul.mubr.msk.f32.gmra.mxu0 %vm58_vm1, %v9685_v9  ;;  %v7527_v7 = vld [vmem:[%s15626_s3 + $0x3a0] sm:$0xff] }
  0xb5   :  { %2018 = vmatprep.mubr.f32.mxu1 %v15634_v3  ;;  %1883 = vmatprep.mubr.f32.mxu0 %v15634_v3 }
  0xb6   :  { %2502 = vmatpush1.msra.mxu1 %v7577_v23  ;;  %2397 = vmatpush1.msra.mxu0 %v7559_v24 }
  0xb7   :  { %2503 = vmatprep.subr.mxu1 %v7574_v25  ;;  %2398 = vmatprep.subr.mxu0 %v7556_v26  ;;  %v7515_v25 = vld [vmem:[%s15626_s3 + $0x340] sm:$0xff]  ;;  %v7517_v26 = vld [vmem:[%s15626_s3 + $0x350] sm:$0xff] }
  0xb8   :  { %7508 = vmatmul.mubr.msk.f32.gmra.mxu1 %vm58_vm1, %v9672_v8  ;;  %7494 = vmatmul.mubr.msk.f32.gmra.mxu0 %vm58_vm1, %v9699_v11  ;;  %v7529_v8 = vld [vmem:[%s15626_s3 + $0x3b0] sm:$0xff] }
  0xb9   :  { %2024 = vmatprep.mubr.f32.mxu1 %v15634_v3  ;;  %1889 = vmatprep.mubr.f32.mxu0 %v15634_v3 }
  0xba   :  { %2504 = vmatpush1.msra.mxu1 %v7573_v27  ;;  %2399 = vmatpush1.msra.mxu0 %v7555_v28  ;;  %v503_v27 = vlaneseq  ;;  %v7616_v28 = vld [vmem:[%s15626_s3 + $0x668] sm:$0xff] }
  0xbb   :  { %2505 = vmatprep.subr.mxu1 %v7570_v29  ;;  %2400 = vmatprep.subr.mxu0 %v7552_v30  ;;  %v7618_v29 = vld [vmem:[%s15626_s3 + $0x678] sm:$0xff] }
  0xbc   :  { %7509 = vmatmul.mubr.msk.f32.gmra.mxu1 %vm58_vm1, %v9685_v9  ;;  %7495 = vmatmul.mubr.msk.f32.gmra.mxu0 %vm58_vm1, %v9717_v14 }
  0xbd   :  { %2030 = vmatprep.mubr.f32.mxu1 %v15634_v3  ;;  %1895 = vmatprep.mubr.f32.mxu0 %v15634_v3 }
  0xbe   :  { %2506 = vmatpush1.msra.mxu1 %v7569_v31  ;;  %2401 = vmatpush1.msra.mxu0 %v7551_v32  ;;  %v7615_v32 = vld [vmem:[%s15626_s3 + $0x660] sm:$0xff] }
  0xbf   :  { %2507 = vmatprep.subr.mxu1 %v7566_v33  ;;  %2402 = vmatprep.subr.mxu0 %v7548_v34  ;;  %v7617_v33 = vld [vmem:[%s15626_s3 + $0x670] sm:$0xff]  ;;  %v7612_v34 = vld [vmem:[%s15626_s3 + $0x648] sm:$0xff] }
  0xc0   :  { %7510 = vmatmul.mubr.msk.f32.gmra.mxu1 %vm58_vm1, %v9699_v11  ;;  %7496 = vmatmul.mubr.msk.f32.gmra.mxu0 %vm58_vm1, %v9733_v17  ;;  %v7524_v11 = vld [vmem:[%s15626_s3 + $0x388] sm:$0xff] }
  0xc1   :  { %2036 = vmatprep.mubr.f32.mxu1 %v15634_v3  ;;  %2508 = vmatpush1.msra.mxu1 %v7565_v35  ;;  %v7614_v35 = vld [vmem:[%s15626_s3 + $0x658] sm:$0xff] }
  0xc2   :  { %2509 = vmatprep.subr.mxu1 %v7562_v36  ;;  %2403 = vmatpush1.msra.mxu0 %v7547_v37 }
  0xc3   :  { %2510 = vmatpush1.msra.mxu1 %v7561_v38  ;;  %2404 = vmatprep.subr.mxu0 %v7544_v39  ;;  %v7611_v38 = vld [vmem:[%s15626_s3 + $0x640] sm:$0xff]  ;;  %v7613_v39 = vld [vmem:[%s15626_s3 + $0x650] sm:$0xff] }
  0xc4   :  { %7511 = vmatmul.mubr.msk.f32.gmra.mxu1 %vm58_vm1, %v9717_v14  ;;  %2511 = vmatprep.subr.mxu1 %v7558_v40  ;;  %v7525_v14 = vld [vmem:[%s15626_s3 + $0x390] sm:$0xff]  ;;  %v10017_v40 = vshrl.u32 %v503_v27, 7  ;;  %v7590_v27 = vld [vmem:[%s15626_s3 + $0x598] sm:$0xff] }
  0xc5   :  { %2042 = vmatprep.mubr.f32.mxu1 %v15634_v3  ;;  %2512 = vmatpush1.msra.mxu1 %v7557_v41  ;;  %v7608_v41 = vld [vmem:[%s15626_s3 + $0x628] sm:$0xff] }
  0xc6   :  { %2513 = vmatprep.subr.mxu1 %v7554_v42  ;;  %2405 = vmatpush1.msra.mxu0 %v7543_v43  ;;  %v7610_v42 = vld [vmem:[%s15626_s3 + $0x638] sm:$0xff] }
  0xc7   :  { %2514 = vmatpush1.msra.mxu1 %v7553_v44  ;;  %2406 = vmatprep.subr.mxu0 %v7540_v45  ;;  %v7607_v45 = vld [vmem:[%s15626_s3 + $0x620] sm:$0xff] }
  0xc8   :  { %7512 = vmatmul.mubr.msk.f32.gmra.mxu1 %vm58_vm1, %v9733_v17  ;;  %2515 = vmatprep.subr.mxu1 %v7550_v46  ;;  %v7609_v46 = vld [vmem:[%s15626_s3 + $0x630] sm:$0xff] }
  0xc9   :  { %2048 = vmatprep.mubr.f32.mxu1 %v15634_v3  ;;  %2516 = vmatpush1.msra.mxu1 %v7549_v47  ;;  %v7604_v47 = vld [vmem:[%s15626_s3 + $0x608] sm:$0xff] }
  0xca   :  { %v9882_v53 = vpop.f32.mrf.mxu0  ;;  %v9884_v54 = vpop.f32.mrf.mxu1  ;;  %2517 = vmatprep.subr.mxu1 %v7546_v48  ;;  %2407 = vmatpush1.msra.mxu0 %v7539_v49  ;;  %v7606_v48 = vld [vmem:[%s15626_s3 + $0x618] sm:$0xff] }
  0xcb   :  { %2518 = vmatpush1.msra.mxu1 %v7545_v50  ;;  %2408 = vmatprep.subr.mxu0 %v7536_v51  ;;  %v7603_v51 = vld [vmem:[%s15626_s3 + $0x600] sm:$0xff] }
  0xcc   :  { %7513 = vmatmul.mubr.msk.f32.gmra.mxu1 %vm58_vm1, %v9749_v20  ;;  %v9897_v58 = vpop.f32.mrf.mxu0  ;;  %v9899_v59 = vpop.f32.mrf.mxu1  ;;  %2519 = vmatprep.subr.mxu1 %v7542_v52  ;;  %v7521_v20 = vld [vmem:[%s15626_s3 + $0x370] sm:$0xff] }
  0xcd   :  { %2054 = vmatprep.mubr.f32.mxu1 %v15634_v3  ;;  %2520 = vmatpush1.msra.mxu1 %v7541_v55  ;;  %v7605_v52 = vld [vmem:[%s15626_s3 + $0x610] sm:$0xff]  ;;  %v10052_v55 = vsub.s32 0, %v10017_v40 }
  0xce   :  { %2521 = vmatprep.subr.mxu1 %v7538_v56  ;;  %2409 = vmatpush1.msra.mxu0 %v7535_v57  ;;  %v7600_v56 = vld [vmem:[%s15626_s3 + $0x5e8] sm:$0xff]  ;;  %v7602_v57 = vld [vmem:[%s15626_s3 + $0x5f8] sm:$0xff]  ;;  %v3454_v3 = vld [vmem:[%s15626_s3 + $0x250] sm:$0xff] }
  0xcf   :  { %v9920_v2 = vpop.f32.mrf.mxu0  ;;  %v9922_v4 = vpop.f32.mrf.mxu1  ;;  %2522 = vmatpush1.msra.mxu1 %v7537_v60  ;;  %2410 = vmatprep.subr.mxu0 %v7532_v61 }
  0xd0   :  { %7514 = vmatmul.mubr.msk.f32.gmra.mxu1 %vm58_vm1, %v1909_v62  ;;  %2523 = vmatprep.subr.mxu1 %v7534_v63  ;;  %v501_v62 = vld [vmem:[%s15627_s2] sm:$0x3] }
  0xd1   :  { %v9937_v9 = vpop.f32.mrf.mxu0  ;;  %v9939_v10 = vpop.f32.mrf.mxu1  ;;  %2411 = vmatpush1.msra.mxu0 %v7531_v0  ;;  %2524 = vmatpush1.msra.mxu1 %v7533_v1  ;;  %v7599_v63 = vld [vmem:[%s15626_s3 + $0x5e0] sm:$0xff]  ;;  %v7601_v0 = vld [vmem:[%s15626_s3 + $0x5f0] sm:$0xff]  ;;  %v10074_v1 = vsub.s32 1, %v10017_v40 }
  0xd2   :  { %2412 = vmatprep.subr.mxu0 %v7528_v5  ;;  %2525 = vmatprep.subr.mxu1 %v7530_v6  ;;  %v7596_v5 = vld [vmem:[%s15626_s3 + $0x5c8] sm:$0xff]  ;;  %v7598_v6 = vld [vmem:[%s15626_s3 + $0x5d8] sm:$0xff] }
  0xd3   :  { %2413 = vmatpush1.msra.mxu0 %v7527_v7  ;;  %2526 = vmatpush1.msra.mxu1 %v7529_v8 }
  0xd4   :  { %v9959_v17 = vpop.f32.mrf.mxu0  ;;  %v9961_v18 = vpop.f32.mrf.mxu1  ;;  %2414 = vmatprep.subr.mxu0 %v7524_v11  ;;  %2527 = vmatprep.subr.mxu1 %v7526_v12  ;;  %v7595_v11 = vld [vmem:[%s15626_s3 + $0x5c0] sm:$0xff]  ;;  %v7597_v12 = vld [vmem:[%s15626_s3 + $0x5d0] sm:$0xff] }
  0xd5   :  { %2415 = vmatpush1.msra.mxu0 %v7523_v13  ;;  %2528 = vmatpush1.msra.mxu1 %v7525_v14  ;;  %v279_v13 = vadd.f32 %v9961_v18, %v9882_v53  ;;  %v10095_v14 = vrot.slane %v501_v62, %v10052_v55  ;;  %v7591_v53 = vld [vmem:[%s15626_s3 + $0x5a0] sm:$0xff]  ;;  %v7593_v18 = vld [vmem:[%s15626_s3 + $0x5b0] sm:$0xff] }
  0xd6   :  { %v9975_v23 = vpop.f32.mrf.mxu0  ;;  %v9977_v24 = vpop.f32.mrf.mxu1  ;;  %2416 = vmatprep.subr.mxu0 %v7520_v15  ;;  %2529 = vmatprep.subr.mxu1 %v7522_v16  ;;  %v7592_v15 = vld [vmem:[%s15626_s3 + $0x5a8] sm:$0xff]  ;;  %v7594_v16 = vld [vmem:[%s15626_s3 + $0x5b8] sm:$0xff] }
  0xd7   :  { %2417 = vmatpush1.msra.mxu0 %v7519_v19  ;;  %2530 = vmatpush1.msra.mxu1 %v7521_v20 }
  0xd8   :  { %v9991_v30 = vpop.f32.mrf.mxu0  ;;  %v9993_v31 = vpop.f32.mrf.mxu1  ;;  %2418 = vmatprep.subr.mxu0 %v7516_v21  ;;  %2531 = vmatprep.subr.mxu1 %v7518_v22  ;;  %v281_v21 = vadd.f32 %v9977_v24, %v9897_v58  ;;  %v7587_v58 = vld [vmem:[%s15626_s3 + $0x580] sm:$0xff]  ;;  %v7589_v24 = vld [vmem:[%s15626_s3 + $0x590] sm:$0xff] }
  0xd9   :  { %2419 = vmatpush1.msra.mxu0 %v7515_v25  ;;  %2532 = vmatpush1.msra.mxu1 %v7517_v26  ;;  %v10114_v25 = vrot.slane %v501_v62, %v10074_v1  ;;  %v7588_v26 = vld [vmem:[%s15626_s3 + $0x588] sm:$0xff] }
  0xda   :  { %v10007_v36 = vpop.f32.mrf.mxu0  ;;  %v10009_v37 = vpop.f32.mrf.mxu1  ;;  %2432 = vmatprep.subr.mxu0 %v7616_v28  ;;  %2545 = vmatprep.subr.mxu1 %v7618_v29 }
  0xdb   :  { %2433 = vmatpush2.msra.mxu0 %v7615_v32  ;;  %2546 = vmatpush2.msra.mxu1 %v7617_v33  ;;  %v285_v32 = vadd.f32 %v9993_v31, %v9920_v2  ;;  %v7583_v2 = vld [vmem:[%s15626_s3 + $0x560] sm:$0xff]  ;;  %v7585_v31 = vld [vmem:[%s15626_s3 + $0x570] sm:$0xff] }
  0xdc   :  { %v10025_v43 = vpop.f32.mrf.mxu0  ;;  %v10027_v44 = vpop.f32.mrf.mxu1  ;;  %2434 = vmatprep.subr.mxu0 %v7612_v34  ;;  %2547 = vmatprep.subr.mxu1 %v7614_v35  ;;  %v7584_v35 = vld [vmem:[%s15626_s3 + $0x568] sm:$0xff] }
  0xdd   :  { %2435 = vmatpush2.msra.mxu0 %v7611_v38  ;;  %2548 = vmatpush2.msra.mxu1 %v7613_v39  ;;  %v7586_v38 = vld [vmem:[%s15626_s3 + $0x578] sm:$0xff] }
  0xde   :  { %v10041_v49 = vpop.f32.mrf.mxu0  ;;  %v10043_v50 = vpop.f32.mrf.mxu1  ;;  %2436 = vmatprep.subr.mxu0 %v7608_v41  ;;  %2549 = vmatprep.subr.mxu1 %v7610_v42  ;;  %v287_v42 = vadd.f32 %v10009_v37, %v9937_v9  ;;  %v7579_v9 = vld [vmem:[%s15626_s3 + $0x540] sm:$0xff]  ;;  %v7581_v37 = vld [vmem:[%s15626_s3 + $0x550] sm:$0xff] }
  0xdf   :  { %2437 = vmatpush2.msra.mxu0 %v7607_v45  ;;  %2550 = vmatpush2.msra.mxu1 %v7609_v46 }
  0xe0   :  { %v10060_v60 = vpop.f32.mrf.mxu0  ;;  %v10062_v61 = vpop.f32.mrf.mxu1  ;;  %2438 = vmatprep.subr.mxu0 %v7604_v47  ;;  %2551 = vmatprep.subr.mxu1 %v7606_v48  ;;  %v7580_v48 = vld [vmem:[%s15626_s3 + $0x548] sm:$0xff] }
  0xe1   :  { %2439 = vmatpush2.msra.mxu0 %v7603_v51  ;;  %2552 = vmatpush2.msra.mxu1 %v7605_v52  ;;  %v7582_v51 = vld [vmem:[%s15626_s3 + $0x558] sm:$0xff] }
  0xe2   :  { %v10082_v7 = vpop.f32.mrf.mxu0  ;;  %v10084_v8 = vpop.f32.mrf.mxu1  ;;  %2440 = vmatprep.subr.mxu0 %v7600_v56  ;;  %2553 = vmatprep.subr.mxu1 %v7602_v57  ;;  %v291_v57 = vadd.f32 %v10027_v44, %v9959_v17  ;;  %v293_v17 = vadd.f32 %v10043_v50, %v9975_v23 }
  0xe3   :  { %2441 = vmatpush2.msra.mxu0 %v7599_v63  ;;  %2554 = vmatpush2.msra.mxu1 %v7601_v0 }
  0xe4   :  { %v10103_v19 = vpop.f32.mrf.mxu1  ;;  %v438_v20 = vpop.f32.mrf.mxu0  ;;  %2442 = vmatprep.subr.mxu0 %v7596_v5  ;;  %2555 = vmatprep.subr.mxu1 %v7598_v6  ;;  %v2214_v5 = vld [vmem:[%s15626_s3 + $0x1e8] sm:$0xff]  ;;  %v2216_v6 = vld [vmem:[%s15626_s3 + $0x1f8] sm:$0xff] }
  0xe5   :  { %v485_v22 = vadd.f32 %v438_v20, %v279_v13  ;;  %2443 = vmatpush2.msra.mxu0 %v7595_v11  ;;  %2556 = vmatpush2.msra.mxu1 %v7597_v12 }
  0xe6   :  { %v10122_v28 = vpop.f32.mrf.mxu1  ;;  %v440_v29 = vpop.f32.mrf.mxu0  ;;  %2444 = vmatprep.subr.mxu0 %v7592_v15  ;;  %2557 = vmatprep.subr.mxu1 %v7594_v16 }
  0xe7   :  { %v513_v33 = vadd.f32 %v10095_v14, %v485_v22  ;;  %v486_v34 = vadd.f32 %v440_v29, %v281_v21  ;;  %2445 = vmatpush2.msra.mxu0 %v7591_v53  ;;  %2558 = vmatpush2.msra.mxu1 %v7593_v18  ;;  %v297_v53 = vadd.f32 %v10062_v61, %v9991_v30 }
  0xe8   :  { %v10139_v39 = vpop.f32.mrf.mxu1  ;;  %v444_v41 = vpop.f32.mrf.mxu0  ;;  %2446 = vmatprep.subr.mxu0 %v7588_v26  ;;  %2559 = vmatprep.subr.mxu1 %v7590_v27  ;;  %v299_v26 = vadd.f32 %v10084_v8, %v10007_v36  ;;  %v303_v61 = vadd.f32 %v10103_v19, %v10025_v43 }
  0xe9   :  { %v529_v45 = vmax.f32 %v513_v33, 0.0  ;;  %v514_v46 = vadd.f32 %v10114_v25, %v486_v34  ;;  %v487_v47 = vadd.f32 %v444_v41, %v285_v32  ;;  %2447 = vmatpush2.msra.mxu0 %v7587_v58  ;;  %2560 = vmatpush2.msra.mxu1 %v7589_v24 }
  0xea   :  { %v10156_v52 = vpop.f32.mrf.mxu1  ;;  %v446_v56 = vpop.f32.mrf.mxu0  ;;  %2448 = vmatprep.subr.mxu0 %v7584_v35  ;;  %2561 = vmatprep.subr.mxu1 %v7586_v38  ;;  %v305_v35 = vadd.f32 %v10122_v28, %v10041_v49 }
  0xeb   :  { %545 = vst [vmem:[#allocation2] sm:$0xff] %v529_v45  ;;  %v530_v62 = vmax.f32 %v514_v46, 0.0  ;;  %v515_v63 = vadd.f32 %v10095_v14, %v487_v47  ;;  %v488_v0 = vadd.f32 %v446_v56, %v287_v42  ;;  %2449 = vmatpush2.msra.mxu0 %v7583_v2  ;;  %2562 = vmatpush2.msra.mxu1 %v7585_v31 }
  0xec   :  { %v10173_v11 = vpop.f32.mrf.mxu1  ;;  %v450_v12 = vpop.f32.mrf.mxu0  ;;  %2450 = vmatprep.subr.mxu0 %v7580_v48  ;;  %2563 = vmatprep.subr.mxu1 %v7582_v51  ;;  %v309_v31 = vadd.f32 %v10139_v39, %v10060_v60  ;;  %v2213_v48 = vld [vmem:[%s15626_s3 + $0x1e0] sm:$0xff]  ;;  %v2215_v51 = vld [vmem:[%s15626_s3 + $0x1f0] sm:$0xff]  ;;  %v311_v60 = vadd.f32 %v10156_v52, %v10082_v7  ;;  %v2212_v7 = vld [vmem:[%s15626_s3 + $0x1d8] sm:$0xff] }
  0xed   :  { %547 = vst.msk [vmem:[#allocation2 + $0x8] sm:$0xff] %vm546_vm2, %v530_v62  ;;  %v10178_v44 = vmax.f32 %v515_v63, 0.0  ;;  %v516_v13 = vadd.f32 %v10114_v25, %v488_v0  ;;  %v489_v15 = vadd.f32 %v450_v12, %v291_v57  ;;  %2451 = vmatpush2.msra.mxu0 %v7579_v9  ;;  %2564 = vmatpush2.msra.mxu1 %v7581_v37  ;;  %v2210_v37 = vld [vmem:[%s15626_s3 + $0x1c8] sm:$0xff]  ;;  %v2209_v62 = vld [vmem:[%s15626_s3 + $0x1c0] sm:$0xff]  ;;  %v2211_v63 = vld [vmem:[%s15626_s3 + $0x1d0] sm:$0xff] }
  0xee   :  { %v10181_v16 = vpop.f32.mrf.mxu1  ;;  %v452_v20 = vpop.f32.mrf.mxu0  ;;  %2617 = vmatprep.subr.mxu0 %v2214_v5  ;;  %2730 = vmatprep.subr.mxu1 %v2216_v6  ;;  %v315_v0 = vadd.f32 %v10173_v11, %v9884_v54  ;;  %v2208_v54 = vld [vmem:[%s15626_s3 + $0x1b8] sm:$0xff] }
  0xef   :  { %v532_v18 = vmax.f32 %v516_v13, 0.0  ;;  %v517_v23 = vadd.f32 %v10095_v14, %v489_v15  ;;  %v490_v50 = vadd.f32 %v452_v20, %v293_v17  ;;  %v2206_v20 = vld [vmem:[%s15626_s3 + $0x1a8] sm:$0xff]  ;;  %v317_v11 = vadd.f32 %v10181_v16, %v9899_v59  ;;  %v2205_v59 = vld [vmem:[%s15626_s3 + $0x1a0] sm:$0xff]  ;;  %v2207_v16 = vld [vmem:[%s15626_s3 + $0x1b0] sm:$0xff] }
  0xf0   :  { %v10186_v21 = vpop.f32.mrf.mxu1  ;;  %v456_v22 = vpop.f32.mrf.mxu0 }
  0xf1   :  { %549 = vst.msk [vmem:[#allocation2 + $0x18] sm:$0xff] %vm546_vm2, %v532_v18  ;;  %v10191_v27 = vmax.f32 %v517_v23, 0.0  ;;  %v518_v29 = vadd.f32 %v10114_v25, %v490_v50  ;;  %v491_v58 = vadd.f32 %v456_v22, %v297_v53 }
  0xf2   :  { %v10194_v24 = vpop.f32.mrf.mxu1  ;;  %v458_v30 = vpop.f32.mrf.mxu0 }
  0xf3   :  { %550 = vst [vmem:[#allocation2 + $0x20] sm:$0xff] %v10191_v27  ;;  %v534_v32 = vmax.f32 %v518_v29, 0.0  ;;  %v519_v33 = vadd.f32 %v10095_v14, %v491_v58  ;;  %v492_v34 = vadd.f32 %v458_v30, %v299_v26  ;;  %v321_v26 = vadd.f32 %v10186_v21, %v9922_v4 }
  0xf4   :  { %v462_v36 = vpop.f32.mrf.mxu0  ;;  %v10200_v8 = vpop.f32.mrf.mxu1 }
  0xf5   :  { %551 = vst.msk [vmem:[#allocation2 + $0x28] sm:$0xff] %vm546_vm2, %v534_v32  ;;  %v10205_v38 = vmax.f32 %v519_v33, 0.0  ;;  %v520_v41 = vadd.f32 %v10114_v25, %v492_v34  ;;  %v493_v2 = vadd.f32 %v462_v36, %v303_v61  ;;  %v2202_v61 = vld [vmem:[%s15626_s3 + $0x188] sm:$0xff]  ;;  %v2204_v32 = vld [vmem:[%s15626_s3 + $0x198] sm:$0xff]  ;;  %v2201_v33 = vld [vmem:[%s15626_s3 + $0x180] sm:$0xff]  ;;  %v323_v36 = vadd.f32 %v10194_v24, %v9939_v10 }
  0xf6   :  { %v464_v43 = vpop.f32.mrf.mxu0  ;;  %v10208_v19 = vpop.f32.mrf.mxu1  ;;  %v2203_v34 = vld [vmem:[%s15626_s3 + $0x190] sm:$0xff]  ;;  %v2200_v10 = vld [vmem:[%s15626_s3 + $0x178] sm:$0xff] }
  0xf7   :  { %552 = vst [vmem:[#allocation2 + $0x30] sm:$0xff] %v10205_v38  ;;  %v536_v42 = vmax.f32 %v520_v41, 0.0  ;;  %v521_v45 = vadd.f32 %v10095_v14, %v493_v2  ;;  %v494_v46 = vadd.f32 %v464_v43, %v305_v35  ;;  %v2198_v43 = vld [vmem:[%s15626_s3 + $0x168] sm:$0xff] }
  0xf8   :  { %v468_v49 = vpop.f32.mrf.mxu0  ;;  %v10214_v28 = vpop.f32.mrf.mxu1  ;;  %v10216_v47 = vld [vmem:[#allocation2 + $0x18] sm:$0xff] }
  0xf9   :  { %553 = vst.msk [vmem:[#allocation2 + $0x38] sm:$0xff] %vm546_vm2, %v536_v42  ;;  %v10227_v39 = vmax.f32 %v521_v45, 0.0  ;;  %v522_v56 = vadd.f32 %v10114_v25, %v494_v46  ;;  %v495_v9 = vadd.f32 %v468_v49, %v309_v31  ;;  %7619 = vmatprep.mubr.msk.f32.mxu0 %vm546_vm2, %v10216_v47  ;;  %7627 = vmatprep.mubr.msk.f32.mxu1 %vm546_vm2, %v10216_v47  ;;  %v2197_v49 = vld [vmem:[%s15626_s3 + $0x160] sm:$0xff] }
  0xfa   :  { %v470_v52 = vpop.f32.mrf.mxu0  ;;  %v10240_v57 = vpop.f32.mrf.mxu1  ;;  %2453 = vmatmul.mubr.f32.vlgmr.msra.gmra.mxu0 %v10178_v44  ;;  %2566 = vmatmul.mubr.f32.vlgmr.msra.gmra.mxu1 %v10178_v44 }
  0xfb   :  { %554 = vst [vmem:[#allocation2 + $0x40] sm:$0xff] %v10227_v39  ;;  %v538_v5 = vmax.f32 %v522_v56, 0.0  ;;  %v523_v6 = vadd.f32 %v10095_v14, %v495_v9  ;;  %v496_v12 = vadd.f32 %v470_v52, %v311_v60  ;;  %2618 = vmatpush1.msra.mxu0 %v2213_v48  ;;  %2731 = vmatpush1.msra.mxu1 %v2215_v51  ;;  %v2199_v48 = vld [vmem:[%s15626_s3 + $0x170] sm:$0xff]  ;;  %v2194_v9 = vld [vmem:[%s15626_s3 + $0x148] sm:$0xff] }
  0xfc   :  { %2619 = vmatprep.subr.mxu0 %v2210_v37  ;;  %2732 = vmatprep.subr.mxu1 %v2212_v7  ;;  %v474_v17 = vpop.f32.mrf.mxu0  ;;  %v10254_v13 = vpop.f32.mrf.mxu1  ;;  %v10256_v15 = vld [vmem:[#allocation2 + $0x28] sm:$0xff]  ;;  %v2196_v37 = vld [vmem:[%s15626_s3 + $0x158] sm:$0xff]  ;;  %v2193_v7 = vld [vmem:[%s15626_s3 + $0x140] sm:$0xff] }
  0xfd   :  { %555 = vst.msk [vmem:[#allocation2 + $0x48] sm:$0xff] %vm546_vm2, %v538_v5  ;;  %v10267_v53 = vmax.f32 %v523_v6, 0.0  ;;  %v524_v18 = vadd.f32 %v10114_v25, %v496_v12  ;;  %v497_v23 = vadd.f32 %v474_v17, %v315_v0  ;;  %2620 = vmatpush1.msra.mxu0 %v2209_v62  ;;  %2733 = vmatpush1.msra.mxu1 %v2211_v63  ;;  %v2192_v5 = vld [vmem:[%s15626_s3 + $0x138] sm:$0xff]  ;;  %v2189_v17 = vld [vmem:[%s15626_s3 + $0x120] sm:$0xff] }
  0xfe   :  { %7620 = vmatprep.mubr.msk.f32.mxu0 %vm546_vm2, %v10256_v15  ;;  %7628 = vmatprep.mubr.msk.f32.mxu1 %vm546_vm2, %v10256_v15  ;;  %v476_v50 = vpop.f32.mrf.mxu0  ;;  %v10274_v22 = vpop.f32.mrf.mxu1 }
  0xff   :  { %556 = vst [vmem:[#allocation2 + $0x50] sm:$0xff] %v10267_v53  ;;  %v540_v29 = vmax.f32 %v524_v18, 0.0  ;;  %v525_v58 = vadd.f32 %v10095_v14, %v497_v23  ;;  %2621 = vmatprep.subr.mxu0 %v2206_v20  ;;  %2734 = vmatprep.subr.mxu1 %v2208_v54  ;;  %v498_v30 = vadd.f32 %v476_v50, %v317_v11  ;;  %v2191_v20 = vld [vmem:[%s15626_s3 + $0x130] sm:$0xff]  ;;  %v2186_v18 = vld [vmem:[%s15626_s3 + $0x108] sm:$0xff]  ;;  %v2188_v23 = vld [vmem:[%s15626_s3 + $0x118] sm:$0xff] }
 0x100   :  { %2459 = vmatmul.mubr.f32.gmra.mxu0 %v10191_v27  ;;  %2572 = vmatmul.mubr.f32.gmra.mxu1 %v10191_v27  ;;  %v480_v4 = vpop.f32.mrf.mxu0  ;;  %v10294_v21 = vpop.f32.mrf.mxu1  ;;  %v10308_v2 = vld [vmem:[#allocation2 + $0x38] sm:$0xff]  ;;  %v2185_v50 = vld [vmem:[%s15626_s3 + $0x100] sm:$0xff] }
 0x101   :  { %557 = vst.msk [vmem:[#allocation2 + $0x58] sm:$0xff] %vm546_vm2, %v540_v29  ;;  %v10305_v35 = vmax.f32 %v525_v58, 0.0  ;;  %v526_v27 = vadd.f32 %v10114_v25, %v498_v30  ;;  %2622 = vmatpush1.msra.mxu0 %v2205_v59  ;;  %2735 = vmatpush1.msra.mxu1 %v2207_v16  ;;  %v499_v41 = vadd.f32 %v480_v4, %v321_v26  ;;  %v2187_v59 = vld [vmem:[%s15626_s3 + $0x110] sm:$0xff]  ;;  %v2184_v58 = vld [vmem:[%s15626_s3 + $0xf8] sm:$0xff] }
 0x102   :  { %2623 = vmatprep.subr.mxu0 %v2202_v61  ;;  %2736 = vmatprep.subr.mxu1 %v2204_v32  ;;  %v482_v24 = vpop.f32.mrf.mxu0  ;;  %v10316_v31 = vpop.f32.mrf.mxu1  ;;  %v2181_v32 = vld [vmem:[%s15626_s3 + $0xe0] sm:$0xff]  ;;  %v2183_v4 = vld [vmem:[%s15626_s3 + $0xf0] sm:$0xff] }
 0x103   :  { %558 = vst [vmem:[#allocation2 + $0x60] sm:$0xff] %v10305_v35  ;;  %v542_v42 = vmax.f32 %v526_v27, 0.0  ;;  %v527_v45 = vadd.f32 %v10095_v14, %v499_v41  ;;  %2624 = vmatpush1.msra.mxu0 %v2201_v33  ;;  %2737 = vmatpush1.msra.mxu1 %v2203_v34  ;;  %v500_v46 = vadd.f32 %v482_v24, %v323_v36  ;;  %v1027_v36 = vld [vmem:[%s15627_s2] sm:$0x3]  ;;  %v2178_v27 = vld [vmem:[%s15626_s3 + $0xc8] sm:$0xff]  ;;  %v2180_v41 = vld [vmem:[%s15626_s3 + $0xd8] sm:$0xff] }
 0x104   :  { %7621 = vmatprep.mubr.msk.f32.mxu0 %vm546_vm2, %v10308_v2  ;;  %7629 = vmatprep.mubr.msk.f32.mxu1 %vm546_vm2, %v10308_v2  ;;  %v10330_v51 = vpop.f32.mrf.mxu1  ;;  %v10332_v14 = vpop.f32.mrf.mxu0  ;;  %v10357_v0 = vld [vmem:[#allocation2 + $0x48] sm:$0xff] }
 0x105   :  { %559 = vst.msk [vmem:[#allocation2 + $0x68] sm:$0xff] %vm546_vm2, %v542_v42  ;;  %v10335_v60 = vmax.f32 %v527_v45, 0.0  ;;  %2625 = vmatprep.subr.mxu0 %v2198_v43  ;;  %2738 = vmatprep.subr.mxu1 %v2200_v10  ;;  %v528_v56 = vadd.f32 %v10114_v25, %v500_v46  ;;  %v2195_v25 = vld [vmem:[%s15626_s3 + $0x150] sm:$0xff]  ;;  %v2177_v43 = vld [vmem:[%s15626_s3 + $0xc0] sm:$0xff]  ;;  %v806_v45 = vadd.f32 %v10332_v14, %v10200_v8 }
 0x106   :  { %2465 = vmatmul.mubr.f32.gmra.mxu0 %v10205_v38  ;;  %2578 = vmatmul.mubr.f32.gmra.mxu1 %v10205_v38  ;;  %v10352_v52 = vpop.f32.mrf.mxu1  ;;  %v10354_v62 = vpop.f32.mrf.mxu0  ;;  %v2190_v38 = vld [vmem:[%s15626_s3 + $0x128] sm:$0xff]  ;;  %v2179_v10 = vld [vmem:[%s15626_s3 + $0xd0] sm:$0xff] }
 0x107   :  { %560 = vst [vmem:[#allocation2 + $0x70] sm:$0xff] %v10335_v60  ;;  %v544_v63 = vmax.f32 %v528_v56, 0.0  ;;  %2626 = vmatpush1.msra.mxu0 %v2197_v49  ;;  %2739 = vmatpush1.msra.mxu1 %v2199_v48  ;;  %v2174_v49 = vld [vmem:[%s15626_s3 + $0xa8] sm:$0xff]  ;;  %v2176_v48 = vld [vmem:[%s15626_s3 + $0xb8] sm:$0xff]  ;;  %v808_v14 = vadd.f32 %v10354_v62, %v10208_v19  ;;  %v2175_v19 = vld [vmem:[%s15626_s3 + $0xb0] sm:$0xff] }
 0x108   :  { %2627 = vmatprep.subr.mxu0 %v2194_v9  ;;  %2740 = vmatprep.subr.mxu1 %v2196_v37  ;;  %v10365_v6 = vpop.f32.mrf.mxu1  ;;  %v10367_v12 = vpop.f32.mrf.mxu0  ;;  %v10402_v29 = vld [vmem:[#allocation2 + $0x58] sm:$0xff]  ;;  %v10467_v37 = vrot.slane %v1027_v36, %v10074_v1 }
 0x109   :  { %561 = vst.msk [vmem:[#allocation2 + $0x78] sm:$0xff] %vm546_vm2, %v544_v63  ;;  %2628 = vmatpush1.msra.mxu0 %v2193_v7  ;;  %2741 = vmatpush1.msra.mxu1 %v2195_v25  ;;  %v2173_v7 = vld [vmem:[%s15626_s3 + $0xa0] sm:$0xff]  ;;  %v812_v63 = vadd.f32 %v10367_v12, %v10214_v28  ;;  %v2171_v12 = vld [vmem:[%s15626_s3 + $0x90] sm:$0xff] }
 0x10a   :  { %7622 = vmatprep.mubr.msk.f32.mxu0 %vm546_vm2, %v10357_v0  ;;  %7630 = vmatprep.mubr.msk.f32.mxu1 %vm546_vm2, %v10357_v0  ;;  %v10380_v54 = vpop.f32.mrf.mxu1  ;;  %v10382_v11 = vpop.f32.mrf.mxu0  ;;  %v2169_v28 = vld [vmem:[%s15626_s3 + $0x80] sm:$0xff] }
 0x10b   :  { %2629 = vmatprep.subr.mxu0 %v2190_v38  ;;  %2742 = vmatprep.subr.mxu1 %v2192_v5  ;;  %v2170_v38 = vld [vmem:[%s15626_s3 + $0x88] sm:$0xff]  ;;  %v2172_v5 = vld [vmem:[%s15626_s3 + $0x98] sm:$0xff] }
 0x10c   :  { %2471 = vmatmul.mubr.f32.gmra.mxu0 %v10227_v39  ;;  %2584 = vmatmul.mubr.f32.gmra.mxu1 %v10227_v39  ;;  %v10398_v16 = vpop.f32.mrf.mxu1  ;;  %v10400_v26 = vpop.f32.mrf.mxu0  ;;  %v2182_v39 = vld [vmem:[%s15626_s3 + $0xe8] sm:$0xff] }
 0x10d   :  { %2630 = vmatpush1.msra.mxu0 %v2189_v17  ;;  %2743 = vmatpush1.msra.mxu1 %v2191_v20  ;;  %v10451_v46 = vld [vmem:[#allocation2 + $0x68] sm:$0xff] }
 0x10e   :  { %2631 = vmatprep.subr.mxu0 %v2186_v18  ;;  %2744 = vmatprep.subr.mxu1 %v2188_v23  ;;  %v10410_v30 = vpop.f32.mrf.mxu1  ;;  %v10412_v61 = vpop.f32.mrf.mxu0 }
 0x10f   :  { %2632 = vmatpush1.msra.mxu0 %v2185_v50  ;;  %2745 = vmatpush1.msra.mxu1 %v2187_v59  ;;  %v814_v50 = vadd.f32 %v10382_v11, %v10240_v57 }
 0x110   :  { %7623 = vmatprep.mubr.msk.f32.mxu0 %vm546_vm2, %v10402_v29  ;;  %7631 = vmatprep.mubr.msk.f32.mxu1 %vm546_vm2, %v10402_v29  ;;  %v10424_v33 = vpop.f32.mrf.mxu1  ;;  %v10426_v34 = vpop.f32.mrf.mxu0  ;;  %v10502_v59 = vld [vmem:[#allocation2 + $0x78] sm:$0xff] }
 0x111   :  { %2633 = vmatprep.subr.mxu0 %v2182_v39  ;;  %2746 = vmatprep.subr.mxu1 %v2184_v58 }
 0x112   :  { %2477 = vmatmul.mubr.f32.gmra.mxu0 %v10267_v53  ;;  %2590 = vmatmul.mubr.f32.gmra.mxu1 %v10267_v53  ;;  %v10445_v24 = vpop.f32.mrf.mxu1  ;;  %v10447_v42 = vpop.f32.mrf.mxu0  ;;  %v10454_v53 = vrot.slane %v1027_v36, %v10052_v55  ;;  %v818_v36 = vadd.f32 %v10400_v26, %v10254_v13  ;;  %v2167_v13 = vld [vmem:[%s15626_s3 + $0x70] sm:$0xff] }
 0x113   :  { %2634 = vmatpush1.msra.mxu0 %v2181_v32  ;;  %2747 = vmatpush1.msra.mxu1 %v2183_v4  ;;  %v2166_v32 = vld [vmem:[%s15626_s3 + $0x68] sm:$0xff]  ;;  %v2168_v4 = vld [vmem:[%s15626_s3 + $0x78] sm:$0xff] }
 0x114   :  { %2635 = vmatprep.subr.mxu0 %v2178_v27  ;;  %2748 = vmatprep.subr.mxu1 %v2180_v41  ;;  %v10462_v56 = vpop.f32.mrf.mxu0  ;;  %v964_v8 = vpop.f32.mrf.mxu1 }
 0x115   :  { %2636 = vmatpush1.msra.mxu0 %v2177_v43  ;;  %2749 = vmatpush1.msra.mxu1 %v2179_v10  ;;  %v1011_v9 = vadd.f32 %v964_v8, %v806_v45  ;;  %v2165_v10 = vld [vmem:[%s15626_s3 + $0x60] sm:$0xff]  ;;  %v2164_v8 = vld [vmem:[%s15626_s3 + $0x58] sm:$0xff] }
 0x116   :  { %7624 = vmatprep.mubr.msk.f32.mxu0 %vm546_vm2, %v10451_v46  ;;  %7632 = vmatprep.mubr.msk.f32.mxu1 %vm546_vm2, %v10451_v46  ;;  %v10479_v25 = vpop.f32.mrf.mxu0  ;;  %v966_v62 = vpop.f32.mrf.mxu1 }
 0x117   :  { %2637 = vmatprep.subr.mxu0 %v2174_v49  ;;  %2750 = vmatprep.subr.mxu1 %v2176_v48  ;;  %v1039_v17 = vadd.f32 %v10454_v53, %v1011_v9  ;;  %v1012_v20 = vadd.f32 %v966_v62, %v808_v14  ;;  %v820_v49 = vadd.f32 %v10412_v61, %v10274_v22  ;;  %v2162_v48 = vld [vmem:[%s15626_s3 + $0x48] sm:$0xff]  ;;  %v2161_v22 = vld [vmem:[%s15626_s3 + $0x40] sm:$0xff]  ;;  %v2163_v61 = vld [vmem:[%s15626_s3 + $0x50] sm:$0xff] }
 0x118   :  { %2483 = vmatmul.mubr.f32.gmra.mxu0 %v10305_v35  ;;  %2596 = vmatmul.mubr.f32.gmra.mxu1 %v10305_v35  ;;  %v10498_v18 = vpop.f32.mrf.mxu0  ;;  %v970_v23 = vpop.f32.mrf.mxu1 }
 0x119   :  { %2638 = vmatpush1.msra.mxu0 %v2173_v7  ;;  %2751 = vmatpush1.msra.mxu1 %v2175_v19  ;;  %v10504_v39 = vmax.f32 %v1039_v17, 0.0  ;;  %v1040_v35 = vadd.f32 %v10467_v37, %v1012_v20  ;;  %v1013_v58 = vadd.f32 %v970_v23, %v812_v63  ;;  %v824_v63 = vadd.f32 %v10426_v34, %v10294_v21  ;;  %v2157_v21 = vld [vmem:[%s15626_s3 + $0x20] sm:$0xff]  ;;  %v2159_v34 = vld [vmem:[%s15626_s3 + $0x30] sm:$0xff] }
 0x11a   :  { %2639 = vmatprep.subr.mxu0 %v2170_v38  ;;  %2752 = vmatprep.subr.mxu1 %v2172_v5  ;;  %v10513_v57 = vpop.f32.mrf.mxu0  ;;  %v972_v11 = vpop.f32.mrf.mxu1  ;;  %v2160_v38 = vld [vmem:[%s15626_s3 + $0x38] sm:$0xff]  ;;  %v826_v23 = vadd.f32 %v10447_v42, %v10316_v31  ;;  %v2153_v31 = vld [vmem:[%s15626_s3] sm:$0xff]  ;;  %v2155_v42 = vld [vmem:[%s15626_s3 + $0x10] sm:$0xff] }
 0x11b   :  { %2640 = vmatpush1.msra.mxu0 %v2169_v28  ;;  %2753 = vmatpush1.msra.mxu1 %v2171_v12  ;;  %1071 = vst [vmem:[#allocation2 + $0x80] sm:$0xff] %v10504_v39  ;;  %v1056_v27 = vmax.f32 %v1040_v35, 0.0  ;;  %v1041_v41 = vadd.f32 %v10454_v53, %v1013_v58  ;;  %v1014_v43 = vadd.f32 %v972_v11, %v814_v50  ;;  %v2154_v50 = vld [vmem:[%s15626_s3 + $0x8] sm:$0xff]  ;;  %v2156_v35 = vld [vmem:[%s15626_s3 + $0x18] sm:$0xff] }
 0x11c   :  { %7625 = vmatprep.mubr.msk.f32.mxu0 %vm546_vm2, %v10502_v59  ;;  %7633 = vmatprep.mubr.msk.f32.mxu1 %vm546_vm2, %v10502_v59  ;;  %v10529_v26 = vpop.f32.mrf.mxu0  ;;  %v976_v45 = vpop.f32.mrf.mxu1 }
 0x11d   :  { %2641 = vmatprep.subr.mxu0 %v2166_v32  ;;  %2754 = vmatprep.subr.mxu1 %v2168_v4  ;;  %1072 = vst.msk [vmem:[#allocation2 + $0x88] sm:$0xff] %vm546_vm2, %v1056_v27  ;;  %v1057_v14 = vmax.f32 %v1041_v41, 0.0  ;;  %v1042_v9 = vadd.f32 %v10467_v37, %v1014_v43  ;;  %v1015_v7 = vadd.f32 %v976_v45, %v818_v36  ;;  %v2254_v41 = vld [vmem:[%s15626_s3 + $0x328] sm:$0xff]  ;;  %v2256_v43 = vld [vmem:[%s15626_s3 + $0x338] sm:$0xff] }
 0x11e   :  { %2489 = vmatmul.mubr.f32.gmra.mxu0 %v10335_v60  ;;  %2602 = vmatmul.mubr.f32.gmra.mxu1 %v10335_v60  ;;  %v10549_v19 = vpop.f32.mrf.mxu0  ;;  %v978_v62 = vpop.f32.mrf.mxu1  ;;  %v2158_v60 = vld [vmem:[%s15626_s3 + $0x28] sm:$0xff]  ;;  %v830_v27 = vadd.f32 %v10462_v56, %v10330_v51  ;;  %v2253_v51 = vld [vmem:[%s15626_s3 + $0x320] sm:$0xff]  ;;  %v2255_v56 = vld [vmem:[%s15626_s3 + $0x330] sm:$0xff] }
 0x11f   :  { %2642 = vmatpush1.msra.mxu0 %v2165_v10  ;;  %2755 = vmatpush1.msra.mxu1 %v2167_v13  ;;  %1073 = vst [vmem:[#allocation2 + $0x90] sm:$0xff] %v1057_v14  ;;  %v1058_v5 = vmax.f32 %v1042_v9, 0.0  ;;  %v1043_v17 = vadd.f32 %v10454_v53, %v1015_v7  ;;  %v1016_v20 = vadd.f32 %v978_v62, %v820_v49  ;;  %v2250_v14 = vld [vmem:[%s15626_s3 + $0x308] sm:$0xff]  ;;  %v2252_v9 = vld [vmem:[%s15626_s3 + $0x318] sm:$0xff] }
 0x120   :  { %2643 = vmatprep.subr.mxu0 %v2162_v48  ;;  %2756 = vmatprep.subr.mxu1 %v2164_v8  ;;  %v10566_v28 = vpop.f32.mrf.mxu0  ;;  %v982_v12 = vpop.f32.mrf.mxu1  ;;  %v832_v8 = vadd.f32 %v10479_v25, %v10352_v52  ;;  %v2249_v52 = vld [vmem:[%s15626_s3 + $0x300] sm:$0xff]  ;;  %v2251_v25 = vld [vmem:[%s15626_s3 + $0x310] sm:$0xff] }
 0x121   :  { %2644 = vmatpush1.msra.mxu0 %v2161_v22  ;;  %2757 = vmatpush1.msra.mxu1 %v2163_v61  ;;  %1074 = vst.msk [vmem:[#allocation2 + $0x98] sm:$0xff] %vm546_vm2, %v1058_v5  ;;  %v1059_v58 = vmax.f32 %v1043_v17, 0.0  ;;  %v1044_v32 = vadd.f32 %v10467_v37, %v1016_v20  ;;  %v1017_v4 = vadd.f32 %v982_v12, %v824_v63  ;;  %v2248_v5 = vld [vmem:[%s15626_s3 + $0x2f8] sm:$0xff] }
 0x122   :  { %2645 = vmatprep.subr.mxu0 %v2158_v60  ;;  %2758 = vmatprep.subr.mxu1 %v2160_v38  ;;  %v10584_v11 = vpop.f32.mrf.mxu0  ;;  %v984_v36 = vpop.f32.mrf.mxu1  ;;  %v836_v60 = vadd.f32 %v10498_v18, %v10365_v6  ;;  %v2246_v38 = vld [vmem:[%s15626_s3 + $0x2e8] sm:$0xff]  ;;  %v2245_v6 = vld [vmem:[%s15626_s3 + $0x2e0] sm:$0xff]  ;;  %v2247_v18 = vld [vmem:[%s15626_s3 + $0x2f0] sm:$0xff] }
 0x123   :  { %2646 = vmatpush1.msra.mxu0 %v2157_v21  ;;  %2759 = vmatpush1.msra.mxu1 %v2159_v34  ;;  %1075 = vst [vmem:[#allocation2 + $0xa0] sm:$0xff] %v1059_v58  ;;  %v1060_v10 = vmax.f32 %v1044_v32, 0.0  ;;  %v1045_v13 = vadd.f32 %v10454_v53, %v1017_v4  ;;  %v1018_v45 = vadd.f32 %v984_v36, %v826_v23 }
 0x124   :  { %2647 = vmatprep.subr.mxu0 %v2154_v50  ;;  %2760 = vmatprep.subr.mxu1 %v2156_v35  ;;  %v988_v49 = vpop.f32.mrf.mxu1  ;;  %v10601_v48 = vpop.f32.mrf.mxu0  ;;  %v838_v23 = vadd.f32 %v10513_v57, %v10380_v54  ;;  %v2242_v50 = vld [vmem:[%s15626_s3 + $0x2c8] sm:$0xff]  ;;  %v2244_v35 = vld [vmem:[%s15626_s3 + $0x2d8] sm:$0xff]  ;;  %v2241_v54 = vld [vmem:[%s15626_s3 + $0x2c0] sm:$0xff]  ;;  %v842_v36 = vadd.f32 %v10529_v26, %v10398_v16 }
 0x125   :  { %2648 = vmatpush1.msra.mxu0 %v2153_v31  ;;  %2761 = vmatpush1.msra.mxu1 %v2155_v42  ;;  %1076 = vst.msk [vmem:[#allocation2 + $0xa8] sm:$0xff] %vm546_vm2, %v1060_v10  ;;  %v1061_v7 = vmax.f32 %v1045_v13, 0.0  ;;  %v1046_v22 = vadd.f32 %v10467_v37, %v1018_v45  ;;  %v1019_v61 = vadd.f32 %v988_v49, %v830_v27  ;;  %v2243_v57 = vld [vmem:[%s15626_s3 + $0x2d0] sm:$0xff]  ;;  %v2238_v27 = vld [vmem:[%s15626_s3 + $0x2a8] sm:$0xff]  ;;  %v2237_v16 = vld [vmem:[%s15626_s3 + $0x2a0] sm:$0xff] }
 0x126   :  { %2661 = vmatprep.subr.mxu0 %v2254_v41  ;;  %2774 = vmatprep.subr.mxu1 %v2256_v43  ;;  %v990_v62 = vpop.f32.mrf.mxu1  ;;  %v10619_v63 = vpop.f32.mrf.mxu0  ;;  %v2240_v41 = vld [vmem:[%s15626_s3 + $0x2b8] sm:$0xff]  ;;  %v2239_v26 = vld [vmem:[%s15626_s3 + $0x2b0] sm:$0xff]  ;;  %v2234_v49 = vld [vmem:[%s15626_s3 + $0x288] sm:$0xff] }
 0x127   :  { %2662 = vmatpush2.msra.mxu0 %v2253_v51  ;;  %2775 = vmatpush2.msra.mxu1 %v2255_v56  ;;  %1077 = vst [vmem:[#allocation2 + $0xb0] sm:$0xff] %v1061_v7  ;;  %v1062_v17 = vmax.f32 %v1046_v22, 0.0  ;;  %v1047_v20 = vadd.f32 %v10454_v53, %v1019_v61  ;;  %v1020_v21 = vadd.f32 %v990_v62, %v832_v8  ;;  %v2236_v8 = vld [vmem:[%s15626_s3 + $0x298] sm:$0xff] }
 0x128   :  { %2663 = vmatprep.subr.mxu0 %v2250_v14  ;;  %2776 = vmatprep.subr.mxu1 %v2252_v9  ;;  %v994_v34 = vpop.f32.mrf.mxu1  ;;  %v10636_v12 = vpop.f32.mrf.mxu0  ;;  %v844_v56 = vadd.f32 %v10549_v19, %v10410_v30  ;;  %v2233_v30 = vld [vmem:[%s15626_s3 + $0x280] sm:$0xff]  ;;  %v2235_v19 = vld [vmem:[%s15626_s3 + $0x290] sm:$0xff] }
 0x129   :  { %2664 = vmatpush2.msra.mxu0 %v2249_v52  ;;  %2777 = vmatpush2.msra.mxu1 %v2251_v25  ;;  %1078 = vst.msk [vmem:[#allocation2 + $0xb8] sm:$0xff] %vm546_vm2, %v1062_v17  ;;  %v1063_v58 = vmax.f32 %v1047_v20, 0.0  ;;  %v1048_v32 = vadd.f32 %v10467_v37, %v1020_v21  ;;  %v1021_v4 = vadd.f32 %v994_v34, %v836_v60  ;;  %v2258_v25 = vld [vmem:[#allocation2 + $0x88] sm:$0xff]  ;;  %v2232_v17 = vld [vmem:[%s15626_s3 + $0x278] sm:$0xff]  ;;  %v2229_v34 = vld [vmem:[%s15626_s3 + $0x260] sm:$0xff] }
 0x12a   :  { %2665 = vmatprep.subr.mxu0 %v2246_v38  ;;  %2778 = vmatprep.subr.mxu1 %v2248_v5  ;;  %v996_v31 = vpop.f32.mrf.mxu1  ;;  %v10654_v42 = vpop.f32.mrf.mxu0  ;;  %v848_v52 = vadd.f32 %v10566_v28, %v10424_v33  ;;  %v2230_v5 = vld [vmem:[%s15626_s3 + $0x268] sm:$0xff]  ;;  %v850_v28 = vadd.f32 %v10584_v11, %v10445_v24  ;;  %v2231_v24 = vld [vmem:[%s15626_s3 + $0x270] sm:$0xff] }
 0x12b   :  { %2666 = vmatpush2.msra.mxu0 %v2245_v6  ;;  %2779 = vmatpush2.msra.mxu1 %v2247_v18  ;;  %1079 = vst [vmem:[#allocation2 + $0xc0] sm:$0xff] %v1063_v58  ;;  %v1064_v43 = vmax.f32 %v1048_v32, 0.0  ;;  %v1049_v10 = vadd.f32 %v10454_v53, %v1021_v4  ;;  %v1022_v13 = vadd.f32 %v996_v31, %v838_v23  ;;  %v2228_v4 = vld [vmem:[%s15626_s3 + $0x258] sm:$0xff]  ;;  %v2138_v31 = vld [vmem:[#allocation2 + $0x8] sm:$0xff] }
 0x12c   :  { %2667 = vmatprep.subr.mxu0 %v2242_v50  ;;  %2780 = vmatprep.subr.mxu1 %v2244_v35  ;;  %v1000_v45 = vpop.f32.mrf.mxu1  ;;  %v10671_v51 = vpop.f32.mrf.mxu0  ;;  %v2226_v50 = vld [vmem:[%s15626_s3 + $0x248] sm:$0xff] }
 0x12d   :  { %2668 = vmatpush2.msra.mxu0 %v2241_v54  ;;  %2781 = vmatpush2.msra.mxu1 %v2243_v57  ;;  %1080 = vst.msk [vmem:[#allocation2 + $0xc8] sm:$0xff] %vm546_vm2, %v1064_v43  ;;  %v1065_v14 = vmax.f32 %v1049_v10, 0.0  ;;  %v1050_v9 = vadd.f32 %v10467_v37, %v1022_v13  ;;  %v1023_v7 = vadd.f32 %v1000_v45, %v842_v36  ;;  %v2227_v36 = vld [vmem:[%s15626_s3 + $0x250] sm:$0xff]  ;;  %v2224_v43 = vld [vmem:[%s15626_s3 + $0x238] sm:$0xff]  ;;  %v2218_v45 = vld [vmem:[%s15626_s3 + $0x208] sm:$0xff] }
 0x12e   :  { %2669 = vmatprep.subr.mxu0 %v2238_v27  ;;  %2782 = vmatprep.subr.mxu1 %v2240_v41  ;;  %v1002_v22 = vpop.f32.mrf.mxu1  ;;  %v10689_v61 = vpop.f32.mrf.mxu0  ;;  %v2222_v41 = vld [vmem:[%s15626_s3 + $0x228] sm:$0xff] }
 0x12f   :  { %2670 = vmatpush2.msra.mxu0 %v2237_v16  ;;  %2783 = vmatpush2.msra.mxu1 %v2239_v26  ;;  %1081 = vst [vmem:[#allocation2 + $0xd0] sm:$0xff] %v1065_v14  ;;  %v1066_v62 = vmax.f32 %v1050_v9, 0.0  ;;  %v1051_v60 = vadd.f32 %v10454_v53, %v1023_v7  ;;  %v1024_v38 = vadd.f32 %v1002_v22, %v844_v56  ;;  %v2223_v16 = vld [vmem:[%s15626_s3 + $0x230] sm:$0xff]  ;;  %v2220_v56 = vld [vmem:[%s15626_s3 + $0x218] sm:$0xff]  ;;  %v2217_v14 = vld [vmem:[%s15626_s3 + $0x200] sm:$0xff] }
 0x130   :  { %2671 = vmatprep.subr.mxu0 %v2234_v49  ;;  %2784 = vmatprep.subr.mxu1 %v2236_v8  ;;  %v1006_v20 = vpop.f32.mrf.mxu1  ;;  %v10700_v33 = vpop.f32.mrf.mxu0  ;;  %v2219_v9 = vld [vmem:[%s15626_s3 + $0x210] sm:$0xff]  ;;  %v7714_v22 = vld [vmem:[%s15626_s3 + $0x878] sm:$0xff] }
 0x131   :  { %2672 = vmatpush2.msra.mxu0 %v2233_v30  ;;  %2785 = vmatpush2.msra.mxu1 %v2235_v19  ;;  %1082 = vst.msk [vmem:[#allocation2 + $0xd8] sm:$0xff] %vm546_vm2, %v1066_v62  ;;  %v1067_v21 = vmax.f32 %v1051_v60, 0.0  ;;  %v1052_v6 = vadd.f32 %v10467_v37, %v1024_v38  ;;  %v1025_v18 = vadd.f32 %v1006_v20, %v848_v52  ;;  %v7712_v19 = vld [vmem:[%s15626_s3 + $0x868] sm:$0xff]  ;;  %v2137_v52 = vld [vmem:[#allocation2] sm:$0xff]  ;;  %v7713_v38 = vld [vmem:[%s15626_s3 + $0x870] sm:$0xff] }
 0x132   :  { %7626 = vmatprep.mubr.msk.f32.mxu0 %vm546_vm2, %v2258_v25  ;;  %7634 = vmatprep.mubr.msk.f32.mxu1 %vm546_vm2, %v2258_v25  ;;  %v1008_v11 = vpop.f32.mrf.mxu1  ;;  %v10714_v23 = vpop.f32.mrf.mxu0  ;;  %v7711_v60 = vld [vmem:[%s15626_s3 + $0x860] sm:$0xff] }
 0x133   :  { %2673 = vmatprep.subr.mxu0 %v2230_v5  ;;  %2786 = vmatprep.subr.mxu1 %v2232_v17  ;;  %1083 = vst [vmem:[#allocation2 + $0xe0] sm:$0xff] %v1067_v21  ;;  %v1068_v35 = vmax.f32 %v1052_v6, 0.0  ;;  %v1053_v58 = vadd.f32 %v10454_v53, %v1025_v18  ;;  %v1026_v32 = vadd.f32 %v1008_v11, %v850_v28  ;;  %v2225_v53 = vld [vmem:[%s15626_s3 + $0x240] sm:$0xff]  ;;  %v7708_v5 = vld [vmem:[%s15626_s3 + $0x848] sm:$0xff]  ;;  %v7710_v17 = vld [vmem:[%s15626_s3 + $0x858] sm:$0xff] }
 0x134   :  { %2495 = vmatmul.mubr.f32.gmra.mxu0 %v10504_v39  ;;  %2608 = vmatmul.mubr.f32.gmra.mxu1 %v10504_v39  ;;  %v10725_v54 = vpop.f32.mrf.mxu1  ;;  %v10727_v57 = vpop.f32.mrf.mxu0  ;;  %v7707_v21 = vld [vmem:[%s15626_s3 + $0x840] sm:$0xff]  ;;  %v7709_v6 = vld [vmem:[%s15626_s3 + $0x850] sm:$0xff]  ;;  %v7706_v11 = vld [vmem:[%s15626_s3 + $0x838] sm:$0xff] }
 0x135   :  { %2674 = vmatpush2.msra.mxu0 %v2229_v34  ;;  %2787 = vmatpush2.msra.mxu1 %v2231_v24  ;;  %1084 = vst.msk [vmem:[#allocation2 + $0xe8] sm:$0xff] %vm546_vm2, %v1068_v35  ;;  %v1069_v39 = vmax.f32 %v1053_v58, 0.0  ;;  %v1054_v27 = vadd.f32 %v10467_v37, %v1026_v32  ;;  %v2221_v37 = vld [vmem:[%s15626_s3 + $0x220] sm:$0xff] }
 0x136   :  { %2675 = vmatprep.subr.mxu0 %v2226_v50  ;;  %7635 = vmatprep.mubr.msk.f32.mxu0 %vm546_vm2, %v2138_v31  ;;  %v10744_v10 = vpop.f32.mrf.mxu1  ;;  %v10746_v13 = vpop.f32.mrf.mxu0  ;;  %v1552_v24 = vld [vmem:[%s15627_s2] sm:$0x3]  ;;  %v1331_v50 = vadd.f32 %v10725_v54, %v10601_v48 }
 0x137   :  { %2788 = vmatprep.subr.mxu1 %v2228_v4  ;;  %7643 = vmatprep.mubr.msk.f32.mxu1 %vm546_vm2, %v2138_v31  ;;  %1085 = vst [vmem:[#allocation2 + $0xf0] sm:$0xff] %v1069_v39  ;;  %v1070_v26 = vmax.f32 %v1054_v27, 0.0  ;;  %v7703_v32 = vld [vmem:[%s15626_s3 + $0x820] sm:$0xff]  ;;  %v7705_v4 = vld [vmem:[%s15626_s3 + $0x830] sm:$0xff]  ;;  %v1333_v48 = vadd.f32 %v10744_v10, %v10619_v63  ;;  %v10842_v54 = vrot.slane %v1552_v24, %v10052_v55  ;;  %v7702_v31 = vld [vmem:[%s15626_s3 + $0x818] sm:$0xff] }
 0x138   :  { %2676 = vmatpush2.msra.mxu0 %v2225_v53  ;;  %2789 = vmatpush2.msra.mxu1 %v2227_v36  ;;  %v10761_v49 = vpop.f32.mrf.mxu1  ;;  %v10763_v8 = vpop.f32.mrf.mxu0  ;;  %v7699_v63 = vld [vmem:[%s15626_s3 + $0x800] sm:$0xff]  ;;  %v7701_v39 = vld [vmem:[%s15626_s3 + $0x810] sm:$0xff] }
 0x139   :  { %2677 = vmatprep.subr.mxu0 %v2222_v41  ;;  %2790 = vmatprep.subr.mxu1 %v2224_v43  ;;  %1086 = vst.msk [vmem:[#allocation2 + $0xf8] sm:$0xff] %vm546_vm2, %v1070_v26  ;;  %v1337_v27 = vadd.f32 %v10761_v49, %v10636_v12  ;;  %v10865_v43 = vrot.slane %v1552_v24, %v10074_v1 }
 0x13a   :  { %2678 = vmatpush2.msra.mxu0 %v2221_v37  ;;  %2791 = vmatpush2.msra.mxu1 %v2223_v16  ;;  %v10772_v7 = vpop.f32.mrf.mxu1  ;;  %v10774_v30 = vpop.f32.mrf.mxu0  ;;  %v7696_v37 = vld [vmem:[%s15626_s3 + $0x7e8] sm:$0xff]  ;;  %v7698_v16 = vld [vmem:[%s15626_s3 + $0x7f8] sm:$0xff] }
 0x13b   :  { %2679 = vmatprep.subr.mxu0 %v2218_v45  ;;  %2792 = vmatprep.subr.mxu1 %v2220_v56  ;;  %v1339_v12 = vadd.f32 %v10772_v7, %v10654_v42 }
 0x13c   :  { %2680 = vmatpush2.msra.mxu0 %v2217_v14  ;;  %2793 = vmatpush2.msra.mxu1 %v2219_v9  ;;  %v10782_v25 = vpop.f32.mrf.mxu1  ;;  %v10784_v62 = vpop.f32.mrf.mxu0  ;;  %v9096_v14 = vld [vmem:[#allocation2 + $0x20] sm:$0xff] }
 0x13d   :  { %2682 = vmatmul.mubr.f32.vlgmr.msra.gmra.mxu0 %v2137_v52  ;;  %2795 = vmatmul.mubr.f32.vlgmr.msra.gmra.mxu1 %v2137_v52  ;;  %v7695_v9 = vld [vmem:[%s15626_s3 + $0x7e0] sm:$0xff]  ;;  %v1343_v42 = vadd.f32 %v10782_v25, %v10671_v51  ;;  %v7693_v25 = vld [vmem:[%s15626_s3 + $0x7d0] sm:$0xff] }
 0x13e   :  { %2988 = vmatprep.subr.mxu0 %v7712_v19  ;;  %3101 = vmatprep.subr.mxu1 %v7714_v22  ;;  %v10798_v20 = vpop.f32.mrf.mxu1  ;;  %v10800_v28 = vpop.f32.mrf.mxu0  ;;  %v7697_v19 = vld [vmem:[%s15626_s3 + $0x7f0] sm:$0xff]  ;;  %v7691_v51 = vld [vmem:[%s15626_s3 + $0x7c0] sm:$0xff] }
 0x13f   :  { %7636 = vmatprep.mubr.msk.f32.mxu0 %vm546_vm2, %v10216_v47  ;;  %7644 = vmatprep.mubr.msk.f32.mxu1 %vm546_vm2, %v10216_v47  ;;  %v7704_v47 = vld [vmem:[%s15626_s3 + $0x828] sm:$0xff] }
 0x140   :  { %2989 = vmatpush1.msra.mxu0 %v7711_v60  ;;  %3102 = vmatpush1.msra.mxu1 %v7713_v38  ;;  %v10812_v18 = vpop.f32.mrf.mxu1  ;;  %v10814_v34 = vpop.f32.mrf.mxu0  ;;  %v7692_v60 = vld [vmem:[%s15626_s3 + $0x7c8] sm:$0xff]  ;;  %v7694_v38 = vld [vmem:[%s15626_s3 + $0x7d8] sm:$0xff] }
 0x141   :  { %2990 = vmatprep.subr.mxu0 %v7708_v5  ;;  %3103 = vmatprep.subr.mxu1 %v7710_v17 }
 0x142   :  { %2991 = vmatpush1.msra.mxu0 %v7707_v21  ;;  %3104 = vmatpush1.msra.mxu1 %v7709_v6  ;;  %v10827_v35 = vpop.f32.mrf.mxu1  ;;  %v10829_v58 = vpop.f32.mrf.mxu0  ;;  %v1345_v21 = vadd.f32 %v10798_v20, %v10689_v61  ;;  %v7690_v61 = vld [vmem:[%s15626_s3 + $0x7b8] sm:$0xff]  ;;  %v1349_v20 = vadd.f32 %v10812_v18, %v10700_v33  ;;  %v7689_v33 = vld [vmem:[%s15626_s3 + $0x7b0] sm:$0xff] }
 0x143   :  { %2688 = vmatmul.mubr.f32.gmra.mxu0 %v10178_v44  ;;  %2801 = vmatmul.mubr.f32.gmra.mxu1 %v10178_v44  ;;  %v7700_v44 = vld [vmem:[%s15626_s3 + $0x808] sm:$0xff]  ;;  %v1351_v18 = vadd.f32 %v10827_v35, %v10714_v23  ;;  %v7683_v23 = vld [vmem:[%s15626_s3 + $0x780] sm:$0xff]  ;;  %v7685_v35 = vld [vmem:[%s15626_s3 + $0x790] sm:$0xff] }
 0x144   :  { %2992 = vmatprep.subr.mxu0 %v7704_v47  ;;  %3105 = vmatprep.subr.mxu1 %v7706_v11  ;;  %v10850_v53 = vpop.f32.mrf.mxu1  ;;  %v1489_v36 = vpop.f32.mrf.mxu0 }
 0x145   :  { %7637 = vmatprep.mubr.msk.f32.mxu0 %vm546_vm2, %v10256_v15  ;;  %7645 = vmatprep.mubr.msk.f32.mxu1 %vm546_vm2, %v10256_v15  ;;  %v1536_v41 = vadd.f32 %v1489_v36, %v1331_v50  ;;  %v7688_v50 = vld [vmem:[%s15626_s3 + $0x7a8] sm:$0xff]  ;;  %v9097_v36 = vld [vmem:[#allocation2 + $0x30] sm:$0xff] }
 0x146   :  { %2993 = vmatpush1.msra.mxu0 %v7703_v32  ;;  %3106 = vmatpush1.msra.mxu1 %v7705_v4  ;;  %v10867_v10 = vpop.f32.mrf.mxu1  ;;  %v1491_v15 = vpop.f32.mrf.mxu0 }
 0x147   :  { %2994 = vmatprep.subr.mxu0 %v7700_v44  ;;  %3107 = vmatprep.subr.mxu1 %v7702_v31  ;;  %v1564_v26 = vadd.f32 %v10842_v54, %v1536_v41  ;;  %v1537_v45 = vadd.f32 %v1491_v15, %v1333_v48  ;;  %v7684_v15 = vld [vmem:[%s15626_s3 + $0x788] sm:$0xff] }
 0x148   :  { %2995 = vmatpush1.msra.mxu0 %v7699_v63  ;;  %3108 = vmatpush1.msra.mxu1 %v7701_v39  ;;  %v10878_v56 = vpop.f32.mrf.mxu1  ;;  %v1495_v49 = vpop.f32.mrf.mxu0  ;;  %v7687_v63 = vld [vmem:[%s15626_s3 + $0x7a0] sm:$0xff] }
 0x149   :  { %2694 = vmatmul.mubr.f32.gmra.mxu0 %v9096_v14  ;;  %2807 = vmatmul.mubr.f32.gmra.mxu1 %v9096_v14  ;;  %v1580_v7 = vmax.f32 %v1564_v26, 0.0  ;;  %v1565_v22 = vadd.f32 %v10865_v43, %v1537_v45  ;;  %v1538_v52 = vadd.f32 %v1495_v49, %v1337_v27  ;;  %v1355_v26 = vadd.f32 %v10850_v53, %v10727_v57  ;;  %v7682_v57 = vld [vmem:[%s15626_s3 + $0x778] sm:$0xff] }
 0x14a   :  { %2996 = vmatprep.subr.mxu0 %v7696_v37  ;;  %3109 = vmatprep.subr.mxu1 %v7698_v16  ;;  %v10895_v5 = vpop.f32.mrf.mxu1  ;;  %v1497_v17 = vpop.f32.mrf.mxu0  ;;  %v7686_v37 = vld [vmem:[%s15626_s3 + $0x798] sm:$0xff]  ;;  %v1357_v53 = vadd.f32 %v10867_v10, %v10746_v13  ;;  %v7681_v13 = vld [vmem:[%s15626_s3 + $0x770] sm:$0xff]  ;;  %v1361_v10 = vadd.f32 %v10878_v56, %v10763_v8  ;;  %v7675_v8 = vld [vmem:[%s15626_s3 + $0x740] sm:$0xff] }
 0x14b   :  { %7638 = vmatprep.mubr.msk.f32.mxu0 %vm546_vm2, %v10308_v2  ;;  %7646 = vmatprep.mubr.msk.f32.mxu1 %vm546_vm2, %v10308_v2  ;;  %1596 = vst [vmem:[#allocation2 + $0x100] sm:$0xff] %v1580_v7  ;;  %v1581_v6 = vmax.f32 %v1565_v22, 0.0  ;;  %v1566_v24 = vadd.f32 %v10842_v54, %v1538_v52  ;;  %v1539_v47 = vadd.f32 %v1497_v17, %v1339_v12  ;;  %v7679_v17 = vld [vmem:[%s15626_s3 + $0x760] sm:$0xff]  ;;  %v7677_v56 = vld [vmem:[%s15626_s3 + $0x750] sm:$0xff] }
 0x14c   :  { %2997 = vmatpush1.msra.mxu0 %v7695_v9  ;;  %3110 = vmatpush1.msra.mxu1 %v7697_v19  ;;  %v10910_v11 = vpop.f32.mrf.mxu1  ;;  %v1501_v2 = vpop.f32.mrf.mxu0  ;;  %v7680_v19 = vld [vmem:[%s15626_s3 + $0x768] sm:$0xff] }
 0x14d   :  { %2998 = vmatprep.subr.mxu0 %v7692_v60  ;;  %3111 = vmatprep.subr.mxu1 %v7694_v38  ;;  %1597 = vst.msk [vmem:[#allocation2 + $0x108] sm:$0xff] %vm546_vm2, %v1581_v6  ;;  %v1582_v32 = vmax.f32 %v1566_v24, 0.0  ;;  %v1567_v4 = vadd.f32 %v10865_v43, %v1539_v47  ;;  %v1540_v48 = vadd.f32 %v1501_v2, %v1343_v42  ;;  %v9098_v38 = vld [vmem:[#allocation2 + $0x40] sm:$0xff]  ;;  %v7676_v6 = vld [vmem:[%s15626_s3 + $0x748] sm:$0xff]  ;;  %v7678_v24 = vld [vmem:[%s15626_s3 + $0x758] sm:$0xff] }
 0x14e   :  { %2999 = vmatpush1.msra.mxu0 %v7691_v51  ;;  %3112 = vmatpush1.msra.mxu1 %v7693_v25  ;;  %v10922_v44 = vpop.f32.mrf.mxu1  ;;  %v1503_v31 = vpop.f32.mrf.mxu0 }
 0x14f   :  { %2700 = vmatmul.mubr.f32.gmra.mxu0 %v9097_v36  ;;  %2813 = vmatmul.mubr.f32.gmra.mxu1 %v9097_v36  ;;  %1598 = vst [vmem:[#allocation2 + $0x110] sm:$0xff] %v1582_v32  ;;  %v1583_v39 = vmax.f32 %v1567_v4, 0.0  ;;  %v1568_v27 = vadd.f32 %v10842_v54, %v1540_v48  ;;  %v1541_v41 = vadd.f32 %v1503_v31, %v1345_v21  ;;  %v7672_v48 = vld [vmem:[%s15626_s3 + $0x728] sm:$0xff] }
 0x150   :  { %3000 = vmatprep.subr.mxu0 %v7688_v50  ;;  %3113 = vmatprep.subr.mxu1 %v7690_v61  ;;  %v10939_v16 = vpop.f32.mrf.mxu1  ;;  %v1507_v12 = vpop.f32.mrf.mxu0  ;;  %v1363_v50 = vadd.f32 %v10895_v5, %v10774_v30  ;;  %v7674_v30 = vld [vmem:[%s15626_s3 + $0x738] sm:$0xff]  ;;  %v1367_v5 = vadd.f32 %v10910_v11, %v10784_v62  ;;  %v7673_v62 = vld [vmem:[%s15626_s3 + $0x730] sm:$0xff]  ;;  %v1369_v11 = vadd.f32 %v10922_v44, %v10800_v28  ;;  %v7667_v28 = vld [vmem:[%s15626_s3 + $0x700] sm:$0xff] }
 0x151   :  { %7639 = vmatprep.mubr.msk.f32.mxu0 %vm546_vm2, %v10357_v0  ;;  %7647 = vmatprep.mubr.msk.f32.mxu1 %vm546_vm2, %v10357_v0  ;;  %1599 = vst.msk [vmem:[#allocation2 + $0x118] sm:$0xff] %vm546_vm2, %v1583_v39  ;;  %v1584_v45 = vmax.f32 %v1568_v27, 0.0  ;;  %v1569_v49 = vadd.f32 %v10865_v43, %v1541_v41  ;;  %v1542_v14 = vadd.f32 %v1507_v12, %v1349_v20  ;;  %v9099_v39 = vld [vmem:[#allocation2 + $0x50] sm:$0xff]  ;;  %v7671_v27 = vld [vmem:[%s15626_s3 + $0x720] sm:$0xff]  ;;  %v7668_v12 = vld [vmem:[%s15626_s3 + $0x708] sm:$0xff] }
 0x152   :  { %3001 = vmatpush1.msra.mxu0 %v7687_v63  ;;  %3114 = vmatpush1.msra.mxu1 %v7689_v33  ;;  %v10955_v0 = vpop.f32.mrf.mxu1  ;;  %v1509_v9 = vpop.f32.mrf.mxu0  ;;  %v7669_v44 = vld [vmem:[%s15626_s3 + $0x710] sm:$0xff] }
 0x153   :  { %3002 = vmatprep.subr.mxu0 %v7684_v15  ;;  %3115 = vmatprep.subr.mxu1 %v7686_v37  ;;  %1600 = vst [vmem:[#allocation2 + $0x120] sm:$0xff] %v1584_v45  ;;  %v1585_v42 = vmax.f32 %v1569_v49, 0.0  ;;  %v1570_v7 = vadd.f32 %v10842_v54, %v1542_v14  ;;  %v1543_v22 = vadd.f32 %v1509_v9, %v1351_v18 }
 0x154   :  { %3003 = vmatpush1.msra.mxu0 %v7683_v23  ;;  %3116 = vmatpush1.msra.mxu1 %v7685_v35  ;;  %v10966_v52 = vpop.f32.mrf.mxu1  ;;  %v1513_v60 = vpop.f32.mrf.mxu0  ;;  %v7670_v23 = vld [vmem:[%s15626_s3 + $0x718] sm:$0xff]  ;;  %v1373_v45 = vadd.f32 %v10939_v16, %v10814_v34  ;;  %v1375_v16 = vadd.f32 %v10955_v0, %v10829_v58  ;;  %v7665_v58 = vld [vmem:[%s15626_s3 + $0x6f0] sm:$0xff] }
 0x155   :  { %2706 = vmatmul.mubr.f32.gmra.mxu0 %v9098_v38  ;;  %2819 = vmatmul.mubr.f32.gmra.mxu1 %v9098_v38  ;;  %1601 = vst.msk [vmem:[#allocation2 + $0x128] sm:$0xff] %vm546_vm2, %v1585_v42  ;;  %v1586_v51 = vmax.f32 %v1570_v7, 0.0  ;;  %v1571_v25 = vadd.f32 %v10865_v43, %v1543_v22  ;;  %v1544_v21 = vadd.f32 %v1513_v60, %v1355_v26  ;;  %v7666_v34 = vld [vmem:[%s15626_s3 + $0x6f8] sm:$0xff]  ;;  %v9100_v38 = vld [vmem:[#allocation2 + $0x60] sm:$0xff] }
 0x156   :  { %3004 = vmatprep.subr.mxu0 %v7680_v19  ;;  %3117 = vmatprep.subr.mxu1 %v7682_v57  ;;  %v10984_v47 = vpop.f32.mrf.mxu1  ;;  %v1515_v2 = vpop.f32.mrf.mxu0  ;;  %v7664_v57 = vld [vmem:[%s15626_s3 + $0x6e8] sm:$0xff] }
 0x157   :  { %7640 = vmatprep.mubr.msk.f32.mxu0 %vm546_vm2, %v10402_v29  ;;  %7648 = vmatprep.mubr.msk.f32.mxu1 %vm546_vm2, %v10402_v29  ;;  %1602 = vst [vmem:[#allocation2 + $0x130] sm:$0xff] %v1586_v51  ;;  %v1587_v61 = vmax.f32 %v1571_v25, 0.0  ;;  %v1572_v20 = vadd.f32 %v10842_v54, %v1544_v21  ;;  %v1545_v32 = vadd.f32 %v1515_v2, %v1357_v53  ;;  %v7660_v51 = vld [vmem:[%s15626_s3 + $0x6c8] sm:$0xff]  ;;  %v7662_v25 = vld [vmem:[%s15626_s3 + $0x6d8] sm:$0xff]  ;;  %v7661_v2 = vld [vmem:[%s15626_s3 + $0x6d0] sm:$0xff] }
 0x158   :  { %3005 = vmatpush1.msra.mxu0 %v7679_v17  ;;  %3118 = vmatpush1.msra.mxu1 %v7681_v13  ;;  %v10999_v4 = vpop.f32.mrf.mxu1  ;;  %v1519_v29 = vpop.f32.mrf.mxu0  ;;  %v7663_v17 = vld [vmem:[%s15626_s3 + $0x6e0] sm:$0xff] }
 0x159   :  { %3006 = vmatprep.subr.mxu0 %v7676_v6  ;;  %3119 = vmatprep.subr.mxu1 %v7678_v24  ;;  %1603 = vst.msk [vmem:[#allocation2 + $0x138] sm:$0xff] %vm546_vm2, %v1587_v61  ;;  %v1588_v31 = vmax.f32 %v1572_v20, 0.0  ;;  %v1573_v36 = vadd.f32 %v10865_v43, %v1545_v32  ;;  %v1546_v63 = vadd.f32 %v1519_v29, %v1361_v10  ;;  %v7659_v24 = vld [vmem:[%s15626_s3 + $0x6c0] sm:$0xff]  ;;  %v7658_v32 = vld [vmem:[%s15626_s3 + $0x6b8] sm:$0xff] }
 0x15a   :  { %3007 = vmatpush1.msra.mxu0 %v7675_v8  ;;  %3120 = vmatpush1.msra.mxu1 %v7677_v56  ;;  %v11011_v33 = vpop.f32.mrf.mxu1  ;;  %v1521_v18 = vpop.f32.mrf.mxu0 }
 0x15b   :  { %2712 = vmatmul.mubr.f32.gmra.mxu0 %v9099_v39  ;;  %2825 = vmatmul.mubr.f32.gmra.mxu1 %v9099_v39  ;;  %1604 = vst [vmem:[#allocation2 + $0x140] sm:$0xff] %v1588_v31  ;;  %v1589_v41 = vmax.f32 %v1573_v36, 0.0  ;;  %v1574_v15 = vadd.f32 %v10842_v54, %v1546_v63  ;;  %v1547_v37 = vadd.f32 %v1521_v18, %v1363_v50  ;;  %v9101_v31 = vld [vmem:[#allocation2 + $0x70] sm:$0xff]  ;;  %v7652_v18 = vld [vmem:[%s15626_s3 + $0x688] sm:$0xff]  ;;  %v7654_v39 = vld [vmem:[%s15626_s3 + $0x698] sm:$0xff] }
 0x15c   :  { %3008 = vmatprep.subr.mxu0 %v7672_v48  ;;  %3121 = vmatprep.subr.mxu1 %v7674_v30  ;;  %v1745_v35 = vpop.f32.mrf.mxu1  ;;  %v1525_v26 = vpop.f32.mrf.mxu0  ;;  %v7655_v48 = vld [vmem:[%s15626_s3 + $0x6a0] sm:$0xff]  ;;  %v7657_v36 = vld [vmem:[%s15626_s3 + $0x6b0] sm:$0xff] }
 0x15d   :  { %7641 = vmatprep.mubr.msk.f32.mxu0 %vm546_vm2, %v10451_v46  ;;  %7649 = vmatprep.mubr.msk.f32.mxu1 %vm546_vm2, %v10451_v46  ;;  %1605 = vst.msk [vmem:[#allocation2 + $0x148] sm:$0xff] %vm546_vm2, %v1589_v41  ;;  %v1590_v49 = vmax.f32 %v1574_v15, 0.0  ;;  %v1575_v14 = vadd.f32 %v10865_v43, %v1547_v37  ;;  %v1548_v9 = vadd.f32 %v1525_v26, %v1367_v5  ;;  %v7653_v41 = vld [vmem:[%s15626_s3 + $0x690] sm:$0xff]  ;;  %v7752_v15 = vld [vmem:[%s15626_s3 + $0x9a8] sm:$0xff]  ;;  %v7754_v37 = vld [vmem:[%s15626_s3 + $0x9b8] sm:$0xff] }
 0x15e   :  { %3009 = vmatpush1.msra.mxu0 %v7671_v27  ;;  %3122 = vmatpush1.msra.mxu1 %v7673_v62  ;;  %v1747_v46 = vpop.f32.mrf.mxu1  ;;  %v1527_v19 = vpop.f32.mrf.mxu0  ;;  %v7751_v35 = vld [vmem:[%s15626_s3 + $0x9a0] sm:$0xff]  ;;  %v7753_v26 = vld [vmem:[%s15626_s3 + $0x9b0] sm:$0xff] }
 0x15f   :  { %3010 = vmatprep.subr.mxu0 %v7668_v12  ;;  %3123 = vmatprep.subr.mxu1 %v7670_v23  ;;  %1606 = vst [vmem:[#allocation2 + $0x150] sm:$0xff] %v1590_v49  ;;  %v1591_v53 = vmax.f32 %v1575_v14, 0.0  ;;  %v1576_v42 = vadd.f32 %v10842_v54, %v1548_v9  ;;  %v1549_v7 = vadd.f32 %v1527_v19, %v1369_v11  ;;  %v7651_v11 = vld [vmem:[%s15626_s3 + $0x680] sm:$0xff]  ;;  %v7749_v9 = vld [vmem:[%s15626_s3 + $0x990] sm:$0xff]  ;;  %v7744_v46 = vld [vmem:[%s15626_s3 + $0x968] sm:$0xff] }
 0x160   :  { %3011 = vmatpush1.msra.mxu0 %v7667_v28  ;;  %3124 = vmatpush1.msra.mxu1 %v7669_v44  ;;  %v1751_v22 = vpop.f32.mrf.mxu1  ;;  %v1531_v60 = vpop.f32.mrf.mxu0  ;;  %v7748_v28 = vld [vmem:[%s15626_s3 + $0x988] sm:$0xff]  ;;  %v7750_v44 = vld [vmem:[%s15626_s3 + $0x998] sm:$0xff]  ;;  %v7747_v14 = vld [vmem:[%s15626_s3 + $0x980] sm:$0xff] }
 0x161   :  { %2718 = vmatmul.mubr.f32.gmra.mxu0 %v9100_v38  ;;  %2831 = vmatmul.mubr.f32.gmra.mxu1 %v9100_v38  ;;  %1607 = vst.msk [vmem:[#allocation2 + $0x158] sm:$0xff] %vm546_vm2, %v1591_v53  ;;  %v1592_v0 = vmax.f32 %v1576_v42, 0.0  ;;  %v1577_v13 = vadd.f32 %v10865_v43, %v1549_v7  ;;  %v1550_v10 = vadd.f32 %v1531_v60, %v1373_v45  ;;  %v7746_v19 = vld [vmem:[%s15626_s3 + $0x978] sm:$0xff]  ;;  %v7745_v53 = vld [vmem:[%s15626_s3 + $0x970] sm:$0xff]  ;;  %v7740_v42 = vld [vmem:[%s15626_s3 + $0x948] sm:$0xff] }
 0x162   :  { %3012 = vmatprep.subr.mxu0 %v7664_v57  ;;  %3125 = vmatprep.subr.mxu1 %v7666_v34  ;;  %v1753_v21 = vpop.f32.mrf.mxu1  ;;  %v1533_v6 = vpop.f32.mrf.mxu0  ;;  %v7742_v7 = vld [vmem:[%s15626_s3 + $0x958] sm:$0xff]  ;;  %v2077_v38 = vld [vmem:[%s15627_s2] sm:$0x3] }
 0x163   :  { %7642 = vmatprep.mubr.msk.f32.mxu0 %vm546_vm2, %v10502_v59  ;;  %7650 = vmatprep.mubr.msk.f32.mxu1 %vm546_vm2, %v10502_v59  ;;  %1608 = vst [vmem:[#allocation2 + $0x160] sm:$0xff] %v1592_v0  ;;  %v1593_v8 = vmax.f32 %v1577_v13, 0.0  ;;  %v1578_v56 = vadd.f32 %v10842_v54, %v1550_v10  ;;  %v1551_v50 = vadd.f32 %v1533_v6, %v1375_v16  ;;  %v7656_v59 = vld [vmem:[%s15626_s3 + $0x6a8] sm:$0xff]  ;;  %v7743_v16 = vld [vmem:[%s15626_s3 + $0x960] sm:$0xff]  ;;  %v7738_v13 = vld [vmem:[%s15626_s3 + $0x938] sm:$0xff] }
 0x164   :  { %3013 = vmatpush1.msra.mxu0 %v7663_v17  ;;  %3126 = vmatpush1.msra.mxu1 %v7665_v58  ;;  %v1757_v61 = vpop.f32.mrf.mxu1  ;;  %v11076_v20 = vpop.f32.mrf.mxu0  ;;  %v7739_v17 = vld [vmem:[%s15626_s3 + $0x940] sm:$0xff]  ;;  %v7741_v58 = vld [vmem:[%s15626_s3 + $0x950] sm:$0xff]  ;;  %v7736_v0 = vld [vmem:[%s15626_s3 + $0x928] sm:$0xff] }
 0x165   :  { %3014 = vmatprep.subr.mxu0 %v7660_v51  ;;  %3127 = vmatprep.subr.mxu1 %v7662_v25  ;;  %1609 = vst.msk [vmem:[#allocation2 + $0x168] sm:$0xff] %vm546_vm2, %v1593_v8  ;;  %v1594_v29 = vmax.f32 %v1578_v56, 0.0  ;;  %v1579_v54 = vadd.f32 %v10865_v43, %v1551_v50  ;;  %v2844_v43 = vld [vmem:[#allocation2 + $0x28] sm:$0xff]  ;;  %v7735_v25 = vld [vmem:[%s15626_s3 + $0x920] sm:$0xff]  ;;  %v7737_v21 = vld [vmem:[%s15626_s3 + $0x930] sm:$0xff]  ;;  %v1856_v6 = vadd.f32 %v11076_v20, %v10966_v52 }
 0x166   :  { %3015 = vmatpush1.msra.mxu0 %v7659_v24  ;;  %3128 = vmatpush1.msra.mxu1 %v7661_v2  ;;  %v1759_v30 = vpop.f32.mrf.mxu1  ;;  %v11089_v5 = vpop.f32.mrf.mxu0  ;;  %v2082_v24 = vrot.slane %v2077_v38, %v10052_v55  ;;  %v7732_v2 = vld [vmem:[%s15626_s3 + $0x908] sm:$0xff]  ;;  %v7734_v8 = vld [vmem:[%s15626_s3 + $0x918] sm:$0xff]  ;;  %v7731_v52 = vld [vmem:[%s15626_s3 + $0x900] sm:$0xff] }
 0x167   :  { %2724 = vmatmul.mubr.f32.gmra.mxu0 %v9101_v31  ;;  %2837 = vmatmul.mubr.f32.gmra.mxu1 %v9101_v31  ;;  %1610 = vst [vmem:[#allocation2 + $0x170] sm:$0xff] %v1594_v29  ;;  %v1595_v63 = vmax.f32 %v1579_v54, 0.0  ;;  %v7733_v61 = vld [vmem:[%s15626_s3 + $0x910] sm:$0xff]  ;;  %v1858_v20 = vadd.f32 %v11089_v5, %v10984_v47  ;;  %v7728_v29 = vld [vmem:[%s15626_s3 + $0x8e8] sm:$0xff]  ;;  %v7730_v54 = vld [vmem:[%s15626_s3 + $0x8f8] sm:$0xff] }
 0x168   :  { %3016 = vmatprep.subr.mxu0 %v7656_v59  ;;  %3129 = vmatprep.subr.mxu1 %v7658_v32  ;;  %v1763_v27 = vpop.f32.mrf.mxu1  ;;  %v11100_v62 = vpop.f32.mrf.mxu0  ;;  %v2086_v32 = vrot.slane %v2077_v38, %v10074_v1  ;;  %v7727_v47 = vld [vmem:[%s15626_s3 + $0x8e0] sm:$0xff]  ;;  %v7729_v5 = vld [vmem:[%s15626_s3 + $0x8f0] sm:$0xff] }
 0x169   :  { %3017 = vmatpush1.msra.mxu0 %v7655_v48  ;;  %7755 = vmatprep.mubr.msk.f32.mxu0 %vm546_vm2, %v2844_v43  ;;  %1611 = vst.msk [vmem:[#allocation2 + $0x178] sm:$0xff] %vm546_vm2, %v1595_v63  ;;  %v1862_v31 = vadd.f32 %v11100_v62, %v10999_v4  ;;  %v7723_v27 = vld [vmem:[%s15626_s3 + $0x8c0] sm:$0xff]  ;;  %v7725_v4 = vld [vmem:[%s15626_s3 + $0x8d0] sm:$0xff] }
 0x16a   :  { %3130 = vmatpush1.msra.mxu1 %v7657_v36  ;;  %7763 = vmatprep.mubr.msk.f32.mxu1 %vm546_vm2, %v2844_v43  ;;  %v1765_v12 = vpop.f32.mrf.mxu1  ;;  %v11117_v23 = vpop.f32.mrf.mxu0  ;;  %v7724_v43 = vld [vmem:[%s15626_s3 + $0x8c8] sm:$0xff] }
 0x16b   :  { %3018 = vmatprep.subr.mxu0 %v7652_v18  ;;  %3131 = vmatprep.subr.mxu1 %v7654_v39  ;;  %v7726_v18 = vld [vmem:[%s15626_s3 + $0x8d8] sm:$0xff]  ;;  %v1864_v62 = vadd.f32 %v11117_v23, %v11011_v33  ;;  %v7719_v33 = vld [vmem:[%s15626_s3 + $0x8a0] sm:$0xff]  ;;  %v7721_v23 = vld [vmem:[%s15626_s3 + $0x8b0] sm:$0xff] }
 0x16c   :  { %3019 = vmatpush1.msra.mxu0 %v7651_v11  ;;  %3132 = vmatpush1.msra.mxu1 %v7653_v41  ;;  %v1769_v45 = vpop.f32.mrf.mxu1  ;;  %v1867_v49 = vpop.f32.mrf.mxu0  ;;  %v7722_v12 = vld [vmem:[%s15626_s3 + $0x8b8] sm:$0xff] }
 0x16d   :  { %3032 = vmatprep.subr.mxu0 %v7752_v15  ;;  %3145 = vmatprep.subr.mxu1 %v7754_v37  ;;  %v7720_v37 = vld [vmem:[%s15626_s3 + $0x8a8] sm:$0xff] }
 0x16e   :  { %3033 = vmatpush2.msra.mxu0 %v7751_v35  ;;  %3146 = vmatpush2.msra.mxu1 %v7753_v26  ;;  %v1771_v57 = vpop.f32.mrf.mxu1  ;;  %v1869_v34 = vpop.f32.mrf.mxu0  ;;  %v7716_v49 = vld [vmem:[%s15626_s3 + $0x888] sm:$0xff] }
 0x16f   :  { %3034 = vmatprep.subr.mxu0 %v7748_v28  ;;  %3147 = vmatprep.subr.mxu1 %v7750_v44 }
 0x170   :  { %3035 = vmatpush2.msra.mxu0 %v7747_v14  ;;  %3148 = vmatpush2.msra.mxu1 %v7749_v9  ;;  %v1775_v22 = vpop.f32.mrf.mxu1  ;;  %v1873_v60 = vpop.f32.mrf.mxu0  ;;  %v7718_v14 = vld [vmem:[%s15626_s3 + $0x898] sm:$0xff] }
 0x171   :  { %3036 = vmatprep.subr.mxu0 %v7744_v46  ;;  %3149 = vmatprep.subr.mxu1 %v7746_v19  ;;  %v7715_v46 = vld [vmem:[%s15626_s3 + $0x880] sm:$0xff]  ;;  %v7717_v19 = vld [vmem:[%s15626_s3 + $0x890] sm:$0xff] }
 0x172   :  { %3037 = vmatpush2.msra.mxu0 %v7743_v16  ;;  %3150 = vmatpush2.msra.mxu1 %v7745_v53  ;;  %v1777_v10 = vpop.f32.mrf.mxu1  ;;  %v1875_v51 = vpop.f32.mrf.mxu0  ;;  %v2843_v60 = vld [vmem:[#allocation2 + $0x20] sm:$0xff] }
 0x173   :  { %3038 = vmatprep.subr.mxu0 %v7740_v42  ;;  %3151 = vmatprep.subr.mxu1 %v7742_v7  ;;  %v7832_v42 = vld [vmem:[%s15626_s3 + $0x528] sm:$0xff]  ;;  %v7834_v7 = vld [vmem:[%s15626_s3 + $0x538] sm:$0xff] }
 0x174   :  { %3039 = vmatpush2.msra.mxu0 %v7739_v17  ;;  %3152 = vmatpush2.msra.mxu1 %v7741_v58  ;;  %v2014_v56 = vpop.f32.mrf.mxu1  ;;  %v1879_v50 = vpop.f32.mrf.mxu0  ;;  %v7831_v17 = vld [vmem:[%s15626_s3 + $0x520] sm:$0xff]  ;;  %v7833_v58 = vld [vmem:[%s15626_s3 + $0x530] sm:$0xff]  ;;  %v7830_v10 = vld [vmem:[%s15626_s3 + $0x518] sm:$0xff] }
 0x175   :  { %3040 = vmatprep.subr.mxu0 %v7736_v0  ;;  %3153 = vmatprep.subr.mxu1 %v7738_v13  ;;  %v2061_v59 = vadd.f32 %v2014_v56, %v1856_v6  ;;  %v2846_v0 = vld [vmem:[#allocation2 + $0x38] sm:$0xff]  ;;  %v7828_v13 = vld [vmem:[%s15626_s3 + $0x508] sm:$0xff]  ;;  %v7829_v6 = vld [vmem:[%s15626_s3 + $0x510] sm:$0xff] }
 0x176   :  { %3041 = vmatpush2.msra.mxu0 %v7735_v25  ;;  %3154 = vmatpush2.msra.mxu1 %v7737_v21  ;;  %v2016_v48 = vpop.f32.mrf.mxu1  ;;  %v1881_v30 = vpop.f32.mrf.mxu0  ;;  %v7827_v21 = vld [vmem:[%s15626_s3 + $0x500] sm:$0xff]  ;;  %v2845_v56 = vld [vmem:[#allocation2 + $0x30] sm:$0xff] }
 0x177   :  { %3042 = vmatprep.subr.mxu0 %v7732_v2  ;;  %3155 = vmatprep.subr.mxu1 %v7734_v8  ;;  %v2089_v36 = vadd.f32 %v2082_v24, %v2061_v59  ;;  %v2062_v63 = vadd.f32 %v2016_v48, %v1858_v20  ;;  %v7824_v2 = vld [vmem:[%s15626_s3 + $0x4e8] sm:$0xff]  ;;  %v7826_v8 = vld [vmem:[%s15626_s3 + $0x4f8] sm:$0xff]  ;;  %v7825_v20 = vld [vmem:[%s15626_s3 + $0x4f0] sm:$0xff] }
 0x178   :  { %3043 = vmatpush2.msra.mxu0 %v7731_v52  ;;  %3156 = vmatpush2.msra.mxu1 %v7733_v61  ;;  %v2020_v39 = vpop.f32.mrf.mxu1  ;;  %v1885_v35 = vpop.f32.mrf.mxu0  ;;  %v7823_v61 = vld [vmem:[%s15626_s3 + $0x4e0] sm:$0xff]  ;;  %v2848_v59 = vld [vmem:[#allocation2 + $0x48] sm:$0xff]  ;;  %v7821_v30 = vld [vmem:[%s15626_s3 + $0x4d0] sm:$0xff] }
 0x179   :  { %3044 = vmatprep.subr.mxu0 %v7728_v29  ;;  %3157 = vmatprep.subr.mxu1 %v7730_v54  ;;  %v2105_v11 = vmax.f32 %v2089_v36, 0.0  ;;  %v2090_v41 = vadd.f32 %v2086_v32, %v2062_v63  ;;  %v2063_v15 = vadd.f32 %v2020_v39, %v1862_v31  ;;  %v7822_v29 = vld [vmem:[%s15626_s3 + $0x4d8] sm:$0xff]  ;;  %v7819_v48 = vld [vmem:[%s15626_s3 + $0x4c0] sm:$0xff]  ;;  %v7816_v31 = vld [vmem:[%s15626_s3 + $0x4a8] sm:$0xff] }
 0x17a   :  { %3045 = vmatpush2.msra.mxu0 %v7727_v47  ;;  %3158 = vmatpush2.msra.mxu1 %v7729_v5  ;;  %v2022_v26 = vpop.f32.mrf.mxu1  ;;  %v1887_v16 = vpop.f32.mrf.mxu0  ;;  %v7818_v36 = vld [vmem:[%s15626_s3 + $0x4b8] sm:$0xff]  ;;  %v2847_v63 = vld [vmem:[#allocation2 + $0x40] sm:$0xff]  ;;  %v7817_v39 = vld [vmem:[%s15626_s3 + $0x4b0] sm:$0xff] }
 0x17b   :  { %3046 = vmatprep.subr.mxu0 %v7724_v43  ;;  %3159 = vmatprep.subr.mxu1 %v7726_v18  ;;  %2121 = vst [vmem:[#allocation2 + $0x180] sm:$0xff] %v2105_v11  ;;  %v2106_v28 = vmax.f32 %v2090_v41, 0.0  ;;  %v2091_v44 = vadd.f32 %v2082_v24, %v2063_v15  ;;  %v2064_v45 = vadd.f32 %v2022_v26, %v1864_v62  ;;  %v7815_v18 = vld [vmem:[%s15626_s3 + $0x4a0] sm:$0xff]  ;;  %v7814_v62 = vld [vmem:[%s15626_s3 + $0x498] sm:$0xff]  ;;  %v7808_v35 = vld [vmem:[%s15626_s3 + $0x468] sm:$0xff] }
 0x17c   :  { %3047 = vmatpush2.msra.mxu0 %v7723_v27  ;;  %3160 = vmatpush2.msra.mxu1 %v7725_v4  ;;  %v2026_v9 = vpop.f32.mrf.mxu1  ;;  %v1891_v51 = vpop.f32.mrf.mxu0  ;;  %v2850_v27 = vld [vmem:[#allocation2 + $0x58] sm:$0xff]  ;;  %v7812_v4 = vld [vmem:[%s15626_s3 + $0x488] sm:$0xff]  ;;  %v7811_v15 = vld [vmem:[%s15626_s3 + $0x480] sm:$0xff] }
 0x17d   :  { %3048 = vmatprep.subr.mxu0 %v7720_v37  ;;  %3161 = vmatprep.subr.mxu1 %v7722_v12  ;;  %2122 = vst.msk [vmem:[#allocation2 + $0x188] sm:$0xff] %vm546_vm2, %v2106_v28  ;;  %v2107_v57 = vmax.f32 %v2091_v44, 0.0  ;;  %v2092_v34 = vadd.f32 %v2086_v32, %v2064_v45  ;;  %v7820_v32 = vld [vmem:[%s15626_s3 + $0x4c8] sm:$0xff]  ;;  %v7813_v37 = vld [vmem:[%s15626_s3 + $0x490] sm:$0xff]  ;;  %v7810_v26 = vld [vmem:[%s15626_s3 + $0x478] sm:$0xff] }
 0x17e   :  { %3049 = vmatpush2.msra.mxu0 %v7719_v33  ;;  %3162 = vmatpush2.msra.mxu1 %v7721_v23  ;;  %v2028_v53 = vpop.f32.mrf.mxu1  ;;  %v1893_v50 = vpop.f32.mrf.mxu0  ;;  %v2849_v33 = vld [vmem:[#allocation2 + $0x50] sm:$0xff]  ;;  %v7807_v28 = vld [vmem:[%s15626_s3 + $0x460] sm:$0xff]  ;;  %v2852_v45 = vld [vmem:[#allocation2 + $0x68] sm:$0xff] }
 0x17f   :  { %3050 = vmatprep.subr.mxu0 %v7716_v49  ;;  %3163 = vmatprep.subr.mxu1 %v7718_v14  ;;  %2123 = vst [vmem:[#allocation2 + $0x190] sm:$0xff] %v2107_v57  ;;  %v2108_v22 = vmax.f32 %v2092_v34, 0.0  ;;  %v7809_v44 = vld [vmem:[%s15626_s3 + $0x470] sm:$0xff]  ;;  %v7804_v49 = vld [vmem:[%s15626_s3 + $0x448] sm:$0xff]  ;;  %v7806_v14 = vld [vmem:[%s15626_s3 + $0x458] sm:$0xff] }
 0x180   :  { %3051 = vmatpush2.msra.mxu0 %v7715_v46  ;;  %3164 = vmatpush2.msra.mxu1 %v7717_v19  ;;  %v2032_v38 = vpop.f32.mrf.mxu1  ;;  %v1897_v47 = vpop.f32.mrf.mxu0  ;;  %v7803_v9 = vld [vmem:[%s15626_s3 + $0x440] sm:$0xff]  ;;  %v7805_v46 = vld [vmem:[%s15626_s3 + $0x450] sm:$0xff]  ;;  %v7800_v19 = vld [vmem:[%s15626_s3 + $0x428] sm:$0xff] }
 0x181   :  { %3053 = vmatmul.mubr.f32.vlgmr.msra.gmra.mxu0 %v2843_v60  ;;  %3166 = vmatmul.mubr.f32.vlgmr.msra.gmra.mxu1 %v2843_v60  ;;  %2124 = vst.msk [vmem:[#allocation2 + $0x198] sm:$0xff] %vm546_vm2, %v2108_v22  ;;  %v7802_v57 = vld [vmem:[%s15626_s3 + $0x438] sm:$0xff]  ;;  %v2851_v34 = vld [vmem:[#allocation2 + $0x60] sm:$0xff]  ;;  %v7801_v53 = vld [vmem:[%s15626_s3 + $0x430] sm:$0xff] }
 0x182   :  { %3614 = vmatprep.subr.mxu0 %v7832_v42  ;;  %3727 = vmatprep.subr.mxu1 %v7834_v7  ;;  %v2034_v25 = vpop.f32.mrf.mxu1  ;;  %v1899_v11 = vpop.f32.mrf.mxu0  ;;  %v7799_v16 = vld [vmem:[%s15626_s3 + $0x420] sm:$0xff]  ;;  %v2854_v42 = vld [vmem:[#allocation2 + $0x78] sm:$0xff]  ;;  %v7796_v7 = vld [vmem:[%s15626_s3 + $0x408] sm:$0xff] }
 0x183   :  { %7756 = vmatprep.mubr.msk.f32.mxu0 %vm546_vm2, %v2846_v0  ;;  %7764 = vmatprep.mubr.msk.f32.mxu1 %vm546_vm2, %v2846_v0  ;;  %v7798_v22 = vld [vmem:[%s15626_s3 + $0x418] sm:$0xff]  ;;  %v7795_v60 = vld [vmem:[%s15626_s3 + $0x400] sm:$0xff]  ;;  %v7797_v38 = vld [vmem:[%s15626_s3 + $0x410] sm:$0xff] }
 0x184   :  { %3615 = vmatpush1.msra.mxu0 %v7831_v17  ;;  %3728 = vmatpush1.msra.mxu1 %v7833_v58  ;;  %v2038_v24 = vpop.f32.mrf.mxu1  ;;  %v7792_v17 = vld [vmem:[%s15626_s3 + $0x3e8] sm:$0xff]  ;;  %v7794_v58 = vld [vmem:[%s15626_s3 + $0x3f8] sm:$0xff]  ;;  %v2853_v0 = vld [vmem:[#allocation2 + $0x70] sm:$0xff] }
 0x185   :  { %3616 = vmatprep.subr.mxu0 %v7828_v13  ;;  %3729 = vmatprep.subr.mxu1 %v7830_v10  ;;  %v7791_v13 = vld [vmem:[%s15626_s3 + $0x3e0] sm:$0xff]  ;;  %v7793_v10 = vld [vmem:[%s15626_s3 + $0x3f0] sm:$0xff]  ;;  %v11390_v51 = vld [vmem:[#allocation2 + $0x88] sm:$0xff] }
 0x186   :  { %3617 = vmatpush1.msra.mxu0 %v7827_v21  ;;  %3730 = vmatpush1.msra.mxu1 %v7829_v6  ;;  %v2040_v52 = vpop.f32.mrf.mxu1  ;;  %v7788_v25 = vld [vmem:[%s15626_s3 + $0x3c8] sm:$0xff]  ;;  %v7790_v21 = vld [vmem:[%s15626_s3 + $0x3d8] sm:$0xff]  ;;  %v7787_v6 = vld [vmem:[%s15626_s3 + $0x3c0] sm:$0xff] }
 0x187   :  { %3059 = vmatmul.mubr.f32.gmra.mxu0 %v2845_v56  ;;  %3172 = vmatmul.mubr.f32.gmra.mxu1 %v2845_v56  ;;  %v7789_v24 = vld [vmem:[%s15626_s3 + $0x3d0] sm:$0xff]  ;;  %v11414_v56 = vld [vmem:[#allocation2 + $0x80] sm:$0xff]  ;;  %v7870_v11 = vld [vmem:[%s15626_s3 + $0x658] sm:$0xff] }
 0x188   :  { %3618 = vmatprep.subr.mxu0 %v7824_v2  ;;  %3731 = vmatprep.subr.mxu1 %v7826_v8  ;;  %v2044_v54 = vpop.f32.mrf.mxu1  ;;  %v7784_v2 = vld [vmem:[%s15626_s3 + $0x3a8] sm:$0xff]  ;;  %v7786_v8 = vld [vmem:[%s15626_s3 + $0x3b8] sm:$0xff]  ;;  %v7783_v50 = vld [vmem:[%s15626_s3 + $0x3a0] sm:$0xff] }
 0x189   :  { %7757 = vmatprep.mubr.msk.f32.mxu0 %vm546_vm2, %v2848_v59  ;;  %7765 = vmatprep.mubr.msk.f32.mxu1 %vm546_vm2, %v2848_v59  ;;  %v7785_v52 = vld [vmem:[%s15626_s3 + $0x3b0] sm:$0xff]  ;;  %v7782_v59 = vld [vmem:[%s15626_s3 + $0x398] sm:$0xff]  ;;  %v7776_v54 = vld [vmem:[%s15626_s3 + $0x368] sm:$0xff] }
 0x18a   :  { %3619 = vmatpush1.msra.mxu0 %v7823_v61  ;;  %3732 = vmatpush1.msra.mxu1 %v7825_v20  ;;  %v2046_v5 = vpop.f32.mrf.mxu1  ;;  %v11424_v61 = vld [vmem:[#allocation2 + $0x98] sm:$0xff]  ;;  %v7780_v20 = vld [vmem:[%s15626_s3 + $0x388] sm:$0xff]  ;;  %v7775_v47 = vld [vmem:[%s15626_s3 + $0x360] sm:$0xff] }
 0x18b   :  { %3620 = vmatprep.subr.mxu0 %v7820_v32  ;;  %3733 = vmatprep.subr.mxu1 %v7822_v29  ;;  %v7779_v32 = vld [vmem:[%s15626_s3 + $0x380] sm:$0xff]  ;;  %v7781_v29 = vld [vmem:[%s15626_s3 + $0x390] sm:$0xff] }
 0x18c   :  { %3621 = vmatpush1.msra.mxu0 %v7819_v48  ;;  %3734 = vmatpush1.msra.mxu1 %v7821_v30  ;;  %v2050_v43 = vpop.f32.mrf.mxu1  ;;  %v7778_v48 = vld [vmem:[%s15626_s3 + $0x378] sm:$0xff]  ;;  %v11448_v30 = vld [vmem:[#allocation2 + $0x90] sm:$0xff] }
 0x18d   :  { %3065 = vmatmul.mubr.f32.gmra.mxu0 %v2847_v63  ;;  %3178 = vmatmul.mubr.f32.gmra.mxu1 %v2847_v63  ;;  %v7777_v5 = vld [vmem:[%s15626_s3 + $0x370] sm:$0xff]  ;;  %v7771_v63 = vld [vmem:[%s15626_s3 + $0x340] sm:$0xff] }
 0x18e   :  { %3622 = vmatprep.subr.mxu0 %v7816_v31  ;;  %3735 = vmatprep.subr.mxu1 %v7818_v36  ;;  %v2052_v41 = vpop.f32.mrf.mxu1  ;;  %v7772_v31 = vld [vmem:[%s15626_s3 + $0x348] sm:$0xff]  ;;  %v7774_v36 = vld [vmem:[%s15626_s3 + $0x358] sm:$0xff]  ;;  %v7773_v43 = vld [vmem:[%s15626_s3 + $0x350] sm:$0xff] }
 0x18f   :  { %7758 = vmatprep.mubr.msk.f32.mxu0 %vm546_vm2, %v2850_v27  ;;  %7766 = vmatprep.mubr.msk.f32.mxu1 %vm546_vm2, %v2850_v27  ;;  %v7871_v27 = vld [vmem:[%s15626_s3 + $0x660] sm:$0xff] }
 0x190   :  { %3623 = vmatpush1.msra.mxu0 %v7815_v18  ;;  %3736 = vmatpush1.msra.mxu1 %v7817_v39  ;;  %v2056_v12 = vpop.f32.mrf.mxu1  ;;  %v7872_v18 = vld [vmem:[%s15626_s3 + $0x668] sm:$0xff]  ;;  %v7874_v39 = vld [vmem:[%s15626_s3 + $0x678] sm:$0xff]  ;;  %v7867_v41 = vld [vmem:[%s15626_s3 + $0x640] sm:$0xff] }
 0x191   :  { %3624 = vmatprep.subr.mxu0 %v7812_v4  ;;  %3737 = vmatprep.subr.mxu1 %v7814_v62  ;;  %v7873_v4 = vld [vmem:[%s15626_s3 + $0x670] sm:$0xff]  ;;  %v7868_v62 = vld [vmem:[%s15626_s3 + $0x648] sm:$0xff]  ;;  %v7866_v12 = vld [vmem:[%s15626_s3 + $0x638] sm:$0xff] }
 0x192   :  { %3625 = vmatpush1.msra.mxu0 %v7811_v15  ;;  %3738 = vmatpush1.msra.mxu1 %v7813_v37  ;;  %v2058_v23 = vpop.f32.mrf.mxu1  ;;  %v7869_v15 = vld [vmem:[%s15626_s3 + $0x650] sm:$0xff]  ;;  %v7864_v37 = vld [vmem:[%s15626_s3 + $0x628] sm:$0xff] }
 0x193   :  { %3071 = vmatmul.mubr.f32.gmra.mxu0 %v2849_v33  ;;  %3184 = vmatmul.mubr.f32.gmra.mxu1 %v2849_v33  ;;  %v7860_v33 = vld [vmem:[%s15626_s3 + $0x608] sm:$0xff]  ;;  %v7862_v23 = vld [vmem:[%s15626_s3 + $0x618] sm:$0xff] }
 0x194   :  { %3626 = vmatprep.subr.mxu0 %v7808_v35  ;;  %3739 = vmatprep.subr.mxu1 %v7810_v26  ;;  %v7863_v35 = vld [vmem:[%s15626_s3 + $0x620] sm:$0xff]  ;;  %v7865_v26 = vld [vmem:[%s15626_s3 + $0x630] sm:$0xff] }
 0x195   :  { %7759 = vmatprep.mubr.msk.f32.mxu0 %vm546_vm2, %v2852_v45  ;;  %7767 = vmatprep.mubr.msk.f32.mxu1 %vm546_vm2, %v2852_v45  ;;  %v7856_v45 = vld [vmem:[%s15626_s3 + $0x5e8] sm:$0xff] }
 0x196   :  { %3627 = vmatpush1.msra.mxu0 %v7807_v28  ;;  %3740 = vmatpush1.msra.mxu1 %v7809_v44  ;;  %v7859_v28 = vld [vmem:[%s15626_s3 + $0x600] sm:$0xff]  ;;  %v7861_v44 = vld [vmem:[%s15626_s3 + $0x610] sm:$0xff] }
 0x197   :  { %3628 = vmatprep.subr.mxu0 %v7804_v49  ;;  %3741 = vmatprep.subr.mxu1 %v7806_v14  ;;  %v7858_v49 = vld [vmem:[%s15626_s3 + $0x5f8] sm:$0xff]  ;;  %v7855_v14 = vld [vmem:[%s15626_s3 + $0x5e0] sm:$0xff] }
 0x198   :  { %3629 = vmatpush1.msra.mxu0 %v7803_v9  ;;  %3742 = vmatpush1.msra.mxu1 %v7805_v46  ;;  %v7857_v9 = vld [vmem:[%s15626_s3 + $0x5f0] sm:$0xff]  ;;  %v7852_v46 = vld [vmem:[%s15626_s3 + $0x5c8] sm:$0xff] }
 0x199   :  { %3077 = vmatmul.mubr.f32.gmra.mxu0 %v2851_v34  ;;  %3190 = vmatmul.mubr.f32.gmra.mxu1 %v2851_v34  ;;  %v7853_v34 = vld [vmem:[%s15626_s3 + $0x5d0] sm:$0xff] }
 0x19a   :  { %3630 = vmatprep.subr.mxu0 %v7800_v19  ;;  %3743 = vmatprep.subr.mxu1 %v7802_v57  ;;  %v7854_v19 = vld [vmem:[%s15626_s3 + $0x5d8] sm:$0xff]  ;;  %v7851_v57 = vld [vmem:[%s15626_s3 + $0x5c0] sm:$0xff] }
 0x19b   :  { %7760 = vmatprep.mubr.msk.f32.mxu0 %vm546_vm2, %v2854_v42  ;;  %7768 = vmatprep.mubr.msk.f32.mxu1 %vm546_vm2, %v2854_v42  ;;  %v7847_v42 = vld [vmem:[%s15626_s3 + $0x5a0] sm:$0xff] }
 0x19c   :  { %3631 = vmatpush1.msra.mxu0 %v7799_v16  ;;  %3744 = vmatpush1.msra.mxu1 %v7801_v53  ;;  %v7848_v16 = vld [vmem:[%s15626_s3 + $0x5a8] sm:$0xff]  ;;  %v7850_v53 = vld [vmem:[%s15626_s3 + $0x5b8] sm:$0xff] }
 0x19d   :  { %3632 = vmatprep.subr.mxu0 %v7796_v7  ;;  %3745 = vmatprep.subr.mxu1 %v7798_v22  ;;  %v7849_v7 = vld [vmem:[%s15626_s3 + $0x5b0] sm:$0xff]  ;;  %v7844_v22 = vld [vmem:[%s15626_s3 + $0x588] sm:$0xff] }
 0x19e   :  { %3633 = vmatpush1.msra.mxu0 %v7795_v60  ;;  %3746 = vmatpush1.msra.mxu1 %v7797_v38  ;;  %v7846_v60 = vld [vmem:[%s15626_s3 + $0x598] sm:$0xff]  ;;  %v7843_v38 = vld [vmem:[%s15626_s3 + $0x580] sm:$0xff] }
 0x19f   :  { %3083 = vmatmul.mubr.f32.gmra.mxu0 %v2853_v0  ;;  %3196 = vmatmul.mubr.f32.gmra.mxu1 %v2853_v0  ;;  %v7842_v0 = vld [vmem:[%s15626_s3 + $0x578] sm:$0xff] }
 0x1a0   :  { %3634 = vmatprep.subr.mxu0 %v7792_v17  ;;  %3747 = vmatprep.subr.mxu1 %v7794_v58  ;;  %v7845_v17 = vld [vmem:[%s15626_s3 + $0x590] sm:$0xff]  ;;  %v7840_v58 = vld [vmem:[%s15626_s3 + $0x568] sm:$0xff] }
 0x1a1   :  { %7761 = vmatprep.mubr.msk.f32.mxu0 %vm546_vm2, %v11390_v51  ;;  %7769 = vmatprep.mubr.msk.f32.mxu1 %vm546_vm2, %v11390_v51 }
 0x1a2   :  { %3635 = vmatpush1.msra.mxu0 %v7791_v13  ;;  %3748 = vmatpush1.msra.mxu1 %v7793_v10  ;;  %v7839_v13 = vld [vmem:[%s15626_s3 + $0x560] sm:$0xff]  ;;  %v7841_v10 = vld [vmem:[%s15626_s3 + $0x570] sm:$0xff] }
 0x1a3   :  { %3636 = vmatprep.subr.mxu0 %v7788_v25  ;;  %3749 = vmatprep.subr.mxu1 %v7790_v21  ;;  %v7836_v25 = vld [vmem:[%s15626_s3 + $0x548] sm:$0xff]  ;;  %v7838_v21 = vld [vmem:[%s15626_s3 + $0x558] sm:$0xff] }
 0x1a4   :  { %3637 = vmatpush1.msra.mxu0 %v7787_v6  ;;  %3750 = vmatpush1.msra.mxu1 %v7789_v24  ;;  %v7835_v6 = vld [vmem:[%s15626_s3 + $0x540] sm:$0xff]  ;;  %v7837_v24 = vld [vmem:[%s15626_s3 + $0x550] sm:$0xff] }
 0x1a5   :  { %3089 = vmatmul.mubr.f32.gmra.mxu0 %v11414_v56  ;;  %3202 = vmatmul.mubr.f32.gmra.mxu1 %v11414_v56 }
 0x1a6   :  { %3638 = vmatprep.subr.mxu0 %v7784_v2  ;;  %3751 = vmatprep.subr.mxu1 %v7786_v8 }
 0x1a7   :  { %7762 = vmatprep.mubr.msk.f32.mxu0 %vm546_vm2, %v11424_v61  ;;  %7770 = vmatprep.mubr.msk.f32.mxu1 %vm546_vm2, %v11424_v61 }
 0x1a8   :  { %3639 = vmatpush1.msra.mxu0 %v7783_v50  ;;  %3752 = vmatpush1.msra.mxu1 %v7785_v52  ;;  %v3441_v50 = vld [vmem:[%s15626_s3 + $0x1e8] sm:$0xff]  ;;  %v3443_v52 = vld [vmem:[%s15626_s3 + $0x1f8] sm:$0xff] }
 0x1a9   :  { %3640 = vmatprep.subr.mxu0 %v7780_v20  ;;  %3753 = vmatprep.subr.mxu1 %v7782_v59  ;;  %v3440_v20 = vld [vmem:[%s15626_s3 + $0x1e0] sm:$0xff]  ;;  %v3442_v59 = vld [vmem:[%s15626_s3 + $0x1f0] sm:$0xff] }
 0x1aa   :  { %3641 = vmatpush1.msra.mxu0 %v7779_v32  ;;  %3754 = vmatpush1.msra.mxu1 %v7781_v29 }
 0x1ab   :  { %3095 = vmatmul.mubr.f32.gmra.mxu0 %v11448_v30  ;;  %3208 = vmatmul.mubr.f32.gmra.mxu1 %v11448_v30 }
 0x1ac   :  { %3642 = vmatprep.subr.mxu0 %v7776_v54  ;;  %3755 = vmatprep.subr.mxu1 %v7778_v48  ;;  %v11616_v54 = vld [vmem:[#allocation2 + $0xa8] sm:$0xff] }
 0x1ad   :  { %3643 = vmatpush1.msra.mxu0 %v7775_v47  ;;  %7875 = vmatprep.mubr.msk.f32.mxu0 %vm546_vm2, %v11424_v61  ;;  %v3437_v48 = vld [vmem:[%s15626_s3 + $0x1c8] sm:$0xff]  ;;  %v3439_v47 = vld [vmem:[%s15626_s3 + $0x1d8] sm:$0xff] }
 0x1ae   :  { %3756 = vmatpush1.msra.mxu1 %v7777_v5  ;;  %7883 = vmatprep.mubr.msk.f32.mxu1 %vm546_vm2, %v11424_v61  ;;  %v3436_v5 = vld [vmem:[%s15626_s3 + $0x1c0] sm:$0xff] }
 0x1af   :  { %3644 = vmatprep.subr.mxu0 %v7772_v31  ;;  %3757 = vmatprep.subr.mxu1 %v7774_v36  ;;  %v3438_v31 = vld [vmem:[%s15626_s3 + $0x1d0] sm:$0xff]  ;;  %v3433_v36 = vld [vmem:[%s15626_s3 + $0x1a8] sm:$0xff] }
 0x1b0   :  { %3645 = vmatpush1.msra.mxu0 %v7771_v63  ;;  %3758 = vmatpush1.msra.mxu1 %v7773_v43  ;;  %v3435_v63 = vld [vmem:[%s15626_s3 + $0x1b8] sm:$0xff] }
 0x1b1   :  { %3658 = vmatprep.subr.mxu0 %v7872_v18  ;;  %3771 = vmatprep.subr.mxu1 %v7874_v39  ;;  %v11644_v39 = vld [vmem:[#allocation2 + $0xa0] sm:$0xff] }
 0x1b2   :  { %3659 = vmatpush2.msra.mxu0 %v7871_v27  ;;  %3772 = vmatpush2.msra.mxu1 %v7873_v4  ;;  %v3432_v27 = vld [vmem:[%s15626_s3 + $0x1a0] sm:$0xff]  ;;  %v3434_v4 = vld [vmem:[%s15626_s3 + $0x1b0] sm:$0xff] }
 0x1b3   :  { %3660 = vmatprep.subr.mxu0 %v7868_v62  ;;  %3773 = vmatprep.subr.mxu1 %v7870_v11  ;;  %v11654_v62 = vld [vmem:[#allocation2 + $0xb8] sm:$0xff]  ;;  %v3429_v11 = vld [vmem:[%s15626_s3 + $0x188] sm:$0xff] }
 0x1b4   :  { %3661 = vmatpush2.msra.mxu0 %v7867_v41  ;;  %3774 = vmatpush2.msra.mxu1 %v7869_v15  ;;  %v3431_v41 = vld [vmem:[%s15626_s3 + $0x198] sm:$0xff]  ;;  %v3428_v15 = vld [vmem:[%s15626_s3 + $0x180] sm:$0xff] }
 0x1b5   :  { %3662 = vmatprep.subr.mxu0 %v7864_v37  ;;  %3775 = vmatprep.subr.mxu1 %v7866_v12  ;;  %v3430_v37 = vld [vmem:[%s15626_s3 + $0x190] sm:$0xff] }
 0x1b6   :  { %3663 = vmatpush2.msra.mxu0 %v7863_v35  ;;  %3776 = vmatpush2.msra.mxu1 %v7865_v26  ;;  %v3425_v26 = vld [vmem:[%s15626_s3 + $0x168] sm:$0xff] }
 0x1b7   :  { %3664 = vmatprep.subr.mxu0 %v7860_v33  ;;  %3777 = vmatprep.subr.mxu1 %v7862_v23  ;;  %v3427_v33 = vld [vmem:[%s15626_s3 + $0x178] sm:$0xff]  ;;  %v11682_v23 = vld [vmem:[#allocation2 + $0xb0] sm:$0xff] }
 0x1b8   :  { %3665 = vmatpush2.msra.mxu0 %v7859_v28  ;;  %3778 = vmatpush2.msra.mxu1 %v7861_v44  ;;  %v3424_v28 = vld [vmem:[%s15626_s3 + $0x160] sm:$0xff]  ;;  %v3426_v44 = vld [vmem:[%s15626_s3 + $0x170] sm:$0xff] }
 0x1b9   :  { %3666 = vmatprep.subr.mxu0 %v7856_v45  ;;  %3779 = vmatprep.subr.mxu1 %v7858_v49 }
 0x1ba   :  { %3667 = vmatpush2.msra.mxu0 %v7855_v14  ;;  %3780 = vmatpush2.msra.mxu1 %v7857_v9  ;;  %v11594_v2 = vpop.f32.mrf.mxu0  ;;  %v11596_v8 = vpop.f32.mrf.mxu1  ;;  %v11696_v14 = vld [vmem:[#allocation2 + $0xc8] sm:$0xff] }
 0x1bb   :  { %3668 = vmatprep.subr.mxu0 %v7852_v46  ;;  %3781 = vmatprep.subr.mxu1 %v7854_v19  ;;  %v3421_v9 = vld [vmem:[%s15626_s3 + $0x148] sm:$0xff]  ;;  %v3423_v46 = vld [vmem:[%s15626_s3 + $0x158] sm:$0xff]  ;;  %v3420_v19 = vld [vmem:[%s15626_s3 + $0x140] sm:$0xff] }
 0x1bc   :  { %3669 = vmatpush2.msra.mxu0 %v7851_v57  ;;  %3782 = vmatpush2.msra.mxu1 %v7853_v34  ;;  %v11612_v32 = vpop.f32.mrf.mxu0  ;;  %v11614_v29 = vpop.f32.mrf.mxu1  ;;  %v3422_v57 = vld [vmem:[%s15626_s3 + $0x150] sm:$0xff]  ;;  %v3417_v34 = vld [vmem:[%s15626_s3 + $0x128] sm:$0xff] }
 0x1bd   :  { %3670 = vmatprep.subr.mxu0 %v7848_v16  ;;  %3783 = vmatprep.subr.mxu1 %v7850_v53  ;;  %v3419_v16 = vld [vmem:[%s15626_s3 + $0x138] sm:$0xff] }
 0x1be   :  { %3671 = vmatpush2.msra.mxu0 %v7847_v42  ;;  %3784 = vmatpush2.msra.mxu1 %v7849_v7  ;;  %v11724_v7 = vld [vmem:[#allocation2 + $0xc0] sm:$0xff] }
 0x1bf   :  { %3672 = vmatprep.subr.mxu0 %v7844_v22  ;;  %3785 = vmatprep.subr.mxu1 %v7846_v60  ;;  %v3416_v22 = vld [vmem:[%s15626_s3 + $0x120] sm:$0xff]  ;;  %v3418_v60 = vld [vmem:[%s15626_s3 + $0x130] sm:$0xff] }
 0x1c0   :  { %3673 = vmatpush2.msra.mxu0 %v7843_v38  ;;  %3786 = vmatpush2.msra.mxu1 %v7845_v17  ;;  %v11640_v43 = vpop.f32.mrf.mxu0  ;;  %v11642_v18 = vpop.f32.mrf.mxu1  ;;  %v11734_v38 = vld [vmem:[#allocation2 + $0xd8] sm:$0xff]  ;;  %v3413_v17 = vld [vmem:[%s15626_s3 + $0x108] sm:$0xff] }
 0x1c1   :  { %3674 = vmatprep.subr.mxu0 %v7840_v58  ;;  %3787 = vmatprep.subr.mxu1 %v7842_v0  ;;  %v3415_v58 = vld [vmem:[%s15626_s3 + $0x118] sm:$0xff]  ;;  %v3412_v0 = vld [vmem:[%s15626_s3 + $0x100] sm:$0xff] }
 0x1c2   :  { %3675 = vmatpush2.msra.mxu0 %v7839_v13  ;;  %3788 = vmatpush2.msra.mxu1 %v7841_v10  ;;  %v11672_v12 = vpop.f32.mrf.mxu0  ;;  %v11674_v35 = vpop.f32.mrf.mxu1  ;;  %v3414_v13 = vld [vmem:[%s15626_s3 + $0x110] sm:$0xff] }
 0x1c3   :  { %3676 = vmatprep.subr.mxu0 %v7836_v25  ;;  %3789 = vmatprep.subr.mxu1 %v7838_v21  ;;  %v3409_v21 = vld [vmem:[%s15626_s3 + $0xe8] sm:$0xff] }
 0x1c4   :  { %3677 = vmatpush2.msra.mxu0 %v7835_v6  ;;  %3790 = vmatpush2.msra.mxu1 %v7837_v24  ;;  %v3411_v6 = vld [vmem:[%s15626_s3 + $0xf8] sm:$0xff]  ;;  %v11762_v24 = vld [vmem:[#allocation2 + $0xd0] sm:$0xff] }
 0x1c5   :  { %3679 = vmatmul.mubr.f32.vlgmr.msra.gmra.mxu0 %v11448_v30  ;;  %3792 = vmatmul.mubr.f32.vlgmr.msra.gmra.mxu1 %v11448_v30 }
 0x1c6   :  { %3843 = vmatprep.subr.mxu0 %v3441_v50  ;;  %3956 = vmatprep.subr.mxu1 %v3443_v52  ;;  %v11692_v45 = vpop.f32.mrf.mxu0  ;;  %v11694_v49 = vpop.f32.mrf.mxu1  ;;  %v3408_v50 = vld [vmem:[%s15626_s3 + $0xe0] sm:$0xff]  ;;  %v3410_v52 = vld [vmem:[%s15626_s3 + $0xf0] sm:$0xff] }
 0x1c7   :  { %7876 = vmatprep.mubr.msk.f32.mxu0 %vm546_vm2, %v11616_v54  ;;  %7884 = vmatprep.mubr.msk.f32.mxu1 %vm546_vm2, %v11616_v54 }
 0x1c8   :  { %3844 = vmatpush1.msra.mxu0 %v3440_v20  ;;  %3957 = vmatpush1.msra.mxu1 %v3442_v59  ;;  %v11720_v53 = vpop.f32.mrf.mxu0  ;;  %v11722_v42 = vpop.f32.mrf.mxu1 }
 0x1c9   :  { %3845 = vmatprep.subr.mxu0 %v3437_v48  ;;  %3958 = vmatprep.subr.mxu1 %v3439_v47  ;;  %v11776_v48 = vld [vmem:[#allocation2 + $0xe8] sm:$0xff] }
 0x1ca   :  { %3846 = vmatpush1.msra.mxu0 %v3436_v5  ;;  %3959 = vmatpush1.msra.mxu1 %v3438_v31  ;;  %v3405_v47 = vld [vmem:[%s15626_s3 + $0xc8] sm:$0xff]  ;;  %v3407_v5 = vld [vmem:[%s15626_s3 + $0xd8] sm:$0xff]  ;;  %v3404_v31 = vld [vmem:[%s15626_s3 + $0xc0] sm:$0xff] }
 0x1cb   :  { %3685 = vmatmul.mubr.f32.gmra.mxu0 %v11644_v39  ;;  %3798 = vmatmul.mubr.f32.gmra.mxu1 %v11644_v39 }
 0x1cc   :  { %3847 = vmatprep.subr.mxu0 %v3433_v36  ;;  %3960 = vmatprep.subr.mxu1 %v3435_v63  ;;  %v11752_v10 = vpop.f32.mrf.mxu0  ;;  %v11754_v25 = vpop.f32.mrf.mxu1  ;;  %v3406_v36 = vld [vmem:[%s15626_s3 + $0xd0] sm:$0xff]  ;;  %v3401_v63 = vld [vmem:[%s15626_s3 + $0xa8] sm:$0xff] }
 0x1cd   :  { %7877 = vmatprep.mubr.msk.f32.mxu0 %vm546_vm2, %v11654_v62  ;;  %7885 = vmatprep.mubr.msk.f32.mxu1 %vm546_vm2, %v11654_v62 }
 0x1ce   :  { %3848 = vmatpush1.msra.mxu0 %v3432_v27  ;;  %3961 = vmatpush1.msra.mxu1 %v3434_v4  ;;  %v11772_v20 = vpop.f32.mrf.mxu0  ;;  %v11774_v59 = vpop.f32.mrf.mxu1  ;;  %v3403_v27 = vld [vmem:[%s15626_s3 + $0xb8] sm:$0xff] }
 0x1cf   :  { %3849 = vmatprep.subr.mxu0 %v3429_v11  ;;  %3962 = vmatprep.subr.mxu1 %v3431_v41  ;;  %v11804_v41 = vld [vmem:[#allocation2 + $0xe0] sm:$0xff] }
 0x1d0   :  { %3850 = vmatpush1.msra.mxu0 %v3428_v15  ;;  %3963 = vmatpush1.msra.mxu1 %v3430_v37  ;;  %v3400_v15 = vld [vmem:[%s15626_s3 + $0xa0] sm:$0xff]  ;;  %v3402_v37 = vld [vmem:[%s15626_s3 + $0xb0] sm:$0xff] }
 0x1d1   :  { %3691 = vmatmul.mubr.f32.gmra.mxu0 %v11682_v23  ;;  %3804 = vmatmul.mubr.f32.gmra.mxu1 %v11682_v23 }
 0x1d2   :  { %3851 = vmatprep.subr.mxu0 %v3425_v26  ;;  %3964 = vmatprep.subr.mxu1 %v3427_v33  ;;  %v11800_v4 = vpop.f32.mrf.mxu0  ;;  %v11802_v11 = vpop.f32.mrf.mxu1  ;;  %v11814_v26 = vld [vmem:[#allocation2 + $0xf8] sm:$0xff]  ;;  %v3397_v33 = vld [vmem:[%s15626_s3 + $0x88] sm:$0xff] }
 0x1d3   :  { %7878 = vmatprep.mubr.msk.f32.mxu0 %vm546_vm2, %v11696_v14  ;;  %7886 = vmatprep.mubr.msk.f32.mxu1 %vm546_vm2, %v11696_v14 }
 0x1d4   :  { %3852 = vmatpush1.msra.mxu0 %v3424_v28  ;;  %3965 = vmatpush1.msra.mxu1 %v3426_v44  ;;  %v3399_v28 = vld [vmem:[%s15626_s3 + $0x98] sm:$0xff]  ;;  %v3396_v44 = vld [vmem:[%s15626_s3 + $0x80] sm:$0xff] }
 0x1d5   :  { %3853 = vmatprep.subr.mxu0 %v3421_v9  ;;  %3966 = vmatprep.subr.mxu1 %v3423_v46  ;;  %v3398_v9 = vld [vmem:[%s15626_s3 + $0x90] sm:$0xff]  ;;  %v11832_v46 = vpop.f32.mrf.mxu0 }
 0x1d6   :  { %3854 = vmatpush1.msra.mxu0 %v3420_v19  ;;  %3967 = vmatpush1.msra.mxu1 %v3422_v57  ;;  %15645 = vst [vmem:[#allocation4_spill] sm:$0xff] %v11832_v46  ;;  %v11834_v19 = vpop.f32.mrf.mxu1  ;;  %v3393_v57 = vld [vmem:[%s15626_s3 + $0x68] sm:$0xff] }
 0x1d7   :  { %3697 = vmatmul.mubr.f32.gmra.mxu0 %v11724_v7  ;;  %3810 = vmatmul.mubr.f32.gmra.mxu1 %v11724_v7  ;;  %15646 = vst [vmem:[#allocation5_spill] sm:$0xff] %v11834_v19  ;;  %v7954_v19 = vld [vmem:[%s15626_s3 + $0x7f8] sm:$0xff] }
 0x1d8   :  { %3855 = vmatprep.subr.mxu0 %v3417_v34  ;;  %3968 = vmatprep.subr.mxu1 %v3419_v16  ;;  %v3395_v34 = vld [vmem:[%s15626_s3 + $0x78] sm:$0xff]  ;;  %v11842_v16 = vld [vmem:[#allocation2 + $0xf0] sm:$0xff] }
 0x1d9   :  { %7879 = vmatprep.mubr.msk.f32.mxu0 %vm546_vm2, %v11734_v38  ;;  %7887 = vmatprep.mubr.msk.f32.mxu1 %vm546_vm2, %v11734_v38 }
 0x1da   :  { %3856 = vmatpush1.msra.mxu0 %v3416_v22  ;;  %3969 = vmatpush1.msra.mxu1 %v3418_v60  ;;  %v3392_v22 = vld [vmem:[%s15626_s3 + $0x60] sm:$0xff]  ;;  %v3394_v60 = vld [vmem:[%s15626_s3 + $0x70] sm:$0xff] }
 0x1db   :  { %3857 = vmatprep.subr.mxu0 %v3413_v17  ;;  %3970 = vmatprep.subr.mxu1 %v3415_v58  ;;  %v11852_v17 = vpop.f32.mrf.mxu0  ;;  %v11854_v58 = vpop.f32.mrf.mxu1 }
 0x1dc   :  { %3858 = vmatpush1.msra.mxu0 %v3412_v0  ;;  %3971 = vmatpush1.msra.mxu1 %v3414_v13  ;;  %v3485_v0 = vld [vmem:[#allocation2 + $0x108] sm:$0xff] }
 0x1dd   :  { %3703 = vmatmul.mubr.f32.gmra.mxu0 %v11762_v24  ;;  %3816 = vmatmul.mubr.f32.gmra.mxu1 %v11762_v24  ;;  %v3389_v13 = vld [vmem:[%s15626_s3 + $0x48] sm:$0xff] }
 0x1de   :  { %3859 = vmatprep.subr.mxu0 %v3409_v21  ;;  %3972 = vmatprep.subr.mxu1 %v3411_v6  ;;  %v3391_v21 = vld [vmem:[%s15626_s3 + $0x58] sm:$0xff]  ;;  %v3388_v6 = vld [vmem:[%s15626_s3 + $0x40] sm:$0xff] }
 0x1df   :  { %7880 = vmatprep.mubr.msk.f32.mxu0 %vm546_vm2, %v11776_v48  ;;  %7888 = vmatprep.mubr.msk.f32.mxu1 %vm546_vm2, %v11776_v48 }
 0x1e0   :  { %3860 = vmatpush1.msra.mxu0 %v3408_v50  ;;  %3973 = vmatpush1.msra.mxu1 %v3410_v52  ;;  %v3390_v50 = vld [vmem:[%s15626_s3 + $0x50] sm:$0xff]  ;;  %v3385_v52 = vld [vmem:[%s15626_s3 + $0x28] sm:$0xff] }
 0x1e1   :  { %3861 = vmatprep.subr.mxu0 %v3405_v47  ;;  %3974 = vmatprep.subr.mxu1 %v3407_v5  ;;  %v3387_v47 = vld [vmem:[%s15626_s3 + $0x38] sm:$0xff]  ;;  %v11876_v5 = vpop.f32.mrf.mxu0 }
 0x1e2   :  { %3862 = vmatpush1.msra.mxu0 %v3404_v31  ;;  %3975 = vmatpush1.msra.mxu1 %v3406_v36  ;;  %15647 = vst [vmem:[#allocation6_spill] sm:$0xff] %v11876_v5  ;;  %v11878_v31 = vpop.f32.mrf.mxu1  ;;  %v3484_v36 = vld [vmem:[#allocation2 + $0x100] sm:$0xff]  ;;  %v7952_v5 = vld [vmem:[%s15626_s3 + $0x7e8] sm:$0xff] }
 0x1e3   :  { %3709 = vmatmul.mubr.f32.gmra.mxu0 %v11804_v41  ;;  %3822 = vmatmul.mubr.f32.gmra.mxu1 %v11804_v41  ;;  %15648 = vst [vmem:[#allocation7_spill] sm:$0xff] %v11878_v31 }
 0x1e4   :  { %3863 = vmatprep.subr.mxu0 %v3401_v63  ;;  %3976 = vmatprep.subr.mxu1 %v3403_v27  ;;  %v3384_v63 = vld [vmem:[%s15626_s3 + $0x20] sm:$0xff]  ;;  %v3386_v27 = vld [vmem:[%s15626_s3 + $0x30] sm:$0xff] }
 0x1e5   :  { %7881 = vmatprep.mubr.msk.f32.mxu0 %vm546_vm2, %v11814_v26  ;;  %7889 = vmatprep.mubr.msk.f32.mxu1 %vm546_vm2, %v11814_v26 }
 0x1e6   :  { %3864 = vmatpush1.msra.mxu0 %v3400_v15  ;;  %3977 = vmatpush1.msra.mxu1 %v3402_v37  ;;  %v3381_v15 = vld [vmem:[%s15626_s3 + $0x8] sm:$0xff]  ;;  %v3383_v37 = vld [vmem:[%s15626_s3 + $0x18] sm:$0xff] }
 0x1e7   :  { %3865 = vmatprep.subr.mxu0 %v3397_v33  ;;  %3978 = vmatprep.subr.mxu1 %v3399_v28  ;;  %v3380_v33 = vld [vmem:[%s15626_s3] sm:$0xff]  ;;  %v3382_v28 = vld [vmem:[%s15626_s3 + $0x10] sm:$0xff] }
 0x1e8   :  { %3866 = vmatpush1.msra.mxu0 %v3396_v44  ;;  %3979 = vmatpush1.msra.mxu1 %v3398_v9  ;;  %v11900_v44 = vpop.f32.mrf.mxu0  ;;  %v11902_v9 = vpop.f32.mrf.mxu1 }
 0x1e9   :  { %3715 = vmatmul.mubr.f32.gmra.mxu0 %v11842_v16  ;;  %3828 = vmatmul.mubr.f32.gmra.mxu1 %v11842_v16 }
 0x1ea   :  { %3867 = vmatprep.subr.mxu0 %v3393_v57  ;;  %3980 = vmatprep.subr.mxu1 %v3395_v34  ;;  %v3481_v57 = vld [vmem:[%s15626_s3 + $0x328] sm:$0xff]  ;;  %v3483_v34 = vld [vmem:[%s15626_s3 + $0x338] sm:$0xff] }
 0x1eb   :  { %7882 = vmatprep.mubr.msk.f32.mxu0 %vm546_vm2, %v3485_v0  ;;  %7890 = vmatprep.mubr.msk.f32.mxu1 %vm546_vm2, %v3485_v0  ;;  %v3479_v0 = vld [vmem:[%s15626_s3 + $0x318] sm:$0xff] }
 0x1ec   :  { %3868 = vmatpush1.msra.mxu0 %v3392_v22  ;;  %3981 = vmatpush1.msra.mxu1 %v3394_v60  ;;  %v3480_v22 = vld [vmem:[%s15626_s3 + $0x320] sm:$0xff]  ;;  %v3482_v60 = vld [vmem:[%s15626_s3 + $0x330] sm:$0xff] }
 0x1ed   :  { %3869 = vmatprep.subr.mxu0 %v3389_v13  ;;  %3982 = vmatprep.subr.mxu1 %v3391_v21  ;;  %v3476_v13 = vld [vmem:[%s15626_s3 + $0x300] sm:$0xff]  ;;  %v3478_v21 = vld [vmem:[%s15626_s3 + $0x310] sm:$0xff] }
 0x1ee   :  { %3870 = vmatpush1.msra.mxu0 %v3388_v6  ;;  %3983 = vmatpush1.msra.mxu1 %v3390_v50  ;;  %v11930_v6 = vpop.f32.mrf.mxu0  ;;  %v11932_v50 = vpop.f32.mrf.mxu1 }
 0x1ef   :  { %3721 = vmatmul.mubr.f32.gmra.mxu0 %v3484_v36  ;;  %3834 = vmatmul.mubr.f32.gmra.mxu1 %v3484_v36  ;;  %15649 = vst [vmem:[#allocation8_spill] sm:$0xff] %v11930_v6  ;;  %15650 = vst [vmem:[#allocation9_spill] sm:$0xff] %v11932_v50  ;;  %v3472_v36 = vld [vmem:[%s15626_s3 + $0x2e0] sm:$0xff]  ;;  %v7962_v6 = vld [vmem:[%s15626_s3 + $0x838] sm:$0xff] }
 0x1f0   :  { %3871 = vmatprep.subr.mxu0 %v3385_v52  ;;  %3984 = vmatprep.subr.mxu1 %v3387_v47  ;;  %v3473_v52 = vld [vmem:[%s15626_s3 + $0x2e8] sm:$0xff]  ;;  %v3475_v47 = vld [vmem:[%s15626_s3 + $0x2f8] sm:$0xff] }
 0x1f1   :  { %3872 = vmatpush1.msra.mxu0 %v3384_v63  ;;  %7891 = vmatprep.mubr.msk.f32.mxu0 %vm546_vm2, %v11390_v51  ;;  %v3474_v63 = vld [vmem:[%s15626_s3 + $0x2f0] sm:$0xff] }
 0x1f2   :  { %3985 = vmatpush1.msra.mxu1 %v3386_v27  ;;  %7899 = vmatprep.mubr.msk.f32.mxu1 %vm546_vm2, %v11390_v51  ;;  %v3477_v51 = vld [vmem:[%s15626_s3 + $0x308] sm:$0xff] }
 0x1f3   :  { %3873 = vmatprep.subr.mxu0 %v3381_v15  ;;  %3986 = vmatprep.subr.mxu1 %v3383_v37  ;;  %v3469_v37 = vld [vmem:[%s15626_s3 + $0x2c8] sm:$0xff] }
 0x1f4   :  { %3874 = vmatpush1.msra.mxu0 %v3380_v33  ;;  %3987 = vmatpush1.msra.mxu1 %v3382_v28  ;;  %v11946_v27 = vpop.f32.mrf.mxu0  ;;  %v11948_v15 = vpop.f32.mrf.mxu1  ;;  %v3471_v33 = vld [vmem:[%s15626_s3 + $0x2d8] sm:$0xff]  ;;  %v3468_v28 = vld [vmem:[%s15626_s3 + $0x2c0] sm:$0xff] }
 0x1f5   :  { %3887 = vmatprep.subr.mxu0 %v3481_v57  ;;  %4000 = vmatprep.subr.mxu1 %v3483_v34  ;;  %v3470_v57 = vld [vmem:[%s15626_s3 + $0x2d0] sm:$0xff]  ;;  %v3465_v34 = vld [vmem:[%s15626_s3 + $0x2a8] sm:$0xff] }
 0x1f6   :  { %3888 = vmatpush2.msra.mxu0 %v3480_v22  ;;  %4001 = vmatpush2.msra.mxu1 %v3482_v60  ;;  %v3467_v22 = vld [vmem:[%s15626_s3 + $0x2b8] sm:$0xff]  ;;  %v3464_v60 = vld [vmem:[%s15626_s3 + $0x2a0] sm:$0xff] }
 0x1f7   :  { %3889 = vmatprep.subr.mxu0 %v3477_v51  ;;  %4002 = vmatprep.subr.mxu1 %v3479_v0  ;;  %v3466_v51 = vld [vmem:[%s15626_s3 + $0x2b0] sm:$0xff]  ;;  %v11974_v0 = vpop.f32.mrf.mxu0 }
 0x1f8   :  { %3890 = vmatpush2.msra.mxu0 %v3476_v13  ;;  %4003 = vmatpush2.msra.mxu1 %v3478_v21  ;;  %15651 = vst [vmem:[#allocation10_spill] sm:$0xff] %v11974_v0  ;;  %v11976_v13 = vpop.f32.mrf.mxu1  ;;  %v3461_v21 = vld [vmem:[%s15626_s3 + $0x288] sm:$0xff]  ;;  %v3446_v0 = vld [vmem:[%s15626_s3 + $0x210] sm:$0xff] }
 0x1f9   :  { %3891 = vmatprep.subr.mxu0 %v3473_v52  ;;  %4004 = vmatprep.subr.mxu1 %v3475_v47  ;;  %15652 = vst [vmem:[#allocation11_spill] sm:$0xff] %v11976_v13  ;;  %v3463_v52 = vld [vmem:[%s15626_s3 + $0x298] sm:$0xff]  ;;  %v3460_v47 = vld [vmem:[%s15626_s3 + $0x280] sm:$0xff]  ;;  %v3445_v13 = vld [vmem:[%s15626_s3 + $0x208] sm:$0xff] }
 0x1fa   :  { %3892 = vmatpush2.msra.mxu0 %v3472_v36  ;;  %4005 = vmatpush2.msra.mxu1 %v3474_v63  ;;  %v3462_v36 = vld [vmem:[%s15626_s3 + $0x290] sm:$0xff] }
 0x1fb   :  { %3893 = vmatprep.subr.mxu0 %v3469_v37  ;;  %4006 = vmatprep.subr.mxu1 %v3471_v33  ;;  %v3457_v33 = vld [vmem:[%s15626_s3 + $0x268] sm:$0xff] }
 0x1fc   :  { %3894 = vmatpush2.msra.mxu0 %v3468_v28  ;;  %4007 = vmatpush2.msra.mxu1 %v3470_v57  ;;  %v3459_v28 = vld [vmem:[%s15626_s3 + $0x278] sm:$0xff]  ;;  %v3456_v57 = vld [vmem:[%s15626_s3 + $0x260] sm:$0xff] }
 0x1fd   :  { %3895 = vmatprep.subr.mxu0 %v3465_v34  ;;  %4008 = vmatprep.subr.mxu1 %v3467_v22  ;;  %v11990_v63 = vpop.f32.mrf.mxu0  ;;  %v11992_v37 = vpop.f32.mrf.mxu1  ;;  %v3458_v34 = vld [vmem:[%s15626_s3 + $0x270] sm:$0xff] }
 0x1fe   :  { %3896 = vmatpush2.msra.mxu0 %v3464_v60  ;;  %4009 = vmatpush2.msra.mxu1 %v3466_v51  ;;  %v3453_v51 = vld [vmem:[%s15626_s3 + $0x248] sm:$0xff] }
 0x1ff   :  { %3897 = vmatprep.subr.mxu0 %v3461_v21  ;;  %4010 = vmatprep.subr.mxu1 %v3463_v52  ;;  %v12006_v22 = vpop.f32.mrf.mxu0  ;;  %v12008_v60 = vpop.f32.mrf.mxu1  ;;  %v3455_v21 = vld [vmem:[%s15626_s3 + $0x258] sm:$0xff]  ;;  %v3452_v52 = vld [vmem:[%s15626_s3 + $0x240] sm:$0xff] }
 0x200   :  { %3898 = vmatpush2.msra.mxu0 %v3460_v47  ;;  %4011 = vmatpush2.msra.mxu1 %v3462_v36  ;;  %v3449_v47 = vld [vmem:[%s15626_s3 + $0x228] sm:$0xff]  ;;  %v3451_v36 = vld [vmem:[%s15626_s3 + $0x238] sm:$0xff] }
 0x201   :  { %3899 = vmatprep.subr.mxu0 %v3457_v33  ;;  %4012 = vmatprep.subr.mxu1 %v3459_v28  ;;  %v3448_v33 = vld [vmem:[%s15626_s3 + $0x220] sm:$0xff]  ;;  %v3450_v28 = vld [vmem:[%s15626_s3 + $0x230] sm:$0xff] }
 0x202   :  { %3900 = vmatpush2.msra.mxu0 %v3456_v57  ;;  %4013 = vmatpush2.msra.mxu1 %v3458_v34 }
 0x203   :  { %3901 = vmatprep.subr.mxu0 %v3453_v51  ;;  %4014 = vmatprep.subr.mxu1 %v3455_v21  ;;  %v12034_v57 = vpop.f32.mrf.mxu0  ;;  %v12036_v34 = vpop.f32.mrf.mxu1  ;;  %v3447_v51 = vld [vmem:[%s15626_s3 + $0x218] sm:$0xff]  ;;  %v3444_v21 = vld [vmem:[%s15626_s3 + $0x200] sm:$0xff] }
 0x204   :  { %3902 = vmatpush2.msra.mxu0 %v3452_v52  ;;  %4015 = vmatpush2.msra.mxu1 %v3454_v3 }
 0x205   :  { %3903 = vmatprep.subr.mxu0 %v3449_v47  ;;  %4016 = vmatprep.subr.mxu1 %v3451_v36  ;;  %v12050_v52 = vpop.f32.mrf.mxu0  ;;  %v12052_v3 = vpop.f32.mrf.mxu1  ;;  %v7968_v47 = vld [vmem:[%s15626_s3 + $0x868] sm:$0xff]  ;;  %v7970_v36 = vld [vmem:[%s15626_s3 + $0x878] sm:$0xff] }
 0x206   :  { %3904 = vmatpush2.msra.mxu0 %v3448_v33  ;;  %4017 = vmatpush2.msra.mxu1 %v3450_v28  ;;  %v7967_v33 = vld [vmem:[%s15626_s3 + $0x860] sm:$0xff] }
 0x207   :  { %3905 = vmatprep.subr.mxu0 %v3445_v13  ;;  %4018 = vmatprep.subr.mxu1 %v3447_v51  ;;  %v7969_v13 = vld [vmem:[%s15626_s3 + $0x870] sm:$0xff] }
 0x208   :  { %3906 = vmatpush2.msra.mxu0 %v3444_v21  ;;  %4019 = vmatpush2.msra.mxu1 %v3446_v0  ;;  %v7964_v0 = vld [vmem:[%s15626_s3 + $0x848] sm:$0xff]  ;;  %v7963_v21 = vld [vmem:[%s15626_s3 + $0x840] sm:$0xff] }
 0x209   :  { %3908 = vmatmul.mubr.f32.vlgmr.msra.gmra.mxu0 %v11414_v56  ;;  %4021 = vmatmul.mubr.f32.vlgmr.msra.gmra.mxu1 %v11414_v56  ;;  %v12068_v28 = vpop.f32.mrf.mxu0  ;;  %v12070_v51 = vpop.f32.mrf.mxu1  ;;  %v7966_v56 = vld [vmem:[%s15626_s3 + $0x858] sm:$0xff] }
 0x20a   :  { %4213 = vmatprep.subr.mxu0 %v7968_v47  ;;  %4326 = vmatprep.subr.mxu1 %v7970_v36  ;;  %v7965_v47 = vld [vmem:[%s15626_s3 + $0x850] sm:$0xff] }
 0x20b   :  { %7892 = vmatprep.mubr.msk.f32.mxu0 %vm546_vm2, %v11424_v61  ;;  %7900 = vmatprep.mubr.msk.f32.mxu1 %vm546_vm2, %v11424_v61  ;;  %v12088_v36 = vpop.f32.mrf.mxu0  ;;  %v12090_v50 = vpop.f32.mrf.mxu1  ;;  %v7960_v61 = vld [vmem:[%s15626_s3 + $0x828] sm:$0xff] }
 0x20c   :  { %4214 = vmatpush1.msra.mxu0 %v7967_v33  ;;  %4327 = vmatpush1.msra.mxu1 %v7969_v13  ;;  %v7959_v33 = vld [vmem:[%s15626_s3 + $0x820] sm:$0xff]  ;;  %v7961_v13 = vld [vmem:[%s15626_s3 + $0x830] sm:$0xff] }
 0x20d   :  { %4215 = vmatprep.subr.mxu0 %v7964_v0  ;;  %4328 = vmatprep.subr.mxu1 %v7966_v56 }
 0x20e   :  { %4216 = vmatpush1.msra.mxu0 %v7963_v21  ;;  %4329 = vmatpush1.msra.mxu1 %v7965_v47  ;;  %v7956_v21 = vld [vmem:[%s15626_s3 + $0x808] sm:$0xff]  ;;  %v7955_v47 = vld [vmem:[%s15626_s3 + $0x800] sm:$0xff] }
 0x20f   :  { %3914 = vmatmul.mubr.f32.gmra.mxu0 %v11448_v30  ;;  %4027 = vmatmul.mubr.f32.gmra.mxu1 %v11448_v30  ;;  %v12106_v0 = vpop.f32.mrf.mxu0  ;;  %v12108_v56 = vpop.f32.mrf.mxu1  ;;  %v7958_v30 = vld [vmem:[%s15626_s3 + $0x818] sm:$0xff] }
 0x210   :  { %4217 = vmatprep.subr.mxu0 %v7960_v61  ;;  %4330 = vmatprep.subr.mxu1 %v7962_v6  ;;  %v7957_v6 = vld [vmem:[%s15626_s3 + $0x810] sm:$0xff] }
 0x211   :  { %7893 = vmatprep.mubr.msk.f32.mxu0 %vm546_vm2, %v11616_v54  ;;  %7901 = vmatprep.mubr.msk.f32.mxu1 %vm546_vm2, %v11616_v54  ;;  %v12126_v61 = vpop.f32.mrf.mxu0  ;;  %v12128_v31 = vpop.f32.mrf.mxu1 }
 0x212   :  { %15653 = vst [vmem:[#allocation12_spill] sm:$0xff] %v12128_v31  ;;  %4218 = vmatpush1.msra.mxu0 %v7959_v33  ;;  %4331 = vmatpush1.msra.mxu1 %v7961_v13  ;;  %v7951_v33 = vld [vmem:[%s15626_s3 + $0x7e0] sm:$0xff]  ;;  %v7953_v13 = vld [vmem:[%s15626_s3 + $0x7f0] sm:$0xff]  ;;  %v7946_v31 = vld [vmem:[%s15626_s3 + $0x7b8] sm:$0xff] }
 0x213   :  { %4219 = vmatprep.subr.mxu0 %v7956_v21  ;;  %4332 = vmatprep.subr.mxu1 %v7958_v30 }
 0x214   :  { %4220 = vmatpush1.msra.mxu0 %v7955_v47  ;;  %4333 = vmatpush1.msra.mxu1 %v7957_v6  ;;  %v7948_v47 = vld [vmem:[%s15626_s3 + $0x7c8] sm:$0xff]  ;;  %v7947_v6 = vld [vmem:[%s15626_s3 + $0x7c0] sm:$0xff] }
 0x215   :  { %3920 = vmatmul.mubr.f32.gmra.mxu0 %v11644_v39  ;;  %4033 = vmatmul.mubr.f32.gmra.mxu1 %v11644_v39  ;;  %v12144_v21 = vpop.f32.mrf.mxu0  ;;  %v12146_v30 = vpop.f32.mrf.mxu1  ;;  %v7950_v39 = vld [vmem:[%s15626_s3 + $0x7d8] sm:$0xff] }
 0x216   :  { %4221 = vmatprep.subr.mxu0 %v7952_v5  ;;  %4334 = vmatprep.subr.mxu1 %v7954_v19  ;;  %v7949_v19 = vld [vmem:[%s15626_s3 + $0x7d0] sm:$0xff] }
 0x217   :  { %7894 = vmatprep.mubr.msk.f32.mxu0 %vm546_vm2, %v11654_v62  ;;  %7902 = vmatprep.mubr.msk.f32.mxu1 %vm546_vm2, %v11654_v62  ;;  %v12164_v5 = vpop.f32.mrf.mxu0  ;;  %v12166_v46 = vpop.f32.mrf.mxu1  ;;  %v7944_v62 = vld [vmem:[%s15626_s3 + $0x7a8] sm:$0xff] }
 0x218   :  { %15654 = vst [vmem:[#allocation13_spill] sm:$0xff] %v12164_v5  ;;  %15655 = vst [vmem:[#allocation14_spill] sm:$0xff] %v12166_v46  ;;  %4222 = vmatpush1.msra.mxu0 %v7951_v33  ;;  %4335 = vmatpush1.msra.mxu1 %v7953_v13  ;;  %v7943_v33 = vld [vmem:[%s15626_s3 + $0x7a0] sm:$0xff]  ;;  %v7945_v13 = vld [vmem:[%s15626_s3 + $0x7b0] sm:$0xff] }
 0x219   :  { %4223 = vmatprep.subr.mxu0 %v7948_v47  ;;  %4336 = vmatprep.subr.mxu1 %v7950_v39  ;;  %v7938_v5 = vld [vmem:[%s15626_s3 + $0x778] sm:$0xff] }
 0x21a   :  { %4224 = vmatpush1.msra.mxu0 %v7947_v6  ;;  %4337 = vmatpush1.msra.mxu1 %v7949_v19  ;;  %v7940_v6 = vld [vmem:[%s15626_s3 + $0x788] sm:$0xff]  ;;  %v7939_v19 = vld [vmem:[%s15626_s3 + $0x780] sm:$0xff] }
 0x21b   :  { %3926 = vmatmul.mubr.f32.gmra.mxu0 %v11682_v23  ;;  %4039 = vmatmul.mubr.f32.gmra.mxu1 %v11682_v23  ;;  %v12182_v47 = vpop.f32.mrf.mxu0  ;;  %v12184_v39 = vpop.f32.mrf.mxu1  ;;  %v7942_v23 = vld [vmem:[%s15626_s3 + $0x798] sm:$0xff] }
 0x21c   :  { %4225 = vmatprep.subr.mxu0 %v7944_v62  ;;  %4338 = vmatprep.subr.mxu1 %v7946_v31  ;;  %v7941_v31 = vld [vmem:[%s15626_s3 + $0x790] sm:$0xff] }
 0x21d   :  { %7895 = vmatprep.mubr.msk.f32.mxu0 %vm546_vm2, %v11696_v14  ;;  %7903 = vmatprep.mubr.msk.f32.mxu1 %vm546_vm2, %v11696_v14  ;;  %v12202_v62 = vpop.f32.mrf.mxu0  ;;  %v12204_v46 = vpop.f32.mrf.mxu1  ;;  %v7936_v14 = vld [vmem:[%s15626_s3 + $0x768] sm:$0xff] }
 0x21e   :  { %15656 = vst [vmem:[#allocation15_spill] sm:$0xff] %v12202_v62  ;;  %15657 = vst [vmem:[#allocation16_spill] sm:$0xff] %v12204_v46  ;;  %4226 = vmatpush1.msra.mxu0 %v7943_v33  ;;  %4339 = vmatpush1.msra.mxu1 %v7945_v13  ;;  %v7935_v33 = vld [vmem:[%s15626_s3 + $0x760] sm:$0xff]  ;;  %v7937_v13 = vld [vmem:[%s15626_s3 + $0x770] sm:$0xff] }
 0x21f   :  { %4227 = vmatprep.subr.mxu0 %v7940_v6  ;;  %4340 = vmatprep.subr.mxu1 %v7942_v23  ;;  %v7930_v62 = vld [vmem:[%s15626_s3 + $0x738] sm:$0xff] }
 0x220   :  { %4228 = vmatpush1.msra.mxu0 %v7939_v19  ;;  %4341 = vmatpush1.msra.mxu1 %v7941_v31  ;;  %v7932_v19 = vld [vmem:[%s15626_s3 + $0x748] sm:$0xff]  ;;  %v7931_v31 = vld [vmem:[%s15626_s3 + $0x740] sm:$0xff] }
 0x221   :  { %3932 = vmatmul.mubr.f32.gmra.mxu0 %v11724_v7  ;;  %4045 = vmatmul.mubr.f32.gmra.mxu1 %v11724_v7  ;;  %v12220_v6 = vpop.f32.mrf.mxu0  ;;  %v12222_v23 = vpop.f32.mrf.mxu1  ;;  %v7934_v7 = vld [vmem:[%s15626_s3 + $0x758] sm:$0xff] }
 0x222   :  { %4229 = vmatprep.subr.mxu0 %v7936_v14  ;;  %4342 = vmatprep.subr.mxu1 %v7938_v5  ;;  %v7933_v5 = vld [vmem:[%s15626_s3 + $0x750] sm:$0xff] }
 0x223   :  { %7896 = vmatprep.mubr.msk.f32.mxu0 %vm546_vm2, %v11734_v38  ;;  %7904 = vmatprep.mubr.msk.f32.mxu1 %vm546_vm2, %v11734_v38  ;;  %v12240_v14 = vpop.f32.mrf.mxu0  ;;  %v12242_v46 = vpop.f32.mrf.mxu1  ;;  %v7928_v38 = vld [vmem:[%s15626_s3 + $0x728] sm:$0xff] }
 0x224   :  { %15658 = vst [vmem:[#allocation17_spill] sm:$0xff] %v12242_v46  ;;  %4230 = vmatpush1.msra.mxu0 %v7935_v33  ;;  %4343 = vmatpush1.msra.mxu1 %v7937_v13  ;;  %v7927_v33 = vld [vmem:[%s15626_s3 + $0x720] sm:$0xff]  ;;  %v7929_v13 = vld [vmem:[%s15626_s3 + $0x730] sm:$0xff] }
 0x225   :  { %4231 = vmatprep.subr.mxu0 %v7932_v19  ;;  %4344 = vmatprep.subr.mxu1 %v7934_v7 }
 0x226   :  { %4232 = vmatpush1.msra.mxu0 %v7931_v31  ;;  %4345 = vmatpush1.msra.mxu1 %v7933_v5  ;;  %v7924_v31 = vld [vmem:[%s15626_s3 + $0x708] sm:$0xff] }
 0x227   :  { %3938 = vmatmul.mubr.f32.gmra.mxu0 %v11762_v24  ;;  %4051 = vmatmul.mubr.f32.gmra.mxu1 %v11762_v24  ;;  %v2725_v19 = vpop.f32.mrf.mxu0  ;;  %v2838_v7 = vpop.f32.mrf.mxu1  ;;  %v7926_v24 = vld [vmem:[%s15626_s3 + $0x718] sm:$0xff] }
 0x228   :  { %4233 = vmatprep.subr.mxu0 %v7928_v38  ;;  %4346 = vmatprep.subr.mxu1 %v7930_v62  ;;  %v12265_v5 = vadd.f32 %v2725_v19, %v11946_v27  ;;  %v12268_v46 = vadd.f32 %v2838_v7, %v11948_v15  ;;  %v7923_v62 = vld [vmem:[%s15626_s3 + $0x700] sm:$0xff]  ;;  %v7925_v38 = vld [vmem:[%s15626_s3 + $0x710] sm:$0xff]  ;;  %v7920_v27 = vld [vmem:[%s15626_s3 + $0x6e8] sm:$0xff] }
 0x229   :  { %7897 = vmatprep.mubr.msk.f32.mxu0 %vm546_vm2, %v11776_v48  ;;  %7905 = vmatprep.mubr.msk.f32.mxu1 %vm546_vm2, %v11776_v48  ;;  %v7922_v48 = vld [vmem:[%s15626_s3 + $0x6f8] sm:$0xff]  ;;  %v7919_v15 = vld [vmem:[%s15626_s3 + $0x6e0] sm:$0xff]  ;;  %v7917_v7 = vld [vmem:[%s15626_s3 + $0x6d0] sm:$0xff] }
 0x22a   :  { %4234 = vmatpush1.msra.mxu0 %v7927_v33  ;;  %4347 = vmatpush1.msra.mxu1 %v7929_v13  ;;  %v7921_v33 = vld [vmem:[%s15626_s3 + $0x6f0] sm:$0xff]  ;;  %v7916_v13 = vld [vmem:[%s15626_s3 + $0x6c8] sm:$0xff]  ;;  %v7918_v19 = vld [vmem:[%s15626_s3 + $0x6d8] sm:$0xff] }
 0x22b   :  { %4235 = vmatprep.subr.mxu0 %v7924_v31  ;;  %4348 = vmatprep.subr.mxu1 %v7926_v24  ;;  %v7912_v31 = vld [vmem:[%s15626_s3 + $0x6a8] sm:$0xff]  ;;  %v7911_v24 = vld [vmem:[%s15626_s3 + $0x6a0] sm:$0xff] }
 0x22c   :  { %4236 = vmatpush1.msra.mxu0 %v7923_v62  ;;  %4349 = vmatpush1.msra.mxu1 %v7925_v38  ;;  %v7913_v62 = vld [vmem:[%s15626_s3 + $0x6b0] sm:$0xff]  ;;  %v7908_v38 = vld [vmem:[%s15626_s3 + $0x688] sm:$0xff] }
 0x22d   :  { %3944 = vmatmul.mubr.f32.gmra.mxu0 %v11804_v41  ;;  %4057 = vmatmul.mubr.f32.gmra.mxu1 %v11804_v41  ;;  %v7915_v41 = vld [vmem:[%s15626_s3 + $0x6c0] sm:$0xff] }
 0x22e   :  { %4237 = vmatprep.subr.mxu0 %v7920_v27  ;;  %4350 = vmatprep.subr.mxu1 %v7922_v48  ;;  %v7910_v27 = vld [vmem:[%s15626_s3 + $0x698] sm:$0xff]  ;;  %v7909_v48 = vld [vmem:[%s15626_s3 + $0x690] sm:$0xff] }
 0x22f   :  { %7898 = vmatprep.mubr.msk.f32.mxu0 %vm546_vm2, %v11814_v26  ;;  %7906 = vmatprep.mubr.msk.f32.mxu1 %vm546_vm2, %v11814_v26  ;;  %v7914_v26 = vld [vmem:[%s15626_s3 + $0x6b8] sm:$0xff] }
 0x230   :  { %4238 = vmatpush1.msra.mxu0 %v7919_v15  ;;  %4351 = vmatpush1.msra.mxu1 %v7921_v33  ;;  %v8008_v15 = vld [vmem:[%s15626_s3 + $0x9a8] sm:$0xff]  ;;  %v8010_v33 = vld [vmem:[%s15626_s3 + $0x9b8] sm:$0xff] }
 0x231   :  { %4239 = vmatprep.subr.mxu0 %v7916_v13  ;;  %4352 = vmatprep.subr.mxu1 %v7918_v19  ;;  %v8007_v13 = vld [vmem:[%s15626_s3 + $0x9a0] sm:$0xff]  ;;  %v8009_v19 = vld [vmem:[%s15626_s3 + $0x9b0] sm:$0xff] }
 0x232   :  { %4240 = vmatpush1.msra.mxu0 %v7915_v41  ;;  %4353 = vmatpush1.msra.mxu1 %v7917_v7  ;;  %v8006_v41 = vld [vmem:[%s15626_s3 + $0x998] sm:$0xff]  ;;  %v8003_v7 = vld [vmem:[%s15626_s3 + $0x980] sm:$0xff] }
 0x233   :  { %3950 = vmatmul.mubr.f32.gmra.mxu0 %v11842_v16  ;;  %4063 = vmatmul.mubr.f32.gmra.mxu1 %v11842_v16  ;;  %v7907_v16 = vld [vmem:[%s15626_s3 + $0x680] sm:$0xff] }
 0x234   :  { %4241 = vmatprep.subr.mxu0 %v7912_v31  ;;  %4354 = vmatprep.subr.mxu1 %v7914_v26  ;;  %v8005_v31 = vld [vmem:[%s15626_s3 + $0x990] sm:$0xff]  ;;  %v8000_v26 = vld [vmem:[%s15626_s3 + $0x968] sm:$0xff] }
 0x235   :  { %4242 = vmatpush1.msra.mxu0 %v7911_v24  ;;  %8011 = vmatprep.mubr.msk.f32.mxu0 %vm546_vm2, %v11616_v54  ;;  %v8002_v24 = vld [vmem:[%s15626_s3 + $0x978] sm:$0xff] }
 0x236   :  { %4355 = vmatpush1.msra.mxu1 %v7913_v62  ;;  %8019 = vmatprep.mubr.msk.f32.mxu1 %vm546_vm2, %v11616_v54  ;;  %v8004_v54 = vld [vmem:[%s15626_s3 + $0x988] sm:$0xff]  ;;  %v7999_v62 = vld [vmem:[%s15626_s3 + $0x960] sm:$0xff] }
 0x237   :  { %4243 = vmatprep.subr.mxu0 %v7908_v38  ;;  %4356 = vmatprep.subr.mxu1 %v7910_v27  ;;  %v8001_v38 = vld [vmem:[%s15626_s3 + $0x970] sm:$0xff]  ;;  %v7996_v27 = vld [vmem:[%s15626_s3 + $0x948] sm:$0xff] }
 0x238   :  { %4244 = vmatpush1.msra.mxu0 %v7907_v16  ;;  %4357 = vmatpush1.msra.mxu1 %v7909_v48  ;;  %v7998_v16 = vld [vmem:[%s15626_s3 + $0x958] sm:$0xff]  ;;  %v7995_v48 = vld [vmem:[%s15626_s3 + $0x940] sm:$0xff] }
 0x239   :  { %4257 = vmatprep.subr.mxu0 %v8008_v15  ;;  %4370 = vmatprep.subr.mxu1 %v8010_v33  ;;  %v7997_v15 = vld [vmem:[%s15626_s3 + $0x950] sm:$0xff]  ;;  %v7992_v33 = vld [vmem:[%s15626_s3 + $0x928] sm:$0xff] }
 0x23a   :  { %4258 = vmatpush2.msra.mxu0 %v8007_v13  ;;  %4371 = vmatpush2.msra.mxu1 %v8009_v19  ;;  %v7994_v13 = vld [vmem:[%s15626_s3 + $0x938] sm:$0xff]  ;;  %v7991_v19 = vld [vmem:[%s15626_s3 + $0x920] sm:$0xff] }
 0x23b   :  { %4259 = vmatprep.subr.mxu0 %v8004_v54  ;;  %4372 = vmatprep.subr.mxu1 %v8006_v41  ;;  %v7993_v54 = vld [vmem:[%s15626_s3 + $0x930] sm:$0xff]  ;;  %v12400_v41 = vpop.f32.mrf.mxu0 }
 0x23c   :  { %4260 = vmatpush2.msra.mxu0 %v8003_v7  ;;  %4373 = vmatpush2.msra.mxu1 %v8005_v31  ;;  %15659 = vst [vmem:[#allocation18_spill] sm:$0xff] %v12400_v41  ;;  %v12402_v7 = vpop.f32.mrf.mxu1  ;;  %v2684_v31 = vadd.f32 %v11990_v63, %v11594_v2  ;;  %v7987_v2 = vld [vmem:[%s15626_s3 + $0x900] sm:$0xff] }
 0x23d   :  { %4261 = vmatprep.subr.mxu0 %v8000_v26  ;;  %4374 = vmatprep.subr.mxu1 %v8002_v24  ;;  %15660 = vst [vmem:[#allocation19_spill] sm:$0xff] %v12402_v7  ;;  %v2797_v26 = vadd.f32 %v11992_v37, %v11596_v8  ;;  %v7988_v24 = vld [vmem:[%s15626_s3 + $0x908] sm:$0xff]  ;;  %v7989_v8 = vld [vmem:[%s15626_s3 + $0x910] sm:$0xff] }
 0x23e   :  { %4262 = vmatpush2.msra.mxu0 %v7999_v62  ;;  %4375 = vmatpush2.msra.mxu1 %v8001_v38  ;;  %v7990_v62 = vld [vmem:[%s15626_s3 + $0x918] sm:$0xff]  ;;  %v3246_v38 = vld [vmem:[%s15628_s4] sm:$0xf] }
 0x23f   :  { %4263 = vmatprep.subr.mxu0 %v7996_v27  ;;  %4376 = vmatprep.subr.mxu1 %v7998_v16  ;;  %v12418_v27 = vsub.s32 2, %v10017_v40  ;;  %v7984_v16 = vld [vmem:[%s15626_s3 + $0x8e8] sm:$0xff] }
 0x240   :  { %4264 = vmatpush2.msra.mxu0 %v7995_v48  ;;  %4377 = vmatpush2.msra.mxu1 %v7997_v15  ;;  %v7986_v48 = vld [vmem:[%s15626_s3 + $0x8f8] sm:$0xff] }
 0x241   :  { %15661 = vst [vmem:[#allocation20_spill] sm:$0xff] %v12418_v27  ;;  %4265 = vmatprep.subr.mxu0 %v7992_v33  ;;  %4378 = vmatprep.subr.mxu1 %v7994_v13  ;;  %v3054_v63 = vpop.f32.mrf.mxu0  ;;  %v3167_v37 = vpop.f32.mrf.mxu1  ;;  %v7983_v13 = vld [vmem:[%s15626_s3 + $0x8e0] sm:$0xff] }
 0x242   :  { %4266 = vmatpush2.msra.mxu0 %v7991_v19  ;;  %4379 = vmatpush2.msra.mxu1 %v7993_v54  ;;  %v3214_v15 = vadd.f32 %v3054_v63, %v2684_v31  ;;  %v3216_v33 = vadd.f32 %v3167_v37, %v2797_v26  ;;  %v7985_v19 = vld [vmem:[%s15626_s3 + $0x8f0] sm:$0xff]  ;;  %v12439_v54 = vrot.slane %v3246_v38, %v10052_v55  ;;  %v7980_v31 = vld [vmem:[%s15626_s3 + $0x8c8] sm:$0xff]  ;;  %v7982_v26 = vld [vmem:[%s15626_s3 + $0x8d8] sm:$0xff] }
 0x243   :  { %4267 = vmatprep.subr.mxu0 %v7988_v24  ;;  %4380 = vmatprep.subr.mxu1 %v7990_v62  ;;  %v12441_v7 = vpop.f32.mrf.mxu0  ;;  %v12443_v41 = vpop.f32.mrf.mxu1  ;;  %v12452_v24 = vrot.slane %v3246_v38, %v12418_v27  ;;  %v7979_v62 = vld [vmem:[%s15626_s3 + $0x8c0] sm:$0xff]  ;;  %v2803_v63 = vadd.f32 %v12036_v34, %v11642_v18  ;;  %v7976_v38 = vld [vmem:[%s15626_s3 + $0x8a8] sm:$0xff]  ;;  %v7978_v37 = vld [vmem:[%s15626_s3 + $0x8b8] sm:$0xff] }
 0x244   :  { %15662 = vst [vmem:[#allocation21_spill] sm:$0xff] %v12443_v41  ;;  %4268 = vmatpush2.msra.mxu0 %v7987_v2  ;;  %4381 = vmatpush2.msra.mxu1 %v7989_v8  ;;  %v7981_v2 = vld [vmem:[%s15626_s3 + $0x8d0] sm:$0xff]  ;;  %v2690_v8 = vadd.f32 %v12034_v57, %v11640_v43  ;;  %v3268_v18 = vadd.f32 %v12439_v54, %v3214_v15  ;;  %v7971_v15 = vld [vmem:[%s15626_s3 + $0x880] sm:$0xff] }
 0x245   :  { %4269 = vmatprep.subr.mxu0 %v7984_v16  ;;  %4382 = vmatprep.subr.mxu1 %v7986_v48  ;;  %v7975_v16 = vld [vmem:[%s15626_s3 + $0x8a0] sm:$0xff]  ;;  %v7977_v43 = vld [vmem:[%s15626_s3 + $0x8b0] sm:$0xff]  ;;  %v7972_v48 = vld [vmem:[%s15626_s3 + $0x888] sm:$0xff] }
 0x246   :  { %4270 = vmatpush2.msra.mxu0 %v7983_v13  ;;  %4383 = vmatpush2.msra.mxu1 %v7985_v19  ;;  %v7974_v13 = vld [vmem:[%s15626_s3 + $0x898] sm:$0xff]  ;;  %v3270_v19 = vadd.f32 %v12452_v24, %v3216_v33 }
 0x247   :  { %4271 = vmatprep.subr.mxu0 %v7980_v31  ;;  %4384 = vmatprep.subr.mxu1 %v7982_v26  ;;  %v3060_v57 = vpop.f32.mrf.mxu0  ;;  %v3173_v34 = vpop.f32.mrf.mxu1 }
 0x248   :  { %4272 = vmatpush2.msra.mxu0 %v7979_v62  ;;  %4385 = vmatpush2.msra.mxu1 %v7981_v2  ;;  %v3218_v31 = vadd.f32 %v3060_v57, %v2690_v8  ;;  %v3220_v26 = vadd.f32 %v3173_v34, %v2803_v63  ;;  %v7973_v62 = vld [vmem:[%s15626_s3 + $0x890] sm:$0xff]  ;;  %v2696_v63 = vadd.f32 %v12068_v28, %v11692_v45  ;;  %v3302_v57 = vmax.f32 %v3270_v19, 0.0  ;;  %v8087_v28 = vld [vmem:[%s15626_s3 + $0x520] sm:$0xff]  ;;  %v8084_v19 = vld [vmem:[%s15626_s3 + $0x508] sm:$0xff] }
 0x249   :  { %4273 = vmatprep.subr.mxu0 %v7976_v38  ;;  %4386 = vmatprep.subr.mxu1 %v7978_v37  ;;  %v12490_v2 = vpop.f32.mrf.mxu0  ;;  %v12492_v41 = vpop.f32.mrf.mxu1  ;;  %v8088_v38 = vld [vmem:[%s15626_s3 + $0x528] sm:$0xff]  ;;  %v8090_v37 = vld [vmem:[%s15626_s3 + $0x538] sm:$0xff]  ;;  %v2809_v45 = vadd.f32 %v12070_v51, %v11694_v49 }
 0x24a   :  { %4274 = vmatpush2.msra.mxu0 %v7975_v16  ;;  %4387 = vmatpush2.msra.mxu1 %v7977_v43  ;;  %v3272_v33 = vadd.f32 %v12439_v54, %v3218_v31  ;;  %v3274_v8 = vadd.f32 %v12452_v24, %v3220_v26  ;;  %v4069_v16 = vld [vmem:[#allocation2 + $0xa0] sm:$0xff]  ;;  %v3300_v43 = vmax.f32 %v3268_v18, 0.0  ;;  %v4072_v18 = vld [vmem:[#allocation2 + $0xb8] sm:$0xff] }
 0x24b   :  { %4275 = vmatprep.subr.mxu0 %v7972_v48  ;;  %4388 = vmatprep.subr.mxu1 %v7974_v13  ;;  %v8089_v48 = vld [vmem:[%s15626_s3 + $0x530] sm:$0xff]  ;;  %v8086_v49 = vld [vmem:[%s15626_s3 + $0x518] sm:$0xff] }
 0x24c   :  { %4276 = vmatpush2.msra.mxu0 %v7971_v15  ;;  %4389 = vmatpush2.msra.mxu1 %v7973_v62  ;;  %v3304_v34 = vmax.f32 %v3272_v33, 0.0  ;;  %v3306_v31 = vmax.f32 %v3274_v8, 0.0  ;;  %v8083_v33 = vld [vmem:[%s15626_s3 + $0x500] sm:$0xff]  ;;  %v8085_v8 = vld [vmem:[%s15626_s3 + $0x510] sm:$0xff] }
 0x24d   :  { %4278 = vmatmul.mubr.f32.vlgmr.msra.gmra.mxu0 %v4069_v16  ;;  %4391 = vmatmul.mubr.f32.vlgmr.msra.gmra.mxu1 %v4069_v16  ;;  %v3066_v13 = vpop.f32.mrf.mxu0  ;;  %v3179_v26 = vpop.f32.mrf.mxu1 }
 0x24e   :  { %4839 = vmatprep.subr.mxu0 %v8088_v38  ;;  %4952 = vmatprep.subr.mxu1 %v8090_v37  ;;  %v12518_v51 = vmax.f32 %v3300_v43, %v3304_v34  ;;  %v12520_v15 = vmax.f32 %v3302_v57, %v3306_v31  ;;  %v3222_v62 = vadd.f32 %v3066_v13, %v2696_v63  ;;  %v8080_v43 = vld [vmem:[%s15626_s3 + $0x4e8] sm:$0xff]  ;;  %v8082_v57 = vld [vmem:[%s15626_s3 + $0x4f8] sm:$0xff] }
 0x24f   :  { %8012 = vmatprep.mubr.msk.f32.mxu0 %vm546_vm2, %v4072_v18  ;;  %8020 = vmatprep.mubr.msk.f32.mxu1 %vm546_vm2, %v4072_v18  ;;  %v3224_v38 = vadd.f32 %v3179_v26, %v2809_v45  ;;  %v12530_v37 = vpop.f32.mrf.mxu0  ;;  %v12532_v16 = vpop.f32.mrf.mxu1  ;;  %v2702_v34 = vadd.f32 %v12106_v0, %v11752_v10  ;;  %v2815_v31 = vadd.f32 %v12108_v56, %v11754_v25  ;;  %v4071_v45 = vld [vmem:[#allocation2 + $0xb0] sm:$0xff]  ;;  %v4074_v25 = vld [vmem:[#allocation2 + $0xc8] sm:$0xff]  ;;  %v8078_v56 = vld [vmem:[%s15626_s3 + $0x4d8] sm:$0xff] }
 0x250   :  { %15663 = vst [vmem:[#allocation22_spill] sm:$0xff] %v12518_v51  ;;  %15664 = vst [vmem:[#allocation23_spill] sm:$0xff] %v12520_v15  ;;  %4840 = vmatpush1.msra.mxu0 %v8087_v28  ;;  %4953 = vmatpush1.msra.mxu1 %v8089_v48  ;;  %v8079_v28 = vld [vmem:[%s15626_s3 + $0x4e0] sm:$0xff]  ;;  %v8081_v48 = vld [vmem:[%s15626_s3 + $0x4f0] sm:$0xff]  ;;  %v3276_v13 = vadd.f32 %v12439_v54, %v3222_v62 }
 0x251   :  { %4841 = vmatprep.subr.mxu0 %v8084_v19  ;;  %4954 = vmatprep.subr.mxu1 %v8086_v49  ;;  %v8076_v0 = vld [vmem:[%s15626_s3 + $0x4c8] sm:$0xff]  ;;  %v3278_v18 = vadd.f32 %v12452_v24, %v3224_v38  ;;  %v8075_v62 = vld [vmem:[%s15626_s3 + $0x4c0] sm:$0xff]  ;;  %v4652_v63 = vld [vmem:[%s15626_s3 + $0x178] sm:$0xff] }
 0x252   :  { %4842 = vmatpush1.msra.mxu0 %v8083_v33  ;;  %4955 = vmatpush1.msra.mxu1 %v8085_v8  ;;  %v8077_v33 = vld [vmem:[%s15626_s3 + $0x4d0] sm:$0xff]  ;;  %v4636_v15 = vld [vmem:[%s15626_s3 + $0xf8] sm:$0xff] }
 0x253   :  { %4284 = vmatmul.mubr.f32.gmra.mxu0 %v4071_v45  ;;  %4397 = vmatmul.mubr.f32.gmra.mxu1 %v4071_v45  ;;  %v3072_v26 = vpop.f32.mrf.mxu0  ;;  %v3185_v10 = vpop.f32.mrf.mxu1  ;;  %v8074_v45 = vld [vmem:[%s15626_s3 + $0x4b8] sm:$0xff]  ;;  %v13084_v51 = vld [vmem:[#allocation2 + $0x150] sm:$0xff] }
 0x254   :  { %4843 = vmatprep.subr.mxu0 %v8080_v43  ;;  %4956 = vmatprep.subr.mxu1 %v8082_v57  ;;  %v3226_v19 = vadd.f32 %v3072_v26, %v2702_v34  ;;  %v3228_v49 = vadd.f32 %v3185_v10, %v2815_v31  ;;  %v2708_v34 = vadd.f32 %v12144_v21, %v11800_v4  ;;  %v8072_v31 = vld [vmem:[%s15626_s3 + $0x4a8] sm:$0xff]  ;;  %v3310_v26 = vmax.f32 %v3278_v18, 0.0  ;;  %v8071_v21 = vld [vmem:[%s15626_s3 + $0x4a0] sm:$0xff] }
 0x255   :  { %8013 = vmatprep.mubr.msk.f32.mxu0 %vm546_vm2, %v4074_v25  ;;  %8021 = vmatprep.mubr.msk.f32.mxu1 %vm546_vm2, %v4074_v25  ;;  %v12568_v8 = vpop.f32.mrf.mxu0  ;;  %v12570_v43 = vpop.f32.mrf.mxu1  ;;  %v2821_v4 = vadd.f32 %v12146_v30, %v11802_v11  ;;  %v8068_v18 = vld [vmem:[%s15626_s3 + $0x488] sm:$0xff]  ;;  %v8070_v11 = vld [vmem:[%s15626_s3 + $0x498] sm:$0xff] }
 0x256   :  { %4844 = vmatpush1.msra.mxu0 %v8079_v28  ;;  %4957 = vmatpush1.msra.mxu1 %v8081_v48  ;;  %v3280_v38 = vadd.f32 %v12439_v54, %v3226_v19  ;;  %v3282_v57 = vadd.f32 %v12452_v24, %v3228_v49  ;;  %v4073_v28 = vld [vmem:[#allocation2 + $0xc0] sm:$0xff]  ;;  %v3308_v48 = vmax.f32 %v3276_v13, 0.0  ;;  %v4076_v13 = vld [vmem:[#allocation2 + $0xd8] sm:$0xff] }
 0x257   :  { %4845 = vmatprep.subr.mxu0 %v8076_v0  ;;  %4958 = vmatprep.subr.mxu1 %v8078_v56  ;;  %v8073_v0 = vld [vmem:[%s15626_s3 + $0x4b0] sm:$0xff] }
 0x258   :  { %4846 = vmatpush1.msra.mxu0 %v8075_v62  ;;  %4959 = vmatpush1.msra.mxu1 %v8077_v33  ;;  %v3312_v10 = vmax.f32 %v3280_v38, 0.0  ;;  %v3314_v25 = vmax.f32 %v3282_v57, 0.0  ;;  %v8067_v33 = vld [vmem:[%s15626_s3 + $0x480] sm:$0xff]  ;;  %v8069_v38 = vld [vmem:[%s15626_s3 + $0x490] sm:$0xff] }
 0x259   :  { %4290 = vmatmul.mubr.f32.gmra.mxu0 %v4073_v28  ;;  %4403 = vmatmul.mubr.f32.gmra.mxu1 %v4073_v28  ;;  %v3078_v56 = vpop.f32.mrf.mxu0  ;;  %v3191_v19 = vpop.f32.mrf.mxu1  ;;  %v8064_v28 = vld [vmem:[%s15626_s3 + $0x468] sm:$0xff] }
 0x25a   :  { %4847 = vmatprep.subr.mxu0 %v8072_v31  ;;  %4960 = vmatprep.subr.mxu1 %v8074_v45  ;;  %v12596_v30 = vmax.f32 %v3308_v48, %v3312_v10  ;;  %v12598_v49 = vmax.f32 %v3310_v26, %v3314_v25  ;;  %v3230_v62 = vadd.f32 %v3078_v56, %v2708_v34  ;;  %v8066_v48 = vld [vmem:[%s15626_s3 + $0x478] sm:$0xff]  ;;  %v4075_v25 = vld [vmem:[#allocation2 + $0xd0] sm:$0xff] }
 0x25b   :  { %8014 = vmatprep.mubr.msk.f32.mxu0 %vm546_vm2, %v4076_v13  ;;  %8022 = vmatprep.mubr.msk.f32.mxu1 %vm546_vm2, %v4076_v13  ;;  %v3232_v57 = vadd.f32 %v3191_v19, %v2821_v4  ;;  %v12608_v31 = vpop.f32.mrf.mxu0  ;;  %v12610_v45 = vpop.f32.mrf.mxu1  ;;  %v2714_v26 = vadd.f32 %v12182_v47, %v11852_v17  ;;  %v2827_v10 = vadd.f32 %v12184_v39, %v11854_v58  ;;  %v8063_v4 = vld [vmem:[%s15626_s3 + $0x460] sm:$0xff]  ;;  %v4078_v58 = vld [vmem:[#allocation2 + $0xe8] sm:$0xff]  ;;  %v8062_v39 = vld [vmem:[%s15626_s3 + $0x458] sm:$0xff] }
 0x25c   :  { %15665 = vst [vmem:[#allocation24_spill] sm:$0xff] %v12596_v30  ;;  %15666 = vst [vmem:[#allocation25_spill] sm:$0xff] %v12598_v49  ;;  %4848 = vmatpush1.msra.mxu0 %v8071_v21  ;;  %4961 = vmatpush1.msra.mxu1 %v8073_v0  ;;  %v8065_v21 = vld [vmem:[%s15626_s3 + $0x470] sm:$0xff]  ;;  %v3284_v0 = vadd.f32 %v12439_v54, %v3230_v62  ;;  %v8060_v47 = vld [vmem:[%s15626_s3 + $0x448] sm:$0xff] }
 0x25d   :  { %15667 = vst [vmem:[#allocation26_spill] sm:$0xff] %v12608_v31  ;;  %15668 = vst [vmem:[#allocation27_spill] sm:$0xff] %v12610_v45  ;;  %4849 = vmatprep.subr.mxu0 %v8068_v18  ;;  %4962 = vmatprep.subr.mxu1 %v8070_v11  ;;  %v3286_v19 = vadd.f32 %v12452_v24, %v3232_v57  ;;  %v8059_v11 = vld [vmem:[%s15626_s3 + $0x440] sm:$0xff]  ;;  %v8061_v62 = vld [vmem:[%s15626_s3 + $0x450] sm:$0xff] }
 0x25e   :  { %4850 = vmatpush1.msra.mxu0 %v8067_v33  ;;  %4963 = vmatpush1.msra.mxu1 %v8069_v38  ;;  %v13004_v34 = vld [vmem:[#allocation2 + $0x130] sm:$0xff]  ;;  %v4628_v49 = vld [vmem:[%s15626_s3 + $0xb8] sm:$0xff]  ;;  %v4698_v31 = vld [vmem:[%s15626_s3 + $0x2e8] sm:$0xff] }
 0x25f   :  { %4296 = vmatmul.mubr.f32.gmra.mxu0 %v4075_v25  ;;  %4409 = vmatmul.mubr.f32.gmra.mxu1 %v4075_v25  ;;  %v3084_v56 = vpop.f32.mrf.mxu0  ;;  %v3197_v17 = vpop.f32.mrf.mxu1  ;;  %v4077_v25 = vld [vmem:[#allocation2 + $0xe0] sm:$0xff]  ;;  %v4616_v45 = vld [vmem:[%s15626_s3 + $0x58] sm:$0xff] }
 0x260   :  { %4851 = vmatprep.subr.mxu0 %v8064_v28  ;;  %4964 = vmatprep.subr.mxu1 %v8066_v48  ;;  %v3234_v13 = vadd.f32 %v3084_v56, %v2714_v26  ;;  %v3236_v18 = vadd.f32 %v3197_v17, %v2827_v10  ;;  %v2720_v48 = vadd.f32 %v12220_v6, %v11900_v44  ;;  %v8056_v26 = vld [vmem:[%s15626_s3 + $0x428] sm:$0xff]  ;;  %v8058_v10 = vld [vmem:[%s15626_s3 + $0x438] sm:$0xff]  ;;  %v8055_v6 = vld [vmem:[%s15626_s3 + $0x420] sm:$0xff] }
 0x261   :  { %8015 = vmatprep.mubr.msk.f32.mxu0 %vm546_vm2, %v4078_v58  ;;  %8023 = vmatprep.mubr.msk.f32.mxu1 %vm546_vm2, %v4078_v58  ;;  %v12646_v33 = vpop.f32.mrf.mxu0  ;;  %v12648_v38 = vpop.f32.mrf.mxu1  ;;  %v2833_v44 = vadd.f32 %v12222_v23, %v11902_v9  ;;  %v8057_v58 = vld [vmem:[%s15626_s3 + $0x430] sm:$0xff]  ;;  %v8054_v9 = vld [vmem:[%s15626_s3 + $0x418] sm:$0xff] }
 0x262   :  { %15669 = vst [vmem:[#allocation28_spill] sm:$0xff] %v12646_v33  ;;  %15670 = vst [vmem:[#allocation29_spill] sm:$0xff] %v12648_v38  ;;  %4852 = vmatpush1.msra.mxu0 %v8063_v4  ;;  %4965 = vmatpush1.msra.mxu1 %v8065_v21  ;;  %v3288_v57 = vadd.f32 %v12439_v54, %v3234_v13  ;;  %v3290_v28 = vadd.f32 %v12452_v24, %v3236_v18  ;;  %v3316_v4 = vmax.f32 %v3284_v0, 0.0  ;;  %v4080_v0 = vld [vmem:[#allocation2 + $0xf8] sm:$0xff]  ;;  %v4709_v33 = vld [vmem:[#allocation2 + $0x180] sm:$0xff] }
 0x263   :  { %4853 = vmatprep.subr.mxu0 %v8060_v47  ;;  %4966 = vmatprep.subr.mxu1 %v8062_v39  ;;  %v3318_v21 = vmax.f32 %v3286_v19, 0.0  ;;  %v8052_v19 = vld [vmem:[%s15626_s3 + $0x408] sm:$0xff] }
 0x264   :  { %4854 = vmatpush1.msra.mxu0 %v8059_v11  ;;  %4967 = vmatpush1.msra.mxu1 %v8061_v62  ;;  %v3320_v56 = vmax.f32 %v3288_v57, 0.0  ;;  %v3322_v17 = vmax.f32 %v3290_v28, 0.0  ;;  %v8051_v11 = vld [vmem:[%s15626_s3 + $0x400] sm:$0xff]  ;;  %v8053_v62 = vld [vmem:[%s15626_s3 + $0x410] sm:$0xff] }
 0x265   :  { %4302 = vmatmul.mubr.f32.gmra.mxu0 %v4077_v25  ;;  %4415 = vmatmul.mubr.f32.gmra.mxu1 %v4077_v25  ;;  %v3090_v47 = vpop.f32.mrf.mxu0  ;;  %v3203_v39 = vpop.f32.mrf.mxu1  ;;  %v8050_v25 = vld [vmem:[%s15626_s3 + $0x3f8] sm:$0xff] }
 0x266   :  { %4855 = vmatprep.subr.mxu0 %v8056_v26  ;;  %4968 = vmatprep.subr.mxu1 %v8058_v10  ;;  %v12674_v23 = vmax.f32 %v3316_v4, %v3320_v56  ;;  %v12676_v13 = vmax.f32 %v3318_v21, %v3322_v17  ;;  %v3238_v18 = vadd.f32 %v3090_v47, %v2720_v48  ;;  %v8048_v10 = vld [vmem:[%s15626_s3 + $0x3e8] sm:$0xff]  ;;  %v4079_v4 = vld [vmem:[#allocation2 + $0xf0] sm:$0xff]  ;;  %v8047_v21 = vld [vmem:[%s15626_s3 + $0x3e0] sm:$0xff] }
 0x267   :  { %8016 = vmatprep.mubr.msk.f32.mxu0 %vm546_vm2, %v4080_v0  ;;  %8024 = vmatprep.mubr.msk.f32.mxu1 %vm546_vm2, %v4080_v0  ;;  %v3240_v57 = vadd.f32 %v3203_v39, %v2833_v44  ;;  %v12686_v28 = vpop.f32.mrf.mxu0  ;;  %v12688_v26 = vpop.f32.mrf.mxu1  ;;  %v8049_v56 = vld [vmem:[%s15626_s3 + $0x3f0] sm:$0xff]  ;;  %v8044_v47 = vld [vmem:[%s15626_s3 + $0x3c8] sm:$0xff]  ;;  %v8046_v39 = vld [vmem:[%s15626_s3 + $0x3d8] sm:$0xff] }
 0x268   :  { %15671 = vst [vmem:[#allocation30_spill] sm:$0xff] %v12674_v23  ;;  %15672 = vst [vmem:[#allocation31_spill] sm:$0xff] %v12676_v13  ;;  %4856 = vmatpush1.msra.mxu0 %v8055_v6  ;;  %4969 = vmatpush1.msra.mxu1 %v8057_v58  ;;  %v3292_v17 = vadd.f32 %v12439_v54, %v3238_v18  ;;  %v12705_v58 = vld [vmem:[#allocation2 + $0x108] sm:$0xff]  ;;  %v8043_v18 = vld [vmem:[%s15626_s3 + $0x3c0] sm:$0xff] }
 0x269   :  { %15673 = vst [vmem:[#allocation32_spill] sm:$0xff] %v12686_v28  ;;  %15674 = vst [vmem:[#allocation33_spill] sm:$0xff] %v12688_v26  ;;  %4857 = vmatprep.subr.mxu0 %v8052_v19  ;;  %4970 = vmatprep.subr.mxu1 %v8054_v9  ;;  %v3294_v0 = vadd.f32 %v12452_v24, %v3240_v57  ;;  %v8042_v57 = vld [vmem:[%s15626_s3 + $0x3b8] sm:$0xff]  ;;  %v4650_v48 = vld [vmem:[%s15626_s3 + $0x168] sm:$0xff] }
 0x26a   :  { %4858 = vmatpush1.msra.mxu0 %v8051_v11  ;;  %4971 = vmatpush1.msra.mxu1 %v8053_v62  ;;  %v8045_v11 = vld [vmem:[%s15626_s3 + $0x3d0] sm:$0xff]  ;;  %v8040_v62 = vld [vmem:[%s15626_s3 + $0x3a8] sm:$0xff]  ;;  %v4644_v13 = vld [vmem:[%s15626_s3 + $0x138] sm:$0xff] }
 0x26b   :  { %4308 = vmatmul.mubr.f32.gmra.mxu0 %v4079_v4  ;;  %4421 = vmatmul.mubr.f32.gmra.mxu1 %v4079_v4  ;;  %v3096_v44 = vpop.f32.mrf.mxu0  ;;  %v3209_v6 = vpop.f32.mrf.mxu1  ;;  %v3326_v4 = vmax.f32 %v3294_v0, 0.0  ;;  %v8035_v0 = vld [vmem:[%s15626_s3 + $0x380] sm:$0xff]  ;;  %v13164_v28 = vld [vmem:[#allocation2 + $0x170] sm:$0xff] }
 0x26c   :  { %4859 = vmatprep.subr.mxu0 %v8048_v10  ;;  %4972 = vmatprep.subr.mxu1 %v8050_v25  ;;  %v3242_v19 = vadd.f32 %v3096_v44, %v12265_v5  ;;  %v3244_v9 = vadd.f32 %v3209_v6, %v12268_v46  ;;  %v4081_v10 = vld [vmem:[#allocation2 + $0x100] sm:$0xff]  ;;  %v3324_v25 = vmax.f32 %v3292_v17, 0.0  ;;  %v12740_v44 = vld [vmem:[#allocation2 + $0x118] sm:$0xff]  ;;  %v8036_v17 = vld [vmem:[%s15626_s3 + $0x388] sm:$0xff] }
 0x26d   :  { %8017 = vmatprep.mubr.msk.f32.mxu0 %vm546_vm2, %v12705_v58  ;;  %8025 = vmatprep.mubr.msk.f32.mxu1 %vm546_vm2, %v12705_v58  ;;  %v8038_v6 = vld [vmem:[%s15626_s3 + $0x398] sm:$0xff] }
 0x26e   :  { %4860 = vmatpush1.msra.mxu0 %v8047_v21  ;;  %4973 = vmatpush1.msra.mxu1 %v8049_v56  ;;  %v3296_v5 = vadd.f32 %v12439_v54, %v3242_v19  ;;  %v3298_v46 = vadd.f32 %v12452_v24, %v3244_v9  ;;  %v8039_v54 = vld [vmem:[%s15626_s3 + $0x3a0] sm:$0xff]  ;;  %v8041_v24 = vld [vmem:[%s15626_s3 + $0x3b0] sm:$0xff] }
 0x26f   :  { %4861 = vmatprep.subr.mxu0 %v8044_v47  ;;  %4974 = vmatprep.subr.mxu1 %v8046_v39  ;;  %v8037_v19 = vld [vmem:[%s15626_s3 + $0x390] sm:$0xff] }
 0x270   :  { %4862 = vmatpush1.msra.mxu0 %v8043_v18  ;;  %4975 = vmatpush1.msra.mxu1 %v8045_v11  ;;  %v3328_v21 = vmax.f32 %v3296_v5, 0.0  ;;  %v3330_v56 = vmax.f32 %v3298_v46, 0.0  ;;  %v8032_v18 = vld [vmem:[%s15626_s3 + $0x368] sm:$0xff]  ;;  %v8034_v11 = vld [vmem:[%s15626_s3 + $0x378] sm:$0xff]  ;;  %v12770_v5 = vld [vmem:[#allocation2 + $0x110] sm:$0xff] }
 0x271   :  { %4314 = vmatmul.mubr.f32.gmra.mxu0 %v4081_v10  ;;  %4427 = vmatmul.mubr.f32.gmra.mxu1 %v4081_v10  ;;  %v8031_v46 = vld [vmem:[%s15626_s3 + $0x360] sm:$0xff]  ;;  %v8030_v10 = vld [vmem:[%s15626_s3 + $0x358] sm:$0xff] }
 0x272   :  { %4863 = vmatprep.subr.mxu0 %v8040_v62  ;;  %4976 = vmatprep.subr.mxu1 %v8042_v57  ;;  %v12748_v47 = vmax.f32 %v3324_v25, %v3328_v21  ;;  %v12750_v39 = vmax.f32 %v3326_v4, %v3330_v56  ;;  %v8033_v62 = vld [vmem:[%s15626_s3 + $0x370] sm:$0xff]  ;;  %v8028_v57 = vld [vmem:[%s15626_s3 + $0x348] sm:$0xff]  ;;  %v8027_v25 = vld [vmem:[%s15626_s3 + $0x340] sm:$0xff] }
 0x273   :  { %8018 = vmatprep.mubr.msk.f32.mxu0 %vm546_vm2, %v12740_v44  ;;  %8026 = vmatprep.mubr.msk.f32.mxu1 %vm546_vm2, %v12740_v44  ;;  %v8029_v4 = vld [vmem:[%s15626_s3 + $0x350] sm:$0xff]  ;;  %v8128_v21 = vld [vmem:[%s15626_s3 + $0x668] sm:$0xff]  ;;  %v8130_v56 = vld [vmem:[%s15626_s3 + $0x678] sm:$0xff] }
 0x274   :  { %15675 = vst [vmem:[#allocation34_spill] sm:$0xff] %v12748_v47  ;;  %15676 = vst [vmem:[#allocation35_spill] sm:$0xff] %v12750_v39  ;;  %4864 = vmatpush1.msra.mxu0 %v8039_v54  ;;  %4977 = vmatpush1.msra.mxu1 %v8041_v24  ;;  %v8127_v54 = vld [vmem:[%s15626_s3 + $0x660] sm:$0xff]  ;;  %v8129_v24 = vld [vmem:[%s15626_s3 + $0x670] sm:$0xff] }
 0x275   :  { %4865 = vmatprep.subr.mxu0 %v8036_v17  ;;  %4978 = vmatprep.subr.mxu1 %v8038_v6  ;;  %v8124_v17 = vld [vmem:[%s15626_s3 + $0x648] sm:$0xff]  ;;  %v8126_v6 = vld [vmem:[%s15626_s3 + $0x658] sm:$0xff] }
 0x276   :  { %4866 = vmatpush1.msra.mxu0 %v8035_v0  ;;  %4979 = vmatpush1.msra.mxu1 %v8037_v19  ;;  %v8123_v0 = vld [vmem:[%s15626_s3 + $0x640] sm:$0xff]  ;;  %v8125_v19 = vld [vmem:[%s15626_s3 + $0x650] sm:$0xff]  ;;  %v4648_v39 = vld [vmem:[%s15626_s3 + $0x158] sm:$0xff] }
 0x277   :  { %4320 = vmatmul.mubr.f32.gmra.mxu0 %v12770_v5  ;;  %4433 = vmatmul.mubr.f32.gmra.mxu1 %v12770_v5  ;;  %v4642_v47 = vld [vmem:[%s15626_s3 + $0x128] sm:$0xff] }
 0x278   :  { %4867 = vmatprep.subr.mxu0 %v8032_v18  ;;  %4980 = vmatprep.subr.mxu1 %v8034_v11  ;;  %v8120_v18 = vld [vmem:[%s15626_s3 + $0x628] sm:$0xff]  ;;  %v8122_v11 = vld [vmem:[%s15626_s3 + $0x638] sm:$0xff] }
 0x279   :  { %4868 = vmatpush1.msra.mxu0 %v8031_v46  ;;  %8131 = vmatprep.mubr.msk.f32.mxu0 %vm546_vm2, %v12740_v44  ;;  %v8119_v46 = vld [vmem:[%s15626_s3 + $0x620] sm:$0xff] }
 0x27a   :  { %4981 = vmatpush1.msra.mxu1 %v8033_v62  ;;  %8139 = vmatprep.mubr.msk.f32.mxu1 %vm546_vm2, %v12740_v44  ;;  %v8121_v62 = vld [vmem:[%s15626_s3 + $0x630] sm:$0xff] }
 0x27b   :  { %4869 = vmatprep.subr.mxu0 %v8028_v57  ;;  %4982 = vmatprep.subr.mxu1 %v8030_v10  ;;  %v8116_v57 = vld [vmem:[%s15626_s3 + $0x608] sm:$0xff]  ;;  %v8118_v10 = vld [vmem:[%s15626_s3 + $0x618] sm:$0xff] }
 0x27c   :  { %4870 = vmatpush1.msra.mxu0 %v8027_v25  ;;  %4983 = vmatpush1.msra.mxu1 %v8029_v4  ;;  %v8115_v25 = vld [vmem:[%s15626_s3 + $0x600] sm:$0xff]  ;;  %v8117_v4 = vld [vmem:[%s15626_s3 + $0x610] sm:$0xff] }
 0x27d   :  { %4883 = vmatprep.subr.mxu0 %v8128_v21  ;;  %4996 = vmatprep.subr.mxu1 %v8130_v56  ;;  %v8112_v21 = vld [vmem:[%s15626_s3 + $0x5e8] sm:$0xff]  ;;  %v8114_v56 = vld [vmem:[%s15626_s3 + $0x5f8] sm:$0xff] }
 0x27e   :  { %4884 = vmatpush2.msra.mxu0 %v8127_v54  ;;  %4997 = vmatpush2.msra.mxu1 %v8129_v24  ;;  %v8111_v54 = vld [vmem:[%s15626_s3 + $0x5e0] sm:$0xff]  ;;  %v8113_v24 = vld [vmem:[%s15626_s3 + $0x5f0] sm:$0xff] }
 0x27f   :  { %4885 = vmatprep.subr.mxu0 %v8124_v17  ;;  %4998 = vmatprep.subr.mxu1 %v8126_v6  ;;  %v8108_v17 = vld [vmem:[%s15626_s3 + $0x5c8] sm:$0xff]  ;;  %v8110_v6 = vld [vmem:[%s15626_s3 + $0x5d8] sm:$0xff] }
 0x280   :  { %4886 = vmatpush2.msra.mxu0 %v8123_v0  ;;  %4999 = vmatpush2.msra.mxu1 %v8125_v19  ;;  %v8107_v0 = vld [vmem:[%s15626_s3 + $0x5c0] sm:$0xff]  ;;  %v8109_v19 = vld [vmem:[%s15626_s3 + $0x5d0] sm:$0xff] }
 0x281   :  { %4887 = vmatprep.subr.mxu0 %v8120_v18  ;;  %5000 = vmatprep.subr.mxu1 %v8122_v11  ;;  %v8104_v18 = vld [vmem:[%s15626_s3 + $0x5a8] sm:$0xff]  ;;  %v8106_v11 = vld [vmem:[%s15626_s3 + $0x5b8] sm:$0xff] }
 0x282   :  { %4888 = vmatpush2.msra.mxu0 %v8119_v46  ;;  %5001 = vmatpush2.msra.mxu1 %v8121_v62  ;;  %v8103_v46 = vld [vmem:[%s15626_s3 + $0x5a0] sm:$0xff]  ;;  %v8105_v62 = vld [vmem:[%s15626_s3 + $0x5b0] sm:$0xff] }
 0x283   :  { %4889 = vmatprep.subr.mxu0 %v8116_v57  ;;  %5002 = vmatprep.subr.mxu1 %v8118_v10  ;;  %v8100_v57 = vld [vmem:[%s15626_s3 + $0x588] sm:$0xff]  ;;  %v8102_v10 = vld [vmem:[%s15626_s3 + $0x598] sm:$0xff] }
 0x284   :  { %4890 = vmatpush2.msra.mxu0 %v8115_v25  ;;  %5003 = vmatpush2.msra.mxu1 %v8117_v4  ;;  %v8099_v25 = vld [vmem:[%s15626_s3 + $0x580] sm:$0xff]  ;;  %v8101_v4 = vld [vmem:[%s15626_s3 + $0x590] sm:$0xff] }
 0x285   :  { %4891 = vmatprep.subr.mxu0 %v8112_v21  ;;  %5004 = vmatprep.subr.mxu1 %v8114_v56  ;;  %v8096_v21 = vld [vmem:[%s15626_s3 + $0x568] sm:$0xff]  ;;  %v8098_v56 = vld [vmem:[%s15626_s3 + $0x578] sm:$0xff] }
 0x286   :  { %4892 = vmatpush2.msra.mxu0 %v8111_v54  ;;  %5005 = vmatpush2.msra.mxu1 %v8113_v24  ;;  %v8095_v54 = vld [vmem:[%s15626_s3 + $0x560] sm:$0xff]  ;;  %v8097_v24 = vld [vmem:[%s15626_s3 + $0x570] sm:$0xff] }
 0x287   :  { %4893 = vmatprep.subr.mxu0 %v8108_v17  ;;  %5006 = vmatprep.subr.mxu1 %v8110_v6  ;;  %v8092_v17 = vld [vmem:[%s15626_s3 + $0x548] sm:$0xff]  ;;  %v8094_v6 = vld [vmem:[%s15626_s3 + $0x558] sm:$0xff] }
 0x288   :  { %4894 = vmatpush2.msra.mxu0 %v8107_v0  ;;  %5007 = vmatpush2.msra.mxu1 %v8109_v19  ;;  %v8091_v0 = vld [vmem:[%s15626_s3 + $0x540] sm:$0xff]  ;;  %v8093_v19 = vld [vmem:[%s15626_s3 + $0x550] sm:$0xff] }
 0x289   :  { %4895 = vmatprep.subr.mxu0 %v8104_v18  ;;  %5008 = vmatprep.subr.mxu1 %v8106_v11  ;;  %v4666_v18 = vld [vmem:[%s15626_s3 + $0x1e8] sm:$0xff]  ;;  %v4668_v11 = vld [vmem:[%s15626_s3 + $0x1f8] sm:$0xff] }
 0x28a   :  { %4896 = vmatpush2.msra.mxu0 %v8103_v46  ;;  %5009 = vmatpush2.msra.mxu1 %v8105_v62  ;;  %v12922_v46 = vpop.f32.mrf.mxu0  ;;  %v12924_v62 = vpop.f32.mrf.mxu1 }
 0x28b   :  { %4897 = vmatprep.subr.mxu0 %v8100_v57  ;;  %5010 = vmatprep.subr.mxu1 %v8102_v10  ;;  %15677 = vst [vmem:[#allocation36_spill] sm:$0xff] %v12922_v46  ;;  %15678 = vst [vmem:[#allocation37_spill] sm:$0xff] %v12924_v62  ;;  %v4665_v57 = vld [vmem:[%s15626_s3 + $0x1e0] sm:$0xff]  ;;  %v4667_v10 = vld [vmem:[%s15626_s3 + $0x1f0] sm:$0xff] }
 0x28c   :  { %4898 = vmatpush2.msra.mxu0 %v8099_v25  ;;  %5011 = vmatpush2.msra.mxu1 %v8101_v4  ;;  %v12934_v25 = vpop.f32.mrf.mxu0  ;;  %v12936_v4 = vpop.f32.mrf.mxu1  ;;  %v13126_v62 = vld [vmem:[#allocation2 + $0x160] sm:$0xff]  ;;  %v4620_v46 = vld [vmem:[%s15626_s3 + $0x78] sm:$0xff] }
 0x28d   :  { %4899 = vmatprep.subr.mxu0 %v8096_v21  ;;  %5012 = vmatprep.subr.mxu1 %v8098_v56  ;;  %v12938_v21 = vld [vmem:[#allocation2 + $0x128] sm:$0xff] }
 0x28e   :  { %4900 = vmatpush2.msra.mxu0 %v8095_v54  ;;  %5013 = vmatpush2.msra.mxu1 %v8097_v24  ;;  %v4662_v56 = vld [vmem:[%s15626_s3 + $0x1c8] sm:$0xff]  ;;  %v4664_v54 = vld [vmem:[%s15626_s3 + $0x1d8] sm:$0xff]  ;;  %v4661_v24 = vld [vmem:[%s15626_s3 + $0x1c0] sm:$0xff] }
 0x28f   :  { %4901 = vmatprep.subr.mxu0 %v8092_v17  ;;  %5014 = vmatprep.subr.mxu1 %v8094_v6  ;;  %v4663_v17 = vld [vmem:[%s15626_s3 + $0x1d0] sm:$0xff]  ;;  %v4658_v6 = vld [vmem:[%s15626_s3 + $0x1a8] sm:$0xff] }
 0x290   :  { %4902 = vmatpush2.msra.mxu0 %v8091_v0  ;;  %5015 = vmatpush2.msra.mxu1 %v8093_v19  ;;  %v4660_v0 = vld [vmem:[%s15626_s3 + $0x1b8] sm:$0xff]  ;;  %v12962_v19 = vpop.f32.mrf.mxu0 }
 0x291   :  { %4904 = vmatmul.mubr.f32.vlgmr.msra.gmra.mxu0 %v12770_v5  ;;  %5017 = vmatmul.mubr.f32.vlgmr.msra.gmra.mxu1 %v12770_v5  ;;  %15679 = vst [vmem:[#allocation38_spill] sm:$0xff] %v12962_v19  ;;  %v4634_v19 = vld [vmem:[%s15626_s3 + $0xe8] sm:$0xff] }
 0x292   :  { %5068 = vmatprep.subr.mxu0 %v4666_v18  ;;  %5181 = vmatprep.subr.mxu1 %v4668_v11  ;;  %v12964_v18 = vpop.f32.mrf.mxu1  ;;  %v12966_v11 = vld [vmem:[#allocation2 + $0x120] sm:$0xff] }
 0x293   :  { %8132 = vmatprep.mubr.msk.f32.mxu0 %vm546_vm2, %v12938_v21  ;;  %8140 = vmatprep.mubr.msk.f32.mxu1 %vm546_vm2, %v12938_v21  ;;  %15680 = vst [vmem:[#allocation39_spill] sm:$0xff] %v12964_v18 }
 0x294   :  { %5069 = vmatpush1.msra.mxu0 %v4665_v57  ;;  %5182 = vmatpush1.msra.mxu1 %v4667_v10  ;;  %v4657_v57 = vld [vmem:[%s15626_s3 + $0x1a0] sm:$0xff]  ;;  %v4659_v10 = vld [vmem:[%s15626_s3 + $0x1b0] sm:$0xff]  ;;  %v12996_v9 = vpop.f32.mrf.mxu1 }
 0x295   :  { %5070 = vmatprep.subr.mxu0 %v4662_v56  ;;  %5183 = vmatprep.subr.mxu1 %v4664_v54  ;;  %v12976_v56 = vld [vmem:[#allocation2 + $0x138] sm:$0xff]  ;;  %v4654_v54 = vld [vmem:[%s15626_s3 + $0x188] sm:$0xff] }
 0x296   :  { %5071 = vmatpush1.msra.mxu0 %v4661_v24  ;;  %5184 = vmatpush1.msra.mxu1 %v4663_v17  ;;  %v4656_v24 = vld [vmem:[%s15626_s3 + $0x198] sm:$0xff]  ;;  %v4653_v17 = vld [vmem:[%s15626_s3 + $0x180] sm:$0xff] }
 0x297   :  { %4910 = vmatmul.mubr.f32.gmra.mxu0 %v12966_v11  ;;  %5023 = vmatmul.mubr.f32.gmra.mxu1 %v12966_v11 }
 0x298   :  { %5072 = vmatprep.subr.mxu0 %v4658_v6  ;;  %5185 = vmatprep.subr.mxu1 %v4660_v0  ;;  %v4655_v6 = vld [vmem:[%s15626_s3 + $0x190] sm:$0xff]  ;;  %v12994_v0 = vpop.f32.mrf.mxu0 }
 0x299   :  { %8133 = vmatprep.mubr.msk.f32.mxu0 %vm546_vm2, %v12976_v56  ;;  %8141 = vmatprep.mubr.msk.f32.mxu1 %vm546_vm2, %v12976_v56 }
 0x29a   :  { %5073 = vmatpush1.msra.mxu0 %v4657_v57  ;;  %5186 = vmatpush1.msra.mxu1 %v4659_v10  ;;  %v4649_v57 = vld [vmem:[%s15626_s3 + $0x160] sm:$0xff]  ;;  %v4651_v10 = vld [vmem:[%s15626_s3 + $0x170] sm:$0xff] }
 0x29b   :  { %5074 = vmatprep.subr.mxu0 %v4654_v54  ;;  %5187 = vmatprep.subr.mxu1 %v4656_v24  ;;  %v13014_v54 = vpop.f32.mrf.mxu0  ;;  %v13016_v24 = vpop.f32.mrf.mxu1 }
 0x29c   :  { %5075 = vmatpush1.msra.mxu0 %v4653_v17  ;;  %5188 = vmatpush1.msra.mxu1 %v4655_v6  ;;  %15681 = vst [vmem:[#allocation40_spill] sm:$0xff] %v13014_v54  ;;  %15682 = vst [vmem:[#allocation41_spill] sm:$0xff] %v13016_v24  ;;  %v13018_v17 = vld [vmem:[#allocation2 + $0x148] sm:$0xff]  ;;  %v13046_v24 = vld [vmem:[#allocation2 + $0x140] sm:$0xff] }
 0x29d   :  { %4916 = vmatmul.mubr.f32.gmra.mxu0 %v13004_v34  ;;  %5029 = vmatmul.mubr.f32.gmra.mxu1 %v13004_v34  ;;  %v4646_v6 = vld [vmem:[%s15626_s3 + $0x148] sm:$0xff]  ;;  %v13042_v23 = vpop.f32.mrf.mxu0  ;;  %v13044_v18 = vpop.f32.mrf.mxu1 }
 0x29e   :  { %5076 = vmatprep.subr.mxu0 %v4650_v48  ;;  %5189 = vmatprep.subr.mxu1 %v4652_v63  ;;  %v4645_v63 = vld [vmem:[%s15626_s3 + $0x140] sm:$0xff]  ;;  %v4647_v48 = vld [vmem:[%s15626_s3 + $0x150] sm:$0xff] }
 0x29f   :  { %8134 = vmatprep.mubr.msk.f32.mxu0 %vm546_vm2, %v13018_v17  ;;  %8142 = vmatprep.mubr.msk.f32.mxu1 %vm546_vm2, %v13018_v17  ;;  %v13076_v54 = vpop.f32.mrf.mxu1 }
 0x2a0   :  { %5077 = vmatpush1.msra.mxu0 %v4649_v57  ;;  %5190 = vmatpush1.msra.mxu1 %v4651_v10  ;;  %v4643_v57 = vld [vmem:[%s15626_s3 + $0x130] sm:$0xff]  ;;  %v13056_v10 = vld [vmem:[#allocation2 + $0x158] sm:$0xff]  ;;  %15684 = vst [vmem:[#allocation43_spill] sm:$0xff] %v13076_v54 }
 0x2a1   :  { %5078 = vmatprep.subr.mxu0 %v4646_v6  ;;  %5191 = vmatprep.subr.mxu1 %v4648_v39  ;;  %v4641_v39 = vld [vmem:[%s15626_s3 + $0x120] sm:$0xff]  ;;  %v4638_v6 = vld [vmem:[%s15626_s3 + $0x108] sm:$0xff]  ;;  %v4632_v54 = vld [vmem:[%s15626_s3 + $0xd8] sm:$0xff] }
 0x2a2   :  { %5079 = vmatpush1.msra.mxu0 %v4645_v63  ;;  %5192 = vmatpush1.msra.mxu1 %v4647_v48  ;;  %v4640_v63 = vld [vmem:[%s15626_s3 + $0x118] sm:$0xff]  ;;  %v13074_v48 = vpop.f32.mrf.mxu0 }
 0x2a3   :  { %4922 = vmatmul.mubr.f32.gmra.mxu0 %v13046_v24  ;;  %5035 = vmatmul.mubr.f32.gmra.mxu1 %v13046_v24  ;;  %15683 = vst [vmem:[#allocation42_spill] sm:$0xff] %v13074_v48  ;;  %v4626_v48 = vld [vmem:[%s15626_s3 + $0xa8] sm:$0xff] }
 0x2a4   :  { %5080 = vmatprep.subr.mxu0 %v4642_v47  ;;  %5193 = vmatprep.subr.mxu1 %v4644_v13  ;;  %v4637_v13 = vld [vmem:[%s15626_s3 + $0x100] sm:$0xff]  ;;  %v4639_v47 = vld [vmem:[%s15626_s3 + $0x110] sm:$0xff] }
 0x2a5   :  { %8135 = vmatprep.mubr.msk.f32.mxu0 %vm546_vm2, %v13056_v10  ;;  %8143 = vmatprep.mubr.msk.f32.mxu1 %vm546_vm2, %v13056_v10 }
 0x2a6   :  { %5081 = vmatpush1.msra.mxu0 %v4641_v39  ;;  %5194 = vmatpush1.msra.mxu1 %v4643_v57  ;;  %v4633_v39 = vld [vmem:[%s15626_s3 + $0xe0] sm:$0xff]  ;;  %v4635_v57 = vld [vmem:[%s15626_s3 + $0xf0] sm:$0xff] }
 0x2a7   :  { %5082 = vmatprep.subr.mxu0 %v4638_v6  ;;  %5195 = vmatprep.subr.mxu1 %v4640_v63  ;;  %v13094_v6 = vpop.f32.mrf.mxu0  ;;  %v13096_v63 = vpop.f32.mrf.mxu1 }
 0x2a8   :  { %5083 = vmatpush1.msra.mxu0 %v4637_v13  ;;  %5196 = vmatpush1.msra.mxu1 %v4639_v47  ;;  %v13098_v13 = vld [vmem:[#allocation2 + $0x168] sm:$0xff] }
 0x2a9   :  { %4928 = vmatmul.mubr.f32.gmra.mxu0 %v13084_v51  ;;  %5041 = vmatmul.mubr.f32.gmra.mxu1 %v13084_v51  ;;  %v4630_v47 = vld [vmem:[%s15626_s3 + $0xc8] sm:$0xff]  ;;  %v13122_v30 = vpop.f32.mrf.mxu0  ;;  %v13124_v26 = vpop.f32.mrf.mxu1 }
 0x2aa   :  { %5084 = vmatprep.subr.mxu0 %v4634_v19  ;;  %5197 = vmatprep.subr.mxu1 %v4636_v15  ;;  %v4629_v15 = vld [vmem:[%s15626_s3 + $0xc0] sm:$0xff]  ;;  %v4631_v19 = vld [vmem:[%s15626_s3 + $0xd0] sm:$0xff]  ;;  %15685 = vst [vmem:[#allocation44_spill] sm:$0xff] %v13122_v30  ;;  %15686 = vst [vmem:[#allocation45_spill] sm:$0xff] %v13124_v26 }
 0x2ab   :  { %8136 = vmatprep.mubr.msk.f32.mxu0 %vm546_vm2, %v13098_v13  ;;  %8144 = vmatprep.mubr.msk.f32.mxu1 %vm546_vm2, %v13098_v13  ;;  %v13156_v26 = vpop.f32.mrf.mxu1  ;;  %v4618_v30 = vld [vmem:[%s15626_s3 + $0x68] sm:$0xff] }
 0x2ac   :  { %5085 = vmatpush1.msra.mxu0 %v4633_v39  ;;  %5198 = vmatpush1.msra.mxu1 %v4635_v57  ;;  %v4627_v39 = vld [vmem:[%s15626_s3 + $0xb0] sm:$0xff]  ;;  %v13136_v57 = vld [vmem:[#allocation2 + $0x178] sm:$0xff] }
 0x2ad   :  { %5086 = vmatprep.subr.mxu0 %v4630_v47  ;;  %5199 = vmatprep.subr.mxu1 %v4632_v54  ;;  %v4625_v54 = vld [vmem:[%s15626_s3 + $0xa0] sm:$0xff]  ;;  %v4622_v47 = vld [vmem:[%s15626_s3 + $0x88] sm:$0xff] }
 0x2ae   :  { %5087 = vmatpush1.msra.mxu0 %v4629_v15  ;;  %5200 = vmatpush1.msra.mxu1 %v4631_v19  ;;  %v4624_v15 = vld [vmem:[%s15626_s3 + $0x98] sm:$0xff]  ;;  %v13154_v19 = vpop.f32.mrf.mxu0 }
 0x2af   :  { %4934 = vmatmul.mubr.f32.gmra.mxu0 %v13126_v62  ;;  %5047 = vmatmul.mubr.f32.gmra.mxu1 %v13126_v62 }
 0x2b0   :  { %5088 = vmatprep.subr.mxu0 %v4626_v48  ;;  %5201 = vmatprep.subr.mxu1 %v4628_v49  ;;  %v4621_v49 = vld [vmem:[%s15626_s3 + $0x80] sm:$0xff]  ;;  %v4623_v48 = vld [vmem:[%s15626_s3 + $0x90] sm:$0xff] }
 0x2b1   :  { %8137 = vmatprep.mubr.msk.f32.mxu0 %vm546_vm2, %v13136_v57  ;;  %8145 = vmatprep.mubr.msk.f32.mxu1 %vm546_vm2, %v13136_v57 }
 0x2b2   :  { %5089 = vmatpush1.msra.mxu0 %v4625_v54  ;;  %5202 = vmatpush1.msra.mxu1 %v4627_v39  ;;  %v4617_v54 = vld [vmem:[%s15626_s3 + $0x60] sm:$0xff]  ;;  %v4619_v39 = vld [vmem:[%s15626_s3 + $0x70] sm:$0xff] }
 0x2b3   :  { %5090 = vmatprep.subr.mxu0 %v4622_v47  ;;  %5203 = vmatprep.subr.mxu1 %v4624_v15  ;;  %v13174_v47 = vpop.f32.mrf.mxu0  ;;  %v13176_v15 = vpop.f32.mrf.mxu1 }
 0x2b4   :  { %5091 = vmatpush1.msra.mxu0 %v4621_v49  ;;  %5204 = vmatpush1.msra.mxu1 %v4623_v48  ;;  %15687 = vst [vmem:[#allocation46_spill] sm:$0xff] %v13174_v47  ;;  %15688 = vst [vmem:[#allocation47_spill] sm:$0xff] %v13176_v15  ;;  %v4710_v49 = vld [vmem:[#allocation2 + $0x188] sm:$0xff]  ;;  %v4613_v47 = vld [vmem:[%s15626_s3 + $0x40] sm:$0xff] }
 0x2b5   :  { %4940 = vmatmul.mubr.f32.gmra.mxu0 %v13164_v28  ;;  %5053 = vmatmul.mubr.f32.gmra.mxu1 %v13164_v28  ;;  %v4614_v48 = vld [vmem:[%s15626_s3 + $0x48] sm:$0xff]  ;;  %v13198_v15 = vpop.f32.mrf.mxu0  ;;  %v13200_v38 = vpop.f32.mrf.mxu1 }
 0x2b6   :  { %5092 = vmatprep.subr.mxu0 %v4618_v30  ;;  %5205 = vmatprep.subr.mxu1 %v4620_v46  ;;  %v4615_v30 = vld [vmem:[%s15626_s3 + $0x50] sm:$0xff]  ;;  %v4610_v46 = vld [vmem:[%s15626_s3 + $0x28] sm:$0xff]  ;;  %15689 = vst [vmem:[#allocation48_spill] sm:$0xff] %v13198_v15  ;;  %15690 = vst [vmem:[#allocation49_spill] sm:$0xff] %v13200_v38 }
 0x2b7   :  { %8138 = vmatprep.mubr.msk.f32.mxu0 %vm546_vm2, %v4710_v49  ;;  %8146 = vmatprep.mubr.msk.f32.mxu1 %vm546_vm2, %v4710_v49  ;;  %v4612_v49 = vld [vmem:[%s15626_s3 + $0x38] sm:$0xff]  ;;  %v4671_v38 = vld [vmem:[%s15626_s3 + $0x210] sm:$0xff]  ;;  %v4589_v15 = vld [vmem:[#allocation2 + $0x100] sm:$0xff] }
 0x2b8   :  { %5093 = vmatpush1.msra.mxu0 %v4617_v54  ;;  %5206 = vmatpush1.msra.mxu1 %v4619_v39  ;;  %v4609_v54 = vld [vmem:[%s15626_s3 + $0x20] sm:$0xff]  ;;  %v4606_v39 = vld [vmem:[%s15626_s3 + $0x8] sm:$0xff] }
 0x2b9   :  { %5094 = vmatprep.subr.mxu0 %v4614_v48  ;;  %5207 = vmatprep.subr.mxu1 %v4616_v45  ;;  %v4611_v45 = vld [vmem:[%s15626_s3 + $0x30] sm:$0xff] }
 0x2ba   :  { %5095 = vmatpush1.msra.mxu0 %v4613_v47  ;;  %5208 = vmatpush1.msra.mxu1 %v4615_v30  ;;  %v4608_v47 = vld [vmem:[%s15626_s3 + $0x18] sm:$0xff]  ;;  %v4607_v48 = vld [vmem:[%s15626_s3 + $0x10] sm:$0xff]  ;;  %v13222_v30 = vpop.f32.mrf.mxu0 }
 0x2bb   :  { %4946 = vmatmul.mubr.f32.gmra.mxu0 %v4709_v33  ;;  %5059 = vmatmul.mubr.f32.gmra.mxu1 %v4709_v33  ;;  %v4605_v33 = vld [vmem:[%s15626_s3] sm:$0xff]  ;;  %15691 = vst [vmem:[#allocation50_spill] sm:$0xff] %v13222_v30 }
 0x2bc   :  { %5096 = vmatprep.subr.mxu0 %v4610_v46  ;;  %5209 = vmatprep.subr.mxu1 %v4612_v49  ;;  %v13224_v46 = vpop.f32.mrf.mxu1  ;;  %v4706_v49 = vld [vmem:[%s15626_s3 + $0x328] sm:$0xff]  ;;  %v4705_v30 = vld [vmem:[%s15626_s3 + $0x320] sm:$0xff] }
 0x2bd   :  { %5097 = vmatpush1.msra.mxu0 %v4609_v54  ;;  %8147 = vmatprep.mubr.msk.f32.mxu0 %vm546_vm2, %v12705_v58  ;;  %15692 = vst [vmem:[#allocation51_spill] sm:$0xff] %v13224_v46  ;;  %v4708_v54 = vld [vmem:[%s15626_s3 + $0x338] sm:$0xff] }
 0x2be   :  { %5210 = vmatpush1.msra.mxu1 %v4611_v45  ;;  %8155 = vmatprep.mubr.msk.f32.mxu1 %vm546_vm2, %v12705_v58  ;;  %v4707_v45 = vld [vmem:[%s15626_s3 + $0x330] sm:$0xff]  ;;  %v4702_v58 = vld [vmem:[%s15626_s3 + $0x308] sm:$0xff]  ;;  %v4704_v46 = vld [vmem:[%s15626_s3 + $0x318] sm:$0xff] }
 0x2bf   :  { %5098 = vmatprep.subr.mxu0 %v4606_v39  ;;  %5211 = vmatprep.subr.mxu1 %v4608_v47  ;;  %v4701_v39 = vld [vmem:[%s15626_s3 + $0x300] sm:$0xff]  ;;  %v4703_v47 = vld [vmem:[%s15626_s3 + $0x310] sm:$0xff] }
 0x2c0   :  { %5099 = vmatpush1.msra.mxu0 %v4605_v33  ;;  %5212 = vmatpush1.msra.mxu1 %v4607_v48  ;;  %v13252_v33 = vpop.f32.mrf.mxu0  ;;  %v13254_v48 = vpop.f32.mrf.mxu1 }
 0x2c1   :  { %5112 = vmatprep.subr.mxu0 %v4706_v49  ;;  %5225 = vmatprep.subr.mxu1 %v4708_v54  ;;  %15693 = vst [vmem:[#allocation52_spill] sm:$0xff] %v13252_v33  ;;  %15694 = vst [vmem:[#allocation53_spill] sm:$0xff] %v13254_v48  ;;  %v4700_v49 = vld [vmem:[%s15626_s3 + $0x2f8] sm:$0xff]  ;;  %v4697_v54 = vld [vmem:[%s15626_s3 + $0x2e0] sm:$0xff] }
 0x2c2   :  { %5113 = vmatpush2.msra.mxu0 %v4705_v30  ;;  %5226 = vmatpush2.msra.mxu1 %v4707_v45  ;;  %v4699_v48 = vld [vmem:[%s15626_s3 + $0x2f0] sm:$0xff]  ;;  %v4694_v30 = vld [vmem:[%s15626_s3 + $0x2c8] sm:$0xff]  ;;  %v4696_v45 = vld [vmem:[%s15626_s3 + $0x2d8] sm:$0xff] }
 0x2c3   :  { %5114 = vmatprep.subr.mxu0 %v4702_v58  ;;  %5227 = vmatprep.subr.mxu1 %v4704_v46  ;;  %v4693_v46 = vld [vmem:[%s15626_s3 + $0x2c0] sm:$0xff]  ;;  %v4695_v58 = vld [vmem:[%s15626_s3 + $0x2d0] sm:$0xff]  ;;  %v4690_v33 = vld [vmem:[%s15626_s3 + $0x2a8] sm:$0xff] }
 0x2c4   :  { %5115 = vmatpush2.msra.mxu0 %v4701_v39  ;;  %5228 = vmatpush2.msra.mxu1 %v4703_v47  ;;  %v13280_v39 = vpop.f32.mrf.mxu0  ;;  %v13282_v47 = vpop.f32.mrf.mxu1 }
 0x2c5   :  { %5116 = vmatprep.subr.mxu0 %v4698_v31  ;;  %5229 = vmatprep.subr.mxu1 %v4700_v49  ;;  %15695 = vst [vmem:[#allocation54_spill] sm:$0xff] %v13280_v39  ;;  %15696 = vst [vmem:[#allocation55_spill] sm:$0xff] %v13282_v47  ;;  %v4692_v31 = vld [vmem:[%s15626_s3 + $0x2b8] sm:$0xff]  ;;  %v4689_v49 = vld [vmem:[%s15626_s3 + $0x2a0] sm:$0xff] }
 0x2c6   :  { %5117 = vmatpush2.msra.mxu0 %v4697_v54  ;;  %5230 = vmatpush2.msra.mxu1 %v4699_v48  ;;  %v4691_v47 = vld [vmem:[%s15626_s3 + $0x2b0] sm:$0xff]  ;;  %v4686_v48 = vld [vmem:[%s15626_s3 + $0x288] sm:$0xff]  ;;  %v4688_v54 = vld [vmem:[%s15626_s3 + $0x298] sm:$0xff] }
 0x2c7   :  { %5118 = vmatprep.subr.mxu0 %v4694_v30  ;;  %5231 = vmatprep.subr.mxu1 %v4696_v45  ;;  %v4685_v30 = vld [vmem:[%s15626_s3 + $0x280] sm:$0xff]  ;;  %v4687_v45 = vld [vmem:[%s15626_s3 + $0x290] sm:$0xff]  ;;  %v4682_v39 = vld [vmem:[%s15626_s3 + $0x268] sm:$0xff] }
 0x2c8   :  { %5119 = vmatpush2.msra.mxu0 %v4693_v46  ;;  %5232 = vmatpush2.msra.mxu1 %v4695_v58  ;;  %v13308_v46 = vpop.f32.mrf.mxu0  ;;  %v13310_v58 = vpop.f32.mrf.mxu1 }
 0x2c9   :  { %5120 = vmatprep.subr.mxu0 %v4690_v33  ;;  %5233 = vmatprep.subr.mxu1 %v4692_v31  ;;  %15697 = vst [vmem:[#allocation56_spill] sm:$0xff] %v13308_v46  ;;  %15698 = vst [vmem:[#allocation57_spill] sm:$0xff] %v13310_v58  ;;  %v4684_v33 = vld [vmem:[%s15626_s3 + $0x278] sm:$0xff]  ;;  %v4681_v31 = vld [vmem:[%s15626_s3 + $0x260] sm:$0xff] }
 0x2ca   :  { %5121 = vmatpush2.msra.mxu0 %v4689_v49  ;;  %5234 = vmatpush2.msra.mxu1 %v4691_v47  ;;  %v4683_v58 = vld [vmem:[%s15626_s3 + $0x270] sm:$0xff]  ;;  %v4678_v47 = vld [vmem:[%s15626_s3 + $0x248] sm:$0xff]  ;;  %v4680_v49 = vld [vmem:[%s15626_s3 + $0x258] sm:$0xff] }
 0x2cb   :  { %5122 = vmatprep.subr.mxu0 %v4686_v48  ;;  %5235 = vmatprep.subr.mxu1 %v4688_v54  ;;  %v4677_v48 = vld [vmem:[%s15626_s3 + $0x240] sm:$0xff]  ;;  %v4679_v54 = vld [vmem:[%s15626_s3 + $0x250] sm:$0xff]  ;;  %v4674_v46 = vld [vmem:[%s15626_s3 + $0x228] sm:$0xff] }
 0x2cc   :  { %5123 = vmatpush2.msra.mxu0 %v4685_v30  ;;  %5236 = vmatpush2.msra.mxu1 %v4687_v45  ;;  %v13336_v30 = vpop.f32.mrf.mxu0  ;;  %v13338_v45 = vpop.f32.mrf.mxu1 }
 0x2cd   :  { %5124 = vmatprep.subr.mxu0 %v4682_v39  ;;  %5237 = vmatprep.subr.mxu1 %v4684_v33  ;;  %15699 = vst [vmem:[#allocation58_spill] sm:$0xff] %v13336_v30  ;;  %15700 = vst [vmem:[#allocation59_spill] sm:$0xff] %v13338_v45  ;;  %v4676_v39 = vld [vmem:[%s15626_s3 + $0x238] sm:$0xff]  ;;  %v4673_v33 = vld [vmem:[%s15626_s3 + $0x220] sm:$0xff] }
 0x2ce   :  { %5125 = vmatpush2.msra.mxu0 %v4681_v31  ;;  %5238 = vmatpush2.msra.mxu1 %v4683_v58  ;;  %v4675_v45 = vld [vmem:[%s15626_s3 + $0x230] sm:$0xff]  ;;  %v13352_v31 = vpop.f32.mrf.mxu0  ;;  %v13354_v58 = vpop.f32.mrf.mxu1  ;;  %v4670_v30 = vld [vmem:[%s15626_s3 + $0x208] sm:$0xff] }
 0x2cf   :  { %5126 = vmatprep.subr.mxu0 %v4678_v47  ;;  %5239 = vmatprep.subr.mxu1 %v4680_v49  ;;  %v4672_v47 = vld [vmem:[%s15626_s3 + $0x218] sm:$0xff]  ;;  %v4669_v49 = vld [vmem:[%s15626_s3 + $0x200] sm:$0xff] }
 0x2d0   :  { %5127 = vmatpush2.msra.mxu0 %v4677_v48  ;;  %5240 = vmatpush2.msra.mxu1 %v4679_v54  ;;  %v8224_v48 = vld [vmem:[%s15626_s3 + $0x868] sm:$0xff]  ;;  %v13374_v54 = vpop.f32.mrf.mxu0 }
 0x2d1   :  { %5128 = vmatprep.subr.mxu0 %v4674_v46  ;;  %5241 = vmatprep.subr.mxu1 %v4676_v39  ;;  %v8226_v46 = vld [vmem:[%s15626_s3 + $0x878] sm:$0xff]  ;;  %15701 = vst [vmem:[#allocation60_spill] sm:$0xff] %v13374_v54  ;;  %v13376_v39 = vpop.f32.mrf.mxu1  ;;  %v8252_v54 = vld [vmem:[%s15626_s3 + $0x948] sm:$0xff] }
 0x2d2   :  { %5129 = vmatpush2.msra.mxu0 %v4673_v33  ;;  %5242 = vmatpush2.msra.mxu1 %v4675_v45  ;;  %15702 = vst [vmem:[#allocation61_spill] sm:$0xff] %v13376_v39  ;;  %v8225_v45 = vld [vmem:[%s15626_s3 + $0x870] sm:$0xff]  ;;  %v8220_v33 = vld [vmem:[%s15626_s3 + $0x848] sm:$0xff]  ;;  %v8210_v39 = vld [vmem:[%s15626_s3 + $0x7f8] sm:$0xff] }
 0x2d3   :  { %5130 = vmatprep.subr.mxu0 %v4670_v30  ;;  %5243 = vmatprep.subr.mxu1 %v4672_v47  ;;  %v8223_v30 = vld [vmem:[%s15626_s3 + $0x860] sm:$0xff]  ;;  %v8221_v47 = vld [vmem:[%s15626_s3 + $0x850] sm:$0xff] }
 0x2d4   :  { %5131 = vmatpush2.msra.mxu0 %v4669_v49  ;;  %5244 = vmatpush2.msra.mxu1 %v4671_v38  ;;  %v8222_v38 = vld [vmem:[%s15626_s3 + $0x858] sm:$0xff]  ;;  %v13400_v49 = vpop.f32.mrf.mxu0 }
 0x2d5   :  { %5133 = vmatmul.mubr.f32.vlgmr.msra.gmra.mxu0 %v4589_v15  ;;  %5246 = vmatmul.mubr.f32.vlgmr.msra.gmra.mxu1 %v4589_v15  ;;  %v8219_v15 = vld [vmem:[%s15626_s3 + $0x840] sm:$0xff] }
 0x2d6   :  { %5438 = vmatprep.subr.mxu0 %v8224_v48  ;;  %5551 = vmatprep.subr.mxu1 %v8226_v46  ;;  %v13402_v48 = vpop.f32.mrf.mxu1  ;;  %v8218_v46 = vld [vmem:[%s15626_s3 + $0x838] sm:$0xff] }
 0x2d7   :  { %8148 = vmatprep.mubr.msk.f32.mxu0 %vm546_vm2, %v12740_v44  ;;  %8156 = vmatprep.mubr.msk.f32.mxu1 %vm546_vm2, %v12740_v44  ;;  %v8216_v44 = vld [vmem:[%s15626_s3 + $0x828] sm:$0xff] }
 0x2d8   :  { %5439 = vmatpush1.msra.mxu0 %v8223_v30  ;;  %5552 = vmatpush1.msra.mxu1 %v8225_v45  ;;  %v8215_v30 = vld [vmem:[%s15626_s3 + $0x820] sm:$0xff]  ;;  %v8217_v45 = vld [vmem:[%s15626_s3 + $0x830] sm:$0xff] }
 0x2d9   :  { %5440 = vmatprep.subr.mxu0 %v8220_v33  ;;  %5553 = vmatprep.subr.mxu1 %v8222_v38  ;;  %v13418_v33 = vpop.f32.mrf.mxu0  ;;  %v13420_v38 = vpop.f32.mrf.mxu1 }
 0x2da   :  { %5441 = vmatpush1.msra.mxu0 %v8219_v15  ;;  %5554 = vmatpush1.msra.mxu1 %v8221_v47  ;;  %15703 = vst [vmem:[#allocation62_spill] sm:$0xff] %v13418_v33  ;;  %15704 = vst [vmem:[#allocation63_spill] sm:$0xff] %v13420_v38  ;;  %v8212_v15 = vld [vmem:[%s15626_s3 + $0x808] sm:$0xff]  ;;  %v8211_v47 = vld [vmem:[%s15626_s3 + $0x800] sm:$0xff] }
 0x2db   :  { %5139 = vmatmul.mubr.f32.gmra.mxu0 %v12770_v5  ;;  %5252 = vmatmul.mubr.f32.gmra.mxu1 %v12770_v5  ;;  %v8214_v5 = vld [vmem:[%s15626_s3 + $0x818] sm:$0xff]  ;;  %v13444_v38 = vpop.f32.mrf.mxu0  ;;  %v13446_v33 = vpop.f32.mrf.mxu1 }
 0x2dc   :  { %5442 = vmatprep.subr.mxu0 %v8216_v44  ;;  %5555 = vmatprep.subr.mxu1 %v8218_v46  ;;  %v8213_v44 = vld [vmem:[%s15626_s3 + $0x810] sm:$0xff]  ;;  %v8208_v46 = vld [vmem:[%s15626_s3 + $0x7e8] sm:$0xff] }
 0x2dd   :  { %8149 = vmatprep.mubr.msk.f32.mxu0 %vm546_vm2, %v12938_v21  ;;  %8157 = vmatprep.mubr.msk.f32.mxu1 %vm546_vm2, %v12938_v21 }
 0x2de   :  { %5443 = vmatpush1.msra.mxu0 %v8215_v30  ;;  %5556 = vmatpush1.msra.mxu1 %v8217_v45  ;;  %v8207_v30 = vld [vmem:[%s15626_s3 + $0x7e0] sm:$0xff]  ;;  %v8209_v45 = vld [vmem:[%s15626_s3 + $0x7f0] sm:$0xff] }
 0x2df   :  { %5444 = vmatprep.subr.mxu0 %v8212_v15  ;;  %5557 = vmatprep.subr.mxu1 %v8214_v5  ;;  %v8204_v15 = vld [vmem:[%s15626_s3 + $0x7c8] sm:$0xff]  ;;  %v8206_v5 = vld [vmem:[%s15626_s3 + $0x7d8] sm:$0xff] }
 0x2e0   :  { %5445 = vmatpush1.msra.mxu0 %v8211_v47  ;;  %5558 = vmatpush1.msra.mxu1 %v8213_v44  ;;  %v13472_v47 = vpop.f32.mrf.mxu0  ;;  %v13474_v44 = vpop.f32.mrf.mxu1 }
 0x2e1   :  { %5145 = vmatmul.mubr.f32.gmra.mxu0 %v12966_v11  ;;  %5258 = vmatmul.mubr.f32.gmra.mxu1 %v12966_v11  ;;  %v8203_v11 = vld [vmem:[%s15626_s3 + $0x7c0] sm:$0xff]  ;;  %15705 = vst [vmem:[#allocation64_spill] sm:$0xff] %v13472_v47  ;;  %15706 = vst [vmem:[#allocation65_spill] sm:$0xff] %v13474_v44 }
 0x2e2   :  { %5446 = vmatprep.subr.mxu0 %v8208_v46  ;;  %5559 = vmatprep.subr.mxu1 %v8210_v39  ;;  %v8205_v39 = vld [vmem:[%s15626_s3 + $0x7d0] sm:$0xff]  ;;  %v8202_v46 = vld [vmem:[%s15626_s3 + $0x7b8] sm:$0xff] }
 0x2e3   :  { %8150 = vmatprep.mubr.msk.f32.mxu0 %vm546_vm2, %v12976_v56  ;;  %8158 = vmatprep.mubr.msk.f32.mxu1 %vm546_vm2, %v12976_v56  ;;  %v8200_v56 = vld [vmem:[%s15626_s3 + $0x7a8] sm:$0xff] }
 0x2e4   :  { %5447 = vmatpush1.msra.mxu0 %v8207_v30  ;;  %5560 = vmatpush1.msra.mxu1 %v8209_v45  ;;  %v8199_v30 = vld [vmem:[%s15626_s3 + $0x7a0] sm:$0xff]  ;;  %v8201_v45 = vld [vmem:[%s15626_s3 + $0x7b0] sm:$0xff] }
 0x2e5   :  { %5448 = vmatprep.subr.mxu0 %v8204_v15  ;;  %5561 = vmatprep.subr.mxu1 %v8206_v5  ;;  %v13490_v15 = vpop.f32.mrf.mxu0  ;;  %v13492_v5 = vpop.f32.mrf.mxu1 }
 0x2e6   :  { %5449 = vmatpush1.msra.mxu0 %v8203_v11  ;;  %5562 = vmatpush1.msra.mxu1 %v8205_v39  ;;  %v8196_v11 = vld [vmem:[%s15626_s3 + $0x788] sm:$0xff]  ;;  %v8195_v39 = vld [vmem:[%s15626_s3 + $0x780] sm:$0xff] }
 0x2e7   :  { %5151 = vmatmul.mubr.f32.gmra.mxu0 %v13004_v34  ;;  %5264 = vmatmul.mubr.f32.gmra.mxu1 %v13004_v34  ;;  %v8198_v34 = vld [vmem:[%s15626_s3 + $0x798] sm:$0xff]  ;;  %v13516_v44 = vpop.f32.mrf.mxu0  ;;  %v13518_v47 = vpop.f32.mrf.mxu1 }
 0x2e8   :  { %5450 = vmatprep.subr.mxu0 %v8200_v56  ;;  %5563 = vmatprep.subr.mxu1 %v8202_v46  ;;  %v8197_v56 = vld [vmem:[%s15626_s3 + $0x790] sm:$0xff]  ;;  %v8192_v46 = vld [vmem:[%s15626_s3 + $0x768] sm:$0xff]  ;;  %15707 = vst [vmem:[#allocation66_spill] sm:$0xff] %v13516_v44  ;;  %15708 = vst [vmem:[#allocation67_spill] sm:$0xff] %v13518_v47 }
 0x2e9   :  { %8151 = vmatprep.mubr.msk.f32.mxu0 %vm546_vm2, %v13018_v17  ;;  %8159 = vmatprep.mubr.msk.f32.mxu1 %vm546_vm2, %v13018_v17  ;;  %v8194_v17 = vld [vmem:[%s15626_s3 + $0x778] sm:$0xff]  ;;  %v8260_v47 = vld [vmem:[%s15626_s3 + $0x988] sm:$0xff]  ;;  %v8261_v44 = vld [vmem:[%s15626_s3 + $0x990] sm:$0xff] }
 0x2ea   :  { %5451 = vmatpush1.msra.mxu0 %v8199_v30  ;;  %5564 = vmatpush1.msra.mxu1 %v8201_v45  ;;  %v8191_v30 = vld [vmem:[%s15626_s3 + $0x760] sm:$0xff]  ;;  %v8193_v45 = vld [vmem:[%s15626_s3 + $0x770] sm:$0xff] }
 0x2eb   :  { %5452 = vmatprep.subr.mxu0 %v8196_v11  ;;  %5565 = vmatprep.subr.mxu1 %v8198_v34  ;;  %v8188_v11 = vld [vmem:[%s15626_s3 + $0x748] sm:$0xff]  ;;  %v8190_v34 = vld [vmem:[%s15626_s3 + $0x758] sm:$0xff] }
 0x2ec   :  { %5453 = vmatpush1.msra.mxu0 %v8195_v39  ;;  %5566 = vmatpush1.msra.mxu1 %v8197_v56  ;;  %v8189_v39 = vld [vmem:[%s15626_s3 + $0x750] sm:$0xff]  ;;  %v13544_v56 = vpop.f32.mrf.mxu0 }
 0x2ed   :  { %5157 = vmatmul.mubr.f32.gmra.mxu0 %v13046_v24  ;;  %5270 = vmatmul.mubr.f32.gmra.mxu1 %v13046_v24  ;;  %v8187_v24 = vld [vmem:[%s15626_s3 + $0x740] sm:$0xff] }
 0x2ee   :  { %5454 = vmatprep.subr.mxu0 %v8192_v46  ;;  %5567 = vmatprep.subr.mxu1 %v8194_v17  ;;  %v13546_v46 = vpop.f32.mrf.mxu1  ;;  %v8186_v17 = vld [vmem:[%s15626_s3 + $0x738] sm:$0xff] }
 0x2ef   :  { %8152 = vmatprep.mubr.msk.f32.mxu0 %vm546_vm2, %v13056_v10  ;;  %8160 = vmatprep.mubr.msk.f32.mxu1 %vm546_vm2, %v13056_v10  ;;  %v8184_v10 = vld [vmem:[%s15626_s3 + $0x728] sm:$0xff] }
 0x2f0   :  { %5455 = vmatpush1.msra.mxu0 %v8191_v30  ;;  %5568 = vmatpush1.msra.mxu1 %v8193_v45  ;;  %v8183_v30 = vld [vmem:[%s15626_s3 + $0x720] sm:$0xff]  ;;  %v8185_v45 = vld [vmem:[%s15626_s3 + $0x730] sm:$0xff] }
 0x2f1   :  { %5456 = vmatprep.subr.mxu0 %v8188_v11  ;;  %5569 = vmatprep.subr.mxu1 %v8190_v34  ;;  %v13562_v11 = vpop.f32.mrf.mxu0  ;;  %v13564_v34 = vpop.f32.mrf.mxu1 }
 0x2f2   :  { %5457 = vmatpush1.msra.mxu0 %v8187_v24  ;;  %5570 = vmatpush1.msra.mxu1 %v8189_v39  ;;  %15709 = vst [vmem:[#allocation68_spill] sm:$0xff] %v13562_v11  ;;  %15710 = vst [vmem:[#allocation69_spill] sm:$0xff] %v13564_v34  ;;  %v8180_v24 = vld [vmem:[%s15626_s3 + $0x708] sm:$0xff]  ;;  %v8179_v39 = vld [vmem:[%s15626_s3 + $0x700] sm:$0xff] }
 0x2f3   :  { %5163 = vmatmul.mubr.f32.gmra.mxu0 %v13084_v51  ;;  %5276 = vmatmul.mubr.f32.gmra.mxu1 %v13084_v51  ;;  %v8182_v51 = vld [vmem:[%s15626_s3 + $0x718] sm:$0xff]  ;;  %v13588_v34 = vpop.f32.mrf.mxu0  ;;  %v13590_v11 = vpop.f32.mrf.mxu1 }
 0x2f4   :  { %5458 = vmatprep.subr.mxu0 %v8184_v10  ;;  %5571 = vmatprep.subr.mxu1 %v8186_v17  ;;  %v8181_v10 = vld [vmem:[%s15626_s3 + $0x710] sm:$0xff]  ;;  %v8176_v17 = vld [vmem:[%s15626_s3 + $0x6e8] sm:$0xff] }
 0x2f5   :  { %8153 = vmatprep.mubr.msk.f32.mxu0 %vm546_vm2, %v13098_v13  ;;  %8161 = vmatprep.mubr.msk.f32.mxu1 %vm546_vm2, %v13098_v13  ;;  %v8178_v13 = vld [vmem:[%s15626_s3 + $0x6f8] sm:$0xff] }
 0x2f6   :  { %5459 = vmatpush1.msra.mxu0 %v8183_v30  ;;  %5572 = vmatpush1.msra.mxu1 %v8185_v45  ;;  %v8175_v30 = vld [vmem:[%s15626_s3 + $0x6e0] sm:$0xff]  ;;  %v8177_v45 = vld [vmem:[%s15626_s3 + $0x6f0] sm:$0xff] }
 0x2f7   :  { %5460 = vmatprep.subr.mxu0 %v8180_v24  ;;  %5573 = vmatprep.subr.mxu1 %v8182_v51  ;;  %v8172_v24 = vld [vmem:[%s15626_s3 + $0x6c8] sm:$0xff]  ;;  %v8174_v51 = vld [vmem:[%s15626_s3 + $0x6d8] sm:$0xff] }
 0x2f8   :  { %5461 = vmatpush1.msra.mxu0 %v8179_v39  ;;  %5574 = vmatpush1.msra.mxu1 %v8181_v10  ;;  %v8173_v39 = vld [vmem:[%s15626_s3 + $0x6d0] sm:$0xff]  ;;  %v13616_v10 = vpop.f32.mrf.mxu0 }
 0x2f9   :  { %5169 = vmatmul.mubr.f32.gmra.mxu0 %v13126_v62  ;;  %5282 = vmatmul.mubr.f32.gmra.mxu1 %v13126_v62  ;;  %v8171_v62 = vld [vmem:[%s15626_s3 + $0x6c0] sm:$0xff]  ;;  %15711 = vst [vmem:[#allocation70_spill] sm:$0xff] %v13616_v10 }
 0x2fa   :  { %5462 = vmatprep.subr.mxu0 %v8176_v17  ;;  %5575 = vmatprep.subr.mxu1 %v8178_v13  ;;  %v13618_v17 = vpop.f32.mrf.mxu1  ;;  %v8170_v13 = vld [vmem:[%s15626_s3 + $0x6b8] sm:$0xff]  ;;  %v8167_v10 = vld [vmem:[%s15626_s3 + $0x6a0] sm:$0xff] }
 0x2fb   :  { %8154 = vmatprep.mubr.msk.f32.mxu0 %vm546_vm2, %v13136_v57  ;;  %8162 = vmatprep.mubr.msk.f32.mxu1 %vm546_vm2, %v13136_v57  ;;  %15712 = vst [vmem:[#allocation71_spill] sm:$0xff] %v13618_v17  ;;  %v8168_v57 = vld [vmem:[%s15626_s3 + $0x6a8] sm:$0xff] }
 0x2fc   :  { %5463 = vmatpush1.msra.mxu0 %v8175_v30  ;;  %5576 = vmatpush1.msra.mxu1 %v8177_v45  ;;  %v8169_v30 = vld [vmem:[%s15626_s3 + $0x6b0] sm:$0xff]  ;;  %v13634_v45 = vpop.f32.mrf.mxu0 }
 0x2fd   :  { %5464 = vmatprep.subr.mxu0 %v8172_v24  ;;  %5577 = vmatprep.subr.mxu1 %v8174_v51  ;;  %v13636_v24 = vpop.f32.mrf.mxu1  ;;  %v8164_v51 = vld [vmem:[%s15626_s3 + $0x688] sm:$0xff] }
 0x2fe   :  { %5465 = vmatpush1.msra.mxu0 %v8171_v62  ;;  %5578 = vmatpush1.msra.mxu1 %v8173_v39  ;;  %15713 = vst [vmem:[#allocation72_spill] sm:$0xff] %v13636_v24  ;;  %v8166_v62 = vld [vmem:[%s15626_s3 + $0x698] sm:$0xff]  ;;  %v8165_v39 = vld [vmem:[%s15626_s3 + $0x690] sm:$0xff]  ;;  %v13666_v17 = vpop.f32.mrf.mxu0 }
 0x2ff   :  { %5175 = vmatmul.mubr.f32.gmra.mxu0 %v13164_v28  ;;  %5288 = vmatmul.mubr.f32.gmra.mxu1 %v13164_v28  ;;  %v8163_v28 = vld [vmem:[%s15626_s3 + $0x680] sm:$0xff]  ;;  %15714 = vst [vmem:[#allocation73_spill] sm:$0xff] %v13666_v17  ;;  %v4023_v17 = vadd.f32 %v13354_v58, %v12936_v4  ;;  %v8241_v4 = vld [vmem:[%s15626_s3 + $0x8f0] sm:$0xff] }
 0x300   :  { %5466 = vmatprep.subr.mxu0 %v8168_v57  ;;  %5579 = vmatprep.subr.mxu1 %v8170_v13  ;;  %v8264_v57 = vld [vmem:[%s15626_s3 + $0x9a8] sm:$0xff]  ;;  %v8263_v13 = vld [vmem:[%s15626_s3 + $0x9a0] sm:$0xff] }
 0x301   :  { %5467 = vmatpush1.msra.mxu0 %v8167_v10  ;;  %8267 = vmatprep.mubr.msk.f32.mxu0 %vm546_vm2, %v12938_v21  ;;  %v8266_v10 = vld [vmem:[%s15626_s3 + $0x9b8] sm:$0xff] }
 0x302   :  { %5580 = vmatpush1.msra.mxu1 %v8169_v30  ;;  %8275 = vmatprep.mubr.msk.f32.mxu1 %vm546_vm2, %v12938_v21  ;;  %v8265_v30 = vld [vmem:[%s15626_s3 + $0x9b0] sm:$0xff]  ;;  %v13668_v21 = vpop.f32.mrf.mxu1 }
 0x303   :  { %5468 = vmatprep.subr.mxu0 %v8164_v51  ;;  %5581 = vmatprep.subr.mxu1 %v8166_v62  ;;  %15715 = vst [vmem:[#allocation74_spill] sm:$0xff] %v13668_v21  ;;  %v8262_v51 = vld [vmem:[%s15626_s3 + $0x998] sm:$0xff]  ;;  %v8259_v62 = vld [vmem:[%s15626_s3 + $0x980] sm:$0xff] }
 0x304   :  { %5469 = vmatpush1.msra.mxu0 %v8163_v28  ;;  %5582 = vmatpush1.msra.mxu1 %v8165_v39  ;;  %v8256_v28 = vld [vmem:[%s15626_s3 + $0x968] sm:$0xff]  ;;  %v8258_v39 = vld [vmem:[%s15626_s3 + $0x978] sm:$0xff] }
 0x305   :  { %5482 = vmatprep.subr.mxu0 %v8264_v57  ;;  %5595 = vmatprep.subr.mxu1 %v8266_v10  ;;  %v8255_v57 = vld [vmem:[%s15626_s3 + $0x960] sm:$0xff]  ;;  %v8257_v10 = vld [vmem:[%s15626_s3 + $0x970] sm:$0xff] }
 0x306   :  { %5483 = vmatpush2.msra.mxu0 %v8263_v13  ;;  %5596 = vmatpush2.msra.mxu1 %v8265_v30  ;;  %v13694_v13 = vpop.f32.mrf.mxu0  ;;  %v13696_v30 = vpop.f32.mrf.mxu1 }
 0x307   :  { %5484 = vmatprep.subr.mxu0 %v8260_v47  ;;  %5597 = vmatprep.subr.mxu1 %v8262_v51  ;;  %15716 = vst [vmem:[#allocation75_spill] sm:$0xff] %v13694_v13  ;;  %15717 = vst [vmem:[#allocation76_spill] sm:$0xff] %v13696_v30  ;;  %v8254_v47 = vld [vmem:[%s15626_s3 + $0x958] sm:$0xff]  ;;  %v8251_v51 = vld [vmem:[%s15626_s3 + $0x940] sm:$0xff] }
 0x308   :  { %5485 = vmatpush2.msra.mxu0 %v8259_v62  ;;  %5598 = vmatpush2.msra.mxu1 %v8261_v44  ;;  %v8253_v30 = vld [vmem:[%s15626_s3 + $0x950] sm:$0xff]  ;;  %v8248_v44 = vld [vmem:[%s15626_s3 + $0x928] sm:$0xff]  ;;  %v8250_v62 = vld [vmem:[%s15626_s3 + $0x938] sm:$0xff] }
 0x309   :  { %5486 = vmatprep.subr.mxu0 %v8256_v28  ;;  %5599 = vmatprep.subr.mxu1 %v8258_v39  ;;  %v8247_v28 = vld [vmem:[%s15626_s3 + $0x920] sm:$0xff]  ;;  %v8249_v39 = vld [vmem:[%s15626_s3 + $0x930] sm:$0xff]  ;;  %v8244_v13 = vld [vmem:[%s15626_s3 + $0x908] sm:$0xff] }
 0x30a   :  { %5487 = vmatpush2.msra.mxu0 %v8255_v57  ;;  %5600 = vmatpush2.msra.mxu1 %v8257_v10  ;;  %v13722_v57 = vpop.f32.mrf.mxu0  ;;  %v13724_v10 = vpop.f32.mrf.mxu1 }
 0x30b   :  { %5488 = vmatprep.subr.mxu0 %v8252_v54  ;;  %5601 = vmatprep.subr.mxu1 %v8254_v47  ;;  %15718 = vst [vmem:[#allocation77_spill] sm:$0xff] %v13722_v57  ;;  %15719 = vst [vmem:[#allocation78_spill] sm:$0xff] %v13724_v10  ;;  %v8246_v54 = vld [vmem:[%s15626_s3 + $0x918] sm:$0xff]  ;;  %v13735_v47 = vld [vmem:[%s15628_s4] sm:$0xf]  ;;  %v3910_v57 = vadd.f32 %v13352_v31, %v12934_v25 }
 0x30c   :  { %5489 = vmatpush2.msra.mxu0 %v8251_v51  ;;  %5602 = vmatpush2.msra.mxu1 %v8253_v30  ;;  %v8243_v30 = vld [vmem:[%s15626_s3 + $0x900] sm:$0xff]  ;;  %v8245_v51 = vld [vmem:[%s15626_s3 + $0x910] sm:$0xff]  ;;  %v8240_v25 = vld [vmem:[%s15626_s3 + $0x8e8] sm:$0xff] }
 0x30d   :  { %5490 = vmatprep.subr.mxu0 %v8248_v44  ;;  %5603 = vmatprep.subr.mxu1 %v8250_v62  ;;  %v4279_v10 = vpop.f32.mrf.mxu0  ;;  %v4392_v21 = vpop.f32.mrf.mxu1  ;;  %v8242_v31 = vld [vmem:[%s15626_s3 + $0x8f8] sm:$0xff]  ;;  %v8239_v44 = vld [vmem:[%s15626_s3 + $0x8e0] sm:$0xff]  ;;  %v13761_v62 = vrot.slane %v13735_v47, %v10052_v55 }
 0x30e   :  { %5491 = vmatpush2.msra.mxu0 %v8247_v28  ;;  %5604 = vmatpush2.msra.mxu1 %v8249_v39  ;;  %v4439_v58 = vadd.f32 %v4279_v10, %v3910_v57  ;;  %v4441_v24 = vadd.f32 %v4392_v21, %v4023_v17  ;;  %v13775_v57 = vrot.slane %v13735_v47, %v12418_v27  ;;  %v13778_v10 = vsub.s32 3, %v10017_v40  ;;  %v8232_v40 = vld [vmem:[%s15626_s3 + $0x8a8] sm:$0xff] }
 0x30f   :  { %5492 = vmatprep.subr.mxu0 %v8244_v13  ;;  %5605 = vmatprep.subr.mxu1 %v8246_v54  ;;  %v13763_v28 = vpop.f32.mrf.mxu0  ;;  %v13765_v39 = vpop.f32.mrf.mxu1  ;;  %v8236_v13 = vld [vmem:[%s15626_s3 + $0x8c8] sm:$0xff]  ;;  %v8238_v54 = vld [vmem:[%s15626_s3 + $0x8d8] sm:$0xff]  ;;  %v3916_v17 = vadd.f32 %v13400_v49, %v12994_v0  ;;  %v4029_v21 = vadd.f32 %v13402_v48, %v12996_v9  ;;  %v13802_v0 = vadd.f32 %v12008_v60, %v11614_v29  ;;  %v8231_v9 = vld [vmem:[%s15626_s3 + $0x8a0] sm:$0xff] }
 0x310   :  { %5493 = vmatpush2.msra.mxu0 %v8243_v30  ;;  %5606 = vmatpush2.msra.mxu1 %v8245_v51  ;;  %v8235_v30 = vld [vmem:[%s15626_s3 + $0x8c0] sm:$0xff]  ;;  %v8237_v51 = vld [vmem:[%s15626_s3 + $0x8d0] sm:$0xff]  ;;  %v4493_v48 = vadd.f32 %v13761_v62, %v4439_v58  ;;  %v8230_v29 = vld [vmem:[%s15626_s3 + $0x898] sm:$0xff] }
 0x311   :  { %5494 = vmatprep.subr.mxu0 %v8240_v25  ;;  %5607 = vmatprep.subr.mxu1 %v8242_v31  ;;  %v8234_v25 = vld [vmem:[%s15626_s3 + $0x8b8] sm:$0xff]  ;;  %v13798_v31 = vadd.f32 %v12006_v22, %v11612_v32  ;;  %v8233_v49 = vld [vmem:[%s15626_s3 + $0x8b0] sm:$0xff]  ;;  %v8228_v32 = vld [vmem:[%s15626_s3 + $0x888] sm:$0xff]  ;;  %v4495_v22 = vadd.f32 %v13775_v57, %v4441_v24 }
 0x312   :  { %5495 = vmatpush2.msra.mxu0 %v8239_v44  ;;  %5608 = vmatpush2.msra.mxu1 %v8241_v4  ;;  %v9102_v58 = vld [vmem:[%s15628_s4] sm:$0xf] }
 0x313   :  { %5496 = vmatprep.subr.mxu0 %v8236_v13  ;;  %5609 = vmatprep.subr.mxu1 %v8238_v54  ;;  %v4285_v44 = vpop.f32.mrf.mxu0  ;;  %v4398_v4 = vpop.f32.mrf.mxu1  ;;  %v2692_v54 = vadd.f32 %v12050_v52, %v11672_v12  ;;  %v8227_v24 = vld [vmem:[%s15626_s3 + $0x880] sm:$0xff]  ;;  %v8229_v12 = vld [vmem:[%s15626_s3 + $0x890] sm:$0xff] }
 0x314   :  { %5497 = vmatpush2.msra.mxu0 %v8235_v30  ;;  %5610 = vmatpush2.msra.mxu1 %v8237_v51  ;;  %v4443_v60 = vadd.f32 %v4285_v44, %v3916_v17  ;;  %v4445_v13 = vadd.f32 %v4398_v4, %v4029_v21  ;;  %v13824_v30 = vrot.slane %v9102_v58, %v10074_v1 }
 0x315   :  { %v13827_v51 = vrot.slane %v9102_v58, %v13778_v10  ;;  %5498 = vmatprep.subr.mxu0 %v8232_v40  ;;  %5611 = vmatprep.subr.mxu1 %v8234_v25  ;;  %v13835_v52 = vpop.f32.mrf.mxu0  ;;  %v13837_v17 = vpop.f32.mrf.mxu1  ;;  %v2805_v21 = vadd.f32 %v12052_v3, %v11674_v35  ;;  %v13845_v44 = vadd.f32 %v12088_v36, %v11720_v53  ;;  %v8314_v35 = vld [vmem:[%s15629_s5 + $0x1f8] sm:$0xff]  ;;  %v5294_v53 = vld [vmem:[#allocation2 + $0x120] sm:$0xff]  ;;  %v4525_v36 = vmax.f32 %v4493_v48, 0.0 }
 0x316   :  { %5499 = vmatpush2.msra.mxu0 %v8231_v9  ;;  %5612 = vmatpush2.msra.mxu1 %v8233_v49  ;;  %v4497_v40 = vadd.f32 %v13761_v62, %v4443_v60  ;;  %v4499_v25 = vadd.f32 %v13775_v57, %v4445_v13  ;;  %v13849_v4 = vadd.f32 %v12090_v50, %v11722_v42  ;;  %v5859_v3 = vld [vmem:[%s15629_s5 + $0xf8] sm:$0xff]  ;;  %v4527_v42 = vmax.f32 %v4495_v22, 0.0  ;;  %v15721_v49 = vld [vmem:[#allocation4_spill] sm:$0xff] }
 0x317   :  { %v13853_v58 = vadd.f32 %v12126_v61, %v11772_v20  ;;  %5500 = vmatprep.subr.mxu0 %v8228_v32  ;;  %5613 = vmatprep.subr.mxu1 %v8230_v29  ;;  %v15720_v20 = vld [vmem:[#allocation12_spill] sm:$0xff]  ;;  %v15722_v32 = vld [vmem:[#allocation13_spill] sm:$0xff]  ;;  %v3922_v60 = vadd.f32 %v13444_v38, %v13042_v23  ;;  %v8298_v48 = vld [vmem:[%s15629_s5 + $0x178] sm:$0xff] }
 0x318   :  { %5501 = vmatpush2.msra.mxu0 %v8227_v24  ;;  %5614 = vmatpush2.msra.mxu1 %v8229_v12  ;;  %v4529_v50 = vmax.f32 %v4497_v40, 0.0  ;;  %v4531_v9 = vmax.f32 %v4499_v25, 0.0  ;;  %v13863_v61 = vadd.f32 %v15720_v20, %v11774_v59  ;;  %v13867_v29 = vadd.f32 %v15722_v32, %v15721_v49  ;;  %v5843_v22 = vld [vmem:[%s15629_s5 + $0x78] sm:$0xff]  ;;  %v8313_v23 = vld [vmem:[%s15629_s5 + $0x1f0] sm:$0xff] }
 0x319   :  { %5503 = vmatmul.mubr.f32.vlgmr.msra.gmra.mxu0 %v5294_v53  ;;  %5616 = vmatmul.mubr.f32.vlgmr.msra.gmra.mxu1 %v5294_v53  ;;  %v4291_v13 = vpop.f32.mrf.mxu0  ;;  %v4404_v59 = vpop.f32.mrf.mxu1  ;;  %v4035_v24 = vadd.f32 %v13446_v33, %v13044_v18  ;;  %v5297_v12 = vld [vmem:[#allocation2 + $0x138] sm:$0xff]  ;;  %v5858_v38 = vld [vmem:[%s15629_s5 + $0xf0] sm:$0xff]  ;;  %v15723_v53 = vld [vmem:[#allocation5_spill] sm:$0xff] }
 0x31a   :  { %8638 = vmatprep.subr.mxu0 %v8314_v35  ;;  %8673 = vmatprep.subr.mxu1 %v5859_v3  ;;  %v13885_v40 = vmax.f32 %v4525_v36, %v4529_v50  ;;  %v13887_v25 = vmax.f32 %v4527_v42, %v4531_v9  ;;  %v15724_v20 = vld [vmem:[#allocation14_spill] sm:$0xff]  ;;  %v15726_v33 = vld [vmem:[#allocation15_spill] sm:$0xff]  ;;  %v4447_v42 = vadd.f32 %v4291_v13, %v3922_v60 }
 0x31b   :  { %v13891_v49 = vadd.f32 %v15724_v20, %v15723_v53  ;;  %v15725_v18 = vld [vmem:[#allocation6_spill] sm:$0xff]  ;;  %8268 = vmatprep.mubr.msk.f32.mxu0 %vm546_vm2, %v5297_v12  ;;  %8276 = vmatprep.mubr.msk.f32.mxu1 %vm546_vm2, %v5297_v12  ;;  %v13905_v50 = vpop.f32.mrf.mxu0  ;;  %v13907_v9 = vpop.f32.mrf.mxu1  ;;  %v15727_v32 = vld [vmem:[#allocation7_spill] sm:$0xff]  ;;  %v15728_v53 = vld [vmem:[#allocation16_spill] sm:$0xff]  ;;  %v3215_v60 = vadd.f32 %v12441_v7, %v13798_v31  ;;  %v3219_v13 = vadd.f32 %v12490_v2, %v2692_v54 }
 0x31c   :  { %v13895_v35 = vadd.f32 %v15726_v33, %v15725_v18  ;;  %v8297_v3 = vld [vmem:[%s15629_s5 + $0x170] sm:$0xff]  ;;  %v13911_v20 = vadd.f32 %v15728_v53, %v15727_v32  ;;  %8639 = vmatpush3.msra.mxu0 %v8298_v48  ;;  %8674 = vmatpush3.msra.mxu1 %v5843_v22  ;;  %v6295_v12 = vmax.f32 %v13885_v40, %v13887_v25  ;;  %v15729_v33 = vld [vmem:[#allocation8_spill] sm:$0xff]  ;;  %v8312_v48 = vld [vmem:[%s15629_s5 + $0x1e8] sm:$0xff] }
 0x31d   :  { %v5842_v36 = vld [vmem:[%s15629_s5 + $0x70] sm:$0xff]  ;;  %v4449_v18 = vadd.f32 %v4404_v59, %v4035_v24  ;;  %v13917_v27 = vadd.f32 %v12240_v14, %v15729_v33  ;;  %8640 = vmatprep.subr.mxu0 %v8313_v23  ;;  %8675 = vmatprep.subr.mxu1 %v5858_v38  ;;  %v5857_v22 = vld [vmem:[%s15629_s5 + $0xe8] sm:$0xff]  ;;  %v3221_v59 = vadd.f32 %v12492_v41, %v2805_v21 }
 0x31e   :  { %v3928_v14 = vadd.f32 %v13490_v15, %v13094_v6  ;;  %v4041_v7 = vadd.f32 %v13492_v5, %v13096_v63  ;;  %8641 = vmatpush3.msra.mxu0 %v8297_v3  ;;  %8676 = vmatpush3.msra.mxu1 %v5842_v36  ;;  %v5296_v2 = vld [vmem:[#allocation2 + $0x130] sm:$0xff]  ;;  %v15730_v31 = vld [vmem:[#allocation9_spill] sm:$0xff]  ;;  %v4501_v63 = vadd.f32 %v13761_v62, %v4447_v42  ;;  %v5856_v3 = vld [vmem:[%s15629_s5 + $0xe0] sm:$0xff] }
 0x31f   :  { %v15731_v54 = vld [vmem:[#allocation17_spill] sm:$0xff]  ;;  %5509 = vmatmul.mubr.f32.gmra.mxu0 %v5296_v2  ;;  %5622 = vmatmul.mubr.f32.gmra.mxu1 %v5296_v2  ;;  %v4297_v15 = vpop.f32.mrf.mxu0  ;;  %v4410_v5 = vpop.f32.mrf.mxu1  ;;  %v4503_v36 = vadd.f32 %v13775_v57, %v4449_v18  ;;  %v15733_v33 = vld [vmem:[#allocation10_spill] sm:$0xff]  ;;  %v8295_v18 = vld [vmem:[%s15629_s5 + $0x160] sm:$0xff] }
 0x320   :  { %v13935_v24 = vadd.f32 %v15731_v54, %v15730_v31  ;;  %v15732_v23 = vld [vmem:[#allocation21_spill] sm:$0xff]  ;;  %8642 = vmatprep.subr.mxu0 %v8312_v48  ;;  %8677 = vmatprep.subr.mxu1 %v5857_v22  ;;  %v4451_v32 = vadd.f32 %v4297_v15, %v3928_v14  ;;  %v4453_v53 = vadd.f32 %v4410_v5, %v4041_v7  ;;  %v15734_v2 = vld [vmem:[#allocation18_spill] sm:$0xff]  ;;  %v5840_v14 = vld [vmem:[%s15629_s5 + $0x60] sm:$0xff] }
 0x321   :  { %v3217_v38 = vadd.f32 %v15732_v23, %v13802_v0  ;;  %v8296_v41 = vld [vmem:[%s15629_s5 + $0x168] sm:$0xff]  ;;  %v8311_v0 = vld [vmem:[%s15629_s5 + $0x1e0] sm:$0xff]  ;;  %v13955_v42 = vadd.f32 %v15734_v2, %v15733_v33  ;;  %v13958_v48 = vadd.f32 %v13824_v30, %v3215_v60  ;;  %v13961_v22 = vadd.f32 %v13824_v30, %v3219_v13  ;;  %v13971_v7 = vpop.f32.mrf.mxu0  ;;  %v13973_v31 = vpop.f32.mrf.mxu1  ;;  %v8473_v40 = vld [vmem:[%s15629_s5 + $0x6f0] sm:$0xff] }
 0x322   :  { %v5841_v6 = vld [vmem:[%s15629_s5 + $0x68] sm:$0xff]  ;;  %v13976_v60 = vadd.f32 %v13827_v51, %v3221_v59  ;;  %8643 = vmatpush3.msra.mxu0 %v8296_v41  ;;  %v4505_v13 = vadd.f32 %v13761_v62, %v4451_v32  ;;  %v4507_v54 = vadd.f32 %v13775_v57, %v4453_v53  ;;  %v3227_v15 = vadd.f32 %v12568_v8, %v13853_v58  ;;  %v8310_v59 = vld [vmem:[%s15629_s5 + $0x1d8] sm:$0xff]  ;;  %v8505_v25 = vld [vmem:[%s15629_s5 + $0x7f0] sm:$0xff] }
 0x323   :  { %v5299_v21 = vld [vmem:[#allocation2 + $0x148] sm:$0xff]  ;;  %8678 = vmatpush3.msra.mxu1 %v5841_v6  ;;  %v3271_v23 = vadd.f32 %v13827_v51, %v3217_v38  ;;  %v3229_v5 = vadd.f32 %v12570_v43, %v13863_v61  ;;  %8644 = vmatprep.subr.mxu0 %v8311_v0  ;;  %v5855_v41 = vld [vmem:[%s15629_s5 + $0xd8] sm:$0xff]  ;;  %v5298_v6 = vld [vmem:[#allocation2 + $0x140] sm:$0xff]  ;;  %v4533_v38 = vmax.f32 %v4501_v63, 0.0  ;;  %v3305_v58 = vmax.f32 %v13961_v22, 0.0 }
 0x324   :  { %8269 = vmatprep.mubr.msk.f32.mxu0 %vm546_vm2, %v5299_v21  ;;  %8277 = vmatprep.mubr.msk.f32.mxu1 %vm546_vm2, %v5299_v21  ;;  %v4535_v21 = vmax.f32 %v4503_v36, 0.0  ;;  %v4537_v32 = vmax.f32 %v4505_v13, 0.0  ;;  %v4539_v8 = vmax.f32 %v4507_v54, 0.0  ;;  %v3223_v43 = vadd.f32 %v12530_v37, %v13845_v44  ;;  %v8294_v63 = vld [vmem:[%s15629_s5 + $0x158] sm:$0xff]  ;;  %v5854_v44 = vld [vmem:[%s15629_s5 + $0xd0] sm:$0xff] }
 0x325   :  { %8679 = vmatprep.subr.mxu1 %v5856_v3  ;;  %8645 = vmatpush3.msra.mxu0 %v8295_v18  ;;  %v3225_v61 = vadd.f32 %v12532_v16, %v13849_v4  ;;  %v3934_v0 = vadd.f32 %v13544_v56, %v13154_v19  ;;  %v5839_v3 = vld [vmem:[%s15629_s5 + $0x58] sm:$0xff]  ;;  %v4303_v36 = vpop.f32.mrf.mxu0  ;;  %v4416_v53 = vpop.f32.mrf.mxu1  ;;  %v3307_v37 = vmax.f32 %v13976_v60, 0.0  ;;  %v4047_v16 = vadd.f32 %v13546_v46, %v13156_v26  ;;  %v8309_v56 = vld [vmem:[%s15629_s5 + $0x1d0] sm:$0xff] }
 0x326   :  { %8680 = vmatpush3.msra.mxu1 %v5840_v14  ;;  %5515 = vmatmul.mubr.f32.gmra.mxu0 %v5298_v6  ;;  %v5301_v19 = vld [vmem:[#allocation2 + $0x158] sm:$0xff]  ;;  %v14013_v4 = vmax.f32 %v4533_v38, %v4537_v32  ;;  %v14015_v33 = vmax.f32 %v4535_v21, %v4539_v8  ;;  %v3301_v2 = vmax.f32 %v13958_v48, 0.0  ;;  %v14019_v22 = vadd.f32 %v13824_v30, %v3227_v15  ;;  %v8293_v46 = vld [vmem:[%s15629_s5 + $0x150] sm:$0xff]  ;;  %v8308_v21 = vld [vmem:[%s15629_s5 + $0x1c8] sm:$0xff] }
 0x327   :  { %5628 = vmatmul.mubr.f32.gmra.mxu1 %v5298_v6  ;;  %8646 = vmatprep.subr.mxu0 %v8310_v59  ;;  %v14022_v26 = vadd.f32 %v13827_v51, %v3229_v5  ;;  %v5838_v18 = vld [vmem:[%s15629_s5 + $0x50] sm:$0xff]  ;;  %v4455_v14 = vadd.f32 %v4303_v36, %v3934_v0  ;;  %v14032_v48 = vpop.f32.mrf.mxu0  ;;  %v14034_v60 = vpop.f32.mrf.mxu1  ;;  %v15735_v13 = vld [vmem:[#allocation11_spill] sm:$0xff]  ;;  %v3303_v5 = vmax.f32 %v3271_v23, 0.0  ;;  %v3277_v6 = vadd.f32 %v13824_v30, %v3223_v43  ;;  %v5853_v23 = vld [vmem:[%s15629_s5 + $0xc8] sm:$0xff] }
 0x328   :  { %8681 = vmatprep.subr.mxu1 %v5855_v41  ;;  %8270 = vmatprep.mubr.msk.f32.mxu0 %vm546_vm2, %v5301_v19  ;;  %v15736_v54 = vld [vmem:[#allocation19_spill] sm:$0xff]  ;;  %v6413_v59 = vmax.f32 %v14013_v4, %v14015_v33  ;;  %v4457_v41 = vadd.f32 %v4416_v53, %v4047_v16  ;;  %v3279_v38 = vadd.f32 %v13827_v51, %v3225_v61  ;;  %v15737_v8 = vld [vmem:[#allocation48_spill] sm:$0xff]  ;;  %v5300_v61 = vld [vmem:[#allocation2 + $0x150] sm:$0xff]  ;;  %v3313_v36 = vmax.f32 %v14019_v22, 0.0 }
 0x329   :  { %8278 = vmatprep.mubr.msk.f32.mxu1 %vm546_vm2, %v5301_v19  ;;  %v14038_v15 = vadd.f32 %v15736_v54, %v15735_v13  ;;  %8647 = vmatpush3.msra.mxu0 %v8294_v63  ;;  %v14050_v32 = vmax.f32 %v3301_v2, %v3305_v58  ;;  %v3940_v0 = vadd.f32 %v13588_v34, %v15737_v8  ;;  %v15738_v63 = vld [vmem:[#allocation49_spill] sm:$0xff]  ;;  %v3315_v53 = vmax.f32 %v14022_v26, 0.0  ;;  %v15739_v16 = vld [vmem:[#allocation26_spill] sm:$0xff]  ;;  %v5852_v2 = vld [vmem:[%s15629_s5 + $0xc0] sm:$0xff] }
 0x32a   :  { %8682 = vmatpush3.msra.mxu1 %v5839_v3  ;;  %8648 = vmatprep.subr.mxu0 %v8309_v56  ;;  %v4053_v43 = vadd.f32 %v13590_v11, %v15738_v63  ;;  %v14056_v3 = vmax.f32 %v3303_v5, %v3307_v37  ;;  %v3231_v19 = vadd.f32 %v15739_v16, %v13867_v29  ;;  %v8292_v34 = vld [vmem:[%s15629_s5 + $0x148] sm:$0xff]  ;;  %v8307_v29 = vld [vmem:[%s15629_s5 + $0x1c0] sm:$0xff]  ;;  %v3311_v13 = vmax.f32 %v3279_v38, 0.0  ;;  %v8489_v4 = vld [vmem:[%s15629_s5 + $0x770] sm:$0xff] }
 0x32b   :  { %8683 = vmatprep.subr.mxu1 %v5854_v44  ;;  %8649 = vmatpush3.msra.mxu0 %v8293_v46  ;;  %v5837_v11 = vld [vmem:[%s15629_s5 + $0x48] sm:$0xff]  ;;  %v4509_v58 = vadd.f32 %v13761_v62, %v4455_v14  ;;  %v4309_v37 = vpop.f32.mrf.mxu0  ;;  %v4422_v56 = vpop.f32.mrf.mxu1  ;;  %v4511_v22 = vadd.f32 %v13775_v57, %v4457_v41  ;;  %v15740_v14 = vld [vmem:[#allocation28_spill] sm:$0xff] }
 0x32c   :  { %8684 = vmatpush3.msra.mxu1 %v5838_v18  ;;  %5521 = vmatmul.mubr.f32.gmra.mxu0 %v5300_v61  ;;  %v5303_v44 = vld [vmem:[#allocation2 + $0x168] sm:$0xff]  ;;  %v4459_v26 = vadd.f32 %v4309_v37, %v3940_v0  ;;  %v4461_v46 = vadd.f32 %v4422_v56, %v4053_v43  ;;  %v3309_v18 = vmax.f32 %v3277_v6, 0.0  ;;  %v3235_v54 = vadd.f32 %v15740_v14, %v13895_v35  ;;  %v5836_v41 = vld [vmem:[%s15629_s5 + $0x40] sm:$0xff]  ;;  %v15742_v35 = vld [vmem:[#allocation27_spill] sm:$0xff] }
 0x32d   :  { %5634 = vmatmul.mubr.f32.gmra.mxu1 %v5300_v61  ;;  %8650 = vmatprep.subr.mxu0 %v8308_v21  ;;  %v15741_v5 = vld [vmem:[#allocation29_spill] sm:$0xff]  ;;  %v14088_v6 = vpop.f32.mrf.mxu0  ;;  %v14090_v38 = vpop.f32.mrf.mxu1  ;;  %v14094_v8 = vadd.f32 %v15742_v35, %v13891_v49  ;;  %v14099_v63 = vadd.f32 %v13824_v30, %v3231_v19  ;;  %v8306_v43 = vld [vmem:[%s15629_s5 + $0x1b8] sm:$0xff]  ;;  %v14109_v16 = vmax.f32 %v3311_v13, %v3315_v53  ;;  %v4543_v19 = vmax.f32 %v4511_v22, 0.0  ;;  %v15747_v35 = vld [vmem:[#allocation54_spill] sm:$0xff] }
 0x32e   :  { %8685 = vmatprep.subr.mxu1 %v5853_v23  ;;  %v3237_v21 = vadd.f32 %v15741_v5, %v13911_v20  ;;  %8271 = vmatprep.mubr.msk.f32.mxu0 %vm546_vm2, %v5303_v44  ;;  %v8291_v23 = vld [vmem:[%s15629_s5 + $0x140] sm:$0xff]  ;;  %v4513_v20 = vadd.f32 %v13761_v62, %v4459_v26  ;;  %v4515_v0 = vadd.f32 %v13775_v57, %v4461_v46  ;;  %v5851_v49 = vld [vmem:[%s15629_s5 + $0xb8] sm:$0xff]  ;;  %v15744_v46 = vld [vmem:[#allocation53_spill] sm:$0xff] }
 0x32f   :  { %8279 = vmatprep.mubr.msk.f32.mxu1 %vm546_vm2, %v5303_v44  ;;  %8651 = vmatpush3.msra.mxu0 %v8292_v34  ;;  %v14107_v61 = vmax.f32 %v3309_v18, %v3313_v36  ;;  %v5302_v34 = vld [vmem:[#allocation2 + $0x160] sm:$0xff]  ;;  %v14112_v44 = vadd.f32 %v13824_v30, %v3235_v54  ;;  %v8290_v36 = vld [vmem:[%s15629_s5 + $0x138] sm:$0xff]  ;;  %v5850_v54 = vld [vmem:[%s15629_s5 + $0xb0] sm:$0xff] }
 0x330   :  { %8686 = vmatpush3.msra.mxu1 %v5837_v11  ;;  %8652 = vmatprep.subr.mxu0 %v8307_v29  ;;  %v4541_v11 = vmax.f32 %v4509_v58, 0.0  ;;  %v4545_v37 = vmax.f32 %v4513_v20, 0.0  ;;  %v4547_v56 = vmax.f32 %v4515_v0, 0.0  ;;  %v14115_v29 = vadd.f32 %v13827_v51, %v3237_v21  ;;  %v5835_v53 = vld [vmem:[%s15629_s5 + $0x38] sm:$0xff]  ;;  %v15745_v18 = vld [vmem:[#allocation72_spill] sm:$0xff]  ;;  %v15748_v20 = vld [vmem:[#allocation73_spill] sm:$0xff] }
 0x331   :  { %8687 = vmatprep.subr.mxu1 %v5852_v2  ;;  %8653 = vmatpush3.msra.mxu0 %v8291_v23  ;;  %v15743_v2 = vld [vmem:[#allocation52_spill] sm:$0xff]  ;;  %v4315_v58 = vpop.f32.mrf.mxu0  ;;  %v4428_v22 = vpop.f32.mrf.mxu1  ;;  %v4059_v13 = vadd.f32 %v15745_v18, %v15744_v46  ;;  %v5305_v14 = vld [vmem:[#allocation2 + $0x178] sm:$0xff]  ;;  %v3948_v0 = vadd.f32 %v15748_v20, %v15747_v35  ;;  %v15750_v46 = vld [vmem:[#allocation37_spill] sm:$0xff] }
 0x332   :  { %8688 = vmatpush3.msra.mxu1 %v5836_v41  ;;  %v3946_v26 = vadd.f32 %v13634_v45, %v15743_v2  ;;  %5527 = vmatmul.mubr.f32.gmra.mxu0 %v5302_v34  ;;  %v8305_v45 = vld [vmem:[%s15629_s5 + $0x1b0] sm:$0xff]  ;;  %v14133_v5 = vmax.f32 %v4541_v11, %v4545_v37  ;;  %v14135_v21 = vmax.f32 %v4543_v19, %v4547_v56  ;;  %v15746_v23 = vld [vmem:[#allocation32_spill] sm:$0xff]  ;;  %v15759_v56 = vld [vmem:[#allocation59_spill] sm:$0xff] }
 0x333   :  { %5640 = vmatmul.mubr.f32.gmra.mxu1 %v5302_v34  ;;  %8654 = vmatprep.subr.mxu0 %v8306_v43  ;;  %v14139_v41 = vadd.f32 %v15746_v23, %v13917_v27  ;;  %v8289_v43 = vld [vmem:[%s15629_s5 + $0x130] sm:$0xff]  ;;  %v4317_v11 = vpop.f32.mrf.mxu0  ;;  %v4430_v19 = vpop.f32.mrf.mxu1  ;;  %v15749_v27 = vld [vmem:[#allocation36_spill] sm:$0xff]  ;;  %v4465_v2 = vadd.f32 %v4428_v22, %v4059_v13  ;;  %v3245_v18 = vadd.f32 %v15750_v46, %v14038_v15  ;;  %v15755_v13 = vld [vmem:[#allocation57_spill] sm:$0xff] }
 0x334   :  { %8689 = vmatprep.subr.mxu1 %v5851_v49  ;;  %8272 = vmatprep.mubr.msk.f32.mxu0 %vm546_vm2, %v5305_v14  ;;  %v5834_v49 = vld [vmem:[%s15629_s5 + $0x30] sm:$0xff]  ;;  %v4463_v34 = vadd.f32 %v4315_v58, %v3946_v26  ;;  %v14153_v37 = vadd.f32 %v15749_v27, %v13955_v42  ;;  %v8304_v26 = vld [vmem:[%s15629_s5 + $0x1a8] sm:$0xff]  ;;  %v15754_v58 = vld [vmem:[#allocation75_spill] sm:$0xff] }
 0x335   :  { %8280 = vmatprep.mubr.msk.f32.mxu1 %vm546_vm2, %v5305_v14  ;;  %8655 = vmatpush3.msra.mxu0 %v8290_v36  ;;  %v15751_v14 = vld [vmem:[#allocation55_spill] sm:$0xff]  ;;  %v15752_v23 = vld [vmem:[#allocation74_spill] sm:$0xff]  ;;  %v5849_v42 = vld [vmem:[%s15629_s5 + $0xa8] sm:$0xff]  ;;  %v4464_v36 = vadd.f32 %v4317_v11, %v3948_v0 }
 0x336   :  { %8690 = vmatpush3.msra.mxu1 %v5835_v53  ;;  %v4061_v35 = vadd.f32 %v15752_v23, %v15751_v14  ;;  %8656 = vmatprep.subr.mxu0 %v8305_v45  ;;  %v15753_v53 = vld [vmem:[#allocation56_spill] sm:$0xff]  ;;  %v5304_v27 = vld [vmem:[#allocation2 + $0x170] sm:$0xff]  ;;  %v14173_v45 = vrot.slane %v13735_v47, %v10074_v1  ;;  %v15758_v46 = vld [vmem:[#allocation77_spill] sm:$0xff] }
 0x337   :  { %8691 = vmatprep.subr.mxu1 %v5850_v54  ;;  %v3952_v22 = vadd.f32 %v15754_v58, %v15753_v53  ;;  %v15756_v20 = vld [vmem:[#allocation76_spill] sm:$0xff]  ;;  %8657 = vmatpush3.msra.mxu0 %v8289_v43  ;;  %v15757_v54 = vld [vmem:[#allocation58_spill] sm:$0xff]  ;;  %v8288_v0 = vld [vmem:[%s15629_s5 + $0x128] sm:$0xff]  ;;  %v4517_v43 = vadd.f32 %v13761_v62, %v4463_v34  ;;  %v4321_v23 = vpop.f32.mrf.mxu0  ;;  %v4434_v53 = vpop.f32.mrf.mxu1 }
 0x338   :  { %v4065_v15 = vadd.f32 %v15756_v20, %v15755_v13  ;;  %8692 = vmatpush3.msra.mxu1 %v5834_v49  ;;  %v3954_v14 = vadd.f32 %v15758_v46, %v15757_v54  ;;  %5533 = vmatmul.mubr.f32.gmra.mxu0 %v5304_v27  ;;  %v5833_v11 = vld [vmem:[%s15629_s5 + $0x28] sm:$0xff]  ;;  %v4466_v49 = vadd.f32 %v4430_v19, %v4061_v35  ;;  %v8303_v13 = vld [vmem:[%s15629_s5 + $0x1a0] sm:$0xff]  ;;  %v15760_v34 = vld [vmem:[#allocation78_spill] sm:$0xff] }
 0x339   :  { %5646 = vmatmul.mubr.f32.gmra.mxu1 %v5304_v27  ;;  %8658 = vmatprep.subr.mxu0 %v8304_v26  ;;  %v5307_v58 = vld [vmem:[#allocation2 + $0x188] sm:$0xff]  ;;  %v5848_v20 = vld [vmem:[%s15629_s5 + $0xa0] sm:$0xff]  ;;  %v4519_v27 = vadd.f32 %v13775_v57, %v4465_v2  ;;  %v4467_v54 = vadd.f32 %v4321_v23, %v3952_v22  ;;  %v4067_v19 = vadd.f32 %v15760_v34, %v15759_v56  ;;  %v4323_v22 = vpop.f32.mrf.mxu0  ;;  %v4436_v56 = vpop.f32.mrf.mxu1 }
 0x33a   :  { %8693 = vmatprep.subr.mxu1 %v5849_v42  ;;  %v4469_v46 = vadd.f32 %v4434_v53, %v4065_v15  ;;  %8273 = vmatprep.mubr.msk.f32.mxu0 %vm546_vm2, %v5307_v58  ;;  %v8287_v35 = vld [vmem:[%s15629_s5 + $0x120] sm:$0xff]  ;;  %v14203_v2 = vrot.slane %v13735_v47, %v13778_v10  ;;  %v4518_v42 = vadd.f32 %v14173_v45, %v4464_v36  ;;  %v8302_v47 = vld [vmem:[%s15629_s5 + $0x198] sm:$0xff]  ;;  %v8472_v33 = vld [vmem:[%s15629_s5 + $0x6e8] sm:$0xff] }
 0x33b   :  { %8281 = vmatprep.mubr.msk.f32.mxu1 %vm546_vm2, %v5307_v58  ;;  %v5832_v26 = vld [vmem:[%s15629_s5 + $0x20] sm:$0xff]  ;;  %8659 = vmatpush3.msra.mxu0 %v8288_v0  ;;  %v4521_v15 = vadd.f32 %v13761_v62, %v4467_v54  ;;  %v4468_v53 = vadd.f32 %v4323_v22, %v3954_v14  ;;  %v15761_v58 = vld [vmem:[#allocation33_spill] sm:$0xff]  ;;  %v5847_v36 = vld [vmem:[%s15629_s5 + $0x98] sm:$0xff]  ;;  %v4549_v0 = vmax.f32 %v4517_v43, 0.0  ;;  %v4470_v62 = vadd.f32 %v4436_v56, %v4067_v19 }
 0x33c   :  { %8694 = vmatpush3.msra.mxu1 %v5833_v11  ;;  %v4523_v23 = vadd.f32 %v13775_v57, %v4469_v46  ;;  %v3241_v34 = vadd.f32 %v15761_v58, %v13935_v24  ;;  %8660 = vmatprep.subr.mxu0 %v8303_v13  ;;  %v4520_v11 = vadd.f32 %v14203_v2, %v4466_v49  ;;  %v5306_v57 = vld [vmem:[#allocation2 + $0x180] sm:$0xff]  ;;  %v4551_v14 = vmax.f32 %v4519_v27, 0.0  ;;  %v8286_v43 = vld [vmem:[%s15629_s5 + $0x118] sm:$0xff] }
 0x33d   :  { %8695 = vmatprep.subr.mxu1 %v5848_v20  ;;  %8661 = vmatpush3.msra.mxu0 %v8287_v35  ;;  %v4553_v54 = vmax.f32 %v4521_v15, 0.0  ;;  %v4522_v13 = vadd.f32 %v14173_v45, %v4468_v53  ;;  %v14220_v20 = vadd.f32 %v13824_v30, %v14153_v37  ;;  %v14223_v46 = vadd.f32 %v13827_v51, %v3245_v18  ;;  %v5831_v49 = vld [vmem:[%s15629_s5 + $0x18] sm:$0xff]  ;;  %v8301_v37 = vld [vmem:[%s15629_s5 + $0x190] sm:$0xff] }
 0x33e   :  { %8696 = vmatpush3.msra.mxu1 %v5832_v26  ;;  %v4555_v24 = vmax.f32 %v4523_v23, 0.0  ;;  %5539 = vmatmul.mubr.f32.gmra.mxu0 %v5306_v57  ;;  %v4524_v27 = vadd.f32 %v14203_v2, %v4470_v62  ;;  %v5309_v19 = vld [vmem:[#allocation2 + $0x198] sm:$0xff]  ;;  %v5846_v18 = vld [vmem:[%s15629_s5 + $0x90] sm:$0xff]  ;;  %v4550_v35 = vmax.f32 %v4518_v42, 0.0  ;;  %v3287_v15 = vadd.f32 %v13827_v51, %v14094_v8 }
 0x33f   :  { %5652 = vmatmul.mubr.f32.gmra.mxu1 %v5306_v57  ;;  %8662 = vmatprep.subr.mxu0 %v8302_v47  ;;  %v14238_v26 = vmax.f32 %v4549_v0, %v4553_v54  ;;  %v4554_v56 = vmax.f32 %v4522_v13, 0.0  ;;  %v3293_v23 = vadd.f32 %v13824_v30, %v14139_v41  ;;  %v8285_v53 = vld [vmem:[%s15629_s5 + $0x110] sm:$0xff]  ;;  %v4552_v58 = vmax.f32 %v4520_v11, 0.0  ;;  %v8300_v11 = vld [vmem:[%s15629_s5 + $0x188] sm:$0xff] }
 0x340   :  { %8697 = vmatprep.subr.mxu1 %v5847_v36  ;;  %v14240_v22 = vmax.f32 %v4551_v14, %v4555_v24  ;;  %8274 = vmatprep.mubr.msk.f32.mxu0 %vm546_vm2, %v5309_v19  ;;  %v5830_v42 = vld [vmem:[%s15629_s5 + $0x10] sm:$0xff]  ;;  %v4556_v47 = vmax.f32 %v4524_v27, 0.0  ;;  %v3295_v36 = vadd.f32 %v13827_v51, %v3241_v34  ;;  %v3321_v41 = vmax.f32 %v14112_v44, 0.0  ;;  %v5845_v51 = vld [vmem:[%s15629_s5 + $0x88] sm:$0xff]  ;;  %v5828_v27 = vld [vmem:[%s15629_s5] sm:$0xff] }
 0x341   :  { %8282 = vmatprep.mubr.msk.f32.mxu1 %vm546_vm2, %v5309_v19  ;;  %8663 = vmatpush3.msra.mxu0 %v8286_v43  ;;  %v14257_v8 = vmax.f32 %v4550_v35, %v4554_v56  ;;  %v3323_v0 = vmax.f32 %v14115_v29, 0.0  ;;  %v3329_v62 = vmax.f32 %v14220_v20, 0.0  ;;  %v3331_v57 = vmax.f32 %v14223_v46, 0.0  ;;  %v5308_v44 = vld [vmem:[#allocation2 + $0x190] sm:$0xff]  ;;  %v8284_v29 = vld [vmem:[%s15629_s5 + $0x108] sm:$0xff]  ;;  %v8378_v35 = vld [vmem:[%s15629_s5 + $0x3f8] sm:$0xff] }
 0x342   :  { %8698 = vmatpush3.msra.mxu1 %v5831_v49  ;;  %v6649_v30 = vmax.f32 %v14238_v26, %v14240_v22  ;;  %8664 = vmatprep.subr.mxu0 %v8301_v37  ;;  %v14267_v34 = vmax.f32 %v4552_v58, %v4556_v47  ;;  %v3317_v14 = vmax.f32 %v14099_v63, 0.0  ;;  %v3319_v54 = vmax.f32 %v3287_v15, 0.0  ;;  %v5829_v13 = vld [vmem:[%s15629_s5 + $0x8] sm:$0xff]  ;;  %v8299_v49 = vld [vmem:[%s15629_s5 + $0x180] sm:$0xff]  ;;  %v8330_v56 = vld [vmem:[%s15629_s5 + $0x278] sm:$0xff] }
 0x343   :  { %8699 = vmatprep.subr.mxu1 %v5846_v18  ;;  %8665 = vmatpush3.msra.mxu0 %v8285_v53  ;;  %v5873_v24 = vmax.f32 %v14107_v61, %v14109_v16  ;;  %v3325_v46 = vmax.f32 %v3293_v23, 0.0  ;;  %v3327_v43 = vmax.f32 %v3295_v36, 0.0  ;;  %v5827_v63 = vmax.f32 %v14050_v32, %v14056_v3  ;;  %v5844_v61 = vld [vmem:[%s15629_s5 + $0x80] sm:$0xff]  ;;  %v8346_v18 = vld [vmem:[%s15629_s5 + $0x2f8] sm:$0xff]  ;;  %v15763_v23 = vld [vmem:[#allocation25_spill] sm:$0xff] }
 0x344   :  { %8700 = vmatpush3.msra.mxu1 %v5830_v42  ;;  %5545 = vmatmul.mubr.f32.gmra.mxu0 %v5308_v44  ;;  %v6650_v20 = vmax.f32 %v14257_v8, %v14267_v34  ;;  %v8283_v16 = vld [vmem:[%s15629_s5 + $0x100] sm:$0xff]  ;;  %v6052_v19 = vmax.f32 %v3317_v14, %v3321_v41  ;;  %v6058_v32 = vmax.f32 %v3319_v54, %v3323_v0  ;;  %v15765_v42 = vld [vmem:[#allocation22_spill] sm:$0xff]  ;;  %v15766_v58 = vld [vmem:[#allocation23_spill] sm:$0xff] }
 0x345   :  { %5658 = vmatmul.mubr.f32.gmra.mxu1 %v5308_v44  ;;  %8666 = vmatprep.subr.mxu0 %v8300_v11  ;;  %v6170_v3 = vmax.f32 %v3325_v46, %v3329_v62  ;;  %v6176_v37 = vmax.f32 %v3327_v43, %v3331_v57  ;;  %v15762_v15 = vld [vmem:[#allocation24_spill] sm:$0xff]  ;;  %v15767_v47 = vmax.f32 %v15765_v42, %v15766_v58  ;;  %v8362_v41 = vld [vmem:[%s15629_s5 + $0x378] sm:$0xff]  ;;  %v8345_v11 = vld [vmem:[%s15629_s5 + $0x2f0] sm:$0xff] }
 0x346   :  { %8701 = vmatprep.subr.mxu1 %v5845_v51  ;;  %8667 = vmatpush3.msra.mxu0 %v8284_v29  ;;  %v15764_v53 = vmax.f32 %v15762_v15, %v15763_v23  ;;  %v6060_v36 = vmax.f32 %v6052_v19, %v6058_v32  ;;  %v8377_v51 = vld [vmem:[%s15629_s5 + $0x3f0] sm:$0xff]  ;;  %v8344_v44 = vld [vmem:[%s15629_s5 + $0x2e8] sm:$0xff]  ;;  %v8327_v46 = vld [vmem:[%s15629_s5 + $0x260] sm:$0xff] }
 0x347   :  { %5971 = vmatprep.mubr.f32.mxu0 %v5873_v24  ;;  %8702 = vmatpush3.msra.mxu1 %v5829_v13  ;;  %v6178_v0 = vmax.f32 %v6170_v3, %v6176_v37  ;;  %v8329_v62 = vld [vmem:[%s15629_s5 + $0x270] sm:$0xff]  ;;  %v8376_v29 = vld [vmem:[%s15629_s5 + $0x3e8] sm:$0xff]  ;;  %v8343_v24 = vld [vmem:[%s15629_s5 + $0x2e0] sm:$0xff] }
 0x348   :  { %6041 = vmatprep.mubr.f32.mxu1 %v5827_v63  ;;  %8668 = vmatprep.subr.mxu0 %v8299_v49  ;;  %v8361_v57 = vld [vmem:[%s15629_s5 + $0x370] sm:$0xff]  ;;  %v8328_v14 = vld [vmem:[%s15629_s5 + $0x268] sm:$0xff]  ;;  %v8375_v13 = vld [vmem:[%s15629_s5 + $0x3e0] sm:$0xff] }
 0x349   :  { %8703 = vmatprep.subr.mxu1 %v5844_v61  ;;  %8669 = vmatpush3.msra.mxu0 %v8283_v16  ;;  %v8360_v54 = vld [vmem:[%s15629_s5 + $0x368] sm:$0xff]  ;;  %v8359_v43 = vld [vmem:[%s15629_s5 + $0x360] sm:$0xff]  ;;  %v8342_v63 = vld [vmem:[%s15629_s5 + $0x2d8] sm:$0xff] }
 0x34a   :  { %8704 = vmatpush3.msra.mxu1 %v5828_v27  ;;  %5972 = vmatmul.mubr.f32.vlgmr.msra.gmra.mxu0 %v15764_v53  ;;  %v8374_v49 = vld [vmem:[%s15629_s5 + $0x3d8] sm:$0xff]  ;;  %v8341_v27 = vld [vmem:[%s15629_s5 + $0x2d0] sm:$0xff]  ;;  %v8340_v37 = vld [vmem:[%s15629_s5 + $0x2c8] sm:$0xff] }
 0x34b   :  { %6042 = vmatmul.mubr.f32.vlgmr.msra.gmra.mxu1 %v15767_v47  ;;  %8708 = vmatprep.subr.mxu0 %v8346_v18  ;;  %v8326_v61 = vld [vmem:[%s15629_s5 + $0x258] sm:$0xff]  ;;  %v8373_v19 = vld [vmem:[%s15629_s5 + $0x3d0] sm:$0xff]  ;;  %v8372_v18 = vld [vmem:[%s15629_s5 + $0x3c8] sm:$0xff] }
 0x34c   :  { %8743 = vmatprep.subr.mxu1 %v8378_v35  ;;  %8709 = vmatpush3.msra.mxu0 %v8330_v56  ;;  %v8358_v16 = vld [vmem:[%s15629_s5 + $0x358] sm:$0xff]  ;;  %v8325_v32 = vld [vmem:[%s15629_s5 + $0x250] sm:$0xff]  ;;  %v8324_v35 = vld [vmem:[%s15629_s5 + $0x248] sm:$0xff] }
 0x34d   :  { %6158 = vmatprep.mubr.f32.mxu0 %v6060_v36  ;;  %8744 = vmatpush3.msra.mxu1 %v8362_v41  ;;  %v8357_v3 = vld [vmem:[%s15629_s5 + $0x350] sm:$0xff]  ;;  %v8356_v56 = vld [vmem:[%s15629_s5 + $0x348] sm:$0xff]  ;;  %v8339_v15 = vld [vmem:[%s15629_s5 + $0x2c0] sm:$0xff] }
 0x34e   :  { %6276 = vmatprep.mubr.f32.mxu1 %v6178_v0  ;;  %8710 = vmatprep.subr.mxu0 %v8345_v11  ;;  %v8371_v23 = vld [vmem:[%s15629_s5 + $0x3c0] sm:$0xff]  ;;  %v8338_v58 = vld [vmem:[%s15629_s5 + $0x2b8] sm:$0xff]  ;;  %v15768_v36 = vld [vmem:[#allocation38_spill] sm:$0xff] }
 0x34f   :  { %8745 = vmatprep.subr.mxu1 %v8377_v51  ;;  %8711 = vmatpush3.msra.mxu0 %v8329_v62  ;;  %v8323_v53 = vld [vmem:[%s15629_s5 + $0x240] sm:$0xff]  ;;  %v8370_v47 = vld [vmem:[%s15629_s5 + $0x3b8] sm:$0xff]  ;;  %v15771_v51 = vld [vmem:[#allocation62_spill] sm:$0xff] }
 0x350   :  { %8746 = vmatpush3.msra.mxu1 %v8361_v57  ;;  %8712 = vmatprep.subr.mxu0 %v8344_v44  ;;  %v8355_v42 = vld [vmem:[%s15629_s5 + $0x340] sm:$0xff]  ;;  %v15772_v57 = vld [vmem:[#allocation41_spill] sm:$0xff]  ;;  %v15773_v44 = vld [vmem:[#allocation63_spill] sm:$0xff] }
 0x351   :  { %8747 = vmatprep.subr.mxu1 %v8376_v29  ;;  %8713 = vmatpush3.msra.mxu0 %v8328_v14  ;;  %v15769_v41 = vld [vmem:[#allocation60_spill] sm:$0xff]  ;;  %v4031_v29 = vadd.f32 %v15773_v44, %v15772_v57  ;;  %v8322_v14 = vld [vmem:[%s15629_s5 + $0x238] sm:$0xff]  ;;  %v8536_v26 = vld [vmem:[%s15629_s5 + $0x8e8] sm:$0xff] }
 0x352   :  { %8748 = vmatpush3.msra.mxu1 %v8360_v54  ;;  %8714 = vmatprep.subr.mxu0 %v8343_v24  ;;  %v3912_v0 = vadd.f32 %v15769_v41, %v15768_v36  ;;  %v15770_v11 = vld [vmem:[#allocation40_spill] sm:$0xff]  ;;  %v8354_v54 = vld [vmem:[%s15629_s5 + $0x338] sm:$0xff]  ;;  %v8568_v22 = vld [vmem:[%s15629_s5 + $0x9e8] sm:$0xff] }
 0x353   :  { %8749 = vmatprep.subr.mxu1 %v8375_v13  ;;  %8715 = vmatpush3.msra.mxu0 %v8327_v46  ;;  %v3918_v62 = vadd.f32 %v15771_v51, %v15770_v11  ;;  %v15774_v24 = vld [vmem:[#allocation39_spill] sm:$0xff]  ;;  %v15775_v13 = vld [vmem:[#allocation61_spill] sm:$0xff]  ;;  %v14456_v51 = vpop.f32.mrf.mxu0 }
 0x354   :  { %8750 = vmatpush3.msra.mxu1 %v8359_v43  ;;  %8716 = vmatprep.subr.mxu0 %v8342_v63  ;;  %v4025_v46 = vadd.f32 %v15775_v13, %v15774_v24  ;;  %v15776_v43 = vld [vmem:[#allocation44_spill] sm:$0xff]  ;;  %v15777_v63 = vld [vmem:[#allocation66_spill] sm:$0xff]  ;;  %v8334_v24 = vld [vmem:[%s15629_s5 + $0x298] sm:$0xff] }
 0x355   :  { %8751 = vmatprep.subr.mxu1 %v8374_v49  ;;  %8717 = vmatpush3.msra.mxu0 %v8326_v61  ;;  %v3930_v49 = vadd.f32 %v15777_v63, %v15776_v43  ;;  %v15778_v61 = vld [vmem:[#allocation45_spill] sm:$0xff]  ;;  %v8366_v13 = vld [vmem:[%s15629_s5 + $0x398] sm:$0xff] }
 0x356   :  { %8752 = vmatpush3.msra.mxu1 %v8358_v16  ;;  %8718 = vmatprep.subr.mxu0 %v8341_v27  ;;  %v15779_v16 = vld [vmem:[#allocation67_spill] sm:$0xff]  ;;  %v4442_v11 = vadd.f32 %v13765_v39, %v4025_v46  ;;  %v8335_v39 = vld [vmem:[%s15629_s5 + $0x2a0] sm:$0xff] }
 0x357   :  { %8753 = vmatprep.subr.mxu1 %v8373_v19  ;;  %8719 = vmatpush3.msra.mxu0 %v8325_v32  ;;  %v4043_v27 = vadd.f32 %v15779_v16, %v15778_v61  ;;  %v8337_v19 = vld [vmem:[%s15629_s5 + $0x2b0] sm:$0xff]  ;;  %v4452_v41 = vadd.f32 %v13971_v7, %v3930_v49  ;;  %v8320_v7 = vld [vmem:[%s15629_s5 + $0x228] sm:$0xff]  ;;  %v8318_v63 = vld [vmem:[%s15629_s5 + $0x218] sm:$0xff]  ;;  %v14492_v61 = vpop.f32.mrf.mxu0 }
 0x358   :  { %8754 = vmatpush3.msra.mxu1 %v8357_v3  ;;  %8720 = vmatprep.subr.mxu0 %v8340_v37  ;;  %v8369_v32 = vld [vmem:[%s15629_s5 + $0x3b0] sm:$0xff]  ;;  %v15781_v37 = vld [vmem:[#allocation64_spill] sm:$0xff]  ;;  %v4496_v43 = vadd.f32 %v14203_v2, %v4442_v11  ;;  %v8350_v49 = vld [vmem:[%s15629_s5 + $0x318] sm:$0xff] }
 0x359   :  { %8755 = vmatprep.subr.mxu1 %v8372_v18  ;;  %8721 = vmatpush3.msra.mxu0 %v8324_v35  ;;  %v15780_v3 = vld [vmem:[#allocation42_spill] sm:$0xff]  ;;  %v4444_v35 = vadd.f32 %v13835_v52, %v3918_v62  ;;  %v4454_v52 = vadd.f32 %v13973_v31, %v4043_v27  ;;  %v8352_v31 = vld [vmem:[%s15629_s5 + $0x328] sm:$0xff]  ;;  %v14458_v62 = vpop.f32.mrf.mxu1 }
 0x35a   :  { %8756 = vmatpush3.msra.mxu1 %v8356_v56  ;;  %8722 = vmatprep.subr.mxu0 %v8339_v15  ;;  %v3924_v18 = vadd.f32 %v15781_v37, %v15780_v3  ;;  %v4446_v56 = vadd.f32 %v13837_v17, %v4031_v29  ;;  %v8321_v15 = vld [vmem:[%s15629_s5 + $0x230] sm:$0xff]  ;;  %v8336_v17 = vld [vmem:[%s15629_s5 + $0x2a8] sm:$0xff] }
 0x35b   :  { %8757 = vmatprep.subr.mxu1 %v8371_v23  ;;  %8723 = vmatpush3.msra.mxu0 %v8323_v53  ;;  %v8353_v23 = vld [vmem:[%s15629_s5 + $0x330] sm:$0xff]  ;;  %v15782_v53 = vld [vmem:[#allocation43_spill] sm:$0xff]  ;;  %v4498_v44 = vadd.f32 %v14173_v45, %v4444_v35  ;;  %v14494_v16 = vpop.f32.mrf.mxu1 }
 0x35c   :  { %8758 = vmatpush3.msra.mxu1 %v8355_v42  ;;  %8724 = vmatprep.subr.mxu0 %v8338_v58  ;;  %v15783_v42 = vld [vmem:[#allocation65_spill] sm:$0xff]  ;;  %v4448_v57 = vadd.f32 %v13905_v50, %v3924_v18  ;;  %v4500_v29 = vadd.f32 %v14203_v2, %v4446_v56  ;;  %v8319_v50 = vld [vmem:[%s15629_s5 + $0x220] sm:$0xff]  ;;  %v8365_v3 = vld [vmem:[%s15629_s5 + $0x390] sm:$0xff] }
 0x35d   :  { %8759 = vmatprep.subr.mxu1 %v8370_v47  ;;  %v4037_v36 = vadd.f32 %v15783_v42, %v15782_v53  ;;  %8725 = vmatpush3.msra.mxu0 %v8322_v14  ;;  %v8368_v58 = vld [vmem:[%s15629_s5 + $0x3a8] sm:$0xff]  ;;  %v4440_v47 = vadd.f32 %v13763_v28, %v3912_v0  ;;  %v8367_v0 = vld [vmem:[%s15629_s5 + $0x3a0] sm:$0xff]  ;;  %v4506_v14 = vadd.f32 %v14173_v45, %v4452_v41  ;;  %v4530_v37 = vmax.f32 %v4498_v44, 0.0  ;;  %v8317_v35 = vld [vmem:[%s15629_s5 + $0x210] sm:$0xff] }
 0x35e   :  { %8760 = vmatpush3.msra.mxu1 %v8354_v54  ;;  %8726 = vmatprep.subr.mxu0 %v8337_v19  ;;  %v4508_v54 = vadd.f32 %v14203_v2, %v4454_v52  ;;  %v4502_v27 = vadd.f32 %v14173_v45, %v4448_v57  ;;  %v4532_v18 = vmax.f32 %v4500_v29, 0.0  ;;  %v8349_v56 = vld [vmem:[%s15629_s5 + $0x310] sm:$0xff]  ;;  %v8332_v53 = vld [vmem:[%s15629_s5 + $0x288] sm:$0xff]  ;;  %v4528_v41 = vmax.f32 %v4496_v43, 0.0  ;;  %v8363_v57 = vld [vmem:[%s15629_s5 + $0x380] sm:$0xff] }
 0x35f   :  { %8761 = vmatprep.subr.mxu1 %v8369_v32  ;;  %v4450_v28 = vadd.f32 %v13907_v9, %v4037_v36  ;;  %8727 = vmatpush3.msra.mxu0 %v8321_v15  ;;  %v8351_v9 = vld [vmem:[%s15629_s5 + $0x320] sm:$0xff]  ;;  %v4494_v46 = vadd.f32 %v14173_v45, %v4440_v47  ;;  %v8333_v32 = vld [vmem:[%s15629_s5 + $0x290] sm:$0xff]  ;;  %v4538_v15 = vmax.f32 %v4506_v14, 0.0  ;;  %v8364_v42 = vld [vmem:[%s15629_s5 + $0x388] sm:$0xff]  ;;  %v14524_v47 = vpop.f32.mrf.mxu1 }
 0x360   :  { %8762 = vmatpush3.msra.mxu1 %v8353_v23  ;;  %8728 = vmatprep.subr.mxu0 %v8336_v17  ;;  %v4540_v23 = vmax.f32 %v4508_v54, 0.0  ;;  %v8316_v52 = vld [vmem:[%s15629_s5 + $0x208] sm:$0xff]  ;;  %v4534_v11 = vmax.f32 %v4502_v27, 0.0  ;;  %v8347_v44 = vld [vmem:[%s15629_s5 + $0x300] sm:$0xff]  ;;  %v8442_v14 = vld [vmem:[%s15629_s5 + $0x5f8] sm:$0xff] }
 0x361   :  { %8763 = vmatprep.subr.mxu1 %v8368_v58  ;;  %8729 = vmatpush3.msra.mxu0 %v8320_v7  ;;  %v4504_v19 = vadd.f32 %v14203_v2, %v4450_v28  ;;  %v4526_v36 = vmax.f32 %v4494_v46, 0.0  ;;  %v8348_v17 = vld [vmem:[%s15629_s5 + $0x308] sm:$0xff]  ;;  %v14522_v58 = vpop.f32.mrf.mxu0  ;;  %v15784_v46 = vld [vmem:[#allocation30_spill] sm:$0xff]  ;;  %v15785_v43 = vld [vmem:[#allocation31_spill] sm:$0xff] }
 0x362   :  { %8764 = vmatpush3.msra.mxu1 %v8352_v31  ;;  %8730 = vmatprep.subr.mxu0 %v8335_v39  ;;  %v8331_v31 = vld [vmem:[%s15629_s5 + $0x280] sm:$0xff]  ;;  %v6294_v39 = vmax.f32 %v4528_v41, %v4532_v18  ;;  %v6406_v29 = vmax.f32 %v4534_v11, %v4538_v15  ;;  %v15788_v27 = vld [vmem:[#allocation35_spill] sm:$0xff]  ;;  %v8409_v18 = vld [vmem:[%s15629_s5 + $0x4f0] sm:$0xff] }
 0x363   :  { %8765 = vmatprep.subr.mxu1 %v8367_v0  ;;  %8731 = vmatpush3.msra.mxu0 %v8319_v50  ;;  %v4536_v7 = vmax.f32 %v4504_v19, 0.0  ;;  %v6288_v28 = vmax.f32 %v4526_v36, %v4530_v37  ;;  %v8315_v0 = vld [vmem:[%s15629_s5 + $0x200] sm:$0xff]  ;;  %v14544_v54 = vpop.f32.mrf.mxu0  ;;  %v8425_v15 = vld [vmem:[%s15629_s5 + $0x570] sm:$0xff]  ;;  %v8440_v36 = vld [vmem:[%s15629_s5 + $0x5e8] sm:$0xff] }
 0x364   :  { %8766 = vmatpush3.msra.mxu1 %v8351_v9  ;;  %8732 = vmatprep.subr.mxu0 %v8334_v24  ;;  %v8410_v9 = vld [vmem:[%s15629_s5 + $0x4f8] sm:$0xff]  ;;  %v14546_v24 = vpop.f32.mrf.mxu1  ;;  %v8392_v41 = vld [vmem:[%s15629_s5 + $0x468] sm:$0xff]  ;;  %v8439_v11 = vld [vmem:[%s15629_s5 + $0x5e0] sm:$0xff] }
 0x365   :  { %8767 = vmatprep.subr.mxu1 %v8366_v13  ;;  %8733 = vmatpush3.msra.mxu0 %v8318_v63  ;;  %v6412_v50 = vmax.f32 %v4536_v7, %v4540_v23  ;;  %v8394_v13 = vld [vmem:[%s15629_s5 + $0x478] sm:$0xff]  ;;  %v15786_v63 = vmax.f32 %v15784_v46, %v15785_v43  ;;  %v14572_v23 = vpop.f32.mrf.mxu0  ;;  %v8391_v7 = vld [vmem:[%s15629_s5 + $0x460] sm:$0xff] }
 0x366   :  { %8768 = vmatpush3.msra.mxu1 %v8350_v49  ;;  %8734 = vmatprep.subr.mxu0 %v8333_v32  ;;  %v15787_v49 = vld [vmem:[#allocation34_spill] sm:$0xff]  ;;  %v6296_v32 = vmax.f32 %v6288_v28, %v6294_v39  ;;  %v8406_v39 = vld [vmem:[%s15629_s5 + $0x4d8] sm:$0xff] }
 0x367   :  { %8769 = vmatprep.subr.mxu1 %v8365_v3  ;;  %8735 = vmatpush3.msra.mxu0 %v8317_v35  ;;  %v15789_v19 = vmax.f32 %v15787_v49, %v15788_v27  ;;  %v8426_v3 = vld [vmem:[%s15629_s5 + $0x578] sm:$0xff]  ;;  %v6414_v37 = vmax.f32 %v6406_v29, %v6412_v50  ;;  %v8441_v35 = vld [vmem:[%s15629_s5 + $0x5f0] sm:$0xff]  ;;  %v8436_v49 = vld [vmem:[%s15629_s5 + $0x5c8] sm:$0xff] }
 0x368   :  { %8770 = vmatpush3.msra.mxu1 %v8349_v56  ;;  %8736 = vmatprep.subr.mxu0 %v8332_v53  ;;  %v8393_v56 = vld [vmem:[%s15629_s5 + $0x470] sm:$0xff]  ;;  %v14574_v53 = vpop.f32.mrf.mxu1  ;;  %v8422_v29 = vld [vmem:[%s15629_s5 + $0x558] sm:$0xff]  ;;  %v8388_v27 = vld [vmem:[%s15629_s5 + $0x448] sm:$0xff] }
 0x369   :  { %8771 = vmatprep.subr.mxu1 %v8364_v42  ;;  %8737 = vmatpush3.msra.mxu0 %v8316_v52  ;;  %v8408_v42 = vld [vmem:[%s15629_s5 + $0x4e8] sm:$0xff]  ;;  %v8405_v50 = vld [vmem:[%s15629_s5 + $0x4d0] sm:$0xff] }
 0x36a   :  { %8772 = vmatpush3.msra.mxu1 %v8348_v17  ;;  %8738 = vmatprep.subr.mxu0 %v8331_v31  ;;  %v8424_v52 = vld [vmem:[%s15629_s5 + $0x568] sm:$0xff]  ;;  %v8407_v17 = vld [vmem:[%s15629_s5 + $0x4e0] sm:$0xff]  ;;  %v14602_v28 = vpop.f32.mrf.mxu1 }
 0x36b   :  { %8773 = vmatprep.subr.mxu1 %v8363_v57  ;;  %8739 = vmatpush3.msra.mxu0 %v8315_v0  ;;  %v8423_v31 = vld [vmem:[%s15629_s5 + $0x560] sm:$0xff]  ;;  %v14600_v57 = vpop.f32.mrf.mxu0  ;;  %v8438_v0 = vld [vmem:[%s15629_s5 + $0x5d8] sm:$0xff] }
 0x36c   :  { %8774 = vmatpush3.msra.mxu1 %v8347_v44  ;;  %6159 = vmatmul.mubr.f32.vlgmr.msra.gmra.mxu0 %v15786_v63  ;;  %v8390_v44 = vld [vmem:[%s15629_s5 + $0x458] sm:$0xff]  ;;  %v14630_v43 = vpop.f32.mrf.mxu1  ;;  %v8404_v63 = vld [vmem:[%s15629_s5 + $0x4c8] sm:$0xff] }
 0x36d   :  { %6277 = vmatmul.mubr.f32.vlgmr.msra.gmra.mxu1 %v15789_v19  ;;  %8778 = vmatprep.subr.mxu0 %v8410_v9  ;;  %v8437_v9 = vld [vmem:[%s15629_s5 + $0x5d0] sm:$0xff]  ;;  %v14628_v46 = vpop.f32.mrf.mxu0  ;;  %v8420_v19 = vld [vmem:[%s15629_s5 + $0x548] sm:$0xff] }
 0x36e   :  { %8813 = vmatprep.subr.mxu1 %v8442_v14  ;;  %8779 = vmatpush3.msra.mxu0 %v8394_v13  ;;  %v8389_v14 = vld [vmem:[%s15629_s5 + $0x450] sm:$0xff] }
 0x36f   :  { %6394 = vmatprep.mubr.f32.mxu0 %v6296_v32  ;;  %8814 = vmatpush3.msra.mxu1 %v8426_v3  ;;  %v8421_v13 = vld [vmem:[%s15629_s5 + $0x550] sm:$0xff]  ;;  %v8403_v32 = vld [vmem:[%s15629_s5 + $0x4c0] sm:$0xff] }
 0x370   :  { %6512 = vmatprep.mubr.f32.mxu1 %v6414_v37  ;;  %8780 = vmatprep.subr.mxu0 %v8409_v18  ;;  %v8435_v3 = vld [vmem:[%s15629_s5 + $0x5c0] sm:$0xff] }
 0x371   :  { %8815 = vmatprep.subr.mxu1 %v8441_v35  ;;  %8781 = vmatpush3.msra.mxu0 %v8393_v56  ;;  %v8387_v37 = vld [vmem:[%s15629_s5 + $0x440] sm:$0xff]  ;;  %v14656_v35 = vpop.f32.mrf.mxu0  ;;  %v14658_v56 = vpop.f32.mrf.mxu1 }
 0x372   :  { %8816 = vmatpush3.msra.mxu1 %v8425_v15  ;;  %8782 = vmatprep.subr.mxu0 %v8408_v42  ;;  %v8419_v18 = vld [vmem:[%s15629_s5 + $0x540] sm:$0xff]  ;;  %v8402_v15 = vld [vmem:[%s15629_s5 + $0x4b8] sm:$0xff] }
 0x373   :  { %8817 = vmatprep.subr.mxu1 %v8440_v36  ;;  %8783 = vmatpush3.msra.mxu0 %v8392_v41  ;;  %v8434_v42 = vld [vmem:[%s15629_s5 + $0x5b8] sm:$0xff]  ;;  %v15790_v36 = vld [vmem:[#allocation50_spill] sm:$0xff] }
 0x374   :  { %8818 = vmatpush3.msra.mxu1 %v8424_v52  ;;  %8784 = vmatprep.subr.mxu0 %v8407_v17  ;;  %v15791_v41 = vld [vmem:[#allocation70_spill] sm:$0xff]  ;;  %v15792_v17 = vld [vmem:[#allocation51_spill] sm:$0xff] }
 0x375   :  { %8819 = vmatprep.subr.mxu1 %v8439_v11  ;;  %8785 = vmatpush3.msra.mxu0 %v8391_v7  ;;  %v3942_v52 = vadd.f32 %v15791_v41, %v15790_v36  ;;  %v15793_v11 = vld [vmem:[#allocation71_spill] sm:$0xff]  ;;  %v8416_v36 = vld [vmem:[%s15629_s5 + $0x528] sm:$0xff]  ;;  %v8399_v41 = vld [vmem:[%s15629_s5 + $0x4a0] sm:$0xff] }
 0x376   :  { %8820 = vmatpush3.msra.mxu1 %v8423_v31  ;;  %8786 = vmatprep.subr.mxu0 %v8406_v39  ;;  %v4055_v7 = vadd.f32 %v15793_v11, %v15792_v17  ;;  %v8386_v31 = vld [vmem:[%s15629_s5 + $0x438] sm:$0xff]  ;;  %v8383_v17 = vld [vmem:[%s15629_s5 + $0x420] sm:$0xff] }
 0x377   :  { %8821 = vmatprep.subr.mxu1 %v8438_v0  ;;  %8787 = vmatpush3.msra.mxu0 %v8390_v44  ;;  %v8418_v39 = vld [vmem:[%s15629_s5 + $0x538] sm:$0xff]  ;;  %v15794_v0 = vld [vmem:[#allocation46_spill] sm:$0xff]  ;;  %v15795_v44 = vld [vmem:[#allocation68_spill] sm:$0xff] }
 0x378   :  { %8822 = vmatpush3.msra.mxu1 %v8422_v29  ;;  %8788 = vmatprep.subr.mxu0 %v8405_v50  ;;  %v3936_v29 = vadd.f32 %v15795_v44, %v15794_v0  ;;  %v8401_v50 = vld [vmem:[%s15629_s5 + $0x4b0] sm:$0xff]  ;;  %v8415_v11 = vld [vmem:[%s15629_s5 + $0x520] sm:$0xff]  ;;  %v8430_v0 = vld [vmem:[%s15629_s5 + $0x598] sm:$0xff] }
 0x379   :  { %8823 = vmatprep.subr.mxu1 %v8437_v9  ;;  %8789 = vmatpush3.msra.mxu0 %v8389_v14  ;;  %v8433_v9 = vld [vmem:[%s15629_s5 + $0x5b0] sm:$0xff]  ;;  %v15796_v14 = vld [vmem:[#allocation47_spill] sm:$0xff] }
 0x37a   :  { %8824 = vmatpush3.msra.mxu1 %v8421_v13  ;;  %8790 = vmatprep.subr.mxu0 %v8404_v63  ;;  %v15797_v13 = vld [vmem:[#allocation69_spill] sm:$0xff] }
 0x37b   :  { %8825 = vmatprep.subr.mxu1 %v8436_v49  ;;  %8791 = vmatpush3.msra.mxu0 %v8388_v27  ;;  %v4049_v63 = vadd.f32 %v15797_v13, %v15796_v14  ;;  %v4460_v49 = vadd.f32 %v14088_v6, %v3942_v52  ;;  %v4462_v27 = vadd.f32 %v14090_v38, %v4055_v7  ;;  %v8400_v6 = vld [vmem:[%s15629_s5 + $0x4a8] sm:$0xff]  ;;  %v8397_v14 = vld [vmem:[%s15629_s5 + $0x490] sm:$0xff] }
 0x37c   :  { %8826 = vmatpush3.msra.mxu1 %v8420_v19  ;;  %8792 = vmatprep.subr.mxu0 %v8403_v32  ;;  %v8385_v19 = vld [vmem:[%s15629_s5 + $0x430] sm:$0xff]  ;;  %v8432_v38 = vld [vmem:[%s15629_s5 + $0x5a8] sm:$0xff] }
 0x37d   :  { %8827 = vmatprep.subr.mxu1 %v8435_v3  ;;  %8793 = vmatpush3.msra.mxu0 %v8387_v37  ;;  %v8417_v32 = vld [vmem:[%s15629_s5 + $0x530] sm:$0xff]  ;;  %v14694_v3 = vpop.f32.mrf.mxu0  ;;  %v14696_v37 = vpop.f32.mrf.mxu1  ;;  %v4516_v52 = vadd.f32 %v14203_v2, %v4462_v27 }
 0x37e   :  { %8828 = vmatpush3.msra.mxu1 %v8419_v18  ;;  %8794 = vmatprep.subr.mxu0 %v8402_v15  ;;  %v4456_v18 = vadd.f32 %v14032_v48, %v3936_v29  ;;  %v4458_v15 = vadd.f32 %v14034_v60, %v4049_v63  ;;  %v8431_v48 = vld [vmem:[%s15629_s5 + $0x5a0] sm:$0xff]  ;;  %v4514_v60 = vadd.f32 %v14173_v45, %v4460_v49  ;;  %v8381_v63 = vld [vmem:[%s15629_s5 + $0x410] sm:$0xff] }
 0x37f   :  { %8829 = vmatprep.subr.mxu1 %v8434_v42  ;;  %8795 = vmatpush3.msra.mxu0 %v8386_v31  ;;  %v8384_v42 = vld [vmem:[%s15629_s5 + $0x428] sm:$0xff]  ;;  %v14726_v7 = vpop.f32.mrf.mxu0  ;;  %v14728_v31 = vpop.f32.mrf.mxu1  ;;  %v4548_v13 = vmax.f32 %v4516_v52, 0.0  ;;  %v8413_v49 = vld [vmem:[%s15629_s5 + $0x510] sm:$0xff]  ;;  %v8379_v52 = vld [vmem:[%s15629_s5 + $0x400] sm:$0xff] }
 0x380   :  { %8830 = vmatpush3.msra.mxu1 %v8418_v39  ;;  %8796 = vmatprep.subr.mxu0 %v8401_v50  ;;  %v8398_v39 = vld [vmem:[%s15629_s5 + $0x498] sm:$0xff]  ;;  %v4510_v44 = vadd.f32 %v14173_v45, %v4456_v18  ;;  %v4512_v29 = vadd.f32 %v14203_v2, %v4458_v15  ;;  %v8429_v45 = vld [vmem:[%s15629_s5 + $0x590] sm:$0xff]  ;;  %v4546_v2 = vmax.f32 %v4514_v60, 0.0  ;;  %v8380_v15 = vld [vmem:[%s15629_s5 + $0x408] sm:$0xff] }
 0x381   :  { %8831 = vmatprep.subr.mxu1 %v8433_v9  ;;  %8797 = vmatpush3.msra.mxu0 %v8385_v19  ;;  %v8382_v50 = vld [vmem:[%s15629_s5 + $0x418] sm:$0xff]  ;;  %v14756_v27 = vpop.f32.mrf.mxu0  ;;  %v14758_v19 = vpop.f32.mrf.mxu1 }
 0x382   :  { %8832 = vmatpush3.msra.mxu1 %v8417_v32  ;;  %8798 = vmatprep.subr.mxu0 %v8400_v6  ;;  %v8414_v9 = vld [vmem:[%s15629_s5 + $0x518] sm:$0xff]  ;;  %v8396_v32 = vld [vmem:[%s15629_s5 + $0x488] sm:$0xff]  ;;  %v4544_v18 = vmax.f32 %v4512_v29, 0.0 }
 0x383   :  { %8833 = vmatprep.subr.mxu1 %v8432_v38  ;;  %8799 = vmatpush3.msra.mxu0 %v8384_v42  ;;  %v8428_v6 = vld [vmem:[%s15629_s5 + $0x588] sm:$0xff]  ;;  %v4542_v38 = vmax.f32 %v4510_v44, 0.0  ;;  %v8506_v44 = vld [vmem:[%s15629_s5 + $0x7f8] sm:$0xff] }
 0x384   :  { %8834 = vmatpush3.msra.mxu1 %v8416_v36  ;;  %8800 = vmatprep.subr.mxu0 %v8399_v41  ;;  %v8412_v42 = vld [vmem:[%s15629_s5 + $0x508] sm:$0xff]  ;;  %v8395_v36 = vld [vmem:[%s15629_s5 + $0x480] sm:$0xff]  ;;  %v6530_v60 = vmax.f32 %v4544_v18, %v4548_v13  ;;  %v8458_v29 = vld [vmem:[%s15629_s5 + $0x678] sm:$0xff] }
 0x385   :  { %8835 = vmatprep.subr.mxu1 %v8431_v48  ;;  %8801 = vmatpush3.msra.mxu0 %v8383_v17  ;;  %v8427_v41 = vld [vmem:[%s15629_s5 + $0x580] sm:$0xff]  ;;  %v6524_v48 = vmax.f32 %v4542_v38, %v4546_v2  ;;  %v8456_v2 = vld [vmem:[%s15629_s5 + $0x668] sm:$0xff]  ;;  %v8502_v38 = vld [vmem:[%s15629_s5 + $0x7d8] sm:$0xff] }
 0x386   :  { %8836 = vmatpush3.msra.mxu1 %v8415_v11  ;;  %8802 = vmatprep.subr.mxu0 %v8398_v39  ;;  %v8411_v17 = vld [vmem:[%s15629_s5 + $0x500] sm:$0xff]  ;;  %v14784_v11 = vpop.f32.mrf.mxu0  ;;  %v14786_v39 = vpop.f32.mrf.mxu1  ;;  %v8488_v13 = vld [vmem:[%s15629_s5 + $0x768] sm:$0xff]  ;;  %v8454_v18 = vld [vmem:[%s15629_s5 + $0x658] sm:$0xff] }
 0x387   :  { %8837 = vmatprep.subr.mxu1 %v8430_v0  ;;  %8803 = vmatpush3.msra.mxu0 %v8382_v50  ;;  %v8474_v0 = vld [vmem:[%s15629_s5 + $0x6f8] sm:$0xff]  ;;  %v6532_v50 = vmax.f32 %v6524_v48, %v6530_v60  ;;  %v8501_v48 = vld [vmem:[%s15629_s5 + $0x7d0] sm:$0xff] }
 0x388   :  { %8838 = vmatpush3.msra.mxu1 %v8414_v9  ;;  %8804 = vmatprep.subr.mxu0 %v8397_v14  ;;  %v8490_v9 = vld [vmem:[%s15629_s5 + $0x778] sm:$0xff]  ;;  %v14806_v14 = vpop.f32.mrf.mxu0  ;;  %v8453_v60 = vld [vmem:[%s15629_s5 + $0x650] sm:$0xff] }
 0x389   :  { %8839 = vmatprep.subr.mxu1 %v8429_v45  ;;  %8805 = vmatpush3.msra.mxu0 %v8381_v63  ;;  %15798 = vst [vmem:[#allocation12_spill] sm:$0xff] %v14806_v14  ;;  %v14808_v45 = vpop.f32.mrf.mxu1  ;;  %v8503_v63 = vld [vmem:[%s15629_s5 + $0x7e0] sm:$0xff] }
 0x38a   :  { %8840 = vmatpush3.msra.mxu1 %v8413_v49  ;;  %8806 = vmatprep.subr.mxu0 %v8396_v32  ;;  %15799 = vst [vmem:[#allocation4_spill] sm:$0xff] %v14808_v45  ;;  %v14837_v8 = vpop.f32.mrf.mxu0  ;;  %v8455_v49 = vld [vmem:[%s15629_s5 + $0x660] sm:$0xff]  ;;  %v8545_v45 = vld [vmem:[%s15629_s5 + $0x930] sm:$0xff] }
 0x38b   :  { %8841 = vmatprep.subr.mxu1 %v8428_v6  ;;  %8807 = vmatpush3.msra.mxu0 %v8380_v15  ;;  %15800 = vst [vmem:[#allocation13_spill] sm:$0xff] %v14837_v8  ;;  %v14839_v34 = vpop.f32.mrf.mxu1  ;;  %v8487_v32 = vld [vmem:[%s15629_s5 + $0x760] sm:$0xff]  ;;  %v8470_v6 = vld [vmem:[%s15629_s5 + $0x6d8] sm:$0xff] }
 0x38c   :  { %8842 = vmatpush3.msra.mxu1 %v8412_v42  ;;  %8808 = vmatprep.subr.mxu0 %v8395_v36  ;;  %15801 = vst [vmem:[#allocation5_spill] sm:$0xff] %v14839_v34  ;;  %v8486_v15 = vld [vmem:[%s15629_s5 + $0x758] sm:$0xff]  ;;  %v14865_v42 = vpop.f32.mrf.mxu0 }
 0x38d   :  { %8843 = vmatprep.subr.mxu1 %v8427_v41  ;;  %8809 = vmatpush3.msra.mxu0 %v8379_v52  ;;  %15802 = vst [vmem:[#allocation14_spill] sm:$0xff] %v14865_v42  ;;  %v14867_v36 = vpop.f32.mrf.mxu1  ;;  %v8469_v41 = vld [vmem:[%s15629_s5 + $0x6d0] sm:$0xff] }
 0x38e   :  { %8844 = vmatpush3.msra.mxu1 %v8411_v17  ;;  %6395 = vmatmul.mubr.f32.vlgmr.msra.gmra.mxu0 %v6295_v12  ;;  %v8457_v12 = vld [vmem:[%s15629_s5 + $0x670] sm:$0xff]  ;;  %15803 = vst [vmem:[#allocation6_spill] sm:$0xff] %v14867_v36  ;;  %v8468_v17 = vld [vmem:[%s15629_s5 + $0x6c8] sm:$0xff] }
 0x38f   :  { %6513 = vmatmul.mubr.f32.vlgmr.msra.gmra.mxu1 %v6413_v59  ;;  %8848 = vmatprep.subr.mxu0 %v8474_v0  ;;  %v8504_v59 = vld [vmem:[%s15629_s5 + $0x7e8] sm:$0xff]  ;;  %v8485_v52 = vld [vmem:[%s15629_s5 + $0x750] sm:$0xff] }
 0x390   :  { %8883 = vmatprep.subr.mxu1 %v8506_v44  ;;  %8849 = vmatpush3.msra.mxu0 %v8458_v29  ;;  %v8500_v0 = vld [vmem:[%s15629_s5 + $0x7c8] sm:$0xff]  ;;  %v8541_v42 = vld [vmem:[%s15629_s5 + $0x910] sm:$0xff] }
 0x391   :  { %6630 = vmatprep.mubr.f32.mxu0 %v6532_v50  ;;  %8884 = vmatpush3.msra.mxu1 %v8490_v9  ;;  %v8452_v44 = vld [vmem:[%s15629_s5 + $0x648] sm:$0xff]  ;;  %v14893_v50 = vpop.f32.mrf.mxu0  ;;  %v14895_v9 = vpop.f32.mrf.mxu1 }
 0x392   :  { %6748 = vmatprep.mubr.f32.mxu1 %v6650_v20  ;;  %8850 = vmatprep.subr.mxu0 %v8473_v40  ;;  %v8471_v20 = vld [vmem:[%s15629_s5 + $0x6e0] sm:$0xff]  ;;  %v8484_v29 = vld [vmem:[%s15629_s5 + $0x748] sm:$0xff]  ;;  %15804 = vst [vmem:[#allocation15_spill] sm:$0xff] %v14893_v50  ;;  %15805 = vst [vmem:[#allocation7_spill] sm:$0xff] %v14895_v9 }
 0x393   :  { %8885 = vmatprep.subr.mxu1 %v8505_v25  ;;  %8851 = vmatpush3.msra.mxu0 %v8457_v12  ;;  %v8467_v40 = vld [vmem:[%s15629_s5 + $0x6c0] sm:$0xff] }
 0x394   :  { %8886 = vmatpush3.msra.mxu1 %v8489_v4  ;;  %8852 = vmatprep.subr.mxu0 %v8472_v33  ;;  %v8499_v25 = vld [vmem:[%s15629_s5 + $0x7c0] sm:$0xff] }
 0x395   :  { %8887 = vmatprep.subr.mxu1 %v8504_v59  ;;  %8853 = vmatpush3.msra.mxu0 %v8456_v2  ;;  %v8451_v12 = vld [vmem:[%s15629_s5 + $0x640] sm:$0xff]  ;;  %v14909_v33 = vpop.f32.mrf.mxu0  ;;  %v14911_v59 = vpop.f32.mrf.mxu1  ;;  %v8466_v2 = vld [vmem:[%s15629_s5 + $0x6b8] sm:$0xff] }
 0x396   :  { %8888 = vmatpush3.msra.mxu1 %v8488_v13  ;;  %8854 = vmatprep.subr.mxu0 %v8471_v20  ;;  %v8483_v4 = vld [vmem:[%s15629_s5 + $0x740] sm:$0xff]  ;;  %v8498_v13 = vld [vmem:[%s15629_s5 + $0x7b8] sm:$0xff] }
 0x397   :  { %8889 = vmatprep.subr.mxu1 %v8503_v63  ;;  %8855 = vmatpush3.msra.mxu0 %v8455_v49  ;;  %v8450_v20 = vld [vmem:[%s15629_s5 + $0x638] sm:$0xff]  ;;  %v8465_v49 = vld [vmem:[%s15629_s5 + $0x6b0] sm:$0xff]  ;;  %v8543_v9 = vld [vmem:[%s15629_s5 + $0x920] sm:$0xff] }
 0x398   :  { %8890 = vmatpush3.msra.mxu1 %v8487_v32  ;;  %8856 = vmatprep.subr.mxu0 %v8470_v6  ;;  %v8482_v63 = vld [vmem:[%s15629_s5 + $0x738] sm:$0xff]  ;;  %v8497_v32 = vld [vmem:[%s15629_s5 + $0x7b0] sm:$0xff] }
 0x399   :  { %8891 = vmatprep.subr.mxu1 %v8502_v38  ;;  %8857 = vmatpush3.msra.mxu0 %v8454_v18  ;;  %v8449_v6 = vld [vmem:[%s15629_s5 + $0x630] sm:$0xff]  ;;  %v14937_v18 = vpop.f32.mrf.mxu0 }
 0x39a   :  { %8892 = vmatpush3.msra.mxu1 %v8486_v15  ;;  %8858 = vmatprep.subr.mxu0 %v8469_v41  ;;  %v8481_v38 = vld [vmem:[%s15629_s5 + $0x730] sm:$0xff]  ;;  %v14939_v15 = vpop.f32.mrf.mxu1  ;;  %v8464_v41 = vld [vmem:[%s15629_s5 + $0x6a8] sm:$0xff] }
 0x39b   :  { %8893 = vmatprep.subr.mxu1 %v8501_v48  ;;  %8859 = vmatpush3.msra.mxu0 %v8453_v60  ;;  %v8496_v48 = vld [vmem:[%s15629_s5 + $0x7a8] sm:$0xff] }
 0x39c   :  { %8894 = vmatpush3.msra.mxu1 %v8485_v52  ;;  %8860 = vmatprep.subr.mxu0 %v8468_v17  ;;  %v8448_v60 = vld [vmem:[%s15629_s5 + $0x628] sm:$0xff]  ;;  %v8463_v17 = vld [vmem:[%s15629_s5 + $0x6a0] sm:$0xff] }
 0x39d   :  { %8895 = vmatprep.subr.mxu1 %v8500_v0  ;;  %8861 = vmatpush3.msra.mxu0 %v8452_v44  ;;  %v8480_v52 = vld [vmem:[%s15629_s5 + $0x728] sm:$0xff]  ;;  %v8495_v0 = vld [vmem:[%s15629_s5 + $0x7a0] sm:$0xff] }
 0x39e   :  { %8896 = vmatpush3.msra.mxu1 %v8484_v29  ;;  %8862 = vmatprep.subr.mxu0 %v8467_v40  ;;  %v8447_v44 = vld [vmem:[%s15629_s5 + $0x620] sm:$0xff]  ;;  %v14965_v40 = vpop.f32.mrf.mxu0 }
 0x39f   :  { %8897 = vmatprep.subr.mxu1 %v8499_v25  ;;  %8863 = vmatpush3.msra.mxu0 %v8451_v12  ;;  %v8479_v29 = vld [vmem:[%s15629_s5 + $0x720] sm:$0xff]  ;;  %v14967_v25 = vpop.f32.mrf.mxu1  ;;  %v8462_v12 = vld [vmem:[%s15629_s5 + $0x698] sm:$0xff] }
 0x3a0   :  { %8898 = vmatpush3.msra.mxu1 %v8483_v4  ;;  %8864 = vmatprep.subr.mxu0 %v8466_v2  ;;  %v8494_v4 = vld [vmem:[%s15629_s5 + $0x798] sm:$0xff] }
 0x3a1   :  { %8899 = vmatprep.subr.mxu1 %v8498_v13  ;;  %8865 = vmatpush3.msra.mxu0 %v8450_v20  ;;  %v8446_v2 = vld [vmem:[%s15629_s5 + $0x618] sm:$0xff]  ;;  %v8461_v20 = vld [vmem:[%s15629_s5 + $0x690] sm:$0xff] }
 0x3a2   :  { %8900 = vmatpush3.msra.mxu1 %v8482_v63  ;;  %8866 = vmatprep.subr.mxu0 %v8465_v49  ;;  %v8478_v13 = vld [vmem:[%s15629_s5 + $0x718] sm:$0xff]  ;;  %v8493_v63 = vld [vmem:[%s15629_s5 + $0x790] sm:$0xff] }
 0x3a3   :  { %8901 = vmatprep.subr.mxu1 %v8497_v32  ;;  %8867 = vmatpush3.msra.mxu0 %v8449_v6  ;;  %v8445_v49 = vld [vmem:[%s15629_s5 + $0x610] sm:$0xff]  ;;  %v14993_v6 = vpop.f32.mrf.mxu0 }
 0x3a4   :  { %8902 = vmatpush3.msra.mxu1 %v8481_v38  ;;  %8868 = vmatprep.subr.mxu0 %v8464_v41  ;;  %v8477_v32 = vld [vmem:[%s15629_s5 + $0x710] sm:$0xff]  ;;  %v14995_v38 = vpop.f32.mrf.mxu1  ;;  %v8460_v41 = vld [vmem:[%s15629_s5 + $0x688] sm:$0xff] }
 0x3a5   :  { %8903 = vmatprep.subr.mxu1 %v8496_v48  ;;  %8869 = vmatpush3.msra.mxu0 %v8448_v60  ;;  %v8492_v48 = vld [vmem:[%s15629_s5 + $0x788] sm:$0xff] }
 0x3a6   :  { %8904 = vmatpush3.msra.mxu1 %v8480_v52  ;;  %8870 = vmatprep.subr.mxu0 %v8463_v17  ;;  %v8444_v60 = vld [vmem:[%s15629_s5 + $0x608] sm:$0xff]  ;;  %v8459_v17 = vld [vmem:[%s15629_s5 + $0x680] sm:$0xff] }
 0x3a7   :  { %8905 = vmatprep.subr.mxu1 %v8495_v0  ;;  %8871 = vmatpush3.msra.mxu0 %v8447_v44  ;;  %v8476_v52 = vld [vmem:[%s15629_s5 + $0x708] sm:$0xff]  ;;  %v8491_v0 = vld [vmem:[%s15629_s5 + $0x780] sm:$0xff] }
 0x3a8   :  { %8906 = vmatpush3.msra.mxu1 %v8479_v29  ;;  %8872 = vmatprep.subr.mxu0 %v8462_v12  ;;  %v8443_v44 = vld [vmem:[%s15629_s5 + $0x600] sm:$0xff]  ;;  %v15021_v12 = vpop.f32.mrf.mxu0 }
 0x3a9   :  { %8907 = vmatprep.subr.mxu1 %v8494_v4  ;;  %8873 = vmatpush3.msra.mxu0 %v8446_v2  ;;  %v8475_v29 = vld [vmem:[%s15629_s5 + $0x700] sm:$0xff]  ;;  %v15023_v4 = vpop.f32.mrf.mxu1  ;;  %v8538_v2 = vld [vmem:[%s15629_s5 + $0x8f8] sm:$0xff] }
 0x3aa   :  { %8908 = vmatpush3.msra.mxu1 %v8478_v13  ;;  %8874 = vmatprep.subr.mxu0 %v8461_v20  ;;  %v8570_v13 = vld [vmem:[%s15629_s5 + $0x9f8] sm:$0xff] }
 0x3ab   :  { %8909 = vmatprep.subr.mxu1 %v8493_v63  ;;  %8875 = vmatpush3.msra.mxu0 %v8445_v49  ;;  %v8522_v20 = vld [vmem:[%s15629_s5 + $0x878] sm:$0xff]  ;;  %v15806_v49 = vmax.f32 %v14133_v5, %v14135_v21  ;;  %v8521_v5 = vld [vmem:[%s15629_s5 + $0x870] sm:$0xff] }
 0x3ac   :  { %8910 = vmatpush3.msra.mxu1 %v8477_v32  ;;  %8876 = vmatprep.subr.mxu0 %v8460_v41  ;;  %v8554_v63 = vld [vmem:[%s15629_s5 + $0x978] sm:$0xff]  ;;  %v15043_v32 = vpop.f32.mrf.mxu0  ;;  %v15045_v41 = vpop.f32.mrf.mxu1  ;;  %v8553_v21 = vld [vmem:[%s15629_s5 + $0x970] sm:$0xff] }
 0x3ad   :  { %8911 = vmatprep.subr.mxu1 %v8492_v48  ;;  %8877 = vmatpush3.msra.mxu0 %v8444_v60  ;;  %v8537_v48 = vld [vmem:[%s15629_s5 + $0x8f0] sm:$0xff] }
 0x3ae   :  { %8912 = vmatpush3.msra.mxu1 %v8476_v52  ;;  %8878 = vmatprep.subr.mxu0 %v8459_v17  ;;  %v8569_v60 = vld [vmem:[%s15629_s5 + $0x9f0] sm:$0xff]  ;;  %v8552_v52 = vld [vmem:[%s15629_s5 + $0x968] sm:$0xff]  ;;  %v15071_v17 = vpop.f32.mrf.mxu0 }
 0x3af   :  { %8913 = vmatprep.subr.mxu1 %v8491_v0  ;;  %8879 = vmatpush3.msra.mxu0 %v8443_v44  ;;  %v15073_v0 = vpop.f32.mrf.mxu1  ;;  %v8535_v44 = vld [vmem:[%s15629_s5 + $0x8e0] sm:$0xff] }
 0x3b0   :  { %8914 = vmatpush3.msra.mxu1 %v8475_v29  ;;  %6631 = vmatmul.mubr.f32.vlgmr.msra.gmra.mxu0 %v15806_v49  ;;  %v8567_v29 = vld [vmem:[%s15629_s5 + $0x9e0] sm:$0xff]  ;;  %v8518_v49 = vld [vmem:[%s15629_s5 + $0x858] sm:$0xff] }
 0x3b1   :  { %6749 = vmatmul.mubr.f32.vlgmr.msra.gmra.mxu1 %v6649_v30  ;;  %8918 = vmatprep.subr.mxu0 %v8538_v2  ;;  %v8520_v30 = vld [vmem:[%s15629_s5 + $0x868] sm:$0xff]  ;;  %v8519_v2 = vld [vmem:[%s15629_s5 + $0x860] sm:$0xff] }
 0x3b2   :  { %8953 = vmatprep.subr.mxu1 %v8570_v13  ;;  %8919 = vmatpush3.msra.mxu0 %v8522_v20  ;;  %v8551_v13 = vld [vmem:[%s15629_s5 + $0x960] sm:$0xff]  ;;  %v8534_v20 = vld [vmem:[%s15629_s5 + $0x8d8] sm:$0xff] }
 0x3b3   :  { %8954 = vmatpush3.msra.mxu1 %v8554_v63  ;;  %8920 = vmatprep.subr.mxu0 %v8537_v48  ;;  %v8566_v63 = vld [vmem:[%s15629_s5 + $0x9d8] sm:$0xff] }
 0x3b4   :  { %8955 = vmatprep.subr.mxu1 %v8569_v60  ;;  %8921 = vmatpush3.msra.mxu0 %v8521_v5  ;;  %v8550_v48 = vld [vmem:[%s15629_s5 + $0x958] sm:$0xff]  ;;  %v15099_v60 = vpop.f32.mrf.mxu0  ;;  %v15101_v5 = vpop.f32.mrf.mxu1 }
 0x3b5   :  { %8956 = vmatpush3.msra.mxu1 %v8553_v21  ;;  %8922 = vmatprep.subr.mxu0 %v8536_v26  ;;  %v8533_v21 = vld [vmem:[%s15629_s5 + $0x8d0] sm:$0xff] }
 0x3b6   :  { %8957 = vmatprep.subr.mxu1 %v8568_v22  ;;  %8923 = vmatpush3.msra.mxu0 %v8520_v30  ;;  %v8565_v26 = vld [vmem:[%s15629_s5 + $0x9d0] sm:$0xff] }
 0x3b7   :  { %8958 = vmatpush3.msra.mxu1 %v8552_v52  ;;  %8924 = vmatprep.subr.mxu0 %v8535_v44  ;;  %v8517_v22 = vld [vmem:[%s15629_s5 + $0x850] sm:$0xff]  ;;  %v8532_v52 = vld [vmem:[%s15629_s5 + $0x8c8] sm:$0xff] }
 0x3b8   :  { %8959 = vmatprep.subr.mxu1 %v8567_v29  ;;  %8925 = vmatpush3.msra.mxu0 %v8519_v2  ;;  %v8549_v30 = vld [vmem:[%s15629_s5 + $0x950] sm:$0xff]  ;;  %v8564_v44 = vld [vmem:[%s15629_s5 + $0x9c8] sm:$0xff] }
 0x3b9   :  { %8960 = vmatpush3.msra.mxu1 %v8551_v13  ;;  %8926 = vmatprep.subr.mxu0 %v8534_v20  ;;  %v8516_v29 = vld [vmem:[%s15629_s5 + $0x848] sm:$0xff]  ;;  %v15127_v13 = vpop.f32.mrf.mxu0  ;;  %v15129_v20 = vpop.f32.mrf.mxu1 }
 0x3ba   :  { %8961 = vmatprep.subr.mxu1 %v8566_v63  ;;  %8927 = vmatpush3.msra.mxu0 %v8518_v49  ;;  %v8548_v2 = vld [vmem:[%s15629_s5 + $0x948] sm:$0xff]  ;;  %v8531_v63 = vld [vmem:[%s15629_s5 + $0x8c0] sm:$0xff] }
 0x3bb   :  { %8962 = vmatpush3.msra.mxu1 %v8550_v48  ;;  %8928 = vmatprep.subr.mxu0 %v8533_v21  ;;  %v8563_v49 = vld [vmem:[%s15629_s5 + $0x9c0] sm:$0xff] }
 0x3bc   :  { %8963 = vmatprep.subr.mxu1 %v8565_v26  ;;  %8929 = vmatpush3.msra.mxu0 %v8517_v22  ;;  %v8515_v48 = vld [vmem:[%s15629_s5 + $0x840] sm:$0xff]  ;;  %v8530_v26 = vld [vmem:[%s15629_s5 + $0x8b8] sm:$0xff] }
 0x3bd   :  { %8964 = vmatpush3.msra.mxu1 %v8549_v30  ;;  %8930 = vmatprep.subr.mxu0 %v8532_v52  ;;  %v8547_v21 = vld [vmem:[%s15629_s5 + $0x940] sm:$0xff]  ;;  %v8562_v22 = vld [vmem:[%s15629_s5 + $0x9b8] sm:$0xff] }
 0x3be   :  { %8965 = vmatprep.subr.mxu1 %v8564_v44  ;;  %8931 = vmatpush3.msra.mxu0 %v8516_v29  ;;  %v8514_v30 = vld [vmem:[%s15629_s5 + $0x838] sm:$0xff]  ;;  %v15155_v44 = vpop.f32.mrf.mxu0  ;;  %v15157_v29 = vpop.f32.mrf.mxu1 }
 0x3bf   :  { %8966 = vmatpush3.msra.mxu1 %v8548_v2  ;;  %8932 = vmatprep.subr.mxu0 %v8531_v63  ;;  %v8546_v52 = vld [vmem:[%s15629_s5 + $0x938] sm:$0xff]  ;;  %v8529_v2 = vld [vmem:[%s15629_s5 + $0x8b0] sm:$0xff] }
 0x3c0   :  { %8967 = vmatprep.subr.mxu1 %v8563_v49  ;;  %8933 = vmatpush3.msra.mxu0 %v8515_v48  ;;  %v8561_v63 = vld [vmem:[%s15629_s5 + $0x9b0] sm:$0xff]  ;;  %v8528_v48 = vld [vmem:[%s15629_s5 + $0x8a8] sm:$0xff]  ;;  %v15185_v36 = vpop.f32.mrf.mxu1 }
 0x3c1   :  { %8968 = vmatpush3.msra.mxu1 %v8547_v21  ;;  %8934 = vmatprep.subr.mxu0 %v8530_v26  ;;  %v8513_v49 = vld [vmem:[%s15629_s5 + $0x830] sm:$0xff]  ;;  %v8560_v21 = vld [vmem:[%s15629_s5 + $0x9a8] sm:$0xff] }
 0x3c2   :  { %8969 = vmatprep.subr.mxu1 %v8562_v22  ;;  %8935 = vmatpush3.msra.mxu0 %v8514_v30  ;;  %v8512_v26 = vld [vmem:[%s15629_s5 + $0x828] sm:$0xff]  ;;  %v15183_v30 = vpop.f32.mrf.mxu0  ;;  %v15213_v50 = vpop.f32.mrf.mxu1 }
 0x3c3   :  { %8970 = vmatpush3.msra.mxu1 %v8546_v52  ;;  %8936 = vmatprep.subr.mxu0 %v8529_v2  ;;  %v8544_v22 = vld [vmem:[%s15629_s5 + $0x928] sm:$0xff]  ;;  %v8527_v52 = vld [vmem:[%s15629_s5 + $0x8a0] sm:$0xff] }
 0x3c4   :  { %8971 = vmatprep.subr.mxu1 %v8561_v63  ;;  %8937 = vmatpush3.msra.mxu0 %v8513_v49  ;;  %v8559_v2 = vld [vmem:[%s15629_s5 + $0x9a0] sm:$0xff]  ;;  %v8526_v49 = vld [vmem:[%s15629_s5 + $0x898] sm:$0xff]  ;;  %v15241_v14 = vpop.f32.mrf.mxu1 }
 0x3c5   :  { %8972 = vmatpush3.msra.mxu1 %v8545_v45  ;;  %8938 = vmatprep.subr.mxu0 %v8528_v48  ;;  %v8511_v63 = vld [vmem:[%s15629_s5 + $0x820] sm:$0xff]  ;;  %v8558_v45 = vld [vmem:[%s15629_s5 + $0x998] sm:$0xff]  ;;  %15808 = vst [vmem:[#allocation8_spill] sm:$0xff] %v15241_v14 }
 0x3c6   :  { %8973 = vmatprep.subr.mxu1 %v8560_v21  ;;  %8939 = vmatpush3.msra.mxu0 %v8512_v26  ;;  %v8510_v48 = vld [vmem:[%s15629_s5 + $0x818] sm:$0xff]  ;;  %v15211_v26 = vpop.f32.mrf.mxu0  ;;  %v8539_v14 = vld [vmem:[%s15629_s5 + $0x900] sm:$0xff] }
 0x3c7   :  { %8974 = vmatpush3.msra.mxu1 %v8544_v22  ;;  %8940 = vmatprep.subr.mxu0 %v8527_v52  ;;  %v8542_v21 = vld [vmem:[%s15629_s5 + $0x918] sm:$0xff]  ;;  %v8525_v22 = vld [vmem:[%s15629_s5 + $0x890] sm:$0xff] }
 0x3c8   :  { %8975 = vmatprep.subr.mxu1 %v8559_v2  ;;  %8941 = vmatpush3.msra.mxu0 %v8511_v63  ;;  %v8557_v52 = vld [vmem:[%s15629_s5 + $0x990] sm:$0xff]  ;;  %v8524_v63 = vld [vmem:[%s15629_s5 + $0x888] sm:$0xff] }
 0x3c9   :  { %8976 = vmatpush3.msra.mxu1 %v8543_v9  ;;  %8942 = vmatprep.subr.mxu0 %v8526_v49  ;;  %v8509_v2 = vld [vmem:[%s15629_s5 + $0x810] sm:$0xff]  ;;  %v8556_v9 = vld [vmem:[%s15629_s5 + $0x988] sm:$0xff] }
 0x3ca   :  { %8977 = vmatprep.subr.mxu1 %v8558_v45  ;;  %8943 = vmatpush3.msra.mxu0 %v8510_v48  ;;  %v8508_v49 = vld [vmem:[%s15629_s5 + $0x808] sm:$0xff]  ;;  %v15239_v48 = vpop.f32.mrf.mxu0 }
 0x3cb   :  { %8978 = vmatpush3.msra.mxu1 %v8542_v21  ;;  %8944 = vmatprep.subr.mxu0 %v8525_v22  ;;  %v8540_v45 = vld [vmem:[%s15629_s5 + $0x908] sm:$0xff]  ;;  %15807 = vst [vmem:[#allocation16_spill] sm:$0xff] %v15239_v48  ;;  %v8523_v21 = vld [vmem:[%s15629_s5 + $0x880] sm:$0xff]  ;;  %v15263_v48 = vpop.f32.mrf.mxu1 }
 0x3cc   :  { %8979 = vmatprep.subr.mxu1 %v8557_v52  ;;  %8945 = vmatpush3.msra.mxu0 %v8509_v2  ;;  %v8555_v22 = vld [vmem:[%s15629_s5 + $0x980] sm:$0xff]  ;;  %v8602_v2 = vld [vmem:[%s15629_s5 + $0xaf8] sm:$0xff]  ;;  %15810 = vst [vmem:[#allocation17_spill] sm:$0xff] %v15263_v48 }
 0x3cd   :  { %8980 = vmatpush3.msra.mxu1 %v8541_v42  ;;  %8946 = vmatprep.subr.mxu0 %v8524_v63  ;;  %v8507_v52 = vld [vmem:[%s15629_s5 + $0x800] sm:$0xff]  ;;  %v8634_v42 = vld [vmem:[%s15629_s5 + $0xbf8] sm:$0xff]  ;;  %v15261_v63 = vpop.f32.mrf.mxu0 }
 0x3ce   :  { %8981 = vmatprep.subr.mxu1 %v8556_v9  ;;  %8947 = vmatpush3.msra.mxu0 %v8508_v49  ;;  %15809 = vst [vmem:[#allocation9_spill] sm:$0xff] %v15261_v63  ;;  %v15267_v49 = vpop.f32.mrf.mxu1 }
 0x3cf   :  { %8982 = vmatpush3.msra.mxu1 %v8540_v45  ;;  %8948 = vmatprep.subr.mxu0 %v8523_v21  ;;  %v15265_v9 = vpop.f32.mrf.mxu0  ;;  %15812 = vst [vmem:[#allocation10_spill] sm:$0xff] %v15267_v49  ;;  %v5696_v21 = vld [vmem:[%s15628_s4] sm:$0xf] }
 0x3d0   :  { %8983 = vmatprep.subr.mxu1 %v8555_v22  ;;  %8949 = vmatpush3.msra.mxu0 %v8507_v52  ;;  %15811 = vst [vmem:[#allocation21_spill] sm:$0xff] %v15265_v9  ;;  %v15271_v45 = vpop.f32.mrf.mxu1  ;;  %v5135_v22 = vadd.f32 %v14909_v33, %v14456_v51  ;;  %v15815_v49 = vld [vmem:[#allocation20_spill] sm:$0xff] }
 0x3d1   :  { %8984 = vmatpush3.msra.mxu1 %v8539_v14  ;;  %8988 = vmatprep.subr.mxu0 %v8602_v2  ;;  %v15269_v34 = vpop.f32.mrf.mxu0  ;;  %15814 = vst [vmem:[#allocation11_spill] sm:$0xff] %v15271_v45  ;;  %v5248_v14 = vadd.f32 %v14911_v59, %v14458_v62  ;;  %v15284_v9 = vrot.slane %v5696_v21, %v15815_v49 }
 0x3d2   :  { %9023 = vmatprep.subr.mxu1 %v8634_v42  ;;  %15813 = vst [vmem:[#allocation18_spill] sm:$0xff] %v15269_v34  ;;  %v15281_v42 = vrot.slane %v5696_v21, %v10052_v55  ;;  %v5137_v45 = vadd.f32 %v14937_v18, %v14492_v61  ;;  %v5250_v34 = vadd.f32 %v14939_v15, %v14494_v16 }
 0x3d3   :  { %v15291_v62 = vrot.slane %v5696_v21, %v10074_v1  ;;  %v15294_v55 = vrot.slane %v5696_v21, %v13778_v10  ;;  %v5141_v49 = vadd.f32 %v14965_v40, %v14522_v58  ;;  %v5254_v61 = vadd.f32 %v14967_v25, %v14524_v47 }
 0x3d4   :  { %v5143_v1 = vadd.f32 %v14993_v6, %v14544_v54 }
 0x3d9   :  { %v5504_v52 = vpop.f32.mrf.mxu0  ;;  %v5617_v2 = vpop.f32.mrf.mxu1 }
 0x3da   :  { %v5664_v48 = vadd.f32 %v5504_v52, %v5135_v22  ;;  %v5666_v63 = vadd.f32 %v5617_v2, %v5248_v14 }
 0x3db   :  { %v5506_v51 = vpop.f32.mrf.mxu0  ;;  %v5619_v33 = vpop.f32.mrf.mxu1 }
 0x3dc   :  { %v5665_v8 = vadd.f32 %v5506_v51, %v5137_v45  ;;  %v5667_v59 = vadd.f32 %v5619_v33, %v5250_v34  ;;  %v5718_v16 = vadd.f32 %v15281_v42, %v5664_v48  ;;  %v5720_v18 = vadd.f32 %v15284_v9, %v5666_v63 }
 0x3dd   :  { %v5256_v34 = vadd.f32 %v14995_v38, %v14546_v24 }
 0x3de   :  { %v5719_v21 = vadd.f32 %v15291_v62, %v5665_v8  ;;  %v5721_v58 = vadd.f32 %v15294_v55, %v5667_v59  ;;  %v5750_v52 = vmax.f32 %v5718_v16, 0.0  ;;  %v5752_v2 = vmax.f32 %v5720_v18, 0.0 }
 0x3df   :  { %v5510_v15 = vpop.f32.mrf.mxu0  ;;  %v5623_v22 = vpop.f32.mrf.mxu1  ;;  %v5260_v16 = vadd.f32 %v15023_v4, %v14574_v53  ;;  %v5149_v18 = vadd.f32 %v15043_v32, %v14600_v57  ;;  %v5266_v53 = vadd.f32 %v15073_v0, %v14630_v43  ;;  %v5155_v32 = vadd.f32 %v15099_v60, %v14656_v35 }
 0x3e0   :  { %v5668_v10 = vadd.f32 %v5510_v15, %v5141_v49  ;;  %v5670_v45 = vadd.f32 %v5623_v22, %v5254_v61  ;;  %v5751_v51 = vmax.f32 %v5719_v21, 0.0  ;;  %v5753_v8 = vmax.f32 %v5721_v58, 0.0 }
 0x3e1   :  { %v5512_v40 = vpop.f32.mrf.mxu0  ;;  %v5625_v47 = vpop.f32.mrf.mxu1 }
 0x3e2   :  { %v5722_v25 = vadd.f32 %v15281_v42, %v5668_v10  ;;  %v5724_v48 = vadd.f32 %v15284_v9, %v5670_v45  ;;  %v5669_v63 = vadd.f32 %v5512_v40, %v5143_v1  ;;  %v5671_v14 = vadd.f32 %v5625_v47, %v5256_v34 }
 0x3e3   :  { %v5147_v1 = vadd.f32 %v15021_v12, %v14572_v23  ;;  %v5262_v34 = vadd.f32 %v15045_v41, %v14602_v28  ;;  %v5153_v23 = vadd.f32 %v15071_v17, %v14628_v46  ;;  %v8586_v28 = vld [vmem:[%s15629_s5 + $0xa78] sm:$0xff]  ;;  %v5268_v41 = vadd.f32 %v15101_v5, %v14658_v56  ;;  %v8601_v46 = vld [vmem:[%s15629_s5 + $0xaf0] sm:$0xff] }
 0x3e4   :  { %v5754_v54 = vmax.f32 %v5722_v25, 0.0  ;;  %v5756_v6 = vmax.f32 %v5724_v48, 0.0  ;;  %v5723_v24 = vadd.f32 %v15291_v62, %v5669_v63  ;;  %v5725_v38 = vadd.f32 %v15294_v55, %v5671_v14  ;;  %v8585_v56 = vld [vmem:[%s15629_s5 + $0xa70] sm:$0xff] }
 0x3e6   :  { %v5516_v33 = vpop.f32.mrf.mxu0  ;;  %v6759_v49 = vmax.f32 %v5750_v52, %v5754_v54  ;;  %v6765_v61 = vmax.f32 %v5752_v2, %v5756_v6  ;;  %v5755_v15 = vmax.f32 %v5723_v24, 0.0  ;;  %v5757_v22 = vmax.f32 %v5725_v38, 0.0  ;;  %v8600_v38 = vld [vmem:[%s15629_s5 + $0xae8] sm:$0xff] }
 0x3e7   :  { %v5629_v59 = vpop.f32.mrf.mxu1  ;;  %v5672_v47 = vadd.f32 %v5516_v33, %v5147_v1 }
 0x3e8   :  { %v5518_v10 = vpop.f32.mrf.mxu0  ;;  %v6767_v21 = vmax.f32 %v6759_v49, %v6765_v61  ;;  %v6760_v58 = vmax.f32 %v5751_v51, %v5755_v15  ;;  %v6766_v40 = vmax.f32 %v5753_v8, %v5757_v22  ;;  %v5674_v25 = vadd.f32 %v5629_v59, %v5260_v16  ;;  %v8584_v51 = vld [vmem:[%s15629_s5 + $0xa68] sm:$0xff]  ;;  %v8599_v61 = vld [vmem:[%s15629_s5 + $0xae0] sm:$0xff] }
 0x3e9   :  { %v5631_v45 = vpop.f32.mrf.mxu1  ;;  %v5673_v48 = vadd.f32 %v5518_v10, %v5149_v18  ;;  %v5726_v43 = vadd.f32 %v15281_v42, %v5672_v47  ;;  %v8583_v18 = vld [vmem:[%s15629_s5 + $0xa60] sm:$0xff] }
 0x3ea   :  { %v5675_v63 = vadd.f32 %v5631_v45, %v5262_v34  ;;  %v6768_v12 = vmax.f32 %v6760_v58, %v6766_v40  ;;  %v5728_v17 = vadd.f32 %v15284_v9, %v5674_v25  ;;  %v8598_v58 = vld [vmem:[%s15629_s5 + $0xad8] sm:$0xff] }
 0x3eb   :  { %v5727_v0 = vadd.f32 %v15291_v62, %v5673_v48  ;;  %v5758_v15 = vmax.f32 %v5726_v43, 0.0  ;;  %v5280_v43 = vadd.f32 %v15213_v50, %v14786_v39  ;;  %v8595_v39 = vld [vmem:[%s15629_s5 + $0xac0] sm:$0xff] }
 0x3ec   :  { %v5522_v57 = vpop.f32.mrf.mxu0  ;;  %6866 = vmatprep.mubr.f32.mxu0 %v6768_v12  ;;  %v5729_v2 = vadd.f32 %v15294_v55, %v5675_v63  ;;  %v5760_v22 = vmax.f32 %v5728_v17, 0.0  ;;  %v8582_v63 = vld [vmem:[%s15629_s5 + $0xa58] sm:$0xff]  ;;  %v8633_v17 = vld [vmem:[%s15629_s5 + $0xbf0] sm:$0xff] }
 0x3ed   :  { %v5635_v4 = vpop.f32.mrf.mxu1  ;;  %v5676_v14 = vadd.f32 %v5522_v57, %v5153_v23  ;;  %6867 = vmatmul.mubr.f32.vlgmr.msra.gmra.mxu0 %v6767_v21  ;;  %v5759_v34 = vmax.f32 %v5727_v0, 0.0  ;;  %v5161_v23 = vadd.f32 %v15155_v44, %v14726_v7  ;;  %v8596_v7 = vld [vmem:[%s15629_s5 + $0xac8] sm:$0xff] }
 0x3ee   :  { %v5678_v52 = vadd.f32 %v5635_v4, %v5266_v53  ;;  %v5524_v54 = vpop.f32.mrf.mxu0  ;;  %8989 = vmatpush3.msra.mxu0 %v8586_v28  ;;  %v5761_v10 = vmax.f32 %v5729_v2, 0.0  ;;  %v5274_v53 = vadd.f32 %v15157_v29, %v14728_v31  ;;  %v8597_v4 = vld [vmem:[%s15629_s5 + $0xad0] sm:$0xff]  ;;  %v8580_v0 = vld [vmem:[%s15629_s5 + $0xa48] sm:$0xff] }
 0x3ef   :  { %v5637_v35 = vpop.f32.mrf.mxu1  ;;  %v5730_v60 = vadd.f32 %v15281_v42, %v5676_v14  ;;  %v5677_v6 = vadd.f32 %v5524_v54, %v5155_v32  ;;  %8990 = vmatprep.subr.mxu0 %v8601_v46  ;;  %v8581_v28 = vld [vmem:[%s15629_s5 + $0xa50] sm:$0xff]  ;;  %v5167_v46 = vadd.f32 %v15211_v26, %v14784_v11 }
 0x3f0   :  { %v5732_v5 = vadd.f32 %v15284_v9, %v5678_v52  ;;  %v5679_v24 = vadd.f32 %v5637_v35, %v5268_v41  ;;  %8991 = vmatpush3.msra.mxu0 %v8585_v56  ;;  %v8618_v52 = vld [vmem:[%s15629_s5 + $0xb78] sm:$0xff]  ;;  %v8617_v11 = vld [vmem:[%s15629_s5 + $0xb70] sm:$0xff] }
 0x3f1   :  { %v5762_v8 = vmax.f32 %v5730_v60, 0.0  ;;  %v5731_v59 = vadd.f32 %v15291_v62, %v5677_v6  ;;  %8992 = vmatprep.subr.mxu0 %v8600_v38  ;;  %v8632_v60 = vld [vmem:[%s15629_s5 + $0xbe8] sm:$0xff] }
 0x3f2   :  { %v5764_v33 = vmax.f32 %v5732_v5, 0.0  ;;  %v5733_v49 = vadd.f32 %v15294_v55, %v5679_v24  ;;  %v15354_v1 = vpop.f32.mrf.mxu0  ;;  %8993 = vmatpush3.msra.mxu0 %v8584_v51  ;;  %v8579_v5 = vld [vmem:[%s15629_s5 + $0xa40] sm:$0xff]  ;;  %v8616_v6 = vld [vmem:[%s15629_s5 + $0xb68] sm:$0xff]  ;;  %v8594_v24 = vld [vmem:[%s15629_s5 + $0xab8] sm:$0xff] }
 0x3f3   :  { %v15356_v16 = vpop.f32.mrf.mxu1  ;;  %v5763_v45 = vmax.f32 %v5731_v59, 0.0  ;;  %v6877_v40 = vmax.f32 %v5758_v15, %v5762_v8  ;;  %8994 = vmatprep.subr.mxu0 %v8599_v61  ;;  %v8631_v8 = vld [vmem:[%s15629_s5 + $0xbe0] sm:$0xff]  ;;  %v5159_v59 = vadd.f32 %v15127_v13, %v14694_v3  ;;  %v5278_v61 = vadd.f32 %v15185_v36, %v14758_v19  ;;  %v8593_v19 = vld [vmem:[%s15629_s5 + $0xab0] sm:$0xff] }
 0x3f4   :  { %v5765_v21 = vmax.f32 %v5733_v49, 0.0  ;;  %v6883_v47 = vmax.f32 %v5760_v22, %v5764_v33  ;;  %v5530_v25 = vpop.f32.mrf.mxu0  ;;  %8995 = vmatpush3.msra.mxu0 %v8583_v18  ;;  %v8578_v33 = vld [vmem:[%s15629_s5 + $0xa38] sm:$0xff]  ;;  %v5165_v49 = vadd.f32 %v15183_v30, %v14756_v27  ;;  %v8615_v18 = vld [vmem:[%s15629_s5 + $0xb60] sm:$0xff]  ;;  %v5272_v36 = vadd.f32 %v15129_v20, %v14696_v37 }
 0x3f5   :  { %v5643_v48 = vpop.f32.mrf.mxu1  ;;  %v6878_v12 = vmax.f32 %v5759_v34, %v5763_v45  ;;  %8996 = vmatprep.subr.mxu0 %v8598_v58  ;;  %v5681_v32 = vadd.f32 %v5530_v25, %v5161_v23  ;;  %v8630_v27 = vld [vmem:[%s15629_s5 + $0xbd8] sm:$0xff]  ;;  %v15816_v25 = vld [vmem:[#allocation13_spill] sm:$0xff] }
 0x3f6   :  { %v6884_v57 = vmax.f32 %v5761_v10, %v5765_v21  ;;  %v5683_v41 = vadd.f32 %v5643_v48, %v5274_v53  ;;  %8997 = vmatpush3.msra.mxu0 %v8582_v63  ;;  %v6885_v31 = vmax.f32 %v6877_v40, %v6883_v47  ;;  %v8614_v40 = vld [vmem:[%s15629_s5 + $0xb58] sm:$0xff]  ;;  %v8577_v47 = vld [vmem:[%s15629_s5 + $0xa30] sm:$0xff]  ;;  %v15817_v48 = vld [vmem:[#allocation9_spill] sm:$0xff] }
 0x3f7   :  { %8998 = vmatprep.subr.mxu0 %v8597_v4  ;;  %v5735_v50 = vadd.f32 %v15291_v62, %v5681_v32  ;;  %v5173_v63 = vadd.f32 %v15817_v48, %v15816_v25  ;;  %v15818_v23 = vld [vmem:[#allocation5_spill] sm:$0xff]  ;;  %v5682_v32 = vadd.f32 %v15356_v16, %v5272_v36  ;;  %v15820_v16 = vld [vmem:[#allocation12_spill] sm:$0xff]  ;;  %v8626_v36 = vld [vmem:[%s15629_s5 + $0xbb8] sm:$0xff] }
 0x3f8   :  { %v6886_v14 = vmax.f32 %v6878_v12, %v6884_v57  ;;  %v5534_v44 = vpop.f32.mrf.mxu0  ;;  %8999 = vmatpush3.msra.mxu0 %v8581_v28  ;;  %v5737_v26 = vadd.f32 %v15294_v55, %v5683_v41  ;;  %v15819_v53 = vld [vmem:[#allocation17_spill] sm:$0xff]  ;;  %v8629_v57 = vld [vmem:[%s15629_s5 + $0xbd0] sm:$0xff]  ;;  %v5680_v28 = vadd.f32 %v15354_v1, %v5159_v59  ;;  %v8574_v25 = vld [vmem:[%s15629_s5 + $0xa18] sm:$0xff] }
 0x3f9   :  { %v5647_v29 = vpop.f32.mrf.mxu1  ;;  %9000 = vmatprep.subr.mxu0 %v8596_v7  ;;  %v5767_v34 = vmax.f32 %v5735_v50, 0.0  ;;  %v5684_v13 = vadd.f32 %v5534_v44, %v5165_v49  ;;  %v5286_v37 = vadd.f32 %v15819_v53, %v15818_v23  ;;  %v8592_v4 = vld [vmem:[%s15629_s5 + $0xaa8] sm:$0xff]  ;;  %v8613_v41 = vld [vmem:[%s15629_s5 + $0xb50] sm:$0xff]  ;;  %v15824_v50 = vld [vmem:[#allocation15_spill] sm:$0xff]  ;;  %v5736_v59 = vadd.f32 %v15284_v9, %v5682_v32 }
 0x3fa   :  { %6984 = vmatprep.mubr.f32.mxu1 %v6886_v14  ;;  %v5536_v2 = vpop.f32.mrf.mxu0  ;;  %9001 = vmatpush3.msra.mxu0 %v8580_v0  ;;  %v5769_v10 = vmax.f32 %v5737_v26, 0.0  ;;  %v5686_v30 = vadd.f32 %v5647_v29, %v5278_v61  ;;  %v8628_v44 = vld [vmem:[%s15629_s5 + $0xbc8] sm:$0xff]  ;;  %v15821_v29 = vld [vmem:[#allocation16_spill] sm:$0xff]  ;;  %v15825_v26 = vld [vmem:[#allocation18_spill] sm:$0xff] }
 0x3fb   :  { %v5649_v54 = vpop.f32.mrf.mxu1  ;;  %6985 = vmatmul.mubr.f32.vlgmr.msra.gmra.mxu1 %v6885_v31  ;;  %v5685_v35 = vadd.f32 %v5536_v2, %v5167_v46  ;;  %9002 = vmatprep.subr.mxu0 %v8595_v39  ;;  %v8576_v1 = vld [vmem:[%s15629_s5 + $0xa28] sm:$0xff]  ;;  %v5738_v46 = vadd.f32 %v15281_v42, %v5684_v13  ;;  %v15830_v13 = vld [vmem:[#allocation4_spill] sm:$0xff]  ;;  %v8610_v48 = vld [vmem:[%s15629_s5 + $0xb38] sm:$0xff] }
 0x3fc   :  { %v5687_v56 = vadd.f32 %v5649_v54, %v5280_v43  ;;  %9024 = vmatpush3.msra.mxu1 %v8618_v52  ;;  %9003 = vmatpush3.msra.mxu0 %v8579_v5  ;;  %v5171_v52 = vadd.f32 %v15821_v29, %v15820_v16  ;;  %v5740_v43 = vadd.f32 %v15284_v9, %v5686_v30  ;;  %v8612_v2 = vld [vmem:[%s15629_s5 + $0xb48] sm:$0xff]  ;;  %v15822_v54 = vld [vmem:[#allocation14_spill] sm:$0xff]  ;;  %v15831_v30 = vld [vmem:[#allocation8_spill] sm:$0xff] }
 0x3fd   :  { %9025 = vmatprep.subr.mxu1 %v8633_v17  ;;  %v5739_v38 = vadd.f32 %v15291_v62, %v5685_v35  ;;  %9004 = vmatprep.subr.mxu0 %v8594_v24  ;;  %v5179_v35 = vadd.f32 %v15825_v26, %v15824_v50  ;;  %v8627_v24 = vld [vmem:[%s15629_s5 + $0xbc0] sm:$0xff]  ;;  %v8622_v26 = vld [vmem:[%s15629_s5 + $0xb98] sm:$0xff] }
 0x3fe   :  { %v5741_v51 = vadd.f32 %v15294_v55, %v5687_v56  ;;  %9026 = vmatpush3.msra.mxu1 %v8617_v11  ;;  %v15427_v15 = vpop.f32.mrf.mxu0  ;;  %9005 = vmatpush3.msra.mxu0 %v8578_v33  ;;  %v15823_v11 = vld [vmem:[#allocation21_spill] sm:$0xff]  ;;  %v15826_v56 = vld [vmem:[#allocation7_spill] sm:$0xff]  ;;  %v5734_v33 = vadd.f32 %v15281_v42, %v5680_v28  ;;  %v8607_v50 = vld [vmem:[%s15629_s5 + $0xb20] sm:$0xff] }
 0x3ff   :  { %v15429_v22 = vpop.f32.mrf.mxu1  ;;  %9027 = vmatprep.subr.mxu1 %v8632_v60  ;;  %v5771_v45 = vmax.f32 %v5739_v38, 0.0  ;;  %9006 = vmatprep.subr.mxu0 %v8593_v19  ;;  %v5177_v39 = vadd.f32 %v15823_v11, %v15822_v54  ;;  %v15827_v60 = vld [vmem:[#allocation11_spill] sm:$0xff]  ;;  %v15828_v38 = vld [vmem:[#allocation6_spill] sm:$0xff] }
 0x400   :  { %v5773_v3 = vmax.f32 %v5741_v51, 0.0  ;;  %9028 = vmatpush3.msra.mxu1 %v8616_v6  ;;  %v5542_v21 = vpop.f32.mrf.mxu0  ;;  %9007 = vmatpush3.msra.mxu0 %v8577_v47  ;;  %v5292_v5 = vadd.f32 %v15827_v60, %v15826_v56  ;;  %v8591_v6 = vld [vmem:[%s15629_s5 + $0xaa0] sm:$0xff]  ;;  %v15829_v51 = vld [vmem:[#allocation10_spill] sm:$0xff]  ;;  %v8590_v19 = vld [vmem:[%s15629_s5 + $0xa98] sm:$0xff] }
 0x401   :  { %v5655_v58 = vpop.f32.mrf.mxu1  ;;  %9029 = vmatprep.subr.mxu1 %v8631_v8  ;;  %v6996_v20 = vmax.f32 %v5767_v34, %v5771_v45  ;;  %v5689_v14 = vadd.f32 %v5542_v21, %v5173_v63  ;;  %9008 = vmatprep.subr.mxu0 %v8592_v4  ;;  %v5290_v8 = vadd.f32 %v15829_v51, %v15828_v38  ;;  %v8611_v34 = vld [vmem:[%s15629_s5 + $0xb40] sm:$0xff]  ;;  %v8606_v56 = vld [vmem:[%s15629_s5 + $0xb18] sm:$0xff]  ;;  %v8621_v60 = vld [vmem:[%s15629_s5 + $0xb90] sm:$0xff]  ;;  %v15832_v51 = vmov 0.0  }
 0x402   :  { %v7002_v12 = vmax.f32 %v5769_v10, %v5773_v3  ;;  %9030 = vmatpush3.msra.mxu1 %v8615_v18  ;;  %v5691_v7 = vadd.f32 %v5655_v58, %v5286_v37  ;;  %9009 = vmatpush3.msra.mxu0 %v8576_v1  ;;  %v8575_v18 = vld [vmem:[%s15629_s5 + $0xa20] sm:$0xff]  ;;  %v5284_v21 = vadd.f32 %v15831_v30, %v15830_v13  ;;  %v5770_v58 = vmax.f32 %v5738_v46, 0.0  ;;  %v8589_v37 = vld [vmem:[%s15629_s5 + $0xa90] sm:$0xff]  ;;  %v8572_v1 = vld [vmem:[%s15629_s5 + $0xa08] sm:$0xff] }
 0x403   :  { %9031 = vmatprep.subr.mxu1 %v8630_v27  ;;  %v5743_v10 = vadd.f32 %v15291_v62, %v5689_v14  ;;  %9010 = vmatprep.subr.mxu0 %v8591_v6  ;;  %v5688_v4 = vadd.f32 %v15427_v15, %v5171_v52  ;;  %v8588_v15 = vld [vmem:[%s15629_s5 + $0xa88] sm:$0xff]  ;;  %v7236_v13 = vld [vmem:[%s15630_s7] sm:$0xff] }
 0x404   :  { %v7004_v31 = vmax.f32 %v6996_v20, %v7002_v12  ;;  %9032 = vmatpush3.msra.mxu1 %v8614_v40  ;;  %v5546_v17 = vpop.f32.mrf.mxu0  ;;  %v5745_v45 = vadd.f32 %v15294_v55, %v5691_v7  ;;  %v5772_v40 = vmax.f32 %v5740_v43, 0.0  ;;  %9011 = vmatpush3.msra.mxu0 %v8575_v18  ;;  %v8625_v20 = vld [vmem:[%s15629_s5 + $0xbb0] sm:$0xff]  ;;  %v5766_v12 = vmax.f32 %v5734_v33, 0.0  ;;  %v8608_v43 = vld [vmem:[%s15629_s5 + $0xb28] sm:$0xff] }
 0x405   :  { %v5659_v0 = vpop.f32.mrf.mxu1  ;;  %9033 = vmatprep.subr.mxu1 %v8629_v57  ;;  %v5692_v47 = vadd.f32 %v5546_v17, %v5177_v39  ;;  %v5768_v57 = vmax.f32 %v5736_v59, 0.0  ;;  %v5690_v28 = vadd.f32 %v15429_v22, %v5284_v21  ;;  %9012 = vmatprep.subr.mxu0 %v8590_v19  ;;  %v8609_v7 = vld [vmem:[%s15629_s5 + $0xb30] sm:$0xff]  ;;  %v8587_v17 = vld [vmem:[%s15629_s5 + $0xa80] sm:$0xff]  ;;  %v8620_v38 = vld [vmem:[%s15629_s5 + $0xb88] sm:$0xff] }
 0x406   :  { %7102 = vmatprep.mubr.f32.mxu0 %v7004_v31  ;;  %9034 = vmatpush3.msra.mxu1 %v8613_v41  ;;  %v5548_v49 = vpop.f32.mrf.mxu0  ;;  %v5694_v63 = vadd.f32 %v5659_v0, %v5290_v8  ;;  %v5777_v32 = vmax.f32 %v5745_v45, 0.0  ;;  %v6995_v22 = vmax.f32 %v5766_v12, %v5770_v58  ;;  %v8623_v0 = vld [vmem:[%s15629_s5 + $0xba0] sm:$0xff]  ;;  %v8604_v59 = vld [vmem:[%s15629_s5 + $0xb08] sm:$0xff]  ;;  %v7238_v19 = vld [vmem:[%s15630_s7 + $0x10] sm:$0xff] }
 0x407   :  { %v5661_v61 = vpop.f32.mrf.mxu1  ;;  %9035 = vmatprep.subr.mxu1 %v8628_v44  ;;  %v5693_v3 = vadd.f32 %v5548_v49, %v5179_v35  ;;  %9013 = vmatpush3.msra.mxu0 %v8574_v25  ;;  %v7001_v31 = vmax.f32 %v5768_v57, %v5772_v40  ;;  %v8624_v44 = vld [vmem:[%s15629_s5 + $0xba8] sm:$0xff]  ;;  %v5746_v16 = vadd.f32 %v15281_v42, %v5692_v47  ;;  %v8571_v39 = vld [vmem:[%s15629_s5 + $0xa00] sm:$0xff] }
 0x408   :  { %v5695_v27 = vadd.f32 %v5661_v61, %v5292_v5  ;;  %9036 = vmatpush3.msra.mxu1 %v8612_v2  ;;  %9014 = vmatprep.subr.mxu0 %v8589_v37  ;;  %v5748_v29 = vadd.f32 %v15284_v9, %v5694_v63  ;;  %v5742_v2 = vadd.f32 %v15281_v42, %v5688_v4  ;;  %v8619_v49 = vld [vmem:[%s15629_s5 + $0xb80] sm:$0xff]  ;;  %v7241_v45 = vld [vmem:[%s15630_s7 + $0x28] sm:$0xff] }
 0x409   :  { %9037 = vmatprep.subr.mxu1 %v8627_v24  ;;  %v5747_v23 = vadd.f32 %v15291_v62, %v5693_v3  ;;  %v8573_v62 = vld [vmem:[%s15629_s5 + $0xa10] sm:$0xff]  ;;  %v5744_v54 = vadd.f32 %v15284_v9, %v5690_v28  ;;  %v7003_v42 = vmax.f32 %v6995_v22, %v7001_v31  ;;  %v5778_v35 = vmax.f32 %v5746_v16, 0.0  ;;  %v8603_v61 = vld [vmem:[%s15629_s5 + $0xb00] sm:$0xff] }
 0x40a   :  { %v5749_v53 = vadd.f32 %v15294_v55, %v5695_v27  ;;  %9038 = vmatpush3.msra.mxu1 %v8611_v34  ;;  %v5775_v55 = vmax.f32 %v5743_v10, 0.0  ;;  %9015 = vmatpush3.msra.mxu0 %v8573_v62  ;;  %v5780_v9 = vmax.f32 %v5748_v29, 0.0  ;;  %v5774_v5 = vmax.f32 %v5742_v2, 0.0  ;;  %v8605_v24 = vld [vmem:[%s15629_s5 + $0xb10] sm:$0xff]  ;;  %v7243_v34 = vld [vmem:[%s15630_s7 + $0x38] sm:$0xff]  ;;  %v7240_v3 = vld [vmem:[%s15630_s7 + $0x20] sm:$0xff]  ;;  %v8670_v30 = vpop.f32.mrf.mxu0 }
 0x40b   :  { %9039 = vmatprep.subr.mxu1 %v8626_v36  ;;  %v5779_v41 = vmax.f32 %v5747_v23, 0.0  ;;  %9016 = vmatprep.subr.mxu0 %v8588_v15  ;;  %v5776_v6 = vmax.f32 %v5744_v54, 0.0  ;;  %v7242_v10 = vld [vmem:[%s15630_s7 + $0x30] sm:$0xff]  ;;  %v7239_v27 = vld [vmem:[%s15630_s7 + $0x18] sm:$0xff]  ;;  %v7237_v36 = vld [vmem:[%s15630_s7 + $0x8] sm:$0xff]  ;;  %v8705_v21 = vpop.f32.mrf.mxu1 }
 0x40c   :  { %v5781_v14 = vmax.f32 %v5749_v53, 0.0  ;;  %9040 = vmatpush3.msra.mxu1 %v8610_v48  ;;  %9017 = vmatpush3.msra.mxu0 %v8572_v1  ;;  %v7113_v8 = vmax.f32 %v5774_v5, %v5778_v35  ;;  %v8671_v58 = vpop.f32.mrf.mxu0 }
 0x40d   :  { %9041 = vmatprep.subr.mxu1 %v8625_v20  ;;  %v7114_v52 = vmax.f32 %v5775_v55, %v5779_v41  ;;  %9018 = vmatprep.subr.mxu0 %v8587_v17  ;;  %v7119_v33 = vmax.f32 %v5776_v6, %v5780_v9  ;;  %v8706_v47 = vpop.f32.mrf.mxu1  ;;  %v8672_v23 = vadd.f32 %v8671_v58, %v8670_v30  ;;  %v8635_v6 = vld [vmem:[%s15631_s6] ss:$0 sm:$0xff] }
 0x40e   :  { %v7120_v46 = vmax.f32 %v5777_v32, %v5781_v14  ;;  %9042 = vmatpush3.msra.mxu1 %v8609_v7  ;;  %9019 = vmatpush3.msra.mxu0 %v8571_v39  ;;  %v8707_v53 = vadd.f32 %v8706_v47, %v8705_v21 }
 0x40f   :  { %9043 = vmatprep.subr.mxu1 %v8624_v44  ;;  %7103 = vmatmul.mubr.f32.vlgmr.msra.gmra.mxu0 %v7003_v42  ;;  %v7121_v18 = vmax.f32 %v7113_v8, %v7119_v33  ;;  %v8636_v8 = vld [vmem:[%s15632_s8] ss:$0 sm:$0xff] }
 0x410   :  { %v7122_v11 = vmax.f32 %v7114_v52, %v7120_v46  ;;  %9044 = vmatpush3.msra.mxu1 %v8608_v43  ;;  %9067 = vmatprep.subr.mxu0 %v15832_v51  ;;  %v6044_v4 = vadd.f32 %v8707_v53, %v8672_v23 }
 0x411   :  { %9045 = vmatprep.subr.mxu1 %v8623_v0  ;;  %9068 = vmatpush3.msra.mxu0 %v7243_v34 }
 0x412   :  { %7220 = vmatprep.mubr.f32.mxu1 %v7122_v11  ;;  %9046 = vmatpush3.msra.mxu1 %v8607_v50 }
 0x413   :  { %9047 = vmatprep.subr.mxu1 %v8622_v26  ;;  %9069 = vmatprep.subr.mxu0 %v15832_v51 }
 0x414   :  { %9048 = vmatpush3.msra.mxu1 %v8606_v56  ;;  %9070 = vmatpush3.msra.mxu0 %v7242_v10 }
 0x415   :  { %9049 = vmatprep.subr.mxu1 %v8621_v60  ;;  %9071 = vmatprep.subr.mxu0 %v15832_v51 }
 0x416   :  { %9050 = vmatpush3.msra.mxu1 %v8605_v24  ;;  %9072 = vmatpush3.msra.mxu0 %v7241_v45 }
 0x417   :  { %9051 = vmatprep.subr.mxu1 %v8620_v38  ;;  %9073 = vmatprep.subr.mxu0 %v15832_v51 }
 0x418   :  { %9052 = vmatpush3.msra.mxu1 %v8604_v59  ;;  %9074 = vmatpush3.msra.mxu0 %v7240_v3 }
 0x419   :  { %9053 = vmatprep.subr.mxu1 %v8619_v49  ;;  %9083 = vmatprep.mubr.msk.f32.mxu0 %vm9104_vm3, %v15832_v51 }
 0x41a   :  { %9054 = vmatpush3.msra.mxu1 %v8603_v61  ;;  %9075 = vmatprep.subr.mxu0 %v15832_v51 }
 0x41b   :  { %7221 = vmatmul.mubr.f32.vlgmr.msra.gmra.mxu1 %v7121_v18  ;;  %9076 = vmatpush3.msra.mxu0 %v7239_v27 }
 0x41c   :  { %9077 = vmatprep.subr.mxu0 %v15832_v51 }
 0x41d   :  { %9078 = vmatpush3.msra.mxu0 %v7238_v19 }
 0x41e   :  { %9079 = vmatprep.subr.mxu0 %v15832_v51 }
 0x41f   :  { %9080 = vmatpush3.msra.mxu0 %v7237_v36 }
 0x420   :  { %9081 = vmatprep.subr.mxu0 %v15832_v51 }
 0x421   :  { %9082 = vmatpush3.msra.mxu0 %v7236_v13 }
 0x42c   :  { %v8740_v40 = vpop.f32.mrf.mxu0 }
 0x42d   :  { %v8775_v25 = vpop.f32.mrf.mxu1 }
 0x42e   :  { %v8741_v48 = vpop.f32.mrf.mxu0 }
 0x42f   :  { %v8776_v37 = vpop.f32.mrf.mxu1  ;;  %v8742_v20 = vadd.f32 %v8741_v48, %v8740_v40 }
 0x430   :  { %v8777_v32 = vadd.f32 %v8776_v37, %v8775_v25 }
 0x431   :  { %v6164_v62 = vadd.f32 %v8742_v20, %v6044_v4 }
 0x433   :  { %v6282_v15 = vadd.f32 %v8777_v32, %v6164_v62 }
 0x44e   :  { %v8810_v63 = vpop.f32.mrf.mxu0 }
 0x44f   :  { %v8845_v12 = vpop.f32.mrf.mxu1 }
 0x450   :  { %v8811_v57 = vpop.f32.mrf.mxu0 }
 0x451   :  { %v8846_v55 = vpop.f32.mrf.mxu1  ;;  %v8812_v41 = vadd.f32 %v8811_v57, %v8810_v63 }
 0x452   :  { %v8847_v1 = vadd.f32 %v8846_v55, %v8845_v12 }
 0x453   :  { %v6400_v31 = vadd.f32 %v8812_v41, %v6282_v15 }
 0x455   :  { %v6518_v46 = vadd.f32 %v8847_v1, %v6400_v31 }
 0x470   :  { %v8880_v28 = vpop.f32.mrf.mxu0 }
 0x471   :  { %v8915_v14 = vpop.f32.mrf.mxu1 }
 0x472   :  { %v8881_v7 = vpop.f32.mrf.mxu0 }
 0x473   :  { %v8916_v44 = vpop.f32.mrf.mxu1  ;;  %v8882_v16 = vadd.f32 %v8881_v7, %v8880_v28 }
 0x474   :  { %v8917_v2 = vadd.f32 %v8916_v44, %v8915_v14 }
 0x475   :  { %v6636_v17 = vadd.f32 %v8882_v16, %v6518_v46 }
 0x477   :  { %v6754_v39 = vadd.f32 %v8917_v2, %v6636_v17 }
 0x4ad   :  { %v8950_v22 = vpop.f32.mrf.mxu0 }
 0x4af   :  { %v8951_v29 = vpop.f32.mrf.mxu0 }
 0x4b0   :  { %v8952_v54 = vadd.f32 %v8951_v29, %v8950_v22 }
 0x4b2   :  { %v6872_v26 = vadd.f32 %v8952_v54, %v6754_v39 }
 0x4bb   :  { %v8985_v52 = vpop.f32.mrf.mxu1 }
 0x4bd   :  { %v8986_v0 = vpop.f32.mrf.mxu1 }
 0x4be   :  { %v8987_v50 = vadd.f32 %v8986_v0, %v8985_v52 }
 0x4c0   :  { %v6990_v9 = vadd.f32 %v8987_v50, %v6872_v26 }
 0x4cf   :  { %v9020_v43 = vpop.f32.mrf.mxu0 }
 0x4d1   :  { %v9021_v11 = vpop.f32.mrf.mxu0 }
 0x4d2   :  { %v9022_v42 = vadd.f32 %v9021_v11, %v9020_v43 }
 0x4d4   :  { %v7108_v60 = vadd.f32 %v9022_v42, %v6990_v9 }
 0x4db   :  { %v9055_v35 = vpop.f32.mrf.mxu1 }
 0x4dd   :  { %v9056_v56 = vpop.f32.mrf.mxu1 }
 0x4de   :  { %v9057_v5 = vadd.f32 %v9056_v56, %v9055_v35 }
 0x4e0   :  { %v7226_v24 = vadd.f32 %v9057_v5, %v7108_v60 }
 0x4e2   :  { %v7234_v38 = vadd.f32 %v8635_v6, %v7226_v24 }
 0x4e4   :  { %v7235_v51 = vmax.f32 %v7234_v38, 0.0 }
 0x4e6   :  { %9084 = vmatmul.mubr.msk.f32.vlgmr.msra.gmra.mxu0 %vm7251_vm4, %v7235_v51 }
 0x5a6   :  { %v7321_v33 = vpop.f32.mrf.mxu0 }
 0x5a7   :  { %v7322_v59 = vadd.f32 %v8636_v8, %v7321_v33 }
 0x5a8   :  { %v9085_v49 = vpop.f32.mrf.mxu0 }
 0x5a9   :  { %7326 = vst.msk [vmem:[%s15633_s9] sm:$0xff] %vm7325_vm5, %v7322_v59 }

</bundles_post_ra>
